<compile_context>
chip_gen: v7x
topology: tpu7x:2x2x1
jax: 0.10.0
libtpu: 0.0.40
codegen_flags: <defaults>
</compile_context>

<pallas_src>
import functools

import jax
import jax.numpy as jnp
from jax import lax
from jax.experimental import pallas as pl
from jax.experimental.pallas import tpu as pltpu


# ----------------------------------------------------------------------------
# Pallas kernels
# ----------------------------------------------------------------------------
def _mm_bias_kernel(a_ref, b_ref, s_ref, o_ref, acc_ref, *, relu):
    """C = A @ B, epilogue: + bias row (folded BN shift / fc bias), optional ReLU."""
    @pl.when(pl.program_id(2) == 0)
    def _():
        acc_ref[...] = jnp.zeros_like(acc_ref)

    acc_ref[...] += jnp.dot(a_ref[...], b_ref[...],
                            preferred_element_type=jnp.float32)

    @pl.when(pl.program_id(2) == pl.num_programs(2) - 1)
    def _():
        y = acc_ref[...] + s_ref[...]
        if relu:
            y = jnp.maximum(y, 0.0)
        o_ref[...] = y.astype(o_ref.dtype)


def _mm_bias_res_kernel(a_ref, b_ref, s_ref, r_ref, o_ref, acc_ref, *, relu):
    """C = A @ B, epilogue: + bias row + residual, optional ReLU (BasicBlock tail)."""
    @pl.when(pl.program_id(2) == 0)
    def _():
        acc_ref[...] = jnp.zeros_like(acc_ref)

    acc_ref[...] += jnp.dot(a_ref[...], b_ref[...],
                            preferred_element_type=jnp.float32)

    @pl.when(pl.program_id(2) == pl.num_programs(2) - 1)
    def _():
        y = acc_ref[...] + s_ref[...] + r_ref[...]
        if relu:
            y = jnp.maximum(y, 0.0)
        o_ref[...] = y.astype(o_ref.dtype)


def _max9_kernel(*refs):
    """Elementwise max over 9 equally-shaped VMEM inputs (3x3 maxpool reduce)."""
    ins, o_ref = refs[:-1], refs[-1]
    m = ins[0][...]
    for r in ins[1:]:
        m = jnp.maximum(m, r[...])
    o_ref[...] = m


# ----------------------------------------------------------------------------
# Fused matmul wrapper (bias / residual / relu epilogue, adaptive tiles)
# ----------------------------------------------------------------------------
def _round_up(x, m):
    return (x + m - 1) // m * m


def fused_matmul(a, b, bias, res=None, relu=False, out_dtype=jnp.float32):
    """out = act(A @ B + bias [+ res]).  A, B should already be bf16; bias/res f32."""
    m, k = a.shape
    k2, n = b.shape
    assert k == k2

    # Adaptive tile selection: don't pad tiny M up to 128; single K step when it fits.
    tm = min(128, _round_up(m, 16))
    tn = min(256, _round_up(n, 128))
    kp128 = _round_up(k, 128)
    tk = kp128 if kp128 <= 1536 else 512

    mp = _round_up(m, tm)
    np_ = _round_up(n, tn)
    kp = _round_up(k, tk)

    a_p = a if (mp == m and kp == k) else jnp.pad(a, ((0, mp - m), (0, kp - k)))
    b_p = b if (kp == k and np_ == n) else jnp.pad(b, ((0, kp - k), (0, np_ - n)))
    bias_p = bias.reshape(1, n).astype(jnp.float32)
    if np_ != n:
        bias_p = jnp.pad(bias_p, ((0, 0), (0, np_ - n)))

    in_specs = [
        pl.BlockSpec((tm, tk), lambda i, j, kk: (i, kk)),
        pl.BlockSpec((tk, tn), lambda i, j, kk: (kk, j)),
        pl.BlockSpec((1, tn), lambda i, j, kk: (0, j)),
    ]
    args = [a_p, b_p, bias_p]

    if res is not None:
        r_p = res.astype(jnp.float32)
        if mp != m or np_ != n:
            r_p = jnp.pad(r_p, ((0, mp - m), (0, np_ - n)))
        in_specs.append(pl.BlockSpec((tm, tn), lambda i, j, kk: (i, j)))
        args.append(r_p)
        kernel = functools.partial(_mm_bias_res_kernel, relu=relu)
    else:
        kernel = functools.partial(_mm_bias_kernel, relu=relu)

    out = pl.pallas_call(
        kernel,
        out_shape=jax.ShapeDtypeStruct((mp, np_), out_dtype),
        grid_spec=pltpu.PrefetchScalarGridSpec(
            num_scalar_prefetch=0,
            grid=(mp // tm, np_ // tn, kp // tk),
            in_specs=in_specs,
            out_specs=pl.BlockSpec((tm, tn), lambda i, j, kk: (i, j)),
            scratch_shapes=[pltpu.VMEM((tm, tn), jnp.float32)],
        ),
        compiler_params=pltpu.CompilerParams(
            dimension_semantics=("parallel", "parallel", "arbitrary")),
    )(*args)

    if mp != m or np_ != n:
        out = out[:m, :n]
    return out


# ----------------------------------------------------------------------------
# Conv (+ folded BN + optional residual/ReLU) and maxpool wrappers
# ----------------------------------------------------------------------------
def _im2col(x_nhwc, kh, kw, stride, pad):
    n, h, w, c = x_nhwc.shape
    oh = (h + 2 * pad - kh) // stride + 1
    ow = (w + 2 * pad - kw) // stride + 1
    xp = jnp.pad(x_nhwc, ((0, 0), (pad, pad), (pad, pad), (0, 0)))
    cols = []
    for di in range(kh):
        for dj in range(kw):
            sl = lax.slice(
                xp, (0, di, dj, 0),
                (n, di + (oh - 1) * stride + 1, dj + (ow - 1) * stride + 1, c),
                (1, stride, stride, 1))
            cols.append(sl)
    patches = jnp.concatenate(cols, axis=-1)       # [n, oh, ow, kh*kw*c]
    return patches.reshape(n * oh * ow, kh * kw * c), (n, oh, ow)


def conv_bn(x_nhwc, w_oihw, scale, shift, *, stride, pad, relu, res2d=None):
    """conv2d + folded eval-mode BN (+ optional residual add) + optional ReLU."""
    cout, cin, kh, kw = w_oihw.shape
    cols, shape = _im2col(x_nhwc, kh, kw, stride, pad)
    # Fold BN scale into the weight columns; BN shift becomes the epilogue bias.
    wmat = jnp.transpose(w_oihw, (2, 3, 1, 0)).reshape(kh * kw * cin, cout)
    wmat = wmat * scale[None, :]
    out = fused_matmul(cols.astype(jnp.bfloat16), wmat.astype(jnp.bfloat16),
                       shift, res=res2d, relu=relu)
    return out, shape


def maxpool_3x3_s2_p1(x_nhwc):
    n, h, w, c = x_nhwc.shape
    oh = (h + 2 - 3) // 2 + 1
    ow = (w + 2 - 3) // 2 + 1
    xp = jnp.pad(x_nhwc, ((0, 0), (1, 1), (1, 1), (0, 0)),
                 constant_values=-jnp.inf)
    m = n * oh * ow
    # Lane-dense layout for the elementwise kernel when C < 128.
    if c % 128 == 0:
        flat = (m, c)
    elif (m * c) % (8 * 128) == 0:
        flat = (m * c // 128, 128)
    else:
        flat = (m, c)
    slices = []
    for di in range(3):
        for dj in range(3):
            sl = lax.slice(xp, (0, di, dj, 0),
                           (n, di + (oh - 1) * 2 + 1, dj + (ow - 1) * 2 + 1, c),
                           (1, 2, 2, 1))
            slices.append(sl.reshape(flat))
    out = pl.pallas_call(
        _max9_kernel,
        out_shape=jax.ShapeDtypeStruct(flat, x_nhwc.dtype),
    )(*slices)
    return out.reshape(n, oh, ow, c)


# ----------------------------------------------------------------------------
# Deterministic synthetic parameters (shapes match torchvision resnet18)
# ----------------------------------------------------------------------------
def _conv_w(key, cout, cin, k):
    std = (2.0 / (cin * k * k)) ** 0.5
    return std * jax.random.normal(key, (cout, cin, k, k), jnp.float32)


def _bn_params(key, c, eps=1e-5):
    k1, k2, k3, k4 = jax.random.split(key, 4)
    gamma = 1.0 + 0.1 * jax.random.normal(k1, (c,), jnp.float32)
    beta = 0.1 * jax.random.normal(k2, (c,), jnp.float32)
    mean = 0.1 * jax.random.normal(k3, (c,), jnp.float32)
    var = 1.0 + 0.1 * jax.random.uniform(k4, (c,), jnp.float32)
    scale = gamma / jnp.sqrt(var + eps)
    shift = beta - mean * scale
    return scale, shift


def init_resnet18_params(key):
    keys = iter(jax.random.split(key, 256))
    params = {
        "conv1_w": _conv_w(next(keys), 64, 3, 7),
        "bn1": _bn_params(next(keys), 64),
    }
    stage_defs = [(64, 64, 1), (64, 128, 2), (128, 256, 2), (256, 512, 2)]
    layers = []
    for cin, cout, stride in stage_defs:
        blocks = []
        for b in range(2):
            s = stride if b == 0 else 1
            bc_in = cin if b == 0 else cout
            blk = {
                "stride": s,
                "conv1_w": _conv_w(next(keys), cout, bc_in, 3),
                "bn1": _bn_params(next(keys), cout),
                "conv2_w": _conv_w(next(keys), cout, cout, 3),
                "bn2": _bn_params(next(keys), cout),
            }
            if s != 1 or bc_in != cout:
                blk["down_w"] = _conv_w(next(keys), cout, bc_in, 1)
                blk["down_bn"] = _bn_params(next(keys), cout)
            blocks.append(blk)
        layers.append(blocks)
    params["layers"] = layers
    kfc1, kfc2 = jax.random.split(next(keys))
    params["fc_w"] = 0.02 * jax.random.normal(kfc1, (1000, 512), jnp.float32)
    params["fc_b"] = 0.02 * jax.random.normal(kfc2, (1000,), jnp.float32)
    return params


# ----------------------------------------------------------------------------
# ResNet-18 forward (BatchNorm in eval mode, as in pretrained inference)
# ----------------------------------------------------------------------------
def basic_block(x_nhwc, blk):
    n, h, w, cin = x_nhwc.shape
    s = blk["stride"]
    cout = blk["conv1_w"].shape[0]

    y2d, (n2, oh, ow) = conv_bn(x_nhwc, blk["conv1_w"], *blk["bn1"],
                                stride=s, pad=1, relu=True)
    y = y2d.reshape(n2, oh, ow, cout)

    if "down_w" in blk:
        idn, _ = conv_bn(x_nhwc, blk["down_w"], *blk["down_bn"],
                         stride=s, pad=0, relu=False)
    else:
        idn = x_nhwc.reshape(n * h * w, cin)

    # conv2 + bn2 + residual add + ReLU all in one fused matmul epilogue.
    out2d, _ = conv_bn(y, blk["conv2_w"], *blk["bn2"],
                       stride=1, pad=1, relu=True, res2d=idn)
    return out2d.reshape(n2, oh, ow, cout)


def resnet18_forward(x_nchw, params):
    x = jnp.transpose(x_nchw, (0, 2, 3, 1))   # NCHW (PyTorch) -> NHWC (kernel layout)

    y2d, (n, oh, ow) = conv_bn(x, params["conv1_w"], *params["bn1"],
                               stride=2, pad=3, relu=True)
    x = y2d.reshape(n, oh, ow, 64)
    x = maxpool_3x3_s2_p1(x)

    for blocks in params["layers"]:
        for blk in blocks:
            x = basic_block(x, blk)

    feats = jnp.mean(x, axis=(1, 2))           # adaptive avg pool to 1x1 -> [N, 512]

    # fc: bias added in the matmul epilogue.
    logits = fused_matmul(feats.astype(jnp.bfloat16),
                          params["fc_w"].T.astype(jnp.bfloat16),
                          params["fc_b"], relu=False)
    return logits


if __name__ == "__main__":
    key = jax.random.PRNGKey(0)
    kx, kp = jax.random.split(key)
    # Small ResNet-compatible input: batch=2, 3 channels, 32x32 spatial (NCHW like PyTorch).
    x = jax.random.normal(kx, (2, 3, 32, 32), jnp.float32)
    params = init_resnet18_params(kp)

    # Close over params so strides stay static and weight folding is constant-folded.
    forward = jax.jit(functools.partial(resnet18_forward, params=params))
    out = jax.block_until_ready(forward(x))
    assert out.shape == (2, 1000) and out.dtype == jnp.float32
    print("KERNEL_OK")
</pallas_src>

<mosaic_0001>
module attributes {stable_mosaic.version = 11 : i64} {
  func.func @_mm_bias_kernel(%arg0: i32, %arg1: i32, %arg2: i32, %arg3: memref<128x256xbf16, #tpu.memory_space<vmem>>, %arg4: memref<256x128xbf16, #tpu.memory_space<vmem>>, %arg5: memref<1x128xf32, #tpu.memory_space<vmem>>, %arg6: memref<128x128xf32, #tpu.memory_space<vmem>>, %arg7: memref<128x128xf32, #tpu.memory_space<vmem>>) attributes {dimension_semantics = [#tpu.dimension_semantics<parallel>, #tpu.dimension_semantics<parallel>, #tpu.dimension_semantics<arbitrary>], iteration_bounds = array<i64: 4, 1, 1>, scalar_prefetch = 0 : i64, scratch_operands = 1 : i64, tpu.core_type = #tpu.core_type<tc>, window_params = [{transform_indices = @transform_0, window_bounds = array<i64: 128, 256>}, {transform_indices = @transform_1, window_bounds = array<i64: 256, 128>}, {transform_indices = @transform_2, window_bounds = array<i64: 1, 128>}, {transform_indices = @transform_3, window_bounds = array<i64: 128, 128>}]} {
    %c0_i32 = arith.constant 0 : i32
    %0 = arith.cmpi eq, %arg2, %c0_i32 : i32
    %1 = arith.extui %0 : i1 to i32
    %c0_i32_0 = arith.constant 0 : i32
    %2 = arith.cmpi ne, %1, %c0_i32_0 : i32
    scf.if %2 {
      %cst_10 = arith.constant 0.000000e+00 : f32
      %12 = vector.broadcast %cst_10 : f32 to vector<128x128xf32>
      %c0_11 = arith.constant 0 : index
      %c0_12 = arith.constant 0 : index
      %13 = vector.load %arg7[%c0_11, %c0_12] : memref<128x128xf32, #tpu.memory_space<vmem>>, vector<128x128xf32>
      tpu.vector_store %arg7[%c0_11, %c0_12], %12 {strides = array<i32>} : memref<128x128xf32, #tpu.memory_space<vmem>>, vector<128x128xf32>,
    } else {
    }
    %c0 = arith.constant 0 : index
    %c0_1 = arith.constant 0 : index
    %3 = vector.load %arg7[%c0, %c0_1] : memref<128x128xf32, #tpu.memory_space<vmem>>, vector<128x128xf32>
    %c0_2 = arith.constant 0 : index
    %c0_3 = arith.constant 0 : index
    %4 = vector.load %arg3[%c0_2, %c0_3] : memref<128x256xbf16, #tpu.memory_space<vmem>>, vector<128x256xbf16>
    %c0_4 = arith.constant 0 : index
    %c0_5 = arith.constant 0 : index
    %5 = vector.load %arg4[%c0_4, %c0_5] : memref<256x128xbf16, #tpu.memory_space<vmem>>, vector<256x128xbf16>
    %cst = arith.constant dense<0.000000e+00> : vector<128x128xf32>
    %6 = tpu.matmul %4, %5, %cst {dimension_numbers = #tpu.dot_dimension_numbers<[1], [0], [0], [1], [0, 0, 1, 1], [], []>} : vector<128x256xbf16>, vector<256x128xbf16>, vector<128x128xf32> -> vector<128x128xf32>
    %7 = arith.addf %3, %6 : vector<128x128xf32>
    %c0_6 = arith.constant 0 : index
    %c0_7 = arith.constant 0 : index
    %8 = vector.load %arg7[%c0_6, %c0_7] : memref<128x128xf32, #tpu.memory_space<vmem>>, vector<128x128xf32>
    tpu.vector_store %arg7[%c0_6, %c0_7], %7 {strides = array<i32>} : memref<128x128xf32, #tpu.memory_space<vmem>>, vector<128x128xf32>,
    %c0_i32_8 = arith.constant 0 : i32
    %9 = arith.cmpi eq, %arg2, %c0_i32_8 : i32
    %10 = arith.extui %9 : i1 to i32
    %c0_i32_9 = arith.constant 0 : i32
    %11 = arith.cmpi ne, %10, %c0_i32_9 : i32
    scf.if %11 {
      %c0_10 = arith.constant 0 : index
      %c0_11 = arith.constant 0 : index
      %12 = vector.load %arg7[%c0_10, %c0_11] : memref<128x128xf32, #tpu.memory_space<vmem>>, vector<128x128xf32>
      %c0_12 = arith.constant 0 : index
      %c0_13 = arith.constant 0 : index
      %13 = vector.load %arg5[%c0_12, %c0_13] : memref<1x128xf32, #tpu.memory_space<vmem>>, vector<1x128xf32>
      %14 = vector.broadcast %13 : vector<1x128xf32> to vector<128x128xf32>
      %15 = arith.addf %12, %14 : vector<128x128xf32>
      %cst_14 = arith.constant 0.000000e+00 : f32
      %16 = vector.broadcast %cst_14 : f32 to vector<128x128xf32>
      %17 = arith.maximumf %15, %16 : vector<128x128xf32>
      %c0_15 = arith.constant 0 : index
      %c0_16 = arith.constant 0 : index
      %18 = vector.load %arg6[%c0_15, %c0_16] : memref<128x128xf32, #tpu.memory_space<vmem>>, vector<128x128xf32>
      tpu.vector_store %arg6[%c0_15, %c0_16], %17 {strides = array<i32>} : memref<128x128xf32, #tpu.memory_space<vmem>>, vector<128x128xf32>,
    } else {
    }
    return
  }
  func.func @transform_0(%arg0: i32, %arg1: i32, %arg2: i32) -> (i32, i32) {
    %c0_i32 = arith.constant 0 : i32
    return %arg0, %arg2 : i32, i32
  }
  func.func @transform_1(%arg0: i32, %arg1: i32, %arg2: i32) -> (i32, i32) {
    %c0_i32 = arith.constant 0 : i32
    return %arg2, %arg1 : i32, i32
  }
  func.func @transform_2(%arg0: i32, %arg1: i32, %arg2: i32) -> (i32, i32) {
    %c0_i32 = arith.constant 0 : i32
    %c0_i32_0 = arith.constant 0 : i32
    return %c0_i32, %arg1 : i32, i32
  }
  func.func @transform_3(%arg0: i32, %arg1: i32, %arg2: i32) -> (i32, i32) {
    %c0_i32 = arith.constant 0 : i32
    return %arg0, %arg1 : i32, i32
  }
}

module attributes {stable_mosaic.version = 11 : i64} {
  func.func @_max9_kernel(%arg0: memref<64x128xf32, #tpu.memory_space<vmem>>, %arg1: memref<64x128xf32, #tpu.memory_space<vmem>>, %arg2: memref<64x128xf32, #tpu.memory_space<vmem>>, %arg3: memref<64x128xf32, #tpu.memory_space<vmem>>, %arg4: memref<64x128xf32, #tpu.memory_space<vmem>>, %arg5: memref<64x128xf32, #tpu.memory_space<vmem>>, %arg6: memref<64x128xf32, #tpu.memory_space<vmem>>, %arg7: memref<64x128xf32, #tpu.memory_space<vmem>>, %arg8: memref<64x128xf32, #tpu.memory_space<vmem>>, %arg9: memref<64x128xf32, #tpu.memory_space<vmem>>) attributes {dimension_semantics = [], scalar_prefetch = 0 : i64, scratch_operands = 0 : i64, tpu.core_type = #tpu.core_type<tc>} {
    %c0 = arith.constant 0 : index
    %c0_0 = arith.constant 0 : index
    %0 = vector.load %arg0[%c0, %c0_0] : memref<64x128xf32, #tpu.memory_space<vmem>>, vector<64x128xf32>
    %c0_1 = arith.constant 0 : index
    %c0_2 = arith.constant 0 : index
    %1 = vector.load %arg1[%c0_1, %c0_2] : memref<64x128xf32, #tpu.memory_space<vmem>>, vector<64x128xf32>
    %2 = arith.maximumf %0, %1 : vector<64x128xf32>
    %c0_3 = arith.constant 0 : index
    %c0_4 = arith.constant 0 : index
    %3 = vector.load %arg2[%c0_3, %c0_4] : memref<64x128xf32, #tpu.memory_space<vmem>>, vector<64x128xf32>
    %4 = arith.maximumf %2, %3 : vector<64x128xf32>
    %c0_5 = arith.constant 0 : index
    %c0_6 = arith.constant 0 : index
    %5 = vector.load %arg3[%c0_5, %c0_6] : memref<64x128xf32, #tpu.memory_space<vmem>>, vector<64x128xf32>
    %6 = arith.maximumf %4, %5 : vector<64x128xf32>
    %c0_7 = arith.constant 0 : index
    %c0_8 = arith.constant 0 : index
    %7 = vector.load %arg4[%c0_7, %c0_8] : memref<64x128xf32, #tpu.memory_space<vmem>>, vector<64x128xf32>
    %8 = arith.maximumf %6, %7 : vector<64x128xf32>
    %c0_9 = arith.constant 0 : index
    %c0_10 = arith.constant 0 : index
    %9 = vector.load %arg5[%c0_9, %c0_10] : memref<64x128xf32, #tpu.memory_space<vmem>>, vector<64x128xf32>
    %10 = arith.maximumf %8, %9 : vector<64x128xf32>
    %c0_11 = arith.constant 0 : index
    %c0_12 = arith.constant 0 : index
    %11 = vector.load %arg6[%c0_11, %c0_12] : memref<64x128xf32, #tpu.memory_space<vmem>>, vector<64x128xf32>
    %12 = arith.maximumf %10, %11 : vector<64x128xf32>
    %c0_13 = arith.constant 0 : index
    %c0_14 = arith.constant 0 : index
    %13 = vector.load %arg7[%c0_13, %c0_14] : memref<64x128xf32, #tpu.memory_space<vmem>>, vector<64x128xf32>
    %14 = arith.maximumf %12, %13 : vector<64x128xf32>
    %c0_15 = arith.constant 0 : index
    %c0_16 = arith.constant 0 : index
    %15 = vector.load %arg8[%c0_15, %c0_16] : memref<64x128xf32, #tpu.memory_space<vmem>>, vector<64x128xf32>
    %16 = arith.maximumf %14, %15 : vector<64x128xf32>
    %c0_17 = arith.constant 0 : index
    %c0_18 = arith.constant 0 : index
    %17 = vector.load %arg9[%c0_17, %c0_18] : memref<64x128xf32, #tpu.memory_space<vmem>>, vector<64x128xf32>
    tpu.vector_store %arg9[%c0_17, %c0_18], %16 {strides = array<i32>} : memref<64x128xf32, #tpu.memory_space<vmem>>, vector<64x128xf32>,
    return
  }
}

module attributes {stable_mosaic.version = 11 : i64} {
  func.func @_mm_bias_kernel(%arg0: i32, %arg1: i32, %arg2: i32, %arg3: memref<128x640xbf16, #tpu.memory_space<vmem>>, %arg4: memref<640x128xbf16, #tpu.memory_space<vmem>>, %arg5: memref<1x128xf32, #tpu.memory_space<vmem>>, %arg6: memref<128x128xf32, #tpu.memory_space<vmem>>, %arg7: memref<128x128xf32, #tpu.memory_space<vmem>>) attributes {dimension_semantics = [#tpu.dimension_semantics<parallel>, #tpu.dimension_semantics<parallel>, #tpu.dimension_semantics<arbitrary>], iteration_bounds = array<i64: 1, 1, 1>, scalar_prefetch = 0 : i64, scratch_operands = 1 : i64, tpu.core_type = #tpu.core_type<tc>, window_params = [{transform_indices = @transform_0, window_bounds = array<i64: 128, 640>}, {transform_indices = @transform_1, window_bounds = array<i64: 640, 128>}, {transform_indices = @transform_2, window_bounds = array<i64: 1, 128>}, {transform_indices = @transform_3, window_bounds = array<i64: 128, 128>}]} {
    %c0_i32 = arith.constant 0 : i32
    %0 = arith.cmpi eq, %arg2, %c0_i32 : i32
    %1 = arith.extui %0 : i1 to i32
    %c0_i32_0 = arith.constant 0 : i32
    %2 = arith.cmpi ne, %1, %c0_i32_0 : i32
    scf.if %2 {
      %cst_10 = arith.constant 0.000000e+00 : f32
      %12 = vector.broadcast %cst_10 : f32 to vector<128x128xf32>
      %c0_11 = arith.constant 0 : index
      %c0_12 = arith.constant 0 : index
      %13 = vector.load %arg7[%c0_11, %c0_12] : memref<128x128xf32, #tpu.memory_space<vmem>>, vector<128x128xf32>
      tpu.vector_store %arg7[%c0_11, %c0_12], %12 {strides = array<i32>} : memref<128x128xf32, #tpu.memory_space<vmem>>, vector<128x128xf32>,
    } else {
    }
    %c0 = arith.constant 0 : index
    %c0_1 = arith.constant 0 : index
    %3 = vector.load %arg7[%c0, %c0_1] : memref<128x128xf32, #tpu.memory_space<vmem>>, vector<128x128xf32>
    %c0_2 = arith.constant 0 : index
    %c0_3 = arith.constant 0 : index
    %4 = vector.load %arg3[%c0_2, %c0_3] : memref<128x640xbf16, #tpu.memory_space<vmem>>, vector<128x640xbf16>
    %c0_4 = arith.constant 0 : index
    %c0_5 = arith.constant 0 : index
    %5 = vector.load %arg4[%c0_4, %c0_5] : memref<640x128xbf16, #tpu.memory_space<vmem>>, vector<640x128xbf16>
    %cst = arith.constant dense<0.000000e+00> : vector<128x128xf32>
    %6 = tpu.matmul %4, %5, %cst {dimension_numbers = #tpu.dot_dimension_numbers<[1], [0], [0], [1], [0, 0, 1, 1], [], []>} : vector<128x640xbf16>, vector<640x128xbf16>, vector<128x128xf32> -> vector<128x128xf32>
    %7 = arith.addf %3, %6 : vector<128x128xf32>
    %c0_6 = arith.constant 0 : index
    %c0_7 = arith.constant 0 : index
    %8 = vector.load %arg7[%c0_6, %c0_7] : memref<128x128xf32, #tpu.memory_space<vmem>>, vector<128x128xf32>
    tpu.vector_store %arg7[%c0_6, %c0_7], %7 {strides = array<i32>} : memref<128x128xf32, #tpu.memory_space<vmem>>, vector<128x128xf32>,
    %c0_i32_8 = arith.constant 0 : i32
    %9 = arith.cmpi eq, %arg2, %c0_i32_8 : i32
    %10 = arith.extui %9 : i1 to i32
    %c0_i32_9 = arith.constant 0 : i32
    %11 = arith.cmpi ne, %10, %c0_i32_9 : i32
    scf.if %11 {
      %c0_10 = arith.constant 0 : index
      %c0_11 = arith.constant 0 : index
      %12 = vector.load %arg7[%c0_10, %c0_11] : memref<128x128xf32, #tpu.memory_space<vmem>>, vector<128x128xf32>
      %c0_12 = arith.constant 0 : index
      %c0_13 = arith.constant 0 : index
      %13 = vector.load %arg5[%c0_12, %c0_13] : memref<1x128xf32, #tpu.memory_space<vmem>>, vector<1x128xf32>
      %14 = vector.broadcast %13 : vector<1x128xf32> to vector<128x128xf32>
      %15 = arith.addf %12, %14 : vector<128x128xf32>
      %cst_14 = arith.constant 0.000000e+00 : f32
      %16 = vector.broadcast %cst_14 : f32 to vector<128x128xf32>
      %17 = arith.maximumf %15, %16 : vector<128x128xf32>
      %c0_15 = arith.constant 0 : index
      %c0_16 = arith.constant 0 : index
      %18 = vector.load %arg6[%c0_15, %c0_16] : memref<128x128xf32, #tpu.memory_space<vmem>>, vector<128x128xf32>
      tpu.vector_store %arg6[%c0_15, %c0_16], %17 {strides = array<i32>} : memref<128x128xf32, #tpu.memory_space<vmem>>, vector<128x128xf32>,
    } else {
    }
    return
  }
  func.func @transform_0(%arg0: i32, %arg1: i32, %arg2: i32) -> (i32, i32) {
    %c0_i32 = arith.constant 0 : i32
    return %arg0, %arg2 : i32, i32
  }
  func.func @transform_1(%arg0: i32, %arg1: i32, %arg2: i32) -> (i32, i32) {
    %c0_i32 = arith.constant 0 : i32
    return %arg2, %arg1 : i32, i32
  }
  func.func @transform_2(%arg0: i32, %arg1: i32, %arg2: i32) -> (i32, i32) {
    %c0_i32 = arith.constant 0 : i32
    %c0_i32_0 = arith.constant 0 : i32
    return %c0_i32, %arg1 : i32, i32
  }
  func.func @transform_3(%arg0: i32, %arg1: i32, %arg2: i32) -> (i32, i32) {
    %c0_i32 = arith.constant 0 : i32
    return %arg0, %arg1 : i32, i32
  }
}

module attributes {stable_mosaic.version = 11 : i64} {
  func.func @_mm_bias_res_kernel(%arg0: i32, %arg1: i32, %arg2: i32, %arg3: memref<128x640xbf16, #tpu.memory_space<vmem>>, %arg4: memref<640x128xbf16, #tpu.memory_space<vmem>>, %arg5: memref<1x128xf32, #tpu.memory_space<vmem>>, %arg6: memref<128x128xf32, #tpu.memory_space<vmem>>, %arg7: memref<128x128xf32, #tpu.memory_space<vmem>>, %arg8: memref<128x128xf32, #tpu.memory_space<vmem>>) attributes {dimension_semantics = [#tpu.dimension_semantics<parallel>, #tpu.dimension_semantics<parallel>, #tpu.dimension_semantics<arbitrary>], iteration_bounds = array<i64: 1, 1, 1>, scalar_prefetch = 0 : i64, scratch_operands = 1 : i64, tpu.core_type = #tpu.core_type<tc>, window_params = [{transform_indices = @transform_0, window_bounds = array<i64: 128, 640>}, {transform_indices = @transform_1, window_bounds = array<i64: 640, 128>}, {transform_indices = @transform_2, window_bounds = array<i64: 1, 128>}, {transform_indices = @transform_3, window_bounds = array<i64: 128, 128>}, {transform_indices = @transform_4, window_bounds = array<i64: 128, 128>}]} {
    %c0_i32 = arith.constant 0 : i32
    %0 = arith.cmpi eq, %arg2, %c0_i32 : i32
    %1 = arith.extui %0 : i1 to i32
    %c0_i32_0 = arith.constant 0 : i32
    %2 = arith.cmpi ne, %1, %c0_i32_0 : i32
    scf.if %2 {
      %cst_10 = arith.constant 0.000000e+00 : f32
      %12 = vector.broadcast %cst_10 : f32 to vector<128x128xf32>
      %c0_11 = arith.constant 0 : index
      %c0_12 = arith.constant 0 : index
      %13 = vector.load %arg8[%c0_11, %c0_12] : memref<128x128xf32, #tpu.memory_space<vmem>>, vector<128x128xf32>
      tpu.vector_store %arg8[%c0_11, %c0_12], %12 {strides = array<i32>} : memref<128x128xf32, #tpu.memory_space<vmem>>, vector<128x128xf32>,
    } else {
    }
    %c0 = arith.constant 0 : index
    %c0_1 = arith.constant 0 : index
    %3 = vector.load %arg8[%c0, %c0_1] : memref<128x128xf32, #tpu.memory_space<vmem>>, vector<128x128xf32>
    %c0_2 = arith.constant 0 : index
    %c0_3 = arith.constant 0 : index
    %4 = vector.load %arg3[%c0_2, %c0_3] : memref<128x640xbf16, #tpu.memory_space<vmem>>, vector<128x640xbf16>
    %c0_4 = arith.constant 0 : index
    %c0_5 = arith.constant 0 : index
    %5 = vector.load %arg4[%c0_4, %c0_5] : memref<640x128xbf16, #tpu.memory_space<vmem>>, vector<640x128xbf16>
    %cst = arith.constant dense<0.000000e+00> : vector<128x128xf32>
    %6 = tpu.matmul %4, %5, %cst {dimension_numbers = #tpu.dot_dimension_numbers<[1], [0], [0], [1], [0, 0, 1, 1], [], []>} : vector<128x640xbf16>, vector<640x128xbf16>, vector<128x128xf32> -> vector<128x128xf32>
    %7 = arith.addf %3, %6 : vector<128x128xf32>
    %c0_6 = arith.constant 0 : index
    %c0_7 = arith.constant 0 : index
    %8 = vector.load %arg8[%c0_6, %c0_7] : memref<128x128xf32, #tpu.memory_space<vmem>>, vector<128x128xf32>
    tpu.vector_store %arg8[%c0_6, %c0_7], %7 {strides = array<i32>} : memref<128x128xf32, #tpu.memory_space<vmem>>, vector<128x128xf32>,
    %c0_i32_8 = arith.constant 0 : i32
    %9 = arith.cmpi eq, %arg2, %c0_i32_8 : i32
    %10 = arith.extui %9 : i1 to i32
    %c0_i32_9 = arith.constant 0 : i32
    %11 = arith.cmpi ne, %10, %c0_i32_9 : i32
    scf.if %11 {
      %c0_10 = arith.constant 0 : index
      %c0_11 = arith.constant 0 : index
      %12 = vector.load %arg8[%c0_10, %c0_11] : memref<128x128xf32, #tpu.memory_space<vmem>>, vector<128x128xf32>
      %c0_12 = arith.constant 0 : index
      %c0_13 = arith.constant 0 : index
      %13 = vector.load %arg5[%c0_12, %c0_13] : memref<1x128xf32, #tpu.memory_space<vmem>>, vector<1x128xf32>
      %14 = vector.broadcast %13 : vector<1x128xf32> to vector<128x128xf32>
      %15 = arith.addf %12, %14 : vector<128x128xf32>
      %c0_14 = arith.constant 0 : index
      %c0_15 = arith.constant 0 : index
      %16 = vector.load %arg6[%c0_14, %c0_15] : memref<128x128xf32, #tpu.memory_space<vmem>>, vector<128x128xf32>
      %17 = arith.addf %15, %16 : vector<128x128xf32>
      %cst_16 = arith.constant 0.000000e+00 : f32
      %18 = vector.broadcast %cst_16 : f32 to vector<128x128xf32>
      %19 = arith.maximumf %17, %18 : vector<128x128xf32>
      %c0_17 = arith.constant 0 : index
      %c0_18 = arith.constant 0 : index
      %20 = vector.load %arg7[%c0_17, %c0_18] : memref<128x128xf32, #tpu.memory_space<vmem>>, vector<128x128xf32>
      tpu.vector_store %arg7[%c0_17, %c0_18], %19 {strides = array<i32>} : memref<128x128xf32, #tpu.memory_space<vmem>>, vector<128x128xf32>,
    } else {
    }
    return
  }
  func.func @transform_0(%arg0: i32, %arg1: i32, %arg2: i32) -> (i32, i32) {
    %c0_i32 = arith.constant 0 : i32
    return %arg0, %arg2 : i32, i32
  }
  func.func @transform_1(%arg0: i32, %arg1: i32, %arg2: i32) -> (i32, i32) {
    %c0_i32 = arith.constant 0 : i32
    return %arg2, %arg1 : i32, i32
  }
  func.func @transform_2(%arg0: i32, %arg1: i32, %arg2: i32) -> (i32, i32) {
    %c0_i32 = arith.constant 0 : i32
    %c0_i32_0 = arith.constant 0 : i32
    return %c0_i32, %arg1 : i32, i32
  }
  func.func @transform_3(%arg0: i32, %arg1: i32, %arg2: i32) -> (i32, i32) {
    %c0_i32 = arith.constant 0 : i32
    return %arg0, %arg1 : i32, i32
  }
  func.func @transform_4(%arg0: i32, %arg1: i32, %arg2: i32) -> (i32, i32) {
    %c0_i32 = arith.constant 0 : i32
    return %arg0, %arg1 : i32, i32
  }
}

module attributes {stable_mosaic.version = 11 : i64} {
  func.func @_mm_bias_kernel(%arg0: i32, %arg1: i32, %arg2: i32, %arg3: memref<32x640xbf16, #tpu.memory_space<vmem>>, %arg4: memref<640x128xbf16, #tpu.memory_space<vmem>>, %arg5: memref<1x128xf32, #tpu.memory_space<vmem>>, %arg6: memref<32x128xf32, #tpu.memory_space<vmem>>, %arg7: memref<32x128xf32, #tpu.memory_space<vmem>>) attributes {dimension_semantics = [#tpu.dimension_semantics<parallel>, #tpu.dimension_semantics<parallel>, #tpu.dimension_semantics<arbitrary>], iteration_bounds = array<i64: 1, 1, 1>, scalar_prefetch = 0 : i64, scratch_operands = 1 : i64, tpu.core_type = #tpu.core_type<tc>, window_params = [{transform_indices = @transform_0, window_bounds = array<i64: 32, 640>}, {transform_indices = @transform_1, window_bounds = array<i64: 640, 128>}, {transform_indices = @transform_2, window_bounds = array<i64: 1, 128>}, {transform_indices = @transform_3, window_bounds = array<i64: 32, 128>}]} {
    %c0_i32 = arith.constant 0 : i32
    %0 = arith.cmpi eq, %arg2, %c0_i32 : i32
    %1 = arith.extui %0 : i1 to i32
    %c0_i32_0 = arith.constant 0 : i32
    %2 = arith.cmpi ne, %1, %c0_i32_0 : i32
    scf.if %2 {
      %cst_10 = arith.constant 0.000000e+00 : f32
      %12 = vector.broadcast %cst_10 : f32 to vector<32x128xf32>
      %c0_11 = arith.constant 0 : index
      %c0_12 = arith.constant 0 : index
      %13 = vector.load %arg7[%c0_11, %c0_12] : memref<32x128xf32, #tpu.memory_space<vmem>>, vector<32x128xf32>
      tpu.vector_store %arg7[%c0_11, %c0_12], %12 {strides = array<i32>} : memref<32x128xf32, #tpu.memory_space<vmem>>, vector<32x128xf32>,
    } else {
    }
    %c0 = arith.constant 0 : index
    %c0_1 = arith.constant 0 : index
    %3 = vector.load %arg7[%c0, %c0_1] : memref<32x128xf32, #tpu.memory_space<vmem>>, vector<32x128xf32>
    %c0_2 = arith.constant 0 : index
    %c0_3 = arith.constant 0 : index
    %4 = vector.load %arg3[%c0_2, %c0_3] : memref<32x640xbf16, #tpu.memory_space<vmem>>, vector<32x640xbf16>
    %c0_4 = arith.constant 0 : index
    %c0_5 = arith.constant 0 : index
    %5 = vector.load %arg4[%c0_4, %c0_5] : memref<640x128xbf16, #tpu.memory_space<vmem>>, vector<640x128xbf16>
    %cst = arith.constant dense<0.000000e+00> : vector<32x128xf32>
    %6 = tpu.matmul %4, %5, %cst {dimension_numbers = #tpu.dot_dimension_numbers<[1], [0], [0], [1], [0, 0, 1, 1], [], []>} : vector<32x640xbf16>, vector<640x128xbf16>, vector<32x128xf32> -> vector<32x128xf32>
    %7 = arith.addf %3, %6 : vector<32x128xf32>
    %c0_6 = arith.constant 0 : index
    %c0_7 = arith.constant 0 : index
    %8 = vector.load %arg7[%c0_6, %c0_7] : memref<32x128xf32, #tpu.memory_space<vmem>>, vector<32x128xf32>
    tpu.vector_store %arg7[%c0_6, %c0_7], %7 {strides = array<i32>} : memref<32x128xf32, #tpu.memory_space<vmem>>, vector<32x128xf32>,
    %c0_i32_8 = arith.constant 0 : i32
    %9 = arith.cmpi eq, %arg2, %c0_i32_8 : i32
    %10 = arith.extui %9 : i1 to i32
    %c0_i32_9 = arith.constant 0 : i32
    %11 = arith.cmpi ne, %10, %c0_i32_9 : i32
    scf.if %11 {
      %c0_10 = arith.constant 0 : index
      %c0_11 = arith.constant 0 : index
      %12 = vector.load %arg7[%c0_10, %c0_11] : memref<32x128xf32, #tpu.memory_space<vmem>>, vector<32x128xf32>
      %c0_12 = arith.constant 0 : index
      %c0_13 = arith.constant 0 : index
      %13 = vector.load %arg5[%c0_12, %c0_13] : memref<1x128xf32, #tpu.memory_space<vmem>>, vector<1x128xf32>
      %14 = vector.broadcast %13 : vector<1x128xf32> to vector<32x128xf32>
      %15 = arith.addf %12, %14 : vector<32x128xf32>
      %cst_14 = arith.constant 0.000000e+00 : f32
      %16 = vector.broadcast %cst_14 : f32 to vector<32x128xf32>
      %17 = arith.maximumf %15, %16 : vector<32x128xf32>
      %c0_15 = arith.constant 0 : index
      %c0_16 = arith.constant 0 : index
      %18 = vector.load %arg6[%c0_15, %c0_16] : memref<32x128xf32, #tpu.memory_space<vmem>>, vector<32x128xf32>
      tpu.vector_store %arg6[%c0_15, %c0_16], %17 {strides = array<i32>} : memref<32x128xf32, #tpu.memory_space<vmem>>, vector<32x128xf32>,
    } else {
    }
    return
  }
  func.func @transform_0(%arg0: i32, %arg1: i32, %arg2: i32) -> (i32, i32) {
    %c0_i32 = arith.constant 0 : i32
    return %arg0, %arg2 : i32, i32
  }
  func.func @transform_1(%arg0: i32, %arg1: i32, %arg2: i32) -> (i32, i32) {
    %c0_i32 = arith.constant 0 : i32
    return %arg2, %arg1 : i32, i32
  }
  func.func @transform_2(%arg0: i32, %arg1: i32, %arg2: i32) -> (i32, i32) {
    %c0_i32 = arith.constant 0 : i32
    %c0_i32_0 = arith.constant 0 : i32
    return %c0_i32, %arg1 : i32, i32
  }
  func.func @transform_3(%arg0: i32, %arg1: i32, %arg2: i32) -> (i32, i32) {
    %c0_i32 = arith.constant 0 : i32
    return %arg0, %arg1 : i32, i32
  }
}

module attributes {stable_mosaic.version = 11 : i64} {
  func.func @_mm_bias_kernel(%arg0: i32, %arg1: i32, %arg2: i32, %arg3: memref<32x128xbf16, #tpu.memory_space<vmem>>, %arg4: memref<128x128xbf16, #tpu.memory_space<vmem>>, %arg5: memref<1x128xf32, #tpu.memory_space<vmem>>, %arg6: memref<32x128xf32, #tpu.memory_space<vmem>>, %arg7: memref<32x128xf32, #tpu.memory_space<vmem>>) attributes {dimension_semantics = [#tpu.dimension_semantics<parallel>, #tpu.dimension_semantics<parallel>, #tpu.dimension_semantics<arbitrary>], iteration_bounds = array<i64: 1, 1, 1>, scalar_prefetch = 0 : i64, scratch_operands = 1 : i64, tpu.core_type = #tpu.core_type<tc>, window_params = [{transform_indices = @transform_0, window_bounds = array<i64: 32, 128>}, {transform_indices = @transform_1, window_bounds = array<i64: 128, 128>}, {transform_indices = @transform_2, window_bounds = array<i64: 1, 128>}, {transform_indices = @transform_3, window_bounds = array<i64: 32, 128>}]} {
    %c0_i32 = arith.constant 0 : i32
    %0 = arith.cmpi eq, %arg2, %c0_i32 : i32
    %1 = arith.extui %0 : i1 to i32
    %c0_i32_0 = arith.constant 0 : i32
    %2 = arith.cmpi ne, %1, %c0_i32_0 : i32
    scf.if %2 {
      %cst_10 = arith.constant 0.000000e+00 : f32
      %12 = vector.broadcast %cst_10 : f32 to vector<32x128xf32>
      %c0_11 = arith.constant 0 : index
      %c0_12 = arith.constant 0 : index
      %13 = vector.load %arg7[%c0_11, %c0_12] : memref<32x128xf32, #tpu.memory_space<vmem>>, vector<32x128xf32>
      tpu.vector_store %arg7[%c0_11, %c0_12], %12 {strides = array<i32>} : memref<32x128xf32, #tpu.memory_space<vmem>>, vector<32x128xf32>,
    } else {
    }
    %c0 = arith.constant 0 : index
    %c0_1 = arith.constant 0 : index
    %3 = vector.load %arg7[%c0, %c0_1] : memref<32x128xf32, #tpu.memory_space<vmem>>, vector<32x128xf32>
    %c0_2 = arith.constant 0 : index
    %c0_3 = arith.constant 0 : index
    %4 = vector.load %arg3[%c0_2, %c0_3] : memref<32x128xbf16, #tpu.memory_space<vmem>>, vector<32x128xbf16>
    %c0_4 = arith.constant 0 : index
    %c0_5 = arith.constant 0 : index
    %5 = vector.load %arg4[%c0_4, %c0_5] : memref<128x128xbf16, #tpu.memory_space<vmem>>, vector<128x128xbf16>
    %cst = arith.constant dense<0.000000e+00> : vector<32x128xf32>
    %6 = tpu.matmul %4, %5, %cst {dimension_numbers = #tpu.dot_dimension_numbers<[1], [0], [0], [1], [0, 0, 1, 1], [], []>} : vector<32x128xbf16>, vector<128x128xbf16>, vector<32x128xf32> -> vector<32x128xf32>
    %7 = arith.addf %3, %6 : vector<32x128xf32>
    %c0_6 = arith.constant 0 : index
    %c0_7 = arith.constant 0 : index
    %8 = vector.load %arg7[%c0_6, %c0_7] : memref<32x128xf32, #tpu.memory_space<vmem>>, vector<32x128xf32>
    tpu.vector_store %arg7[%c0_6, %c0_7], %7 {strides = array<i32>} : memref<32x128xf32, #tpu.memory_space<vmem>>, vector<32x128xf32>,
    %c0_i32_8 = arith.constant 0 : i32
    %9 = arith.cmpi eq, %arg2, %c0_i32_8 : i32
    %10 = arith.extui %9 : i1 to i32
    %c0_i32_9 = arith.constant 0 : i32
    %11 = arith.cmpi ne, %10, %c0_i32_9 : i32
    scf.if %11 {
      %c0_10 = arith.constant 0 : index
      %c0_11 = arith.constant 0 : index
      %12 = vector.load %arg7[%c0_10, %c0_11] : memref<32x128xf32, #tpu.memory_space<vmem>>, vector<32x128xf32>
      %c0_12 = arith.constant 0 : index
      %c0_13 = arith.constant 0 : index
      %13 = vector.load %arg5[%c0_12, %c0_13] : memref<1x128xf32, #tpu.memory_space<vmem>>, vector<1x128xf32>
      %14 = vector.broadcast %13 : vector<1x128xf32> to vector<32x128xf32>
      %15 = arith.addf %12, %14 : vector<32x128xf32>
      %c0_14 = arith.constant 0 : index
      %c0_15 = arith.constant 0 : index
      %16 = vector.load %arg6[%c0_14, %c0_15] : memref<32x128xf32, #tpu.memory_space<vmem>>, vector<32x128xf32>
      tpu.vector_store %arg6[%c0_14, %c0_15], %15 {strides = array<i32>} : memref<32x128xf32, #tpu.memory_space<vmem>>, vector<32x128xf32>,
    } else {
    }
    return
  }
  func.func @transform_0(%arg0: i32, %arg1: i32, %arg2: i32) -> (i32, i32) {
    %c0_i32 = arith.constant 0 : i32
    return %arg0, %arg2 : i32, i32
  }
  func.func @transform_1(%arg0: i32, %arg1: i32, %arg2: i32) -> (i32, i32) {
    %c0_i32 = arith.constant 0 : i32
    return %arg2, %arg1 : i32, i32
  }
  func.func @transform_2(%arg0: i32, %arg1: i32, %arg2: i32) -> (i32, i32) {
    %c0_i32 = arith.constant 0 : i32
    %c0_i32_0 = arith.constant 0 : i32
    return %c0_i32, %arg1 : i32, i32
  }
  func.func @transform_3(%arg0: i32, %arg1: i32, %arg2: i32) -> (i32, i32) {
    %c0_i32 = arith.constant 0 : i32
    return %arg0, %arg1 : i32, i32
  }
}

module attributes {stable_mosaic.version = 11 : i64} {
  func.func @_mm_bias_res_kernel(%arg0: i32, %arg1: i32, %arg2: i32, %arg3: memref<32x1152xbf16, #tpu.memory_space<vmem>>, %arg4: memref<1152x128xbf16, #tpu.memory_space<vmem>>, %arg5: memref<1x128xf32, #tpu.memory_space<vmem>>, %arg6: memref<32x128xf32, #tpu.memory_space<vmem>>, %arg7: memref<32x128xf32, #tpu.memory_space<vmem>>, %arg8: memref<32x128xf32, #tpu.memory_space<vmem>>) attributes {dimension_semantics = [#tpu.dimension_semantics<parallel>, #tpu.dimension_semantics<parallel>, #tpu.dimension_semantics<arbitrary>], iteration_bounds = array<i64: 1, 1, 1>, scalar_prefetch = 0 : i64, scratch_operands = 1 : i64, tpu.core_type = #tpu.core_type<tc>, window_params = [{transform_indices = @transform_0, window_bounds = array<i64: 32, 1152>}, {transform_indices = @transform_1, window_bounds = array<i64: 1152, 128>}, {transform_indices = @transform_2, window_bounds = array<i64: 1, 128>}, {transform_indices = @transform_3, window_bounds = array<i64: 32, 128>}, {transform_indices = @transform_4, window_bounds = array<i64: 32, 128>}]} {
    %c0_i32 = arith.constant 0 : i32
    %0 = arith.cmpi eq, %arg2, %c0_i32 : i32
    %1 = arith.extui %0 : i1 to i32
    %c0_i32_0 = arith.constant 0 : i32
    %2 = arith.cmpi ne, %1, %c0_i32_0 : i32
    scf.if %2 {
      %cst_10 = arith.constant 0.000000e+00 : f32
      %12 = vector.broadcast %cst_10 : f32 to vector<32x128xf32>
      %c0_11 = arith.constant 0 : index
      %c0_12 = arith.constant 0 : index
      %13 = vector.load %arg8[%c0_11, %c0_12] : memref<32x128xf32, #tpu.memory_space<vmem>>, vector<32x128xf32>
      tpu.vector_store %arg8[%c0_11, %c0_12], %12 {strides = array<i32>} : memref<32x128xf32, #tpu.memory_space<vmem>>, vector<32x128xf32>,
    } else {
    }
    %c0 = arith.constant 0 : index
    %c0_1 = arith.constant 0 : index
    %3 = vector.load %arg8[%c0, %c0_1] : memref<32x128xf32, #tpu.memory_space<vmem>>, vector<32x128xf32>
    %c0_2 = arith.constant 0 : index
    %c0_3 = arith.constant 0 : index
    %4 = vector.load %arg3[%c0_2, %c0_3] : memref<32x1152xbf16, #tpu.memory_space<vmem>>, vector<32x1152xbf16>
    %c0_4 = arith.constant 0 : index
    %c0_5 = arith.constant 0 : index
    %5 = vector.load %arg4[%c0_4, %c0_5] : memref<1152x128xbf16, #tpu.memory_space<vmem>>, vector<1152x128xbf16>
    %cst = arith.constant dense<0.000000e+00> : vector<32x128xf32>
    %6 = tpu.matmul %4, %5, %cst {dimension_numbers = #tpu.dot_dimension_numbers<[1], [0], [0], [1], [0, 0, 1, 1], [], []>} : vector<32x1152xbf16>, vector<1152x128xbf16>, vector<32x128xf32> -> vector<32x128xf32>
    %7 = arith.addf %3, %6 : vector<32x128xf32>
    %c0_6 = arith.constant 0 : index
    %c0_7 = arith.constant 0 : index
    %8 = vector.load %arg8[%c0_6, %c0_7] : memref<32x128xf32, #tpu.memory_space<vmem>>, vector<32x128xf32>
    tpu.vector_store %arg8[%c0_6, %c0_7], %7 {strides = array<i32>} : memref<32x128xf32, #tpu.memory_space<vmem>>, vector<32x128xf32>,
    %c0_i32_8 = arith.constant 0 : i32
    %9 = arith.cmpi eq, %arg2, %c0_i32_8 : i32
    %10 = arith.extui %9 : i1 to i32
    %c0_i32_9 = arith.constant 0 : i32
    %11 = arith.cmpi ne, %10, %c0_i32_9 : i32
    scf.if %11 {
      %c0_10 = arith.constant 0 : index
      %c0_11 = arith.constant 0 : index
      %12 = vector.load %arg8[%c0_10, %c0_11] : memref<32x128xf32, #tpu.memory_space<vmem>>, vector<32x128xf32>
      %c0_12 = arith.constant 0 : index
      %c0_13 = arith.constant 0 : index
      %13 = vector.load %arg5[%c0_12, %c0_13] : memref<1x128xf32, #tpu.memory_space<vmem>>, vector<1x128xf32>
      %14 = vector.broadcast %13 : vector<1x128xf32> to vector<32x128xf32>
      %15 = arith.addf %12, %14 : vector<32x128xf32>
      %c0_14 = arith.constant 0 : index
      %c0_15 = arith.constant 0 : index
      %16 = vector.load %arg6[%c0_14, %c0_15] : memref<32x128xf32, #tpu.memory_space<vmem>>, vector<32x128xf32>
      %17 = arith.addf %15, %16 : vector<32x128xf32>
      %cst_16 = arith.constant 0.000000e+00 : f32
      %18 = vector.broadcast %cst_16 : f32 to vector<32x128xf32>
      %19 = arith.maximumf %17, %18 : vector<32x128xf32>
      %c0_17 = arith.constant 0 : index
      %c0_18 = arith.constant 0 : index
      %20 = vector.load %arg7[%c0_17, %c0_18] : memref<32x128xf32, #tpu.memory_space<vmem>>, vector<32x128xf32>
      tpu.vector_store %arg7[%c0_17, %c0_18], %19 {strides = array<i32>} : memref<32x128xf32, #tpu.memory_space<vmem>>, vector<32x128xf32>,
    } else {
    }
    return
  }
  func.func @transform_0(%arg0: i32, %arg1: i32, %arg2: i32) -> (i32, i32) {
    %c0_i32 = arith.constant 0 : i32
    return %arg0, %arg2 : i32, i32
  }
  func.func @transform_1(%arg0: i32, %arg1: i32, %arg2: i32) -> (i32, i32) {
    %c0_i32 = arith.constant 0 : i32
    return %arg2, %arg1 : i32, i32
  }
  func.func @transform_2(%arg0: i32, %arg1: i32, %arg2: i32) -> (i32, i32) {
    %c0_i32 = arith.constant 0 : i32
    %c0_i32_0 = arith.constant 0 : i32
    return %c0_i32, %arg1 : i32, i32
  }
  func.func @transform_3(%arg0: i32, %arg1: i32, %arg2: i32) -> (i32, i32) {
    %c0_i32 = arith.constant 0 : i32
    return %arg0, %arg1 : i32, i32
  }
  func.func @transform_4(%arg0: i32, %arg1: i32, %arg2: i32) -> (i32, i32) {
    %c0_i32 = arith.constant 0 : i32
    return %arg0, %arg1 : i32, i32
  }
}

module attributes {stable_mosaic.version = 11 : i64} {
  func.func @_mm_bias_kernel(%arg0: i32, %arg1: i32, %arg2: i32, %arg3: memref<32x1152xbf16, #tpu.memory_space<vmem>>, %arg4: memref<1152x128xbf16, #tpu.memory_space<vmem>>, %arg5: memref<1x128xf32, #tpu.memory_space<vmem>>, %arg6: memref<32x128xf32, #tpu.memory_space<vmem>>, %arg7: memref<32x128xf32, #tpu.memory_space<vmem>>) attributes {dimension_semantics = [#tpu.dimension_semantics<parallel>, #tpu.dimension_semantics<parallel>, #tpu.dimension_semantics<arbitrary>], iteration_bounds = array<i64: 1, 1, 1>, scalar_prefetch = 0 : i64, scratch_operands = 1 : i64, tpu.core_type = #tpu.core_type<tc>, window_params = [{transform_indices = @transform_0, window_bounds = array<i64: 32, 1152>}, {transform_indices = @transform_1, window_bounds = array<i64: 1152, 128>}, {transform_indices = @transform_2, window_bounds = array<i64: 1, 128>}, {transform_indices = @transform_3, window_bounds = array<i64: 32, 128>}]} {
    %c0_i32 = arith.constant 0 : i32
    %0 = arith.cmpi eq, %arg2, %c0_i32 : i32
    %1 = arith.extui %0 : i1 to i32
    %c0_i32_0 = arith.constant 0 : i32
    %2 = arith.cmpi ne, %1, %c0_i32_0 : i32
    scf.if %2 {
      %cst_10 = arith.constant 0.000000e+00 : f32
      %12 = vector.broadcast %cst_10 : f32 to vector<32x128xf32>
      %c0_11 = arith.constant 0 : index
      %c0_12 = arith.constant 0 : index
      %13 = vector.load %arg7[%c0_11, %c0_12] : memref<32x128xf32, #tpu.memory_space<vmem>>, vector<32x128xf32>
      tpu.vector_store %arg7[%c0_11, %c0_12], %12 {strides = array<i32>} : memref<32x128xf32, #tpu.memory_space<vmem>>, vector<32x128xf32>,
    } else {
    }
    %c0 = arith.constant 0 : index
    %c0_1 = arith.constant 0 : index
    %3 = vector.load %arg7[%c0, %c0_1] : memref<32x128xf32, #tpu.memory_space<vmem>>, vector<32x128xf32>
    %c0_2 = arith.constant 0 : index
    %c0_3 = arith.constant 0 : index
    %4 = vector.load %arg3[%c0_2, %c0_3] : memref<32x1152xbf16, #tpu.memory_space<vmem>>, vector<32x1152xbf16>
    %c0_4 = arith.constant 0 : index
    %c0_5 = arith.constant 0 : index
    %5 = vector.load %arg4[%c0_4, %c0_5] : memref<1152x128xbf16, #tpu.memory_space<vmem>>, vector<1152x128xbf16>
    %cst = arith.constant dense<0.000000e+00> : vector<32x128xf32>
    %6 = tpu.matmul %4, %5, %cst {dimension_numbers = #tpu.dot_dimension_numbers<[1], [0], [0], [1], [0, 0, 1, 1], [], []>} : vector<32x1152xbf16>, vector<1152x128xbf16>, vector<32x128xf32> -> vector<32x128xf32>
    %7 = arith.addf %3, %6 : vector<32x128xf32>
    %c0_6 = arith.constant 0 : index
    %c0_7 = arith.constant 0 : index
    %8 = vector.load %arg7[%c0_6, %c0_7] : memref<32x128xf32, #tpu.memory_space<vmem>>, vector<32x128xf32>
    tpu.vector_store %arg7[%c0_6, %c0_7], %7 {strides = array<i32>} : memref<32x128xf32, #tpu.memory_space<vmem>>, vector<32x128xf32>,
    %c0_i32_8 = arith.constant 0 : i32
    %9 = arith.cmpi eq, %arg2, %c0_i32_8 : i32
    %10 = arith.extui %9 : i1 to i32
    %c0_i32_9 = arith.constant 0 : i32
    %11 = arith.cmpi ne, %10, %c0_i32_9 : i32
    scf.if %11 {
      %c0_10 = arith.constant 0 : index
      %c0_11 = arith.constant 0 : index
      %12 = vector.load %arg7[%c0_10, %c0_11] : memref<32x128xf32, #tpu.memory_space<vmem>>, vector<32x128xf32>
      %c0_12 = arith.constant 0 : index
      %c0_13 = arith.constant 0 : index
      %13 = vector.load %arg5[%c0_12, %c0_13] : memref<1x128xf32, #tpu.memory_space<vmem>>, vector<1x128xf32>
      %14 = vector.broadcast %13 : vector<1x128xf32> to vector<32x128xf32>
      %15 = arith.addf %12, %14 : vector<32x128xf32>
      %cst_14 = arith.constant 0.000000e+00 : f32
      %16 = vector.broadcast %cst_14 : f32 to vector<32x128xf32>
      %17 = arith.maximumf %15, %16 : vector<32x128xf32>
      %c0_15 = arith.constant 0 : index
      %c0_16 = arith.constant 0 : index
      %18 = vector.load %arg6[%c0_15, %c0_16] : memref<32x128xf32, #tpu.memory_space<vmem>>, vector<32x128xf32>
      tpu.vector_store %arg6[%c0_15, %c0_16], %17 {strides = array<i32>} : memref<32x128xf32, #tpu.memory_space<vmem>>, vector<32x128xf32>,
    } else {
    }
    return
  }
  func.func @transform_0(%arg0: i32, %arg1: i32, %arg2: i32) -> (i32, i32) {
    %c0_i32 = arith.constant 0 : i32
    return %arg0, %arg2 : i32, i32
  }
  func.func @transform_1(%arg0: i32, %arg1: i32, %arg2: i32) -> (i32, i32) {
    %c0_i32 = arith.constant 0 : i32
    return %arg2, %arg1 : i32, i32
  }
  func.func @transform_2(%arg0: i32, %arg1: i32, %arg2: i32) -> (i32, i32) {
    %c0_i32 = arith.constant 0 : i32
    %c0_i32_0 = arith.constant 0 : i32
    return %c0_i32, %arg1 : i32, i32
  }
  func.func @transform_3(%arg0: i32, %arg1: i32, %arg2: i32) -> (i32, i32) {
    %c0_i32 = arith.constant 0 : i32
    return %arg0, %arg1 : i32, i32
  }
}

module attributes {stable_mosaic.version = 11 : i64} {
  func.func @_mm_bias_kernel(%arg0: i32, %arg1: i32, %arg2: i32, %arg3: memref<16x1152xbf16, #tpu.memory_space<vmem>>, %arg4: memref<1152x256xbf16, #tpu.memory_space<vmem>>, %arg5: memref<1x256xf32, #tpu.memory_space<vmem>>, %arg6: memref<16x256xf32, #tpu.memory_space<vmem>>, %arg7: memref<16x256xf32, #tpu.memory_space<vmem>>) attributes {dimension_semantics = [#tpu.dimension_semantics<parallel>, #tpu.dimension_semantics<parallel>, #tpu.dimension_semantics<arbitrary>], iteration_bounds = array<i64: 1, 1, 1>, scalar_prefetch = 0 : i64, scratch_operands = 1 : i64, tpu.core_type = #tpu.core_type<tc>, window_params = [{transform_indices = @transform_0, window_bounds = array<i64: 16, 1152>}, {transform_indices = @transform_1, window_bounds = array<i64: 1152, 256>}, {transform_indices = @transform_2, window_bounds = array<i64: 1, 256>}, {transform_indices = @transform_3, window_bounds = array<i64: 16, 256>}]} {
    %c0_i32 = arith.constant 0 : i32
    %0 = arith.cmpi eq, %arg2, %c0_i32 : i32
    %1 = arith.extui %0 : i1 to i32
    %c0_i32_0 = arith.constant 0 : i32
    %2 = arith.cmpi ne, %1, %c0_i32_0 : i32
    scf.if %2 {
      %cst_10 = arith.constant 0.000000e+00 : f32
      %12 = vector.broadcast %cst_10 : f32 to vector<16x256xf32>
      %c0_11 = arith.constant 0 : index
      %c0_12 = arith.constant 0 : index
      %13 = vector.load %arg7[%c0_11, %c0_12] : memref<16x256xf32, #tpu.memory_space<vmem>>, vector<16x256xf32>
      tpu.vector_store %arg7[%c0_11, %c0_12], %12 {strides = array<i32>} : memref<16x256xf32, #tpu.memory_space<vmem>>, vector<16x256xf32>,
    } else {
    }
    %c0 = arith.constant 0 : index
    %c0_1 = arith.constant 0 : index
    %3 = vector.load %arg7[%c0, %c0_1] : memref<16x256xf32, #tpu.memory_space<vmem>>, vector<16x256xf32>
    %c0_2 = arith.constant 0 : index
    %c0_3 = arith.constant 0 : index
    %4 = vector.load %arg3[%c0_2, %c0_3] : memref<16x1152xbf16, #tpu.memory_space<vmem>>, vector<16x1152xbf16>
    %c0_4 = arith.constant 0 : index
    %c0_5 = arith.constant 0 : index
    %5 = vector.load %arg4[%c0_4, %c0_5] : memref<1152x256xbf16, #tpu.memory_space<vmem>>, vector<1152x256xbf16>
    %cst = arith.constant dense<0.000000e+00> : vector<16x256xf32>
    %6 = tpu.matmul %4, %5, %cst {dimension_numbers = #tpu.dot_dimension_numbers<[1], [0], [0], [1], [0, 0, 1, 1], [], []>} : vector<16x1152xbf16>, vector<1152x256xbf16>, vector<16x256xf32> -> vector<16x256xf32>
    %7 = arith.addf %3, %6 : vector<16x256xf32>
    %c0_6 = arith.constant 0 : index
    %c0_7 = arith.constant 0 : index
    %8 = vector.load %arg7[%c0_6, %c0_7] : memref<16x256xf32, #tpu.memory_space<vmem>>, vector<16x256xf32>
    tpu.vector_store %arg7[%c0_6, %c0_7], %7 {strides = array<i32>} : memref<16x256xf32, #tpu.memory_space<vmem>>, vector<16x256xf32>,
    %c0_i32_8 = arith.constant 0 : i32
    %9 = arith.cmpi eq, %arg2, %c0_i32_8 : i32
    %10 = arith.extui %9 : i1 to i32
    %c0_i32_9 = arith.constant 0 : i32
    %11 = arith.cmpi ne, %10, %c0_i32_9 : i32
    scf.if %11 {
      %c0_10 = arith.constant 0 : index
      %c0_11 = arith.constant 0 : index
      %12 = vector.load %arg7[%c0_10, %c0_11] : memref<16x256xf32, #tpu.memory_space<vmem>>, vector<16x256xf32>
      %c0_12 = arith.constant 0 : index
      %c0_13 = arith.constant 0 : index
      %13 = vector.load %arg5[%c0_12, %c0_13] : memref<1x256xf32, #tpu.memory_space<vmem>>, vector<1x256xf32>
      %14 = vector.broadcast %13 : vector<1x256xf32> to vector<16x256xf32>
      %15 = arith.addf %12, %14 : vector<16x256xf32>
      %cst_14 = arith.constant 0.000000e+00 : f32
      %16 = vector.broadcast %cst_14 : f32 to vector<16x256xf32>
      %17 = arith.maximumf %15, %16 : vector<16x256xf32>
      %c0_15 = arith.constant 0 : index
      %c0_16 = arith.constant 0 : index
      %18 = vector.load %arg6[%c0_15, %c0_16] : memref<16x256xf32, #tpu.memory_space<vmem>>, vector<16x256xf32>
      tpu.vector_store %arg6[%c0_15, %c0_16], %17 {strides = array<i32>} : memref<16x256xf32, #tpu.memory_space<vmem>>, vector<16x256xf32>,
    } else {
    }
    return
  }
  func.func @transform_0(%arg0: i32, %arg1: i32, %arg2: i32) -> (i32, i32) {
    %c0_i32 = arith.constant 0 : i32
    return %arg0, %arg2 : i32, i32
  }
  func.func @transform_1(%arg0: i32, %arg1: i32, %arg2: i32) -> (i32, i32) {
    %c0_i32 = arith.constant 0 : i32
    return %arg2, %arg1 : i32, i32
  }
  func.func @transform_2(%arg0: i32, %arg1: i32, %arg2: i32) -> (i32, i32) {
    %c0_i32 = arith.constant 0 : i32
    %c0_i32_0 = arith.constant 0 : i32
    return %c0_i32, %arg1 : i32, i32
  }
  func.func @transform_3(%arg0: i32, %arg1: i32, %arg2: i32) -> (i32, i32) {
    %c0_i32 = arith.constant 0 : i32
    return %arg0, %arg1 : i32, i32
  }
}

module attributes {stable_mosaic.version = 11 : i64} {
  func.func @_mm_bias_kernel(%arg0: i32, %arg1: i32, %arg2: i32, %arg3: memref<16x128xbf16, #tpu.memory_space<vmem>>, %arg4: memref<128x256xbf16, #tpu.memory_space<vmem>>, %arg5: memref<1x256xf32, #tpu.memory_space<vmem>>, %arg6: memref<16x256xf32, #tpu.memory_space<vmem>>, %arg7: memref<16x256xf32, #tpu.memory_space<vmem>>) attributes {dimension_semantics = [#tpu.dimension_semantics<parallel>, #tpu.dimension_semantics<parallel>, #tpu.dimension_semantics<arbitrary>], iteration_bounds = array<i64: 1, 1, 1>, scalar_prefetch = 0 : i64, scratch_operands = 1 : i64, tpu.core_type = #tpu.core_type<tc>, window_params = [{transform_indices = @transform_0, window_bounds = array<i64: 16, 128>}, {transform_indices = @transform_1, window_bounds = array<i64: 128, 256>}, {transform_indices = @transform_2, window_bounds = array<i64: 1, 256>}, {transform_indices = @transform_3, window_bounds = array<i64: 16, 256>}]} {
    %c0_i32 = arith.constant 0 : i32
    %0 = arith.cmpi eq, %arg2, %c0_i32 : i32
    %1 = arith.extui %0 : i1 to i32
    %c0_i32_0 = arith.constant 0 : i32
    %2 = arith.cmpi ne, %1, %c0_i32_0 : i32
    scf.if %2 {
      %cst_10 = arith.constant 0.000000e+00 : f32
      %12 = vector.broadcast %cst_10 : f32 to vector<16x256xf32>
      %c0_11 = arith.constant 0 : index
      %c0_12 = arith.constant 0 : index
      %13 = vector.load %arg7[%c0_11, %c0_12] : memref<16x256xf32, #tpu.memory_space<vmem>>, vector<16x256xf32>
      tpu.vector_store %arg7[%c0_11, %c0_12], %12 {strides = array<i32>} : memref<16x256xf32, #tpu.memory_space<vmem>>, vector<16x256xf32>,
    } else {
    }
    %c0 = arith.constant 0 : index
    %c0_1 = arith.constant 0 : index
    %3 = vector.load %arg7[%c0, %c0_1] : memref<16x256xf32, #tpu.memory_space<vmem>>, vector<16x256xf32>
    %c0_2 = arith.constant 0 : index
    %c0_3 = arith.constant 0 : index
    %4 = vector.load %arg3[%c0_2, %c0_3] : memref<16x128xbf16, #tpu.memory_space<vmem>>, vector<16x128xbf16>
    %c0_4 = arith.constant 0 : index
    %c0_5 = arith.constant 0 : index
    %5 = vector.load %arg4[%c0_4, %c0_5] : memref<128x256xbf16, #tpu.memory_space<vmem>>, vector<128x256xbf16>
    %cst = arith.constant dense<0.000000e+00> : vector<16x256xf32>
    %6 = tpu.matmul %4, %5, %cst {dimension_numbers = #tpu.dot_dimension_numbers<[1], [0], [0], [1], [0, 0, 1, 1], [], []>} : vector<16x128xbf16>, vector<128x256xbf16>, vector<16x256xf32> -> vector<16x256xf32>
    %7 = arith.addf %3, %6 : vector<16x256xf32>
    %c0_6 = arith.constant 0 : index
    %c0_7 = arith.constant 0 : index
    %8 = vector.load %arg7[%c0_6, %c0_7] : memref<16x256xf32, #tpu.memory_space<vmem>>, vector<16x256xf32>
    tpu.vector_store %arg7[%c0_6, %c0_7], %7 {strides = array<i32>} : memref<16x256xf32, #tpu.memory_space<vmem>>, vector<16x256xf32>,
    %c0_i32_8 = arith.constant 0 : i32
    %9 = arith.cmpi eq, %arg2, %c0_i32_8 : i32
    %10 = arith.extui %9 : i1 to i32
    %c0_i32_9 = arith.constant 0 : i32
    %11 = arith.cmpi ne, %10, %c0_i32_9 : i32
    scf.if %11 {
      %c0_10 = arith.constant 0 : index
      %c0_11 = arith.constant 0 : index
      %12 = vector.load %arg7[%c0_10, %c0_11] : memref<16x256xf32, #tpu.memory_space<vmem>>, vector<16x256xf32>
      %c0_12 = arith.constant 0 : index
      %c0_13 = arith.constant 0 : index
      %13 = vector.load %arg5[%c0_12, %c0_13] : memref<1x256xf32, #tpu.memory_space<vmem>>, vector<1x256xf32>
      %14 = vector.broadcast %13 : vector<1x256xf32> to vector<16x256xf32>
      %15 = arith.addf %12, %14 : vector<16x256xf32>
      %c0_14 = arith.constant 0 : index
      %c0_15 = arith.constant 0 : index
      %16 = vector.load %arg6[%c0_14, %c0_15] : memref<16x256xf32, #tpu.memory_space<vmem>>, vector<16x256xf32>
      tpu.vector_store %arg6[%c0_14, %c0_15], %15 {strides = array<i32>} : memref<16x256xf32, #tpu.memory_space<vmem>>, vector<16x256xf32>,
    } else {
    }
    return
  }
  func.func @transform_0(%arg0: i32, %arg1: i32, %arg2: i32) -> (i32, i32) {
    %c0_i32 = arith.constant 0 : i32
    return %arg0, %arg2 : i32, i32
  }
  func.func @transform_1(%arg0: i32, %arg1: i32, %arg2: i32) -> (i32, i32) {
    %c0_i32 = arith.constant 0 : i32
    return %arg2, %arg1 : i32, i32
  }
  func.func @transform_2(%arg0: i32, %arg1: i32, %arg2: i32) -> (i32, i32) {
    %c0_i32 = arith.constant 0 : i32
    %c0_i32_0 = arith.constant 0 : i32
    return %c0_i32, %arg1 : i32, i32
  }
  func.func @transform_3(%arg0: i32, %arg1: i32, %arg2: i32) -> (i32, i32) {
    %c0_i32 = arith.constant 0 : i32
    return %arg0, %arg1 : i32, i32
  }
}

module attributes {stable_mosaic.version = 11 : i64} {
  func.func @_mm_bias_res_kernel(%arg0: i32, %arg1: i32, %arg2: i32, %arg3: memref<16x512xbf16, #tpu.memory_space<vmem>>, %arg4: memref<512x256xbf16, #tpu.memory_space<vmem>>, %arg5: memref<1x256xf32, #tpu.memory_space<vmem>>, %arg6: memref<16x256xf32, #tpu.memory_space<vmem>>, %arg7: memref<16x256xf32, #tpu.memory_space<vmem>>, %arg8: memref<16x256xf32, #tpu.memory_space<vmem>>) attributes {dimension_semantics = [#tpu.dimension_semantics<parallel>, #tpu.dimension_semantics<parallel>, #tpu.dimension_semantics<arbitrary>], iteration_bounds = array<i64: 1, 1, 5>, scalar_prefetch = 0 : i64, scratch_operands = 1 : i64, tpu.core_type = #tpu.core_type<tc>, window_params = [{transform_indices = @transform_0, window_bounds = array<i64: 16, 512>}, {transform_indices = @transform_1, window_bounds = array<i64: 512, 256>}, {transform_indices = @transform_2, window_bounds = array<i64: 1, 256>}, {transform_indices = @transform_3, window_bounds = array<i64: 16, 256>}, {transform_indices = @transform_4, window_bounds = array<i64: 16, 256>}]} {
    %c0_i32 = arith.constant 0 : i32
    %0 = arith.cmpi eq, %arg2, %c0_i32 : i32
    %1 = arith.extui %0 : i1 to i32
    %c0_i32_0 = arith.constant 0 : i32
    %2 = arith.cmpi ne, %1, %c0_i32_0 : i32
    scf.if %2 {
      %cst_9 = arith.constant 0.000000e+00 : f32
      %12 = vector.broadcast %cst_9 : f32 to vector<16x256xf32>
      %c0_10 = arith.constant 0 : index
      %c0_11 = arith.constant 0 : index
      %13 = vector.load %arg8[%c0_10, %c0_11] : memref<16x256xf32, #tpu.memory_space<vmem>>, vector<16x256xf32>
      tpu.vector_store %arg8[%c0_10, %c0_11], %12 {strides = array<i32>} : memref<16x256xf32, #tpu.memory_space<vmem>>, vector<16x256xf32>,
    } else {
    }
    %c0 = arith.constant 0 : index
    %c0_1 = arith.constant 0 : index
    %3 = vector.load %arg8[%c0, %c0_1] : memref<16x256xf32, #tpu.memory_space<vmem>>, vector<16x256xf32>
    %c0_2 = arith.constant 0 : index
    %c0_3 = arith.constant 0 : index
    %4 = vector.load %arg3[%c0_2, %c0_3] : memref<16x512xbf16, #tpu.memory_space<vmem>>, vector<16x512xbf16>
    %c0_4 = arith.constant 0 : index
    %c0_5 = arith.constant 0 : index
    %5 = vector.load %arg4[%c0_4, %c0_5] : memref<512x256xbf16, #tpu.memory_space<vmem>>, vector<512x256xbf16>
    %cst = arith.constant dense<0.000000e+00> : vector<16x256xf32>
    %6 = tpu.matmul %4, %5, %cst {dimension_numbers = #tpu.dot_dimension_numbers<[1], [0], [0], [1], [0, 0, 1, 1], [], []>} : vector<16x512xbf16>, vector<512x256xbf16>, vector<16x256xf32> -> vector<16x256xf32>
    %7 = arith.addf %3, %6 : vector<16x256xf32>
    %c0_6 = arith.constant 0 : index
    %c0_7 = arith.constant 0 : index
    %8 = vector.load %arg8[%c0_6, %c0_7] : memref<16x256xf32, #tpu.memory_space<vmem>>, vector<16x256xf32>
    tpu.vector_store %arg8[%c0_6, %c0_7], %7 {strides = array<i32>} : memref<16x256xf32, #tpu.memory_space<vmem>>, vector<16x256xf32>,
    %c4_i32 = arith.constant 4 : i32
    %9 = arith.cmpi eq, %arg2, %c4_i32 : i32
    %10 = arith.extui %9 : i1 to i32
    %c0_i32_8 = arith.constant 0 : i32
    %11 = arith.cmpi ne, %10, %c0_i32_8 : i32
    scf.if %11 {
      %c0_9 = arith.constant 0 : index
      %c0_10 = arith.constant 0 : index
      %12 = vector.load %arg8[%c0_9, %c0_10] : memref<16x256xf32, #tpu.memory_space<vmem>>, vector<16x256xf32>
      %c0_11 = arith.constant 0 : index
      %c0_12 = arith.constant 0 : index
      %13 = vector.load %arg5[%c0_11, %c0_12] : memref<1x256xf32, #tpu.memory_space<vmem>>, vector<1x256xf32>
      %14 = vector.broadcast %13 : vector<1x256xf32> to vector<16x256xf32>
      %15 = arith.addf %12, %14 : vector<16x256xf32>
      %c0_13 = arith.constant 0 : index
      %c0_14 = arith.constant 0 : index
      %16 = vector.load %arg6[%c0_13, %c0_14] : memref<16x256xf32, #tpu.memory_space<vmem>>, vector<16x256xf32>
      %17 = arith.addf %15, %16 : vector<16x256xf32>
      %cst_15 = arith.constant 0.000000e+00 : f32
      %18 = vector.broadcast %cst_15 : f32 to vector<16x256xf32>
      %19 = arith.maximumf %17, %18 : vector<16x256xf32>
      %c0_16 = arith.constant 0 : index
      %c0_17 = arith.constant 0 : index
      %20 = vector.load %arg7[%c0_16, %c0_17] : memref<16x256xf32, #tpu.memory_space<vmem>>, vector<16x256xf32>
      tpu.vector_store %arg7[%c0_16, %c0_17], %19 {strides = array<i32>} : memref<16x256xf32, #tpu.memory_space<vmem>>, vector<16x256xf32>,
    } else {
    }
    return
  }
  func.func @transform_0(%arg0: i32, %arg1: i32, %arg2: i32) -> (i32, i32) {
    %c0_i32 = arith.constant 0 : i32
    return %arg0, %arg2 : i32, i32
  }
  func.func @transform_1(%arg0: i32, %arg1: i32, %arg2: i32) -> (i32, i32) {
    %c0_i32 = arith.constant 0 : i32
    return %arg2, %arg1 : i32, i32
  }
  func.func @transform_2(%arg0: i32, %arg1: i32, %arg2: i32) -> (i32, i32) {
    %c0_i32 = arith.constant 0 : i32
    %c0_i32_0 = arith.constant 0 : i32
    return %c0_i32, %arg1 : i32, i32
  }
  func.func @transform_3(%arg0: i32, %arg1: i32, %arg2: i32) -> (i32, i32) {
    %c0_i32 = arith.constant 0 : i32
    return %arg0, %arg1 : i32, i32
  }
  func.func @transform_4(%arg0: i32, %arg1: i32, %arg2: i32) -> (i32, i32) {
    %c0_i32 = arith.constant 0 : i32
    return %arg0, %arg1 : i32, i32
  }
}

module attributes {stable_mosaic.version = 11 : i64} {
  func.func @_mm_bias_kernel(%arg0: i32, %arg1: i32, %arg2: i32, %arg3: memref<16x512xbf16, #tpu.memory_space<vmem>>, %arg4: memref<512x256xbf16, #tpu.memory_space<vmem>>, %arg5: memref<1x256xf32, #tpu.memory_space<vmem>>, %arg6: memref<16x256xf32, #tpu.memory_space<vmem>>, %arg7: memref<16x256xf32, #tpu.memory_space<vmem>>) attributes {dimension_semantics = [#tpu.dimension_semantics<parallel>, #tpu.dimension_semantics<parallel>, #tpu.dimension_semantics<arbitrary>], iteration_bounds = array<i64: 1, 1, 5>, scalar_prefetch = 0 : i64, scratch_operands = 1 : i64, tpu.core_type = #tpu.core_type<tc>, window_params = [{transform_indices = @transform_0, window_bounds = array<i64: 16, 512>}, {transform_indices = @transform_1, window_bounds = array<i64: 512, 256>}, {transform_indices = @transform_2, window_bounds = array<i64: 1, 256>}, {transform_indices = @transform_3, window_bounds = array<i64: 16, 256>}]} {
    %c0_i32 = arith.constant 0 : i32
    %0 = arith.cmpi eq, %arg2, %c0_i32 : i32
    %1 = arith.extui %0 : i1 to i32
    %c0_i32_0 = arith.constant 0 : i32
    %2 = arith.cmpi ne, %1, %c0_i32_0 : i32
    scf.if %2 {
      %cst_9 = arith.constant 0.000000e+00 : f32
      %12 = vector.broadcast %cst_9 : f32 to vector<16x256xf32>
      %c0_10 = arith.constant 0 : index
      %c0_11 = arith.constant 0 : index
      %13 = vector.load %arg7[%c0_10, %c0_11] : memref<16x256xf32, #tpu.memory_space<vmem>>, vector<16x256xf32>
      tpu.vector_store %arg7[%c0_10, %c0_11], %12 {strides = array<i32>} : memref<16x256xf32, #tpu.memory_space<vmem>>, vector<16x256xf32>,
    } else {
    }
    %c0 = arith.constant 0 : index
    %c0_1 = arith.constant 0 : index
    %3 = vector.load %arg7[%c0, %c0_1] : memref<16x256xf32, #tpu.memory_space<vmem>>, vector<16x256xf32>
    %c0_2 = arith.constant 0 : index
    %c0_3 = arith.constant 0 : index
    %4 = vector.load %arg3[%c0_2, %c0_3] : memref<16x512xbf16, #tpu.memory_space<vmem>>, vector<16x512xbf16>
    %c0_4 = arith.constant 0 : index
    %c0_5 = arith.constant 0 : index
    %5 = vector.load %arg4[%c0_4, %c0_5] : memref<512x256xbf16, #tpu.memory_space<vmem>>, vector<512x256xbf16>
    %cst = arith.constant dense<0.000000e+00> : vector<16x256xf32>
    %6 = tpu.matmul %4, %5, %cst {dimension_numbers = #tpu.dot_dimension_numbers<[1], [0], [0], [1], [0, 0, 1, 1], [], []>} : vector<16x512xbf16>, vector<512x256xbf16>, vector<16x256xf32> -> vector<16x256xf32>
    %7 = arith.addf %3, %6 : vector<16x256xf32>
    %c0_6 = arith.constant 0 : index
    %c0_7 = arith.constant 0 : index
    %8 = vector.load %arg7[%c0_6, %c0_7] : memref<16x256xf32, #tpu.memory_space<vmem>>, vector<16x256xf32>
    tpu.vector_store %arg7[%c0_6, %c0_7], %7 {strides = array<i32>} : memref<16x256xf32, #tpu.memory_space<vmem>>, vector<16x256xf32>,
    %c4_i32 = arith.constant 4 : i32
    %9 = arith.cmpi eq, %arg2, %c4_i32 : i32
    %10 = arith.extui %9 : i1 to i32
    %c0_i32_8 = arith.constant 0 : i32
    %11 = arith.cmpi ne, %10, %c0_i32_8 : i32
    scf.if %11 {
      %c0_9 = arith.constant 0 : index
      %c0_10 = arith.constant 0 : index
      %12 = vector.load %arg7[%c0_9, %c0_10] : memref<16x256xf32, #tpu.memory_space<vmem>>, vector<16x256xf32>
      %c0_11 = arith.constant 0 : index
      %c0_12 = arith.constant 0 : index
      %13 = vector.load %arg5[%c0_11, %c0_12] : memref<1x256xf32, #tpu.memory_space<vmem>>, vector<1x256xf32>
      %14 = vector.broadcast %13 : vector<1x256xf32> to vector<16x256xf32>
      %15 = arith.addf %12, %14 : vector<16x256xf32>
      %cst_13 = arith.constant 0.000000e+00 : f32
      %16 = vector.broadcast %cst_13 : f32 to vector<16x256xf32>
      %17 = arith.maximumf %15, %16 : vector<16x256xf32>
      %c0_14 = arith.constant 0 : index
      %c0_15 = arith.constant 0 : index
      %18 = vector.load %arg6[%c0_14, %c0_15] : memref<16x256xf32, #tpu.memory_space<vmem>>, vector<16x256xf32>
      tpu.vector_store %arg6[%c0_14, %c0_15], %17 {strides = array<i32>} : memref<16x256xf32, #tpu.memory_space<vmem>>, vector<16x256xf32>,
    } else {
    }
    return
  }
  func.func @transform_0(%arg0: i32, %arg1: i32, %arg2: i32) -> (i32, i32) {
    %c0_i32 = arith.constant 0 : i32
    return %arg0, %arg2 : i32, i32
  }
  func.func @transform_1(%arg0: i32, %arg1: i32, %arg2: i32) -> (i32, i32) {
    %c0_i32 = arith.constant 0 : i32
    return %arg2, %arg1 : i32, i32
  }
  func.func @transform_2(%arg0: i32, %arg1: i32, %arg2: i32) -> (i32, i32) {
    %c0_i32 = arith.constant 0 : i32
    %c0_i32_0 = arith.constant 0 : i32
    return %c0_i32, %arg1 : i32, i32
  }
  func.func @transform_3(%arg0: i32, %arg1: i32, %arg2: i32) -> (i32, i32) {
    %c0_i32 = arith.constant 0 : i32
    return %arg0, %arg1 : i32, i32
  }
}

module attributes {stable_mosaic.version = 11 : i64} {
  func.func @_mm_bias_kernel(%arg0: i32, %arg1: i32, %arg2: i32, %arg3: memref<16x512xbf16, #tpu.memory_space<vmem>>, %arg4: memref<512x256xbf16, #tpu.memory_space<vmem>>, %arg5: memref<1x256xf32, #tpu.memory_space<vmem>>, %arg6: memref<16x256xf32, #tpu.memory_space<vmem>>, %arg7: memref<16x256xf32, #tpu.memory_space<vmem>>) attributes {dimension_semantics = [#tpu.dimension_semantics<parallel>, #tpu.dimension_semantics<parallel>, #tpu.dimension_semantics<arbitrary>], iteration_bounds = array<i64: 1, 2, 5>, scalar_prefetch = 0 : i64, scratch_operands = 1 : i64, tpu.core_type = #tpu.core_type<tc>, window_params = [{transform_indices = @transform_0, window_bounds = array<i64: 16, 512>}, {transform_indices = @transform_1, window_bounds = array<i64: 512, 256>}, {transform_indices = @transform_2, window_bounds = array<i64: 1, 256>}, {transform_indices = @transform_3, window_bounds = array<i64: 16, 256>}]} {
    %c0_i32 = arith.constant 0 : i32
    %0 = arith.cmpi eq, %arg2, %c0_i32 : i32
    %1 = arith.extui %0 : i1 to i32
    %c0_i32_0 = arith.constant 0 : i32
    %2 = arith.cmpi ne, %1, %c0_i32_0 : i32
    scf.if %2 {
      %cst_9 = arith.constant 0.000000e+00 : f32
      %12 = vector.broadcast %cst_9 : f32 to vector<16x256xf32>
      %c0_10 = arith.constant 0 : index
      %c0_11 = arith.constant 0 : index
      %13 = vector.load %arg7[%c0_10, %c0_11] : memref<16x256xf32, #tpu.memory_space<vmem>>, vector<16x256xf32>
      tpu.vector_store %arg7[%c0_10, %c0_11], %12 {strides = array<i32>} : memref<16x256xf32, #tpu.memory_space<vmem>>, vector<16x256xf32>,
    } else {
    }
    %c0 = arith.constant 0 : index
    %c0_1 = arith.constant 0 : index
    %3 = vector.load %arg7[%c0, %c0_1] : memref<16x256xf32, #tpu.memory_space<vmem>>, vector<16x256xf32>
    %c0_2 = arith.constant 0 : index
    %c0_3 = arith.constant 0 : index
    %4 = vector.load %arg3[%c0_2, %c0_3] : memref<16x512xbf16, #tpu.memory_space<vmem>>, vector<16x512xbf16>
    %c0_4 = arith.constant 0 : index
    %c0_5 = arith.constant 0 : index
    %5 = vector.load %arg4[%c0_4, %c0_5] : memref<512x256xbf16, #tpu.memory_space<vmem>>, vector<512x256xbf16>
    %cst = arith.constant dense<0.000000e+00> : vector<16x256xf32>
    %6 = tpu.matmul %4, %5, %cst {dimension_numbers = #tpu.dot_dimension_numbers<[1], [0], [0], [1], [0, 0, 1, 1], [], []>} : vector<16x512xbf16>, vector<512x256xbf16>, vector<16x256xf32> -> vector<16x256xf32>
    %7 = arith.addf %3, %6 : vector<16x256xf32>
    %c0_6 = arith.constant 0 : index
    %c0_7 = arith.constant 0 : index
    %8 = vector.load %arg7[%c0_6, %c0_7] : memref<16x256xf32, #tpu.memory_space<vmem>>, vector<16x256xf32>
    tpu.vector_store %arg7[%c0_6, %c0_7], %7 {strides = array<i32>} : memref<16x256xf32, #tpu.memory_space<vmem>>, vector<16x256xf32>,
    %c4_i32 = arith.constant 4 : i32
    %9 = arith.cmpi eq, %arg2, %c4_i32 : i32
    %10 = arith.extui %9 : i1 to i32
    %c0_i32_8 = arith.constant 0 : i32
    %11 = arith.cmpi ne, %10, %c0_i32_8 : i32
    scf.if %11 {
      %c0_9 = arith.constant 0 : index
      %c0_10 = arith.constant 0 : index
      %12 = vector.load %arg7[%c0_9, %c0_10] : memref<16x256xf32, #tpu.memory_space<vmem>>, vector<16x256xf32>
      %c0_11 = arith.constant 0 : index
      %c0_12 = arith.constant 0 : index
      %13 = vector.load %arg5[%c0_11, %c0_12] : memref<1x256xf32, #tpu.memory_space<vmem>>, vector<1x256xf32>
      %14 = vector.broadcast %13 : vector<1x256xf32> to vector<16x256xf32>
      %15 = arith.addf %12, %14 : vector<16x256xf32>
      %cst_13 = arith.constant 0.000000e+00 : f32
      %16 = vector.broadcast %cst_13 : f32 to vector<16x256xf32>
      %17 = arith.maximumf %15, %16 : vector<16x256xf32>
      %c0_14 = arith.constant 0 : index
      %c0_15 = arith.constant 0 : index
      %18 = vector.load %arg6[%c0_14, %c0_15] : memref<16x256xf32, #tpu.memory_space<vmem>>, vector<16x256xf32>
      tpu.vector_store %arg6[%c0_14, %c0_15], %17 {strides = array<i32>} : memref<16x256xf32, #tpu.memory_space<vmem>>, vector<16x256xf32>,
    } else {
    }
    return
  }
  func.func @transform_0(%arg0: i32, %arg1: i32, %arg2: i32) -> (i32, i32) {
    %c0_i32 = arith.constant 0 : i32
    return %arg0, %arg2 : i32, i32
  }
  func.func @transform_1(%arg0: i32, %arg1: i32, %arg2: i32) -> (i32, i32) {
    %c0_i32 = arith.constant 0 : i32
    return %arg2, %arg1 : i32, i32
  }
  func.func @transform_2(%arg0: i32, %arg1: i32, %arg2: i32) -> (i32, i32) {
    %c0_i32 = arith.constant 0 : i32
    %c0_i32_0 = arith.constant 0 : i32
    return %c0_i32, %arg1 : i32, i32
  }
  func.func @transform_3(%arg0: i32, %arg1: i32, %arg2: i32) -> (i32, i32) {
    %c0_i32 = arith.constant 0 : i32
    return %arg0, %arg1 : i32, i32
  }
}

module attributes {stable_mosaic.version = 11 : i64} {
  func.func @_mm_bias_kernel(%arg0: i32, %arg1: i32, %arg2: i32, %arg3: memref<16x256xbf16, #tpu.memory_space<vmem>>, %arg4: memref<256x256xbf16, #tpu.memory_space<vmem>>, %arg5: memref<1x256xf32, #tpu.memory_space<vmem>>, %arg6: memref<16x256xf32, #tpu.memory_space<vmem>>, %arg7: memref<16x256xf32, #tpu.memory_space<vmem>>) attributes {dimension_semantics = [#tpu.dimension_semantics<parallel>, #tpu.dimension_semantics<parallel>, #tpu.dimension_semantics<arbitrary>], iteration_bounds = array<i64: 1, 2, 1>, scalar_prefetch = 0 : i64, scratch_operands = 1 : i64, tpu.core_type = #tpu.core_type<tc>, window_params = [{transform_indices = @transform_0, window_bounds = array<i64: 16, 256>}, {transform_indices = @transform_1, window_bounds = array<i64: 256, 256>}, {transform_indices = @transform_2, window_bounds = array<i64: 1, 256>}, {transform_indices = @transform_3, window_bounds = array<i64: 16, 256>}]} {
    %c0_i32 = arith.constant 0 : i32
    %0 = arith.cmpi eq, %arg2, %c0_i32 : i32
    %1 = arith.extui %0 : i1 to i32
    %c0_i32_0 = arith.constant 0 : i32
    %2 = arith.cmpi ne, %1, %c0_i32_0 : i32
    scf.if %2 {
      %cst_10 = arith.constant 0.000000e+00 : f32
      %12 = vector.broadcast %cst_10 : f32 to vector<16x256xf32>
      %c0_11 = arith.constant 0 : index
      %c0_12 = arith.constant 0 : index
      %13 = vector.load %arg7[%c0_11, %c0_12] : memref<16x256xf32, #tpu.memory_space<vmem>>, vector<16x256xf32>
      tpu.vector_store %arg7[%c0_11, %c0_12], %12 {strides = array<i32>} : memref<16x256xf32, #tpu.memory_space<vmem>>, vector<16x256xf32>,
    } else {
    }
    %c0 = arith.constant 0 : index
    %c0_1 = arith.constant 0 : index
    %3 = vector.load %arg7[%c0, %c0_1] : memref<16x256xf32, #tpu.memory_space<vmem>>, vector<16x256xf32>
    %c0_2 = arith.constant 0 : index
    %c0_3 = arith.constant 0 : index
    %4 = vector.load %arg3[%c0_2, %c0_3] : memref<16x256xbf16, #tpu.memory_space<vmem>>, vector<16x256xbf16>
    %c0_4 = arith.constant 0 : index
    %c0_5 = arith.constant 0 : index
    %5 = vector.load %arg4[%c0_4, %c0_5] : memref<256x256xbf16, #tpu.memory_space<vmem>>, vector<256x256xbf16>
    %cst = arith.constant dense<0.000000e+00> : vector<16x256xf32>
    %6 = tpu.matmul %4, %5, %cst {dimension_numbers = #tpu.dot_dimension_numbers<[1], [0], [0], [1], [0, 0, 1, 1], [], []>} : vector<16x256xbf16>, vector<256x256xbf16>, vector<16x256xf32> -> vector<16x256xf32>
    %7 = arith.addf %3, %6 : vector<16x256xf32>
    %c0_6 = arith.constant 0 : index
    %c0_7 = arith.constant 0 : index
    %8 = vector.load %arg7[%c0_6, %c0_7] : memref<16x256xf32, #tpu.memory_space<vmem>>, vector<16x256xf32>
    tpu.vector_store %arg7[%c0_6, %c0_7], %7 {strides = array<i32>} : memref<16x256xf32, #tpu.memory_space<vmem>>, vector<16x256xf32>,
    %c0_i32_8 = arith.constant 0 : i32
    %9 = arith.cmpi eq, %arg2, %c0_i32_8 : i32
    %10 = arith.extui %9 : i1 to i32
    %c0_i32_9 = arith.constant 0 : i32
    %11 = arith.cmpi ne, %10, %c0_i32_9 : i32
    scf.if %11 {
      %c0_10 = arith.constant 0 : index
      %c0_11 = arith.constant 0 : index
      %12 = vector.load %arg7[%c0_10, %c0_11] : memref<16x256xf32, #tpu.memory_space<vmem>>, vector<16x256xf32>
      %c0_12 = arith.constant 0 : index
      %c0_13 = arith.constant 0 : index
      %13 = vector.load %arg5[%c0_12, %c0_13] : memref<1x256xf32, #tpu.memory_space<vmem>>, vector<1x256xf32>
      %14 = vector.broadcast %13 : vector<1x256xf32> to vector<16x256xf32>
      %15 = arith.addf %12, %14 : vector<16x256xf32>
      %c0_14 = arith.constant 0 : index
      %c0_15 = arith.constant 0 : index
      %16 = vector.load %arg6[%c0_14, %c0_15] : memref<16x256xf32, #tpu.memory_space<vmem>>, vector<16x256xf32>
      tpu.vector_store %arg6[%c0_14, %c0_15], %15 {strides = array<i32>} : memref<16x256xf32, #tpu.memory_space<vmem>>, vector<16x256xf32>,
    } else {
    }
    return
  }
  func.func @transform_0(%arg0: i32, %arg1: i32, %arg2: i32) -> (i32, i32) {
    %c0_i32 = arith.constant 0 : i32
    return %arg0, %arg2 : i32, i32
  }
  func.func @transform_1(%arg0: i32, %arg1: i32, %arg2: i32) -> (i32, i32) {
    %c0_i32 = arith.constant 0 : i32
    return %arg2, %arg1 : i32, i32
  }
  func.func @transform_2(%arg0: i32, %arg1: i32, %arg2: i32) -> (i32, i32) {
    %c0_i32 = arith.constant 0 : i32
    %c0_i32_0 = arith.constant 0 : i32
    return %c0_i32, %arg1 : i32, i32
  }
  func.func @transform_3(%arg0: i32, %arg1: i32, %arg2: i32) -> (i32, i32) {
    %c0_i32 = arith.constant 0 : i32
    return %arg0, %arg1 : i32, i32
  }
}

module attributes {stable_mosaic.version = 11 : i64} {
  func.func @_mm_bias_res_kernel(%arg0: i32, %arg1: i32, %arg2: i32, %arg3: memref<16x512xbf16, #tpu.memory_space<vmem>>, %arg4: memref<512x256xbf16, #tpu.memory_space<vmem>>, %arg5: memref<1x256xf32, #tpu.memory_space<vmem>>, %arg6: memref<16x256xf32, #tpu.memory_space<vmem>>, %arg7: memref<16x256xf32, #tpu.memory_space<vmem>>, %arg8: memref<16x256xf32, #tpu.memory_space<vmem>>) attributes {dimension_semantics = [#tpu.dimension_semantics<parallel>, #tpu.dimension_semantics<parallel>, #tpu.dimension_semantics<arbitrary>], iteration_bounds = array<i64: 1, 2, 9>, scalar_prefetch = 0 : i64, scratch_operands = 1 : i64, tpu.core_type = #tpu.core_type<tc>, window_params = [{transform_indices = @transform_0, window_bounds = array<i64: 16, 512>}, {transform_indices = @transform_1, window_bounds = array<i64: 512, 256>}, {transform_indices = @transform_2, window_bounds = array<i64: 1, 256>}, {transform_indices = @transform_3, window_bounds = array<i64: 16, 256>}, {transform_indices = @transform_4, window_bounds = array<i64: 16, 256>}]} {
    %c0_i32 = arith.constant 0 : i32
    %0 = arith.cmpi eq, %arg2, %c0_i32 : i32
    %1 = arith.extui %0 : i1 to i32
    %c0_i32_0 = arith.constant 0 : i32
    %2 = arith.cmpi ne, %1, %c0_i32_0 : i32
    scf.if %2 {
      %cst_9 = arith.constant 0.000000e+00 : f32
      %12 = vector.broadcast %cst_9 : f32 to vector<16x256xf32>
      %c0_10 = arith.constant 0 : index
      %c0_11 = arith.constant 0 : index
      %13 = vector.load %arg8[%c0_10, %c0_11] : memref<16x256xf32, #tpu.memory_space<vmem>>, vector<16x256xf32>
      tpu.vector_store %arg8[%c0_10, %c0_11], %12 {strides = array<i32>} : memref<16x256xf32, #tpu.memory_space<vmem>>, vector<16x256xf32>,
    } else {
    }
    %c0 = arith.constant 0 : index
    %c0_1 = arith.constant 0 : index
    %3 = vector.load %arg8[%c0, %c0_1] : memref<16x256xf32, #tpu.memory_space<vmem>>, vector<16x256xf32>
    %c0_2 = arith.constant 0 : index
    %c0_3 = arith.constant 0 : index
    %4 = vector.load %arg3[%c0_2, %c0_3] : memref<16x512xbf16, #tpu.memory_space<vmem>>, vector<16x512xbf16>
    %c0_4 = arith.constant 0 : index
    %c0_5 = arith.constant 0 : index
    %5 = vector.load %arg4[%c0_4, %c0_5] : memref<512x256xbf16, #tpu.memory_space<vmem>>, vector<512x256xbf16>
    %cst = arith.constant dense<0.000000e+00> : vector<16x256xf32>
    %6 = tpu.matmul %4, %5, %cst {dimension_numbers = #tpu.dot_dimension_numbers<[1], [0], [0], [1], [0, 0, 1, 1], [], []>} : vector<16x512xbf16>, vector<512x256xbf16>, vector<16x256xf32> -> vector<16x256xf32>
    %7 = arith.addf %3, %6 : vector<16x256xf32>
    %c0_6 = arith.constant 0 : index
    %c0_7 = arith.constant 0 : index
    %8 = vector.load %arg8[%c0_6, %c0_7] : memref<16x256xf32, #tpu.memory_space<vmem>>, vector<16x256xf32>
    tpu.vector_store %arg8[%c0_6, %c0_7], %7 {strides = array<i32>} : memref<16x256xf32, #tpu.memory_space<vmem>>, vector<16x256xf32>,
    %c8_i32 = arith.constant 8 : i32
    %9 = arith.cmpi eq, %arg2, %c8_i32 : i32
    %10 = arith.extui %9 : i1 to i32
    %c0_i32_8 = arith.constant 0 : i32
    %11 = arith.cmpi ne, %10, %c0_i32_8 : i32
    scf.if %11 {
      %c0_9 = arith.constant 0 : index
      %c0_10 = arith.constant 0 : index
      %12 = vector.load %arg8[%c0_9, %c0_10] : memref<16x256xf32, #tpu.memory_space<vmem>>, vector<16x256xf32>
      %c0_11 = arith.constant 0 : index
      %c0_12 = arith.constant 0 : index
      %13 = vector.load %arg5[%c0_11, %c0_12] : memref<1x256xf32, #tpu.memory_space<vmem>>, vector<1x256xf32>
      %14 = vector.broadcast %13 : vector<1x256xf32> to vector<16x256xf32>
      %15 = arith.addf %12, %14 : vector<16x256xf32>
      %c0_13 = arith.constant 0 : index
      %c0_14 = arith.constant 0 : index
      %16 = vector.load %arg6[%c0_13, %c0_14] : memref<16x256xf32, #tpu.memory_space<vmem>>, vector<16x256xf32>
      %17 = arith.addf %15, %16 : vector<16x256xf32>
      %cst_15 = arith.constant 0.000000e+00 : f32
      %18 = vector.broadcast %cst_15 : f32 to vector<16x256xf32>
      %19 = arith.maximumf %17, %18 : vector<16x256xf32>
      %c0_16 = arith.constant 0 : index
      %c0_17 = arith.constant 0 : index
      %20 = vector.load %arg7[%c0_16, %c0_17] : memref<16x256xf32, #tpu.memory_space<vmem>>, vector<16x256xf32>
      tpu.vector_store %arg7[%c0_16, %c0_17], %19 {strides = array<i32>} : memref<16x256xf32, #tpu.memory_space<vmem>>, vector<16x256xf32>,
    } else {
    }
    return
  }
  func.func @transform_0(%arg0: i32, %arg1: i32, %arg2: i32) -> (i32, i32) {
    %c0_i32 = arith.constant 0 : i32
    return %arg0, %arg2 : i32, i32
  }
  func.func @transform_1(%arg0: i32, %arg1: i32, %arg2: i32) -> (i32, i32) {
    %c0_i32 = arith.constant 0 : i32
    return %arg2, %arg1 : i32, i32
  }
  func.func @transform_2(%arg0: i32, %arg1: i32, %arg2: i32) -> (i32, i32) {
    %c0_i32 = arith.constant 0 : i32
    %c0_i32_0 = arith.constant 0 : i32
    return %c0_i32, %arg1 : i32, i32
  }
  func.func @transform_3(%arg0: i32, %arg1: i32, %arg2: i32) -> (i32, i32) {
    %c0_i32 = arith.constant 0 : i32
    return %arg0, %arg1 : i32, i32
  }
  func.func @transform_4(%arg0: i32, %arg1: i32, %arg2: i32) -> (i32, i32) {
    %c0_i32 = arith.constant 0 : i32
    return %arg0, %arg1 : i32, i32
  }
}

module attributes {stable_mosaic.version = 11 : i64} {
  func.func @_mm_bias_kernel(%arg0: i32, %arg1: i32, %arg2: i32, %arg3: memref<16x512xbf16, #tpu.memory_space<vmem>>, %arg4: memref<512x256xbf16, #tpu.memory_space<vmem>>, %arg5: memref<1x256xf32, #tpu.memory_space<vmem>>, %arg6: memref<16x256xf32, #tpu.memory_space<vmem>>, %arg7: memref<16x256xf32, #tpu.memory_space<vmem>>) attributes {dimension_semantics = [#tpu.dimension_semantics<parallel>, #tpu.dimension_semantics<parallel>, #tpu.dimension_semantics<arbitrary>], iteration_bounds = array<i64: 1, 2, 9>, scalar_prefetch = 0 : i64, scratch_operands = 1 : i64, tpu.core_type = #tpu.core_type<tc>, window_params = [{transform_indices = @transform_0, window_bounds = array<i64: 16, 512>}, {transform_indices = @transform_1, window_bounds = array<i64: 512, 256>}, {transform_indices = @transform_2, window_bounds = array<i64: 1, 256>}, {transform_indices = @transform_3, window_bounds = array<i64: 16, 256>}]} {
    %c0_i32 = arith.constant 0 : i32
    %0 = arith.cmpi eq, %arg2, %c0_i32 : i32
    %1 = arith.extui %0 : i1 to i32
    %c0_i32_0 = arith.constant 0 : i32
    %2 = arith.cmpi ne, %1, %c0_i32_0 : i32
    scf.if %2 {
      %cst_9 = arith.constant 0.000000e+00 : f32
      %12 = vector.broadcast %cst_9 : f32 to vector<16x256xf32>
      %c0_10 = arith.constant 0 : index
      %c0_11 = arith.constant 0 : index
      %13 = vector.load %arg7[%c0_10, %c0_11] : memref<16x256xf32, #tpu.memory_space<vmem>>, vector<16x256xf32>
      tpu.vector_store %arg7[%c0_10, %c0_11], %12 {strides = array<i32>} : memref<16x256xf32, #tpu.memory_space<vmem>>, vector<16x256xf32>,
    } else {
    }
    %c0 = arith.constant 0 : index
    %c0_1 = arith.constant 0 : index
    %3 = vector.load %arg7[%c0, %c0_1] : memref<16x256xf32, #tpu.memory_space<vmem>>, vector<16x256xf32>
    %c0_2 = arith.constant 0 : index
    %c0_3 = arith.constant 0 : index
    %4 = vector.load %arg3[%c0_2, %c0_3] : memref<16x512xbf16, #tpu.memory_space<vmem>>, vector<16x512xbf16>
    %c0_4 = arith.constant 0 : index
    %c0_5 = arith.constant 0 : index
    %5 = vector.load %arg4[%c0_4, %c0_5] : memref<512x256xbf16, #tpu.memory_space<vmem>>, vector<512x256xbf16>
    %cst = arith.constant dense<0.000000e+00> : vector<16x256xf32>
    %6 = tpu.matmul %4, %5, %cst {dimension_numbers = #tpu.dot_dimension_numbers<[1], [0], [0], [1], [0, 0, 1, 1], [], []>} : vector<16x512xbf16>, vector<512x256xbf16>, vector<16x256xf32> -> vector<16x256xf32>
    %7 = arith.addf %3, %6 : vector<16x256xf32>
    %c0_6 = arith.constant 0 : index
    %c0_7 = arith.constant 0 : index
    %8 = vector.load %arg7[%c0_6, %c0_7] : memref<16x256xf32, #tpu.memory_space<vmem>>, vector<16x256xf32>
    tpu.vector_store %arg7[%c0_6, %c0_7], %7 {strides = array<i32>} : memref<16x256xf32, #tpu.memory_space<vmem>>, vector<16x256xf32>,
    %c8_i32 = arith.constant 8 : i32
    %9 = arith.cmpi eq, %arg2, %c8_i32 : i32
    %10 = arith.extui %9 : i1 to i32
    %c0_i32_8 = arith.constant 0 : i32
    %11 = arith.cmpi ne, %10, %c0_i32_8 : i32
    scf.if %11 {
      %c0_9 = arith.constant 0 : index
      %c0_10 = arith.constant 0 : index
      %12 = vector.load %arg7[%c0_9, %c0_10] : memref<16x256xf32, #tpu.memory_space<vmem>>, vector<16x256xf32>
      %c0_11 = arith.constant 0 : index
      %c0_12 = arith.constant 0 : index
      %13 = vector.load %arg5[%c0_11, %c0_12] : memref<1x256xf32, #tpu.memory_space<vmem>>, vector<1x256xf32>
      %14 = vector.broadcast %13 : vector<1x256xf32> to vector<16x256xf32>
      %15 = arith.addf %12, %14 : vector<16x256xf32>
      %cst_13 = arith.constant 0.000000e+00 : f32
      %16 = vector.broadcast %cst_13 : f32 to vector<16x256xf32>
      %17 = arith.maximumf %15, %16 : vector<16x256xf32>
      %c0_14 = arith.constant 0 : index
      %c0_15 = arith.constant 0 : index
      %18 = vector.load %arg6[%c0_14, %c0_15] : memref<16x256xf32, #tpu.memory_space<vmem>>, vector<16x256xf32>
      tpu.vector_store %arg6[%c0_14, %c0_15], %17 {strides = array<i32>} : memref<16x256xf32, #tpu.memory_space<vmem>>, vector<16x256xf32>,
    } else {
    }
    return
  }
  func.func @transform_0(%arg0: i32, %arg1: i32, %arg2: i32) -> (i32, i32) {
    %c0_i32 = arith.constant 0 : i32
    return %arg0, %arg2 : i32, i32
  }
  func.func @transform_1(%arg0: i32, %arg1: i32, %arg2: i32) -> (i32, i32) {
    %c0_i32 = arith.constant 0 : i32
    return %arg2, %arg1 : i32, i32
  }
  func.func @transform_2(%arg0: i32, %arg1: i32, %arg2: i32) -> (i32, i32) {
    %c0_i32 = arith.constant 0 : i32
    %c0_i32_0 = arith.constant 0 : i32
    return %c0_i32, %arg1 : i32, i32
  }
  func.func @transform_3(%arg0: i32, %arg1: i32, %arg2: i32) -> (i32, i32) {
    %c0_i32 = arith.constant 0 : i32
    return %arg0, %arg1 : i32, i32
  }
}

module attributes {stable_mosaic.version = 11 : i64} {
  func.func @_mm_bias_kernel(%arg0: i32, %arg1: i32, %arg2: i32, %arg3: memref<16x512xbf16, #tpu.memory_space<vmem>>, %arg4: memref<512x256xbf16, #tpu.memory_space<vmem>>, %arg5: memref<1x256xf32, #tpu.memory_space<vmem>>, %arg6: memref<16x256xf32, #tpu.memory_space<vmem>>, %arg7: memref<16x256xf32, #tpu.memory_space<vmem>>) attributes {dimension_semantics = [#tpu.dimension_semantics<parallel>, #tpu.dimension_semantics<parallel>, #tpu.dimension_semantics<arbitrary>], iteration_bounds = array<i64: 1, 4, 1>, scalar_prefetch = 0 : i64, scratch_operands = 1 : i64, tpu.core_type = #tpu.core_type<tc>, window_params = [{transform_indices = @transform_0, window_bounds = array<i64: 16, 512>}, {transform_indices = @transform_1, window_bounds = array<i64: 512, 256>}, {transform_indices = @transform_2, window_bounds = array<i64: 1, 256>}, {transform_indices = @transform_3, window_bounds = array<i64: 16, 256>}]} {
    %c0_i32 = arith.constant 0 : i32
    %0 = arith.cmpi eq, %arg2, %c0_i32 : i32
    %1 = arith.extui %0 : i1 to i32
    %c0_i32_0 = arith.constant 0 : i32
    %2 = arith.cmpi ne, %1, %c0_i32_0 : i32
    scf.if %2 {
      %cst_10 = arith.constant 0.000000e+00 : f32
      %12 = vector.broadcast %cst_10 : f32 to vector<16x256xf32>
      %c0_11 = arith.constant 0 : index
      %c0_12 = arith.constant 0 : index
      %13 = vector.load %arg7[%c0_11, %c0_12] : memref<16x256xf32, #tpu.memory_space<vmem>>, vector<16x256xf32>
      tpu.vector_store %arg7[%c0_11, %c0_12], %12 {strides = array<i32>} : memref<16x256xf32, #tpu.memory_space<vmem>>, vector<16x256xf32>,
    } else {
    }
    %c0 = arith.constant 0 : index
    %c0_1 = arith.constant 0 : index
    %3 = vector.load %arg7[%c0, %c0_1] : memref<16x256xf32, #tpu.memory_space<vmem>>, vector<16x256xf32>
    %c0_2 = arith.constant 0 : index
    %c0_3 = arith.constant 0 : index
    %4 = vector.load %arg3[%c0_2, %c0_3] : memref<16x512xbf16, #tpu.memory_space<vmem>>, vector<16x512xbf16>
    %c0_4 = arith.constant 0 : index
    %c0_5 = arith.constant 0 : index
    %5 = vector.load %arg4[%c0_4, %c0_5] : memref<512x256xbf16, #tpu.memory_space<vmem>>, vector<512x256xbf16>
    %cst = arith.constant dense<0.000000e+00> : vector<16x256xf32>
    %6 = tpu.matmul %4, %5, %cst {dimension_numbers = #tpu.dot_dimension_numbers<[1], [0], [0], [1], [0, 0, 1, 1], [], []>} : vector<16x512xbf16>, vector<512x256xbf16>, vector<16x256xf32> -> vector<16x256xf32>
    %7 = arith.addf %3, %6 : vector<16x256xf32>
    %c0_6 = arith.constant 0 : index
    %c0_7 = arith.constant 0 : index
    %8 = vector.load %arg7[%c0_6, %c0_7] : memref<16x256xf32, #tpu.memory_space<vmem>>, vector<16x256xf32>
    tpu.vector_store %arg7[%c0_6, %c0_7], %7 {strides = array<i32>} : memref<16x256xf32, #tpu.memory_space<vmem>>, vector<16x256xf32>,
    %c0_i32_8 = arith.constant 0 : i32
    %9 = arith.cmpi eq, %arg2, %c0_i32_8 : i32
    %10 = arith.extui %9 : i1 to i32
    %c0_i32_9 = arith.constant 0 : i32
    %11 = arith.cmpi ne, %10, %c0_i32_9 : i32
    scf.if %11 {
      %c0_10 = arith.constant 0 : index
      %c0_11 = arith.constant 0 : index
      %12 = vector.load %arg7[%c0_10, %c0_11] : memref<16x256xf32, #tpu.memory_space<vmem>>, vector<16x256xf32>
      %c0_12 = arith.constant 0 : index
      %c0_13 = arith.constant 0 : index
      %13 = vector.load %arg5[%c0_12, %c0_13] : memref<1x256xf32, #tpu.memory_space<vmem>>, vector<1x256xf32>
      %14 = vector.broadcast %13 : vector<1x256xf32> to vector<16x256xf32>
      %15 = arith.addf %12, %14 : vector<16x256xf32>
      %c0_14 = arith.constant 0 : index
      %c0_15 = arith.constant 0 : index
      %16 = vector.load %arg6[%c0_14, %c0_15] : memref<16x256xf32, #tpu.memory_space<vmem>>, vector<16x256xf32>
      tpu.vector_store %arg6[%c0_14, %c0_15], %15 {strides = array<i32>} : memref<16x256xf32, #tpu.memory_space<vmem>>, vector<16x256xf32>,
    } else {
    }
    return
  }
  func.func @transform_0(%arg0: i32, %arg1: i32, %arg2: i32) -> (i32, i32) {
    %c0_i32 = arith.constant 0 : i32
    return %arg0, %arg2 : i32, i32
  }
  func.func @transform_1(%arg0: i32, %arg1: i32, %arg2: i32) -> (i32, i32) {
    %c0_i32 = arith.constant 0 : i32
    return %arg2, %arg1 : i32, i32
  }
  func.func @transform_2(%arg0: i32, %arg1: i32, %arg2: i32) -> (i32, i32) {
    %c0_i32 = arith.constant 0 : i32
    %c0_i32_0 = arith.constant 0 : i32
    return %c0_i32, %arg1 : i32, i32
  }
  func.func @transform_3(%arg0: i32, %arg1: i32, %arg2: i32) -> (i32, i32) {
    %c0_i32 = arith.constant 0 : i32
    return %arg0, %arg1 : i32, i32
  }
}

</mosaic_0001>

<bundles_post_ra>
// kernel: resnet18_forward.22
= control target key start
LH: loop header
LB: loop body
LE: loop exit
PB: predicated region body
PF: predicated region fallthrough
CT: control target
= control target key end

     0   :  { %s1081_s12 = smov 0   ;;  %s1083_s13 = smov 0   ;;  %s1226_s0 = inlined_call_operand.vmem [shape: bf16[512,256], index: 0, kind: input, shape index: {}]   ;;  %s1227_s1 = inlined_call_operand.vmem [shape: bf16[256,128], index: 1, kind: input, shape index: {}]   ;;  %s1228_s2 = inlined_call_operand.vmem [shape: f32[1,128], index: 2, kind: input, shape index: {}]   ;;  %s1229_s3 = inlined_call_operand.vmem [shape: f32[512,128], index: 3, kind: output, shape index: {}]  }
   0x1   :  { %s1085_s14 = smov 0  }
   0x2 LB: > { %s32_s15 = sadd.s32 1, %s1055_s13  ;;  %p851_p0 = scmp.ge.s32.totalorder %s1059_s14, 1  ;;  %s1059_s14 = sphi %s1085_s14, %s13_s14   ;;  %s1055_s13 = sphi %s1083_s13, %s1231_s13   ;;  %s1051_s12 = sphi %s1081_s12, %s1230_s12  }
   0x3   : > { %p34_p1 = scmp.ge.s32.totalorder %s32_s15, 4  ;;  %p191_p2 = scmp.lt.s32.totalorder %s1059_s14, 5 }
   0x5   : > { %s1233_s15 = smov (%p34_p1, %s32_s15), 0  ;;  %p192_p3 = pnand %p851_p0, %p191_p2 }
   0x6   : > { %v997_v0 = vld [vmem:[%s1227_s1 + $0x40] sm:$0xff] (!%p192_p3)   ;;  %s852_s18 = sshll.u32 (!%p192_p3), %s1051_s12, 4  ;;  %v999_v2 = vld [vmem:[%s1227_s1 + $0x48] sm:$0xff] (!%p192_p3)   ;;  %v1001_v4 = vld [vmem:[%s1227_s1 + $0x50] sm:$0xff] (!%p192_p3)  }
   0x7   : > { %195 = sbr.rel (%p192_p3) target bundleno = 285 (0x11d), region = 32  ;;  %v998_v1 = vld [vmem:[%s1227_s1] sm:$0xff] (!%p192_p3)   ;;  %893 = vmatprep.subr.bf16.mxu0 (!%p192_p3), %v997_v0  ;;  %957 = vmatprep.subr.bf16.mxu1 (!%p192_p3), %v997_v0  ;;  %v1000_v3 = vld [vmem:[%s1227_s1 + $0x8] sm:$0xff] (!%p192_p3)   ;;  %p236_p4 = scmp.lt.s32.totalorder (!%p192_p3), %s852_s18, 63  ;;  %v1002_v5 = vld [vmem:[%s1227_s1 + $0x10] sm:$0xff] (!%p192_p3)  }
   0x8   : > { %894 = vmatpush3.bf16.msra.mxu0 (!%p192_p3), %v998_v1  ;;  %965 = vmatpush3.bf16.msra.mxu1 (!%p192_p3), %v998_v1  ;;  %v1003_v6 = vld [vmem:[%s1227_s1 + $0x58] sm:$0xff] (!%p192_p3)   ;;  %v1005_v8 = vld [vmem:[%s1227_s1 + $0x60] sm:$0xff] (!%p192_p3)   ;;  %v1007_v10 = vld [vmem:[%s1227_s1 + $0x68] sm:$0xff] (!%p192_p3)  }
   0x9   : > { %895 = vmatprep.subr.bf16.mxu0 (!%p192_p3), %v999_v2  ;;  %958 = vmatprep.subr.bf16.mxu1 (!%p192_p3), %v999_v2  ;;  %v1004_v7 = vld [vmem:[%s1227_s1 + $0x18] sm:$0xff] (!%p192_p3)   ;;  %v1006_v9 = vld [vmem:[%s1227_s1 + $0x20] sm:$0xff] (!%p192_p3)   ;;  %v1008_v13 = vld [vmem:[%s1227_s1 + $0x28] sm:$0xff] (!%p192_p3)  }
   0xa   : > { %v1009_v14 = vld [vmem:[%s1227_s1 + $0x70] sm:$0xff] (!%p192_p3)   ;;  %v1011_v16 = vld [vmem:[%s1227_s1 + $0x78] sm:$0xff] (!%p192_p3)   ;;  %v1176_v35 = vld [vmem:[%s1228_s2] ss:$0 sm:$0xff] (!%p192_p3) }
   0xb   : > { %v1010_v15 = vld [vmem:[%s1227_s1 + $0x30] sm:$0xff] (!%p192_p3)   ;;  %v1012_v17 = vld [vmem:[%s1227_s1 + $0x38] sm:$0xff] (!%p192_p3)  }
   0xc   : > { %896 = vmatpush3.bf16.msra.mxu0 (!%p192_p3), %v1000_v3  ;;  %966 = vmatpush3.bf16.msra.mxu1 (!%p192_p3), %v1000_v3 }
   0xd   : > { %897 = vmatprep.subr.bf16.mxu0 (!%p192_p3), %v1001_v4  ;;  %959 = vmatprep.subr.bf16.mxu1 (!%p192_p3), %v1001_v4 }
   0xe   : > { %s1235_s18 = smov (!%p236_p4, %s852_s18), 63 }
   0xf   : > { %s892_s6 = sshll.u32 %s1235_s18, 3 }
  0x10   : > { %898 = vmatpush3.bf16.msra.mxu0 %v1002_v5  ;;  %967 = vmatpush3.bf16.msra.mxu1 %v1002_v5  ;;  %s1134_s11 = scalar_lea.vmem %s1226_s0, %s892_s6  ;;  %s1185_s8 = scalar_lea.vmem %s1229_s3, %s892_s6 }
  0x11   : > { %899 = vmatprep.subr.bf16.mxu0 %v1003_v6  ;;  %960 = vmatprep.subr.bf16.mxu1 %v1003_v6  ;;  %v1015_v11 = vld [vmem:[%s1134_s11 + $0x4] ss:$8 sps:$4 sm:$0xff]   ;;  %v1013_v18 = vld [vmem:[%s1134_s11] ss:$8 sps:$4 sm:$0xff]   ;;  %v1019_v20 = vld [vmem:[%s1134_s11 + $0x14] ss:$8 sps:$4 sm:$0xff]  }
  0x12   : > { %v1018_v12 = vld [vmem:[%s1134_s11 + $0x44] ss:$8 sps:$4 sm:$0xff]   ;;  %560 = vmatprep.mubr.bf16.mxu0 %v1015_v11  ;;  %v1016_v19 = vld [vmem:[%s1134_s11 + $0x40] ss:$8 sps:$4 sm:$0xff]   ;;  %v1021_v21 = vld [vmem:[%s1134_s11 + $0x54] ss:$8 sps:$4 sm:$0xff]  }
  0x13   : > { %592 = vmatprep.mubr.bf16.mxu1 %v1018_v12  ;;  %v1023_v22 = vld [vmem:[%s1134_s11 + $0x10] ss:$8 sps:$4 sm:$0xff]   ;;  %v1025_v24 = vld [vmem:[%s1134_s11 + $0x24] ss:$8 sps:$4 sm:$0xff]   ;;  %v1029_v26 = vld [vmem:[%s1134_s11 + $0x20] ss:$8 sps:$4 sm:$0xff]  }
  0x14   : > { %900 = vmatpush3.bf16.msra.mxu0 %v1004_v7  ;;  %968 = vmatpush3.bf16.msra.mxu1 %v1004_v7  ;;  %v1024_v23 = vld [vmem:[%s1134_s11 + $0x50] ss:$8 sps:$4 sm:$0xff]   ;;  %v1027_v25 = vld [vmem:[%s1134_s11 + $0x64] ss:$8 sps:$4 sm:$0xff]   ;;  %v1030_v27 = vld [vmem:[%s1134_s11 + $0x60] ss:$8 sps:$4 sm:$0xff]  }
  0x15   : > { %901 = vmatprep.subr.bf16.mxu0 %v1005_v8  ;;  %961 = vmatprep.subr.bf16.mxu1 %v1005_v8  ;;  %v1031_v28 = vld [vmem:[%s1134_s11 + $0x34] ss:$8 sps:$4 sm:$0xff]   ;;  %v1035_v30 = vld [vmem:[%s1134_s11 + $0x30] ss:$8 sps:$4 sm:$0xff]  }
  0x16   : > { %v1033_v29 = vld [vmem:[%s1134_s11 + $0x74] ss:$8 sps:$4 sm:$0xff]   ;;  %v1036_v31 = vld [vmem:[%s1134_s11 + $0x70] ss:$8 sps:$4 sm:$0xff]  }
  0x18   : > { %902 = vmatpush3.bf16.msra.mxu0 %v1006_v9  ;;  %969 = vmatpush3.bf16.msra.mxu1 %v1006_v9 }
  0x19   : > { %903 = vmatprep.subr.bf16.mxu0 %v1007_v10  ;;  %962 = vmatprep.subr.bf16.mxu1 %v1007_v10 }
  0x1c   : > { %904 = vmatpush3.bf16.msra.mxu0 %v1008_v13  ;;  %970 = vmatpush3.bf16.msra.mxu1 %v1008_v13 }
  0x1d   : > { %905 = vmatprep.subr.bf16.mxu0 %v1009_v14  ;;  %963 = vmatprep.subr.bf16.mxu1 %v1009_v14 }
  0x20   : > { %906 = vmatpush3.bf16.msra.mxu0 %v1010_v15  ;;  %971 = vmatpush3.bf16.msra.mxu1 %v1010_v15 }
  0x21   : > { %907 = vmatprep.subr.bf16.mxu0 %v1011_v16  ;;  %964 = vmatprep.subr.bf16.mxu1 %v1011_v16 }
  0x24   : > { %908 = vmatpush3.bf16.msra.mxu0 %v1012_v17  ;;  %972 = vmatpush3.bf16.msra.mxu1 %v1012_v17 }
  0x27   : > { %561 = vmatmul.mubr.bf16.vlgmr.msra.gmra.mrb[0].mxu0 %v1013_v18  ;;  %593 = vmatmul.mubr.bf16.vlgmr.msra.gmra.mrb[0].mxu1 %v1016_v19 }
  0x28   : > { %568 = vmatprep.mubr.bf16.mxu0 %v1019_v20  ;;  %600 = vmatprep.mubr.bf16.mxu1 %v1021_v21 }
  0x2f   : > { %569 = vmatmul.mubr.bf16.gmra.mrb[4].mxu0 %v1023_v22  ;;  %601 = vmatmul.mubr.bf16.gmra.mrb[4].mxu1 %v1024_v23 }
  0x30   : > { %576 = vmatprep.mubr.bf16.mxu0 %v1025_v24  ;;  %608 = vmatprep.mubr.bf16.mxu1 %v1027_v25 }
  0x37   : > { %577 = vmatmul.mubr.bf16.gmra.mrb[8].mxu0 %v1029_v26  ;;  %609 = vmatmul.mubr.bf16.gmra.mrb[8].mxu1 %v1030_v27 }
  0x38   : > { %584 = vmatprep.mubr.bf16.mxu0 %v1031_v28  ;;  %616 = vmatprep.mubr.bf16.mxu1 %v1033_v29 }
  0x3f   : > { %585 = vmatmul.mubr.bf16.gmra.mrb[12].mxu0 %v1035_v30  ;;  %617 = vmatmul.mubr.bf16.gmra.mrb[12].mxu1 %v1036_v31 }
  0xfa   : > { %v909_v32 = vpop.f32.mrb[0].mxu0  ;;  %v933_v33 = vpop.f32.mrb[0].mxu1 }
  0xfb   : > { %v910_v34 = vpop.f32.mrb[1].mxu0  ;;  %v934_v36 = vpop.f32.mrb[1].mxu1 }
  0xfc   : > { %v911_v37 = vadd.f32 %v910_v34, %v909_v32  ;;  %v935_v38 = vadd.f32 %v934_v36, %v933_v33  ;;  %v912_v39 = vpop.f32.mrb[2].mxu0  ;;  %v936_v40 = vpop.f32.mrb[2].mxu1 }
  0xfd   : > { %v913_v41 = vpop.f32.mrb[3].mxu0  ;;  %v937_v42 = vpop.f32.mrb[3].mxu1 }
  0xfe   : > { %v683_v43 = vadd.f32 %v911_v37, %v1176_v35  ;;  %v691_v44 = vadd.f32 %v935_v38, %v1176_v35  ;;  %v914_v45 = vadd.f32 %v913_v41, %v912_v39  ;;  %v938_v46 = vadd.f32 %v937_v42, %v936_v40 }
 0x100   : > { %v699_v47 = vmax.f32 %v683_v43, 0.0  ;;  %v707_v48 = vmax.f32 %v691_v44, 0.0  ;;  %v684_v49 = vadd.f32 %v914_v45, %v1176_v35  ;;  %v692_v50 = vadd.f32 %v938_v46, %v1176_v35 }
 0x102   : > { %715 = vst [vmem:[%s1185_s8] sm:$0xff] %v699_v47  ;;  %723 = vst [vmem:[%s1185_s8 + $0x40] sm:$0xff] %v707_v48  ;;  %v700_v51 = vmax.f32 %v684_v49, 0.0  ;;  %v708_v52 = vmax.f32 %v692_v50, 0.0  ;;  %v915_v53 = vpop.f32.mrb[4].mxu0  ;;  %v939_v54 = vpop.f32.mrb[4].mxu1 }
 0x103   : > { %v916_v55 = vpop.f32.mrb[5].mxu0  ;;  %v940_v56 = vpop.f32.mrb[5].mxu1 }
 0x104   : > { %716 = vst [vmem:[%s1185_s8 + $0x8] sm:$0xff] %v700_v51  ;;  %724 = vst [vmem:[%s1185_s8 + $0x48] sm:$0xff] %v708_v52  ;;  %v917_v57 = vadd.f32 %v916_v55, %v915_v53  ;;  %v941_v58 = vadd.f32 %v940_v56, %v939_v54  ;;  %v918_v59 = vpop.f32.mrb[6].mxu0  ;;  %v942_v60 = vpop.f32.mrb[6].mxu1 }
 0x105   : > { %v919_v61 = vpop.f32.mrb[7].mxu0  ;;  %v943_v62 = vpop.f32.mrb[7].mxu1 }
 0x106   : > { %v685_v63 = vadd.f32 %v917_v57, %v1176_v35  ;;  %v693_v0 = vadd.f32 %v941_v58, %v1176_v35  ;;  %v920_v1 = vadd.f32 %v919_v61, %v918_v59  ;;  %v944_v2 = vadd.f32 %v943_v62, %v942_v60 }
 0x108   : > { %v701_v3 = vmax.f32 %v685_v63, 0.0  ;;  %v709_v4 = vmax.f32 %v693_v0, 0.0  ;;  %v686_v5 = vadd.f32 %v920_v1, %v1176_v35  ;;  %v694_v6 = vadd.f32 %v944_v2, %v1176_v35 }
 0x10a   : > { %717 = vst [vmem:[%s1185_s8 + $0x10] sm:$0xff] %v701_v3  ;;  %725 = vst [vmem:[%s1185_s8 + $0x50] sm:$0xff] %v709_v4  ;;  %v702_v7 = vmax.f32 %v686_v5, 0.0  ;;  %v710_v8 = vmax.f32 %v694_v6, 0.0  ;;  %v921_v9 = vpop.f32.mrb[8].mxu0  ;;  %v945_v10 = vpop.f32.mrb[8].mxu1 }
 0x10b   : > { %v922_v11 = vpop.f32.mrb[9].mxu0  ;;  %v946_v12 = vpop.f32.mrb[9].mxu1 }
 0x10c   : > { %718 = vst [vmem:[%s1185_s8 + $0x18] sm:$0xff] %v702_v7  ;;  %726 = vst [vmem:[%s1185_s8 + $0x58] sm:$0xff] %v710_v8  ;;  %v923_v13 = vadd.f32 %v922_v11, %v921_v9  ;;  %v947_v14 = vadd.f32 %v946_v12, %v945_v10  ;;  %v924_v15 = vpop.f32.mrb[10].mxu0  ;;  %v948_v16 = vpop.f32.mrb[10].mxu1 }
 0x10d   : > { %v925_v17 = vpop.f32.mrb[11].mxu0  ;;  %v949_v18 = vpop.f32.mrb[11].mxu1 }
 0x10e   : > { %v687_v19 = vadd.f32 %v923_v13, %v1176_v35  ;;  %v695_v20 = vadd.f32 %v947_v14, %v1176_v35  ;;  %v926_v21 = vadd.f32 %v925_v17, %v924_v15  ;;  %v950_v22 = vadd.f32 %v949_v18, %v948_v16 }
 0x110   : > { %v703_v23 = vmax.f32 %v687_v19, 0.0  ;;  %v711_v24 = vmax.f32 %v695_v20, 0.0  ;;  %v688_v25 = vadd.f32 %v926_v21, %v1176_v35  ;;  %v696_v26 = vadd.f32 %v950_v22, %v1176_v35 }
 0x112   : > { %719 = vst [vmem:[%s1185_s8 + $0x20] sm:$0xff] %v703_v23  ;;  %727 = vst [vmem:[%s1185_s8 + $0x60] sm:$0xff] %v711_v24  ;;  %v704_v27 = vmax.f32 %v688_v25, 0.0  ;;  %v712_v28 = vmax.f32 %v696_v26, 0.0  ;;  %v927_v29 = vpop.f32.mrb[12].mxu0  ;;  %v951_v30 = vpop.f32.mrb[12].mxu1 }
 0x113   : > { %v928_v31 = vpop.f32.mrb[13].mxu0  ;;  %v952_v32 = vpop.f32.mrb[13].mxu1 }
 0x114   : > { %720 = vst [vmem:[%s1185_s8 + $0x28] sm:$0xff] %v704_v27  ;;  %728 = vst [vmem:[%s1185_s8 + $0x68] sm:$0xff] %v712_v28  ;;  %v929_v33 = vadd.f32 %v928_v31, %v927_v29  ;;  %v953_v34 = vadd.f32 %v952_v32, %v951_v30  ;;  %v930_v36 = vpop.f32.mrb[14].mxu0  ;;  %v954_v37 = vpop.f32.mrb[14].mxu1 }
 0x115   : > { %v931_v38 = vpop.f32.mrb[15].mxu0  ;;  %v955_v39 = vpop.f32.mrb[15].mxu1 }
 0x116   : > { %v689_v40 = vadd.f32 %v929_v33, %v1176_v35  ;;  %v697_v41 = vadd.f32 %v953_v34, %v1176_v35  ;;  %v932_v42 = vadd.f32 %v931_v38, %v930_v36  ;;  %v956_v43 = vadd.f32 %v955_v39, %v954_v37 }
 0x118   : > { %v705_v44 = vmax.f32 %v689_v40, 0.0  ;;  %v713_v45 = vmax.f32 %v697_v41, 0.0  ;;  %v690_v46 = vadd.f32 %v932_v42, %v1176_v35  ;;  %v698_v47 = vadd.f32 %v956_v43, %v1176_v35 }
 0x11a   : > { %721 = vst [vmem:[%s1185_s8 + $0x30] sm:$0xff] %v705_v44  ;;  %729 = vst [vmem:[%s1185_s8 + $0x70] sm:$0xff] %v713_v45  ;;  %v706_v48 = vmax.f32 %v690_v46, 0.0  ;;  %v714_v49 = vmax.f32 %v698_v47, 0.0 }
 0x11c   : > { %722 = vst [vmem:[%s1185_s8 + $0x38] sm:$0xff] %v706_v48  ;;  %730 = vst [vmem:[%s1185_s8 + $0x78] sm:$0xff] %v714_v49 }
 0x11d PF: > { %s13_s14 = sadd.s32 1, %s1059_s14   ;;  %s1230_s12 = smov %s1055_s13 }
 0x11e   : > { %p10_p5 = scmp.ge.s32.totalorder %s13_s14, 6   ;;  %s1231_s13 = smov %s1233_s15 }
 0x120   :  { %12 = sbr.rel (!%p10_p5) target bundleno = 2 (0x2), region = 76 }

// kernel: resnet18_forward.23
= control target key start
LH: loop header
LB: loop body
LE: loop exit
PB: predicated region body
PF: predicated region fallthrough
CT: control target
= control target key end

     0   :  { %s470_s0 = inlined_call_operand.vmem [shape: f32[64,128], index: 0, kind: input, shape index: {}]   ;;  %s471_s1 = inlined_call_operand.vmem [shape: f32[64,128], index: 1, kind: input, shape index: {}]   ;;  %s472_s2 = inlined_call_operand.vmem [shape: f32[64,128], index: 2, kind: input, shape index: {}]   ;;  %s473_s3 = inlined_call_operand.vmem [shape: f32[64,128], index: 3, kind: input, shape index: {}]   ;;  %s474_s4 = inlined_call_operand.vmem [shape: f32[64,128], index: 4, kind: input, shape index: {}]   ;;  %s475_s5 = inlined_call_operand.vmem [shape: f32[64,128], index: 5, kind: input, shape index: {}]   ;;  %s476_s6 = inlined_call_operand.vmem [shape: f32[64,128], index: 6, kind: input, shape index: {}]   ;;  %s477_s7 = inlined_call_operand.vmem [shape: f32[64,128], index: 7, kind: input, shape index: {}]   ;;  %s478_s8 = inlined_call_operand.vmem [shape: f32[64,128], index: 8, kind: input, shape index: {}]   ;;  %s479_s9 = inlined_call_operand.vmem [shape: f32[64,128], index: 9, kind: output, shape index: {}]  }
   0x1   :  { %v32_v0 = vld [vmem:[%s470_s0] sm:$0xff]  ;;  %v33_v6 = vld [vmem:[%s470_s0 + $0x8] sm:$0xff]  ;;  %v34_v15 = vld [vmem:[%s470_s0 + $0x10] sm:$0xff] }
   0x2   :  { %v40_v1 = vld [vmem:[%s471_s1] sm:$0xff]  ;;  %v41_v7 = vld [vmem:[%s471_s1 + $0x8] sm:$0xff]  ;;  %v42_v16 = vld [vmem:[%s471_s1 + $0x10] sm:$0xff] }
   0x3   :  { %v56_v2 = vld [vmem:[%s472_s2] sm:$0xff]  ;;  %v48_v3 = vmax.f32 %v32_v0, %v40_v1  ;;  %v57_v8 = vld [vmem:[%s472_s2 + $0x8] sm:$0xff]  ;;  %v49_v10 = vmax.f32 %v33_v6, %v41_v7  ;;  %v58_v17 = vld [vmem:[%s472_s2 + $0x10] sm:$0xff]  ;;  %v50_v20 = vmax.f32 %v34_v15, %v42_v16 }
   0x4   :  { %v72_v4 = vld [vmem:[%s473_s3] sm:$0xff]  ;;  %v73_v13 = vld [vmem:[%s473_s3 + $0x8] sm:$0xff]  ;;  %v74_v24 = vld [vmem:[%s473_s3 + $0x10] sm:$0xff] }
   0x5   :  { %v64_v5 = vmax.f32 %v48_v3, %v56_v2  ;;  %v88_v9 = vld [vmem:[%s474_s4] sm:$0xff]  ;;  %v65_v14 = vmax.f32 %v49_v10, %v57_v8  ;;  %v89_v19 = vld [vmem:[%s474_s4 + $0x8] sm:$0xff]  ;;  %v66_v26 = vmax.f32 %v50_v20, %v58_v17  ;;  %v35_v27 = vld [vmem:[%s470_s0 + $0x18] sm:$0xff] }
   0x6   :  { %v104_v12 = vld [vmem:[%s475_s5] sm:$0xff]  ;;  %v105_v23 = vld [vmem:[%s475_s5 + $0x8] sm:$0xff]  ;;  %v43_v28 = vld [vmem:[%s471_s1 + $0x18] sm:$0xff] }
   0x7   :  { %v80_v11 = vmax.f32 %v64_v5, %v72_v4  ;;  %v120_v21 = vld [vmem:[%s476_s6] sm:$0xff]  ;;  %v81_v22 = vmax.f32 %v65_v14, %v73_v13  ;;  %v59_v29 = vld [vmem:[%s472_s2 + $0x18] sm:$0xff]  ;;  %v90_v33 = vld [vmem:[%s474_s4 + $0x10] sm:$0xff]  ;;  %v51_v34 = vmax.f32 %v35_v27, %v43_v28  ;;  %v82_v37 = vmax.f32 %v66_v26, %v74_v24 }
   0x8   :  { %v136_v30 = vld [vmem:[%s477_s7] sm:$0xff]  ;;  %v121_v36 = vld [vmem:[%s476_s6 + $0x8] sm:$0xff]  ;;  %v106_v38 = vld [vmem:[%s475_s5 + $0x10] sm:$0xff] }
   0x9   :  { %v96_v18 = vmax.f32 %v80_v11, %v88_v9  ;;  %v152_v31 = vld [vmem:[%s478_s8] sm:$0xff]  ;;  %v97_v32 = vmax.f32 %v81_v22, %v89_v19  ;;  %v75_v39 = vld [vmem:[%s473_s3 + $0x18] sm:$0xff]  ;;  %v67_v41 = vmax.f32 %v51_v34, %v59_v29  ;;  %v137_v46 = vld [vmem:[%s477_s7 + $0x8] sm:$0xff]  ;;  %v98_v48 = vmax.f32 %v82_v37, %v90_v33 }
   0xa   :  { %v36_v42 = vld [vmem:[%s470_s0 + $0x20] sm:$0xff]  ;;  %v153_v47 = vld [vmem:[%s478_s8 + $0x8] sm:$0xff]  ;;  %v91_v49 = vld [vmem:[%s474_s4 + $0x18] sm:$0xff] }
   0xb   :  { %v112_v25 = vmax.f32 %v96_v18, %v104_v12  ;;  %v113_v40 = vmax.f32 %v97_v32, %v105_v23  ;;  %v44_v43 = vld [vmem:[%s471_s1 + $0x20] sm:$0xff]  ;;  %v122_v52 = vld [vmem:[%s476_s6 + $0x10] sm:$0xff]  ;;  %v83_v53 = vmax.f32 %v67_v41, %v75_v39  ;;  %v107_v54 = vld [vmem:[%s475_s5 + $0x18] sm:$0xff]  ;;  %v114_v57 = vmax.f32 %v98_v48, %v106_v38 }
   0xc   :  { %v60_v44 = vld [vmem:[%s472_s2 + $0x20] sm:$0xff]  ;;  %v52_v50 = vmax.f32 %v36_v42, %v44_v43  ;;  %v37_v59 = vld [vmem:[%s470_s0 + $0x28] sm:$0xff]  ;;  %v138_v63 = vld [vmem:[%s477_s7 + $0x10] sm:$0xff] }
   0xd   :  { %v128_v35 = vmax.f32 %v112_v25, %v120_v21  ;;  %v129_v51 = vmax.f32 %v113_v40, %v121_v36  ;;  %v76_v55 = vld [vmem:[%s473_s3 + $0x20] sm:$0xff]  ;;  %v45_v60 = vld [vmem:[%s471_s1 + $0x28] sm:$0xff]  ;;  %v154_v0 = vld [vmem:[%s478_s8 + $0x10] sm:$0xff]  ;;  %v99_v1 = vmax.f32 %v83_v53, %v91_v49  ;;  %v130_v4 = vmax.f32 %v114_v57, %v122_v52 }
   0xe   :  { %v68_v58 = vmax.f32 %v52_v50, %v60_v44  ;;  %v61_v61 = vld [vmem:[%s472_s2 + $0x28] sm:$0xff]  ;;  %v92_v2 = vld [vmem:[%s474_s4 + $0x20] sm:$0xff]  ;;  %v53_v3 = vmax.f32 %v37_v59, %v45_v60  ;;  %v123_v5 = vld [vmem:[%s476_s6 + $0x18] sm:$0xff] }
   0xf   :  { %v144_v45 = vmax.f32 %v128_v35, %v136_v30  ;;  %v145_v62 = vmax.f32 %v129_v51, %v137_v46  ;;  %v108_v7 = vld [vmem:[%s475_s5 + $0x20] sm:$0xff]  ;;  %v77_v8 = vld [vmem:[%s473_s3 + $0x28] sm:$0xff]  ;;  %v115_v10 = vmax.f32 %v99_v1, %v107_v54  ;;  %v38_v12 = vld [vmem:[%s470_s0 + $0x30] sm:$0xff]  ;;  %v146_v15 = vmax.f32 %v130_v4, %v138_v63 }
  0x10   :  { %v84_v6 = vmax.f32 %v68_v58, %v76_v55  ;;  %v69_v11 = vmax.f32 %v53_v3, %v61_v61  ;;  %v46_v13 = vld [vmem:[%s471_s1 + $0x30] sm:$0xff]  ;;  %v139_v16 = vld [vmem:[%s477_s7 + $0x18] sm:$0xff]  ;;  %v93_v19 = vld [vmem:[%s474_s4 + $0x28] sm:$0xff] }
  0x11   :  { %v160_v56 = vmax.f32 %v144_v45, %v152_v31  ;;  %v161_v9 = vmax.f32 %v145_v62, %v153_v47  ;;  %v62_v14 = vld [vmem:[%s472_s2 + $0x30] sm:$0xff]  ;;  %v155_v17 = vld [vmem:[%s478_s8 + $0x18] sm:$0xff]  ;;  %v54_v20 = vmax.f32 %v38_v12, %v46_v13  ;;  %v131_v21 = vmax.f32 %v115_v10, %v123_v5  ;;  %v124_v22 = vld [vmem:[%s476_s6 + $0x20] sm:$0xff] }
  0x12   :  { %v100_v18 = vmax.f32 %v84_v6, %v92_v2  ;;  %v85_v23 = vmax.f32 %v69_v11, %v77_v8  ;;  %v109_v24 = vld [vmem:[%s475_s5 + $0x28] sm:$0xff]  ;;  %v78_v25 = vld [vmem:[%s473_s3 + $0x30] sm:$0xff]  ;;  %v162_v26 = vmax.f32 %v146_v15, %v154_v0  ;;  %v39_v29 = vld [vmem:[%s470_s0 + $0x38] sm:$0xff] }
  0x13   :  { %168 = vst [vmem:[%s479_s9] sm:$0xff] %v160_v56  ;;  %169 = vst [vmem:[%s479_s9 + $0x8] sm:$0xff] %v161_v9  ;;  %v70_v28 = vmax.f32 %v54_v20, %v62_v14  ;;  %v47_v30 = vld [vmem:[%s471_s1 + $0x38] sm:$0xff]  ;;  %v147_v32 = vmax.f32 %v131_v21, %v139_v16  ;;  %v140_v33 = vld [vmem:[%s477_s7 + $0x20] sm:$0xff] }
  0x14   :  { %v116_v27 = vmax.f32 %v100_v18, %v108_v7  ;;  %v63_v31 = vld [vmem:[%s472_s2 + $0x38] sm:$0xff]  ;;  %v101_v34 = vmax.f32 %v85_v23, %v93_v19  ;;  %v94_v35 = vld [vmem:[%s474_s4 + $0x30] sm:$0xff]  ;;  %v55_v36 = vmax.f32 %v39_v29, %v47_v30  ;;  %170 = vst [vmem:[%s479_s9 + $0x10] sm:$0xff] %v162_v26  ;;  %v125_v38 = vld [vmem:[%s476_s6 + $0x28] sm:$0xff] }
  0x15   :  { %v86_v39 = vmax.f32 %v70_v28, %v78_v25  ;;  %v79_v40 = vld [vmem:[%s473_s3 + $0x38] sm:$0xff]  ;;  %v163_v41 = vmax.f32 %v147_v32, %v155_v17  ;;  %v156_v42 = vld [vmem:[%s478_s8 + $0x20] sm:$0xff]  ;;  %v110_v44 = vld [vmem:[%s475_s5 + $0x30] sm:$0xff] }
  0x16   :  { %v132_v37 = vmax.f32 %v116_v27, %v124_v22  ;;  %v117_v43 = vmax.f32 %v101_v34, %v109_v24  ;;  %v71_v45 = vmax.f32 %v55_v36, %v63_v31  ;;  %v141_v47 = vld [vmem:[%s477_s7 + $0x28] sm:$0xff]  ;;  %v95_v49 = vld [vmem:[%s474_s4 + $0x38] sm:$0xff]  ;;  %v126_v51 = vld [vmem:[%s476_s6 + $0x30] sm:$0xff] }
  0x17   :  { %v102_v48 = vmax.f32 %v86_v39, %v94_v35  ;;  %171 = vst [vmem:[%s479_s9 + $0x18] sm:$0xff] %v163_v41  ;;  %v157_v54 = vld [vmem:[%s478_s8 + $0x28] sm:$0xff]  ;;  %v111_v56 = vld [vmem:[%s475_s5 + $0x38] sm:$0xff]  ;;  %v142_v58 = vld [vmem:[%s477_s7 + $0x30] sm:$0xff] }
  0x18   :  { %v148_v46 = vmax.f32 %v132_v37, %v140_v33  ;;  %v133_v50 = vmax.f32 %v117_v43, %v125_v38  ;;  %v87_v52 = vmax.f32 %v71_v45, %v79_v40  ;;  %v127_v61 = vld [vmem:[%s476_s6 + $0x38] sm:$0xff]  ;;  %v158_v63 = vld [vmem:[%s478_s8 + $0x30] sm:$0xff] }
  0x19   :  { %v118_v55 = vmax.f32 %v102_v48, %v110_v44  ;;  %v143_v2 = vld [vmem:[%s477_s7 + $0x38] sm:$0xff] }
  0x1a   :  { %v164_v53 = vmax.f32 %v148_v46, %v156_v42  ;;  %v149_v57 = vmax.f32 %v133_v50, %v141_v47  ;;  %v103_v59 = vmax.f32 %v87_v52, %v95_v49  ;;  %v159_v5 = vld [vmem:[%s478_s8 + $0x38] sm:$0xff] }
  0x1b   :  { %v134_v60 = vmax.f32 %v118_v55, %v126_v51 }
  0x1c   :  { %172 = vst [vmem:[%s479_s9 + $0x20] sm:$0xff] %v164_v53  ;;  %v165_v62 = vmax.f32 %v149_v57, %v157_v54  ;;  %v119_v0 = vmax.f32 %v103_v59, %v111_v56 }
  0x1d   :  { %v150_v1 = vmax.f32 %v134_v60, %v142_v58 }
  0x1e   :  { %173 = vst [vmem:[%s479_s9 + $0x28] sm:$0xff] %v165_v62  ;;  %v135_v3 = vmax.f32 %v119_v0, %v127_v61 }
  0x1f   :  { %v166_v4 = vmax.f32 %v150_v1, %v158_v63 }
  0x20   :  { %v151_v6 = vmax.f32 %v135_v3, %v143_v2 }
  0x21   :  { %174 = vst [vmem:[%s479_s9 + $0x30] sm:$0xff] %v166_v4 }
  0x22   :  { %v167_v7 = vmax.f32 %v151_v6, %v159_v5 }
  0x24   :  { %175 = vst [vmem:[%s479_s9 + $0x38] sm:$0xff] %v167_v7 }

// kernel: resnet18_forward.24
= control target key start
LH: loop header
LB: loop body
LE: loop exit
PB: predicated region body
PF: predicated region fallthrough
CT: control target
= control target key end

     0   :  { %s1759_s1 = inlined_call_operand.vmem [shape: bf16[640,128], index: 1, kind: input, shape index: {}]   ;;  %s1760_s0 = inlined_call_operand.vmem [shape: bf16[128,640], index: 0, kind: input, shape index: {}]   ;;  %s1761_s2 = inlined_call_operand.vmem [shape: f32[1,128], index: 2, kind: input, shape index: {}]   ;;  %s1762_s3 = inlined_call_operand.vmem [shape: f32[128,128], index: 3, kind: output, shape index: {}]  }
   0x1   :  { %v1301_v0 = vld [vmem:[%s1759_s1 + $0x40] sm:$0xff]   ;;  %v1305_v4 = vld [vmem:[%s1759_s1 + $0x48] sm:$0xff]   ;;  %v1309_v8 = vld [vmem:[%s1759_s1 + $0x50] sm:$0xff]  }
   0x2   :  { %v1302_v1 = vld [vmem:[%s1759_s1 + $0xc0] sm:$0xff]   ;;  %1109 = vmatprep.subr.bf16.mxu0 %v1301_v0  ;;  %v1306_v5 = vld [vmem:[%s1759_s1 + $0xc8] sm:$0xff]   ;;  %v1310_v9 = vld [vmem:[%s1759_s1 + $0xd0] sm:$0xff]  }
   0x3   :  { %v1303_v2 = vld [vmem:[%s1759_s1] sm:$0xff]   ;;  %1173 = vmatprep.subr.bf16.mxu1 %v1302_v1  ;;  %v1307_v6 = vld [vmem:[%s1759_s1 + $0x8] sm:$0xff]   ;;  %v1311_v10 = vld [vmem:[%s1759_s1 + $0x10] sm:$0xff]  }
   0x4   :  { %v1304_v3 = vld [vmem:[%s1759_s1 + $0x80] sm:$0xff]   ;;  %1110 = vmatpush3.bf16.msra.mxu0 %v1303_v2  ;;  %v1308_v7 = vld [vmem:[%s1759_s1 + $0x88] sm:$0xff]   ;;  %v1312_v11 = vld [vmem:[%s1759_s1 + $0x90] sm:$0xff]  }
   0x5   :  { %1174 = vmatpush3.bf16.msra.mxu1 %v1304_v3  ;;  %1111 = vmatprep.subr.bf16.mxu0 %v1305_v4  ;;  %v1313_v12 = vld [vmem:[%s1759_s1 + $0x58] sm:$0xff]   ;;  %v1317_v16 = vld [vmem:[%s1759_s1 + $0x60] sm:$0xff]   ;;  %v1321_v20 = vld [vmem:[%s1759_s1 + $0x68] sm:$0xff]  }
   0x6   :  { %1175 = vmatprep.subr.bf16.mxu1 %v1306_v5  ;;  %v1314_v13 = vld [vmem:[%s1759_s1 + $0xd8] sm:$0xff]   ;;  %v1318_v17 = vld [vmem:[%s1759_s1 + $0xe0] sm:$0xff]   ;;  %v1322_v21 = vld [vmem:[%s1759_s1 + $0xe8] sm:$0xff]  }
   0x7   :  { %v1315_v14 = vld [vmem:[%s1759_s1 + $0x18] sm:$0xff]   ;;  %v1319_v18 = vld [vmem:[%s1759_s1 + $0x20] sm:$0xff]   ;;  %v1323_v22 = vld [vmem:[%s1759_s1 + $0x28] sm:$0xff]  }
   0x8   :  { %1112 = vmatpush3.bf16.msra.mxu0 %v1307_v6  ;;  %v1316_v15 = vld [vmem:[%s1759_s1 + $0x98] sm:$0xff]   ;;  %v1320_v19 = vld [vmem:[%s1759_s1 + $0xa0] sm:$0xff]   ;;  %v1324_v23 = vld [vmem:[%s1759_s1 + $0xa8] sm:$0xff]  }
   0x9   :  { %1176 = vmatpush3.bf16.msra.mxu1 %v1308_v7  ;;  %1113 = vmatprep.subr.bf16.mxu0 %v1309_v8  ;;  %v1325_v24 = vld [vmem:[%s1759_s1 + $0x70] sm:$0xff]   ;;  %v1329_v28 = vld [vmem:[%s1759_s1 + $0x78] sm:$0xff]   ;;  %v1338_v35 = vld [vmem:[%s1760_s0 + $0xc] ss:$20 sps:$4 sm:$0xff]  }
   0xa   :  { %1177 = vmatprep.subr.bf16.mxu1 %v1310_v9  ;;  %v1326_v25 = vld [vmem:[%s1759_s1 + $0xf0] sm:$0xff]   ;;  %v1330_v29 = vld [vmem:[%s1759_s1 + $0xf8] sm:$0xff]   ;;  %v1339_v36 = vld [vmem:[%s1759_s1 + $0x100] sm:$0xff]   ;;  %756 = vmatprep.mubr.bf16.mxu1 %v1338_v35 }
   0xb   :  { %v1327_v26 = vld [vmem:[%s1759_s1 + $0x30] sm:$0xff]   ;;  %v1331_v30 = vld [vmem:[%s1759_s1 + $0x38] sm:$0xff]   ;;  %v1340_v37 = vld [vmem:[%s1760_s0 + $0x2c] ss:$20 sps:$4 sm:$0xff]  }
   0xc   :  { %1114 = vmatpush3.bf16.msra.mxu0 %v1311_v10  ;;  %v1328_v27 = vld [vmem:[%s1759_s1 + $0xb0] sm:$0xff]   ;;  %v1332_v31 = vld [vmem:[%s1759_s1 + $0xb8] sm:$0xff]   ;;  %v1346_v39 = vld [vmem:[%s1759_s1 + $0x108] sm:$0xff]  }
   0xd   :  { %1178 = vmatpush3.bf16.msra.mxu1 %v1312_v11  ;;  %1115 = vmatprep.subr.bf16.mxu0 %v1313_v12  ;;  %v1333_v32 = vld [vmem:[%s1760_s0] ss:$20 sps:$4 sm:$0xff]   ;;  %v1335_v33 = vld [vmem:[%s1760_s0 + $0x4] ss:$20 sps:$4 sm:$0xff]   ;;  %v1336_v34 = vld [vmem:[%s1760_s0 + $0x8] ss:$20 sps:$4 sm:$0xff]  }
   0xe   :  { %1179 = vmatprep.subr.bf16.mxu1 %v1314_v13  ;;  %659 = vmatprep.mubr.bf16.mxu0 %v1335_v33  ;;  %v1342_v38 = vld [vmem:[%s1760_s0 + $0x34] ss:$20 sps:$4 sm:$0xff]   ;;  %v1345_v41 = vld [vmem:[%s1760_s0 + $0x30] ss:$20 sps:$4 sm:$0xff]   ;;  %v1360_v45 = vld [vmem:[%s1759_s1 + $0x118] sm:$0xff]  }
   0xf   :  { %v1344_v40 = vld [vmem:[%s1760_s0 + $0x28] ss:$20 sps:$4 sm:$0xff]   ;;  %v1353_v44 = vld [vmem:[%s1759_s1 + $0x110] sm:$0xff]   ;;  %v1352_v47 = vld [vmem:[%s1760_s0 + $0x58] ss:$20 sps:$4 sm:$0xff]  }
  0x10   :  { %1116 = vmatpush3.bf16.msra.mxu0 %v1315_v14  ;;  %v1347_v42 = vld [vmem:[%s1760_s0 + $0x54] ss:$20 sps:$4 sm:$0xff]   ;;  %v1349_v43 = vld [vmem:[%s1760_s0 + $0x5c] ss:$20 sps:$4 sm:$0xff]   ;;  %v1356_v49 = vld [vmem:[%s1760_s0 + $0x84] ss:$20 sps:$4 sm:$0xff]  }
  0x11   :  { %1180 = vmatpush3.bf16.msra.mxu1 %v1316_v15  ;;  %1117 = vmatprep.subr.bf16.mxu0 %v1317_v16  ;;  %v1351_v46 = vld [vmem:[%s1760_s0 + $0x50] ss:$20 sps:$4 sm:$0xff]   ;;  %v1374_v51 = vld [vmem:[%s1759_s1 + $0x128] sm:$0xff]   ;;  %v1359_v53 = vld [vmem:[%s1760_s0 + $0x80] ss:$20 sps:$4 sm:$0xff]  }
  0x12   :  { %1181 = vmatprep.subr.bf16.mxu1 %v1318_v17  ;;  %v1354_v48 = vld [vmem:[%s1760_s0 + $0x7c] ss:$20 sps:$4 sm:$0xff]   ;;  %v1367_v50 = vld [vmem:[%s1759_s1 + $0x120] sm:$0xff]   ;;  %v1358_v52 = vld [vmem:[%s1760_s0 + $0x78] ss:$20 sps:$4 sm:$0xff]  }
  0x13   :  { %v1361_v54 = vld [vmem:[%s1760_s0 + $0xa4] ss:$20 sps:$4 sm:$0xff]   ;;  %v1381_v55 = vld [vmem:[%s1759_s1 + $0x130] sm:$0xff]   ;;  %v1363_v56 = vld [vmem:[%s1760_s0 + $0xac] ss:$20 sps:$4 sm:$0xff]  }
  0x14   :  { %1118 = vmatpush3.bf16.msra.mxu0 %v1319_v18  ;;  %v1388_v57 = vld [vmem:[%s1759_s1 + $0x138] sm:$0xff]   ;;  %v1365_v58 = vld [vmem:[%s1760_s0 + $0xa0] ss:$20 sps:$4 sm:$0xff]   ;;  %v1373_v63 = vld [vmem:[%s1760_s0 + $0xd0] ss:$20 sps:$4 sm:$0xff]  }
  0x15   :  { %1182 = vmatpush3.bf16.msra.mxu1 %v1320_v19  ;;  %1119 = vmatprep.subr.bf16.mxu0 %v1321_v20  ;;  %v1366_v59 = vld [vmem:[%s1760_s0 + $0xa8] ss:$20 sps:$4 sm:$0xff]   ;;  %v1368_v60 = vld [vmem:[%s1760_s0 + $0xcc] ss:$20 sps:$4 sm:$0xff]   ;;  %v1379_v2 = vld [vmem:[%s1760_s0 + $0xf0] ss:$20 sps:$4 sm:$0xff]  }
  0x16   :  { %1183 = vmatprep.subr.bf16.mxu1 %v1322_v21  ;;  %v1370_v61 = vld [vmem:[%s1760_s0 + $0xd4] ss:$20 sps:$4 sm:$0xff]   ;;  %v1377_v1 = vld [vmem:[%s1760_s0 + $0xfc] ss:$20 sps:$4 sm:$0xff]   ;;  %v1380_v3 = vld [vmem:[%s1760_s0 + $0xf8] ss:$20 sps:$4 sm:$0xff]  }
  0x17   :  { %v1372_v62 = vld [vmem:[%s1760_s0 + $0xc8] ss:$20 sps:$4 sm:$0xff]   ;;  %v1384_v5 = vld [vmem:[%s1760_s0 + $0x124] ss:$20 sps:$4 sm:$0xff]   ;;  %v1387_v7 = vld [vmem:[%s1760_s0 + $0x120] ss:$20 sps:$4 sm:$0xff]  }
  0x18   :  { %1120 = vmatpush3.bf16.msra.mxu0 %v1323_v22  ;;  %v1375_v0 = vld [vmem:[%s1760_s0 + $0xf4] ss:$20 sps:$4 sm:$0xff]   ;;  %v1382_v4 = vld [vmem:[%s1760_s0 + $0x11c] ss:$20 sps:$4 sm:$0xff]   ;;  %v1386_v6 = vld [vmem:[%s1760_s0 + $0x118] ss:$20 sps:$4 sm:$0xff]  }
  0x19   :  { %1184 = vmatpush3.bf16.msra.mxu1 %v1324_v23  ;;  %1121 = vmatprep.subr.bf16.mxu0 %v1325_v24  ;;  %v1389_v8 = vld [vmem:[%s1760_s0 + $0x10] ss:$20 sps:$4 sm:$0xff]   ;;  %v1391_v10 = vld [vmem:[%s1760_s0 + $0x38] ss:$20 sps:$4 sm:$0xff]   ;;  %v1393_v12 = vld [vmem:[%s1760_s0 + $0x60] ss:$20 sps:$4 sm:$0xff]  }
  0x1a   :  { %1185 = vmatprep.subr.bf16.mxu1 %v1326_v25  ;;  %v1390_v9 = vld [vmem:[%s1760_s0 + $0xb0] ss:$20 sps:$4 sm:$0xff]   ;;  %v1392_v11 = vld [vmem:[%s1760_s0 + $0xd8] ss:$20 sps:$4 sm:$0xff]   ;;  %v1394_v13 = vld [vmem:[%s1760_s0 + $0x100] ss:$20 sps:$4 sm:$0xff]  }
  0x1b   :  { %v1395_v14 = vld [vmem:[%s1760_s0 + $0x88] ss:$20 sps:$4 sm:$0xff]  }
  0x1c   :  { %1122 = vmatpush3.bf16.msra.mxu0 %v1327_v26  ;;  %v1396_v15 = vld [vmem:[%s1760_s0 + $0x128] ss:$20 sps:$4 sm:$0xff]  }
  0x1d   :  { %1186 = vmatpush3.bf16.msra.mxu1 %v1328_v27  ;;  %1123 = vmatprep.subr.bf16.mxu0 %v1329_v28 }
  0x1e   :  { %1187 = vmatprep.subr.bf16.mxu1 %v1330_v29 }
  0x20   :  { %1124 = vmatpush3.bf16.msra.mxu0 %v1331_v30 }
  0x21   :  { %1188 = vmatpush3.bf16.msra.mxu1 %v1332_v31  ;;  %1253 = vmatprep.subr.bf16.mxu0 %v1339_v36 }
  0x22   :  { %1285 = vmatprep.subr.bf16.mxu1 %v1339_v36 }
  0x23   :  { %660 = vmatmul.mubr.bf16.vlgmr.msra.gmra.mrb[0].mxu0 %v1333_v32 }
  0x24   :  { %757 = vmatmul.mubr.bf16.vlgmr.msra.gmra.mrb[0].mxu1 %v1336_v34  ;;  %1254 = vmatpush3.bf16.msra.mxu0 %v1339_v36 }
  0x25   :  { %1293 = vmatpush3.bf16.msra.mxu1 %v1339_v36  ;;  %667 = vmatprep.mubr.bf16.mxu0 %v1340_v37 }
  0x26   :  { %764 = vmatprep.mubr.bf16.mxu1 %v1342_v38  ;;  %1255 = vmatprep.subr.bf16.mxu0 %v1346_v39 }
  0x27   :  { %1286 = vmatprep.subr.bf16.mxu1 %v1346_v39 }
  0x28   :  { %1256 = vmatpush3.bf16.msra.mxu0 %v1346_v39 }
  0x29   :  { %1294 = vmatpush3.bf16.msra.mxu1 %v1346_v39  ;;  %1257 = vmatprep.subr.bf16.mxu0 %v1353_v44 }
  0x2a   :  { %1287 = vmatprep.subr.bf16.mxu1 %v1353_v44 }
  0x2b   :  { %668 = vmatmul.mubr.bf16.gmra.mrb[4].mxu0 %v1344_v40 }
  0x2c   :  { %765 = vmatmul.mubr.bf16.gmra.mrb[4].mxu1 %v1345_v41  ;;  %675 = vmatprep.mubr.bf16.mxu0 %v1347_v42 }
  0x2d   :  { %772 = vmatprep.mubr.bf16.mxu1 %v1349_v43  ;;  %1258 = vmatpush3.bf16.msra.mxu0 %v1353_v44 }
  0x2e   :  { %1295 = vmatpush3.bf16.msra.mxu1 %v1353_v44  ;;  %1259 = vmatprep.subr.bf16.mxu0 %v1360_v45 }
  0x2f   :  { %1288 = vmatprep.subr.bf16.mxu1 %v1360_v45 }
  0x31   :  { %1260 = vmatpush3.bf16.msra.mxu0 %v1360_v45 }
  0x32   :  { %1296 = vmatpush3.bf16.msra.mxu1 %v1360_v45  ;;  %1261 = vmatprep.subr.bf16.mxu0 %v1367_v50 }
  0x33   :  { %676 = vmatmul.mubr.bf16.gmra.mrb[8].mxu0 %v1351_v46  ;;  %1289 = vmatprep.subr.bf16.mxu1 %v1367_v50 }
  0x34   :  { %773 = vmatmul.mubr.bf16.gmra.mrb[8].mxu1 %v1352_v47  ;;  %683 = vmatprep.mubr.bf16.mxu0 %v1354_v48 }
  0x35   :  { %780 = vmatprep.mubr.bf16.mxu1 %v1356_v49  ;;  %1262 = vmatpush3.bf16.msra.mxu0 %v1367_v50 }
  0x36   :  { %1297 = vmatpush3.bf16.msra.mxu1 %v1367_v50  ;;  %1263 = vmatprep.subr.bf16.mxu0 %v1374_v51 }
  0x37   :  { %1290 = vmatprep.subr.bf16.mxu1 %v1374_v51 }
  0x39   :  { %1264 = vmatpush3.bf16.msra.mxu0 %v1374_v51 }
  0x3a   :  { %1298 = vmatpush3.bf16.msra.mxu1 %v1374_v51  ;;  %1265 = vmatprep.subr.bf16.mxu0 %v1381_v55 }
  0x3b   :  { %684 = vmatmul.mubr.bf16.gmra.mrb[12].mxu0 %v1358_v52  ;;  %1291 = vmatprep.subr.bf16.mxu1 %v1381_v55 }
  0x3c   :  { %781 = vmatmul.mubr.bf16.gmra.mrb[12].mxu1 %v1359_v53  ;;  %691 = vmatprep.mubr.bf16.mxu0 %v1361_v54 }
  0x3d   :  { %788 = vmatprep.mubr.bf16.mxu1 %v1363_v56  ;;  %1266 = vmatpush3.bf16.msra.mxu0 %v1381_v55 }
  0x3e   :  { %1299 = vmatpush3.bf16.msra.mxu1 %v1381_v55  ;;  %1267 = vmatprep.subr.bf16.mxu0 %v1388_v57 }
  0x3f   :  { %1292 = vmatprep.subr.bf16.mxu1 %v1388_v57 }
  0x41   :  { %1268 = vmatpush3.bf16.msra.mxu0 %v1388_v57 }
  0x42   :  { %1300 = vmatpush3.bf16.msra.mxu1 %v1388_v57 }
  0x43   :  { %692 = vmatmul.mubr.bf16.gmra.mrb[16].mxu0 %v1365_v58 }
  0x44   :  { %789 = vmatmul.mubr.bf16.gmra.mrb[16].mxu1 %v1366_v59  ;;  %699 = vmatprep.mubr.bf16.mxu0 %v1368_v60 }
  0x45   :  { %796 = vmatprep.mubr.bf16.mxu1 %v1370_v61 }
  0x4b   :  { %700 = vmatmul.mubr.bf16.gmra.mrb[20].mxu0 %v1372_v62 }
  0x4c   :  { %797 = vmatmul.mubr.bf16.gmra.mrb[20].mxu1 %v1373_v63  ;;  %707 = vmatprep.mubr.bf16.mxu0 %v1375_v0 }
  0x4d   :  { %804 = vmatprep.mubr.bf16.mxu1 %v1377_v1 }
  0x53   :  { %708 = vmatmul.mubr.bf16.gmra.mrb[24].mxu0 %v1379_v2 }
  0x54   :  { %805 = vmatmul.mubr.bf16.gmra.mrb[24].mxu1 %v1380_v3  ;;  %715 = vmatprep.mubr.bf16.mxu0 %v1382_v4 }
  0x55   :  { %812 = vmatprep.mubr.bf16.mxu1 %v1384_v5 }
  0x5b   :  { %716 = vmatmul.mubr.bf16.gmra.mrb[28].mxu0 %v1386_v6 }
  0x5c   :  { %813 = vmatmul.mubr.bf16.gmra.mrb[28].mxu1 %v1387_v7  ;;  %1269 = vmatprep.mubr.bf16.mxu0 %v1389_v8 }
  0x5d   :  { %1277 = vmatprep.mubr.bf16.mxu1 %v1390_v9 }
  0x63   :  { %1270 = vmatmul.mubr.bf16.vlgmr.msra.gmra.mrb[32].mxu0 %v1391_v10 }
  0x64   :  { %1278 = vmatmul.mubr.bf16.vlgmr.msra.gmra.mrb[32].mxu1 %v1392_v11  ;;  %1273 = vmatprep.mubr.bf16.mxu0 %v1393_v12 }
  0x65   :  { %1281 = vmatprep.mubr.bf16.mxu1 %v1394_v13 }
  0x6b   :  { %1274 = vmatmul.mubr.bf16.gmra.mrb[36].mxu0 %v1395_v14 }
  0x6c   :  { %1282 = vmatmul.mubr.bf16.gmra.mrb[36].mxu1 %v1396_v15 }
  0xf6   :  { %v1125_v16 = vpop.f32.mrb[0].mxu0 }
  0xf7   :  { %v1189_v17 = vpop.f32.mrb[0].mxu1  ;;  %v1126_v18 = vpop.f32.mrb[1].mxu0 }
  0xf8   :  { %v1127_v19 = vadd.f32 %v1126_v18, %v1125_v16  ;;  %v1190_v20 = vpop.f32.mrb[1].mxu1  ;;  %v1128_v21 = vpop.f32.mrb[2].mxu0 }
  0xf9   :  { %v1191_v22 = vadd.f32 %v1190_v20, %v1189_v17  ;;  %v1192_v23 = vpop.f32.mrb[2].mxu1  ;;  %v1129_v24 = vpop.f32.mrb[3].mxu0 }
  0xfa   :  { %v1130_v25 = vadd.f32 %v1129_v24, %v1128_v21  ;;  %v1193_v26 = vpop.f32.mrb[3].mxu1 }
  0xfb   :  { %v1194_v27 = vadd.f32 %v1193_v26, %v1192_v23  ;;  %v1657_v28 = vadd.f32 %v1191_v22, %v1127_v19 }
  0xfd   :  { %v1659_v29 = vadd.f32 %v1194_v27, %v1130_v25 }
  0xfe   :  { %v1131_v30 = vpop.f32.mrb[4].mxu0 }
  0xff   :  { %v1195_v31 = vpop.f32.mrb[4].mxu1  ;;  %v1132_v32 = vpop.f32.mrb[5].mxu0 }
 0x100   :  { %v1133_v33 = vadd.f32 %v1132_v32, %v1131_v30  ;;  %v1196_v34 = vpop.f32.mrb[5].mxu1  ;;  %v1134_v35 = vpop.f32.mrb[6].mxu0 }
 0x101   :  { %v1197_v36 = vadd.f32 %v1196_v34, %v1195_v31  ;;  %v1198_v37 = vpop.f32.mrb[6].mxu1  ;;  %v1135_v38 = vpop.f32.mrb[7].mxu0 }
 0x102   :  { %v1136_v39 = vadd.f32 %v1135_v38, %v1134_v35  ;;  %v1199_v40 = vpop.f32.mrb[7].mxu1 }
 0x103   :  { %v1200_v41 = vadd.f32 %v1199_v40, %v1198_v37  ;;  %v1661_v42 = vadd.f32 %v1197_v36, %v1133_v33 }
 0x105   :  { %v1663_v43 = vadd.f32 %v1200_v41, %v1136_v39 }
 0x106   :  { %v1137_v44 = vpop.f32.mrb[8].mxu0 }
 0x107   :  { %v1201_v45 = vpop.f32.mrb[8].mxu1  ;;  %v1138_v46 = vpop.f32.mrb[9].mxu0 }
 0x108   :  { %v1139_v47 = vadd.f32 %v1138_v46, %v1137_v44  ;;  %v1202_v48 = vpop.f32.mrb[9].mxu1  ;;  %v1140_v49 = vpop.f32.mrb[10].mxu0 }
 0x109   :  { %v1203_v50 = vadd.f32 %v1202_v48, %v1201_v45  ;;  %v1204_v51 = vpop.f32.mrb[10].mxu1  ;;  %v1141_v52 = vpop.f32.mrb[11].mxu0 }
 0x10a   :  { %v1142_v53 = vadd.f32 %v1141_v52, %v1140_v49  ;;  %v1205_v54 = vpop.f32.mrb[11].mxu1 }
 0x10b   :  { %v1206_v55 = vadd.f32 %v1205_v54, %v1204_v51  ;;  %v1665_v56 = vadd.f32 %v1203_v50, %v1139_v47 }
 0x10d   :  { %v1667_v57 = vadd.f32 %v1206_v55, %v1142_v53 }
 0x10e   :  { %v1143_v58 = vpop.f32.mrb[12].mxu0 }
 0x10f   :  { %v1207_v59 = vpop.f32.mrb[12].mxu1  ;;  %v1144_v60 = vpop.f32.mrb[13].mxu0 }
 0x110   :  { %v1145_v61 = vadd.f32 %v1144_v60, %v1143_v58  ;;  %v1208_v62 = vpop.f32.mrb[13].mxu1  ;;  %v1146_v63 = vpop.f32.mrb[14].mxu0 }
 0x111   :  { %v1209_v0 = vadd.f32 %v1208_v62, %v1207_v59  ;;  %v1210_v1 = vpop.f32.mrb[14].mxu1  ;;  %v1147_v2 = vpop.f32.mrb[15].mxu0 }
 0x112   :  { %v1148_v3 = vadd.f32 %v1147_v2, %v1146_v63  ;;  %v1211_v4 = vpop.f32.mrb[15].mxu1 }
 0x113   :  { %v1212_v5 = vadd.f32 %v1211_v4, %v1210_v1  ;;  %v1669_v6 = vadd.f32 %v1209_v0, %v1145_v61 }
 0x115   :  { %v1671_v7 = vadd.f32 %v1212_v5, %v1148_v3 }
 0x116   :  { %v1149_v8 = vpop.f32.mrb[16].mxu0 }
 0x117   :  { %v1213_v9 = vpop.f32.mrb[16].mxu1  ;;  %v1150_v10 = vpop.f32.mrb[17].mxu0 }
 0x118   :  { %v1151_v11 = vadd.f32 %v1150_v10, %v1149_v8  ;;  %v1214_v12 = vpop.f32.mrb[17].mxu1  ;;  %v1152_v13 = vpop.f32.mrb[18].mxu0 }
 0x119   :  { %v1215_v14 = vadd.f32 %v1214_v12, %v1213_v9  ;;  %v1216_v15 = vpop.f32.mrb[18].mxu1  ;;  %v1153_v16 = vpop.f32.mrb[19].mxu0  ;;  %v1682_v9 = vld [vmem:[%s1761_s2] ss:$0 sm:$0xff] }
 0x11a   :  { %v1154_v17 = vadd.f32 %v1153_v16, %v1152_v13  ;;  %v1217_v18 = vpop.f32.mrb[19].mxu1 }
 0x11b   :  { %v1218_v19 = vadd.f32 %v1217_v18, %v1216_v15  ;;  %v791_v20 = vadd.f32 %v1215_v14, %v1151_v11 }
 0x11d   :  { %v1673_v21 = vadd.f32 %v1218_v19, %v1154_v17 }
 0x11e   :  { %v1155_v22 = vpop.f32.mrb[20].mxu0 }
 0x11f   :  { %v1219_v23 = vpop.f32.mrb[20].mxu1  ;;  %v1156_v24 = vpop.f32.mrb[21].mxu0 }
 0x120   :  { %v1157_v25 = vadd.f32 %v1156_v24, %v1155_v22  ;;  %v1220_v26 = vpop.f32.mrb[21].mxu1  ;;  %v1158_v27 = vpop.f32.mrb[22].mxu0 }
 0x121   :  { %v1221_v30 = vadd.f32 %v1220_v26, %v1219_v23  ;;  %v1222_v31 = vpop.f32.mrb[22].mxu1  ;;  %v1159_v32 = vpop.f32.mrb[23].mxu0 }
 0x122   :  { %v1160_v33 = vadd.f32 %v1159_v32, %v1158_v27  ;;  %v1223_v34 = vpop.f32.mrb[23].mxu1 }
 0x123   :  { %v1224_v35 = vadd.f32 %v1223_v34, %v1222_v31  ;;  %v799_v36 = vadd.f32 %v1221_v30, %v1157_v25 }
 0x125   :  { %v802_v37 = vadd.f32 %v1224_v35, %v1160_v33 }
 0x126   :  { %v1161_v38 = vpop.f32.mrb[24].mxu0 }
 0x127   :  { %v1225_v39 = vpop.f32.mrb[24].mxu1  ;;  %v1162_v40 = vpop.f32.mrb[25].mxu0 }
 0x128   :  { %v1163_v41 = vadd.f32 %v1162_v40, %v1161_v38  ;;  %v1226_v44 = vpop.f32.mrb[25].mxu1  ;;  %v1164_v45 = vpop.f32.mrb[26].mxu0 }
 0x129   :  { %v1227_v46 = vadd.f32 %v1226_v44, %v1225_v39  ;;  %v1228_v47 = vpop.f32.mrb[26].mxu1  ;;  %v1165_v48 = vpop.f32.mrb[27].mxu0 }
 0x12a   :  { %v1166_v49 = vadd.f32 %v1165_v48, %v1164_v45  ;;  %v1229_v50 = vpop.f32.mrb[27].mxu1 }
 0x12b   :  { %v1230_v51 = vadd.f32 %v1229_v50, %v1228_v47  ;;  %v1675_v52 = vadd.f32 %v1227_v46, %v1163_v41 }
 0x12d   :  { %v1677_v53 = vadd.f32 %v1230_v51, %v1166_v49 }
 0x12e   :  { %v1167_v54 = vpop.f32.mrb[28].mxu0 }
 0x12f   :  { %v1231_v55 = vpop.f32.mrb[28].mxu1  ;;  %v1168_v58 = vpop.f32.mrb[29].mxu0 }
 0x130   :  { %v1169_v59 = vadd.f32 %v1168_v58, %v1167_v54  ;;  %v1232_v60 = vpop.f32.mrb[29].mxu1  ;;  %v1170_v61 = vpop.f32.mrb[30].mxu0 }
 0x131   :  { %v1233_v62 = vadd.f32 %v1232_v60, %v1231_v55  ;;  %v1234_v63 = vpop.f32.mrb[30].mxu1  ;;  %v1171_v0 = vpop.f32.mrb[31].mxu0 }
 0x132   :  { %v1172_v1 = vadd.f32 %v1171_v0, %v1170_v61  ;;  %v1235_v2 = vpop.f32.mrb[31].mxu1 }
 0x133   :  { %v1236_v3 = vadd.f32 %v1235_v2, %v1234_v63  ;;  %v815_v4 = vadd.f32 %v1233_v62, %v1169_v59 }
 0x135   :  { %v818_v5 = vadd.f32 %v1236_v3, %v1172_v1 }
 0x136   :  { %v1271_v8 = vpop.f32.mrb[32].mxu0 }
 0x137   :  { %v864_v10 = vadd.f32 %v1271_v8, %v1661_v42  ;;  %v1279_v11 = vpop.f32.mrb[32].mxu1  ;;  %v855_v12 = vpop.f32.mrb[33].mxu0 }
 0x138   :  { %v896_v13 = vadd.f32 %v1279_v11, %v799_v36  ;;  %v856_v14 = vadd.f32 %v855_v12, %v1657_v28  ;;  %v887_v15 = vpop.f32.mrb[33].mxu1  ;;  %v1272_v16 = vpop.f32.mrb[34].mxu0 }
 0x139   :  { %v978_v17 = vadd.f32 %v1682_v9, %v864_v10  ;;  %v888_v18 = vadd.f32 %v887_v15, %v791_v20  ;;  %v867_v19 = vadd.f32 %v1272_v16, %v1663_v43  ;;  %v1280_v22 = vpop.f32.mrb[34].mxu1  ;;  %v858_v23 = vpop.f32.mrb[35].mxu0 }
 0x13a   :  { %v986_v24 = vadd.f32 %v1682_v9, %v896_v13  ;;  %v976_v25 = vadd.f32 %v1682_v9, %v856_v14  ;;  %v899_v26 = vadd.f32 %v1280_v22, %v802_v37  ;;  %v859_v42 = vadd.f32 %v858_v23, %v1659_v29  ;;  %v890_v27 = vpop.f32.mrb[35].mxu1 }
 0x13b   :  { %v994_v30 = vmax.f32 %v978_v17, 0.0  ;;  %v984_v28 = vadd.f32 %v1682_v9, %v888_v18  ;;  %v979_v31 = vadd.f32 %v1682_v9, %v867_v19  ;;  %v891_v32 = vadd.f32 %v890_v27, %v1673_v21 }
 0x13c   :  { %v1002_v20 = vmax.f32 %v986_v24, 0.0  ;;  %v992_v33 = vmax.f32 %v976_v25, 0.0  ;;  %v987_v43 = vadd.f32 %v1682_v9, %v899_v26  ;;  %v977_v34 = vadd.f32 %v1682_v9, %v859_v42 }
 0x13d   :  { %1010 = vst [vmem:[%s1762_s3 + $0x10] sm:$0xff] %v994_v30  ;;  %v1000_v35 = vmax.f32 %v984_v28, 0.0  ;;  %v995_v29 = vmax.f32 %v979_v31, 0.0  ;;  %v985_v36 = vadd.f32 %v1682_v9, %v891_v32 }
 0x13e   :  { %1018 = vst [vmem:[%s1762_s3 + $0x50] sm:$0xff] %v1002_v20  ;;  %1008 = vst [vmem:[%s1762_s3] sm:$0xff] %v992_v33  ;;  %v1003_v21 = vmax.f32 %v987_v43, 0.0  ;;  %v993_v37 = vmax.f32 %v977_v34, 0.0  ;;  %v1275_v38 = vpop.f32.mrb[36].mxu0 }
 0x13f   :  { %1016 = vst [vmem:[%s1762_s3 + $0x40] sm:$0xff] %v1000_v35  ;;  %1011 = vst [vmem:[%s1762_s3 + $0x18] sm:$0xff] %v995_v29  ;;  %v1001_v39 = vmax.f32 %v985_v36, 0.0  ;;  %v880_v40 = vadd.f32 %v1275_v38, %v1669_v6  ;;  %v1283_v41 = vpop.f32.mrb[36].mxu1  ;;  %v871_v44 = vpop.f32.mrb[37].mxu0 }
 0x140   :  { %1019 = vst [vmem:[%s1762_s3 + $0x58] sm:$0xff] %v1003_v21  ;;  %1009 = vst [vmem:[%s1762_s3 + $0x8] sm:$0xff] %v993_v37  ;;  %v912_v45 = vadd.f32 %v1283_v41, %v815_v4  ;;  %v872_v46 = vadd.f32 %v871_v44, %v1665_v56  ;;  %v903_v47 = vpop.f32.mrb[37].mxu1  ;;  %v1276_v48 = vpop.f32.mrb[38].mxu0 }
 0x141   :  { %1017 = vst [vmem:[%s1762_s3 + $0x48] sm:$0xff] %v1001_v39  ;;  %v982_v6 = vadd.f32 %v1682_v9, %v880_v40  ;;  %v904_v49 = vadd.f32 %v903_v47, %v1675_v52  ;;  %v883_v50 = vadd.f32 %v1276_v48, %v1671_v7  ;;  %v1284_v51 = vpop.f32.mrb[38].mxu1  ;;  %v874_v54 = vpop.f32.mrb[39].mxu0 }
 0x142   :  { %v990_v55 = vadd.f32 %v1682_v9, %v912_v45  ;;  %v980_v58 = vadd.f32 %v1682_v9, %v872_v46  ;;  %v915_v59 = vadd.f32 %v1284_v51, %v818_v5  ;;  %v875_v56 = vadd.f32 %v874_v54, %v1667_v57  ;;  %v906_v60 = vpop.f32.mrb[39].mxu1 }
 0x143   :  { %v998_v61 = vmax.f32 %v982_v6, 0.0  ;;  %v988_v62 = vadd.f32 %v1682_v9, %v904_v49  ;;  %v983_v63 = vadd.f32 %v1682_v9, %v883_v50  ;;  %v907_v0 = vadd.f32 %v906_v60, %v1677_v53 }
 0x144   :  { %v1006_v52 = vmax.f32 %v990_v55, 0.0  ;;  %v996_v1 = vmax.f32 %v980_v58, 0.0  ;;  %v991_v7 = vadd.f32 %v1682_v9, %v915_v59  ;;  %v981_v2 = vadd.f32 %v1682_v9, %v875_v56 }
 0x145   :  { %1014 = vst [vmem:[%s1762_s3 + $0x30] sm:$0xff] %v998_v61  ;;  %v1004_v3 = vmax.f32 %v988_v62, 0.0  ;;  %v999_v57 = vmax.f32 %v983_v63, 0.0  ;;  %v989_v4 = vadd.f32 %v1682_v9, %v907_v0 }
 0x146   :  { %1022 = vst [vmem:[%s1762_s3 + $0x70] sm:$0xff] %v1006_v52  ;;  %1012 = vst [vmem:[%s1762_s3 + $0x20] sm:$0xff] %v996_v1  ;;  %v1007_v53 = vmax.f32 %v991_v7, 0.0  ;;  %v997_v5 = vmax.f32 %v981_v2, 0.0 }
 0x147   :  { %1020 = vst [vmem:[%s1762_s3 + $0x60] sm:$0xff] %v1004_v3  ;;  %1015 = vst [vmem:[%s1762_s3 + $0x38] sm:$0xff] %v999_v57  ;;  %v1005_v8 = vmax.f32 %v989_v4, 0.0 }
 0x148   :  { %1023 = vst [vmem:[%s1762_s3 + $0x78] sm:$0xff] %v1007_v53  ;;  %1013 = vst [vmem:[%s1762_s3 + $0x28] sm:$0xff] %v997_v5 }
 0x149   :  { %1021 = vst [vmem:[%s1762_s3 + $0x68] sm:$0xff] %v1005_v8 }

// kernel: resnet18_forward.25
= control target key start
LH: loop header
LB: loop body
LE: loop exit
PB: predicated region body
PF: predicated region fallthrough
CT: control target
= control target key end

     0   :  { %s1850_s1 = inlined_call_operand.vmem [shape: bf16[640,128], index: 1, kind: input, shape index: {}]   ;;  %s1851_s0 = inlined_call_operand.vmem [shape: bf16[128,640], index: 0, kind: input, shape index: {}]   ;;  %s1852_s2 = inlined_call_operand.vmem [shape: f32[1,128], index: 2, kind: input, shape index: {}]   ;;  %s1853_s3 = inlined_call_operand.vmem [shape: f32[128,128], index: 3, kind: input, shape index: {}]   ;;  %s1854_s4 = inlined_call_operand.vmem [shape: f32[128,128], index: 4, kind: output, shape index: {}]  }
   0x1   :  { %v1336_v0 = vld [vmem:[%s1850_s1 + $0x40] sm:$0xff]   ;;  %v1340_v4 = vld [vmem:[%s1850_s1 + $0x48] sm:$0xff]   ;;  %v1344_v8 = vld [vmem:[%s1850_s1 + $0x50] sm:$0xff]  }
   0x2   :  { %v1337_v1 = vld [vmem:[%s1850_s1 + $0xc0] sm:$0xff]   ;;  %1144 = vmatprep.subr.bf16.mxu0 %v1336_v0  ;;  %v1341_v5 = vld [vmem:[%s1850_s1 + $0xc8] sm:$0xff]   ;;  %v1345_v9 = vld [vmem:[%s1850_s1 + $0xd0] sm:$0xff]  }
   0x3   :  { %v1338_v2 = vld [vmem:[%s1850_s1] sm:$0xff]   ;;  %1208 = vmatprep.subr.bf16.mxu1 %v1337_v1  ;;  %v1342_v6 = vld [vmem:[%s1850_s1 + $0x8] sm:$0xff]   ;;  %v1346_v10 = vld [vmem:[%s1850_s1 + $0x10] sm:$0xff]  }
   0x4   :  { %v1339_v3 = vld [vmem:[%s1850_s1 + $0x80] sm:$0xff]   ;;  %1145 = vmatpush3.bf16.msra.mxu0 %v1338_v2  ;;  %v1343_v7 = vld [vmem:[%s1850_s1 + $0x88] sm:$0xff]   ;;  %v1347_v11 = vld [vmem:[%s1850_s1 + $0x90] sm:$0xff]  }
   0x5   :  { %1209 = vmatpush3.bf16.msra.mxu1 %v1339_v3  ;;  %1146 = vmatprep.subr.bf16.mxu0 %v1340_v4  ;;  %v1348_v12 = vld [vmem:[%s1850_s1 + $0x58] sm:$0xff]   ;;  %v1352_v16 = vld [vmem:[%s1850_s1 + $0x60] sm:$0xff]   ;;  %v1356_v20 = vld [vmem:[%s1850_s1 + $0x68] sm:$0xff]  }
   0x6   :  { %1210 = vmatprep.subr.bf16.mxu1 %v1341_v5  ;;  %v1349_v13 = vld [vmem:[%s1850_s1 + $0xd8] sm:$0xff]   ;;  %v1353_v17 = vld [vmem:[%s1850_s1 + $0xe0] sm:$0xff]   ;;  %v1357_v21 = vld [vmem:[%s1850_s1 + $0xe8] sm:$0xff]  }
   0x7   :  { %v1350_v14 = vld [vmem:[%s1850_s1 + $0x18] sm:$0xff]   ;;  %v1354_v18 = vld [vmem:[%s1850_s1 + $0x20] sm:$0xff]   ;;  %v1358_v22 = vld [vmem:[%s1850_s1 + $0x28] sm:$0xff]  }
   0x8   :  { %1147 = vmatpush3.bf16.msra.mxu0 %v1342_v6  ;;  %v1351_v15 = vld [vmem:[%s1850_s1 + $0x98] sm:$0xff]   ;;  %v1355_v19 = vld [vmem:[%s1850_s1 + $0xa0] sm:$0xff]   ;;  %v1359_v23 = vld [vmem:[%s1850_s1 + $0xa8] sm:$0xff]  }
   0x9   :  { %1211 = vmatpush3.bf16.msra.mxu1 %v1343_v7  ;;  %1148 = vmatprep.subr.bf16.mxu0 %v1344_v8  ;;  %v1360_v24 = vld [vmem:[%s1850_s1 + $0x70] sm:$0xff]   ;;  %v1364_v28 = vld [vmem:[%s1850_s1 + $0x78] sm:$0xff]   ;;  %v1373_v35 = vld [vmem:[%s1851_s0 + $0xc] ss:$20 sps:$4 sm:$0xff]  }
   0xa   :  { %1212 = vmatprep.subr.bf16.mxu1 %v1345_v9  ;;  %v1361_v25 = vld [vmem:[%s1850_s1 + $0xf0] sm:$0xff]   ;;  %v1365_v29 = vld [vmem:[%s1850_s1 + $0xf8] sm:$0xff]   ;;  %v1374_v36 = vld [vmem:[%s1850_s1 + $0x100] sm:$0xff]   ;;  %759 = vmatprep.mubr.bf16.mxu1 %v1373_v35 }
   0xb   :  { %v1362_v26 = vld [vmem:[%s1850_s1 + $0x30] sm:$0xff]   ;;  %v1366_v30 = vld [vmem:[%s1850_s1 + $0x38] sm:$0xff]   ;;  %v1375_v37 = vld [vmem:[%s1851_s0 + $0x2c] ss:$20 sps:$4 sm:$0xff]  }
   0xc   :  { %1149 = vmatpush3.bf16.msra.mxu0 %v1346_v10  ;;  %v1363_v27 = vld [vmem:[%s1850_s1 + $0xb0] sm:$0xff]   ;;  %v1367_v31 = vld [vmem:[%s1850_s1 + $0xb8] sm:$0xff]   ;;  %v1381_v39 = vld [vmem:[%s1850_s1 + $0x108] sm:$0xff]  }
   0xd   :  { %1213 = vmatpush3.bf16.msra.mxu1 %v1347_v11  ;;  %1150 = vmatprep.subr.bf16.mxu0 %v1348_v12  ;;  %v1368_v32 = vld [vmem:[%s1851_s0] ss:$20 sps:$4 sm:$0xff]   ;;  %v1370_v33 = vld [vmem:[%s1851_s0 + $0x4] ss:$20 sps:$4 sm:$0xff]   ;;  %v1371_v34 = vld [vmem:[%s1851_s0 + $0x8] ss:$20 sps:$4 sm:$0xff]  }
   0xe   :  { %1214 = vmatprep.subr.bf16.mxu1 %v1349_v13  ;;  %662 = vmatprep.mubr.bf16.mxu0 %v1370_v33  ;;  %v1377_v38 = vld [vmem:[%s1851_s0 + $0x34] ss:$20 sps:$4 sm:$0xff]   ;;  %v1380_v41 = vld [vmem:[%s1851_s0 + $0x30] ss:$20 sps:$4 sm:$0xff]   ;;  %v1395_v45 = vld [vmem:[%s1850_s1 + $0x118] sm:$0xff]  }
   0xf   :  { %v1379_v40 = vld [vmem:[%s1851_s0 + $0x28] ss:$20 sps:$4 sm:$0xff]   ;;  %v1388_v44 = vld [vmem:[%s1850_s1 + $0x110] sm:$0xff]   ;;  %v1387_v47 = vld [vmem:[%s1851_s0 + $0x58] ss:$20 sps:$4 sm:$0xff]  }
  0x10   :  { %1151 = vmatpush3.bf16.msra.mxu0 %v1350_v14  ;;  %v1382_v42 = vld [vmem:[%s1851_s0 + $0x54] ss:$20 sps:$4 sm:$0xff]   ;;  %v1384_v43 = vld [vmem:[%s1851_s0 + $0x5c] ss:$20 sps:$4 sm:$0xff]   ;;  %v1391_v49 = vld [vmem:[%s1851_s0 + $0x84] ss:$20 sps:$4 sm:$0xff]  }
  0x11   :  { %1215 = vmatpush3.bf16.msra.mxu1 %v1351_v15  ;;  %1152 = vmatprep.subr.bf16.mxu0 %v1352_v16  ;;  %v1386_v46 = vld [vmem:[%s1851_s0 + $0x50] ss:$20 sps:$4 sm:$0xff]   ;;  %v1409_v51 = vld [vmem:[%s1850_s1 + $0x128] sm:$0xff]   ;;  %v1394_v53 = vld [vmem:[%s1851_s0 + $0x80] ss:$20 sps:$4 sm:$0xff]  }
  0x12   :  { %1216 = vmatprep.subr.bf16.mxu1 %v1353_v17  ;;  %v1389_v48 = vld [vmem:[%s1851_s0 + $0x7c] ss:$20 sps:$4 sm:$0xff]   ;;  %v1402_v50 = vld [vmem:[%s1850_s1 + $0x120] sm:$0xff]   ;;  %v1393_v52 = vld [vmem:[%s1851_s0 + $0x78] ss:$20 sps:$4 sm:$0xff]  }
  0x13   :  { %v1396_v54 = vld [vmem:[%s1851_s0 + $0xa4] ss:$20 sps:$4 sm:$0xff]   ;;  %v1416_v55 = vld [vmem:[%s1850_s1 + $0x130] sm:$0xff]   ;;  %v1398_v56 = vld [vmem:[%s1851_s0 + $0xac] ss:$20 sps:$4 sm:$0xff]  }
  0x14   :  { %1153 = vmatpush3.bf16.msra.mxu0 %v1354_v18  ;;  %v1423_v57 = vld [vmem:[%s1850_s1 + $0x138] sm:$0xff]   ;;  %v1400_v58 = vld [vmem:[%s1851_s0 + $0xa0] ss:$20 sps:$4 sm:$0xff]   ;;  %v1408_v63 = vld [vmem:[%s1851_s0 + $0xd0] ss:$20 sps:$4 sm:$0xff]  }
  0x15   :  { %1217 = vmatpush3.bf16.msra.mxu1 %v1355_v19  ;;  %1154 = vmatprep.subr.bf16.mxu0 %v1356_v20  ;;  %v1401_v59 = vld [vmem:[%s1851_s0 + $0xa8] ss:$20 sps:$4 sm:$0xff]   ;;  %v1403_v60 = vld [vmem:[%s1851_s0 + $0xcc] ss:$20 sps:$4 sm:$0xff]   ;;  %v1414_v2 = vld [vmem:[%s1851_s0 + $0xf0] ss:$20 sps:$4 sm:$0xff]  }
  0x16   :  { %1218 = vmatprep.subr.bf16.mxu1 %v1357_v21  ;;  %v1405_v61 = vld [vmem:[%s1851_s0 + $0xd4] ss:$20 sps:$4 sm:$0xff]   ;;  %v1412_v1 = vld [vmem:[%s1851_s0 + $0xfc] ss:$20 sps:$4 sm:$0xff]   ;;  %v1415_v3 = vld [vmem:[%s1851_s0 + $0xf8] ss:$20 sps:$4 sm:$0xff]  }
  0x17   :  { %v1407_v62 = vld [vmem:[%s1851_s0 + $0xc8] ss:$20 sps:$4 sm:$0xff]   ;;  %v1419_v5 = vld [vmem:[%s1851_s0 + $0x124] ss:$20 sps:$4 sm:$0xff]   ;;  %v1422_v7 = vld [vmem:[%s1851_s0 + $0x120] ss:$20 sps:$4 sm:$0xff]  }
  0x18   :  { %1155 = vmatpush3.bf16.msra.mxu0 %v1358_v22  ;;  %v1410_v0 = vld [vmem:[%s1851_s0 + $0xf4] ss:$20 sps:$4 sm:$0xff]   ;;  %v1417_v4 = vld [vmem:[%s1851_s0 + $0x11c] ss:$20 sps:$4 sm:$0xff]   ;;  %v1421_v6 = vld [vmem:[%s1851_s0 + $0x118] ss:$20 sps:$4 sm:$0xff]  }
  0x19   :  { %1219 = vmatpush3.bf16.msra.mxu1 %v1359_v23  ;;  %1156 = vmatprep.subr.bf16.mxu0 %v1360_v24  ;;  %v1424_v8 = vld [vmem:[%s1851_s0 + $0x10] ss:$20 sps:$4 sm:$0xff]   ;;  %v1426_v10 = vld [vmem:[%s1851_s0 + $0x38] ss:$20 sps:$4 sm:$0xff]   ;;  %v1428_v12 = vld [vmem:[%s1851_s0 + $0x60] ss:$20 sps:$4 sm:$0xff]  }
  0x1a   :  { %1220 = vmatprep.subr.bf16.mxu1 %v1361_v25  ;;  %v1425_v9 = vld [vmem:[%s1851_s0 + $0xb0] ss:$20 sps:$4 sm:$0xff]   ;;  %v1427_v11 = vld [vmem:[%s1851_s0 + $0xd8] ss:$20 sps:$4 sm:$0xff]   ;;  %v1429_v13 = vld [vmem:[%s1851_s0 + $0x100] ss:$20 sps:$4 sm:$0xff]  }
  0x1b   :  { %v1430_v14 = vld [vmem:[%s1851_s0 + $0x88] ss:$20 sps:$4 sm:$0xff]  }
  0x1c   :  { %1157 = vmatpush3.bf16.msra.mxu0 %v1362_v26  ;;  %v1431_v15 = vld [vmem:[%s1851_s0 + $0x128] ss:$20 sps:$4 sm:$0xff]  }
  0x1d   :  { %1221 = vmatpush3.bf16.msra.mxu1 %v1363_v27  ;;  %1158 = vmatprep.subr.bf16.mxu0 %v1364_v28 }
  0x1e   :  { %1222 = vmatprep.subr.bf16.mxu1 %v1365_v29 }
  0x20   :  { %1159 = vmatpush3.bf16.msra.mxu0 %v1366_v30 }
  0x21   :  { %1223 = vmatpush3.bf16.msra.mxu1 %v1367_v31  ;;  %1288 = vmatprep.subr.bf16.mxu0 %v1374_v36 }
  0x22   :  { %1320 = vmatprep.subr.bf16.mxu1 %v1374_v36 }
  0x23   :  { %663 = vmatmul.mubr.bf16.vlgmr.msra.gmra.mrb[0].mxu0 %v1368_v32 }
  0x24   :  { %760 = vmatmul.mubr.bf16.vlgmr.msra.gmra.mrb[0].mxu1 %v1371_v34  ;;  %1289 = vmatpush3.bf16.msra.mxu0 %v1374_v36 }
  0x25   :  { %1328 = vmatpush3.bf16.msra.mxu1 %v1374_v36  ;;  %670 = vmatprep.mubr.bf16.mxu0 %v1375_v37 }
  0x26   :  { %767 = vmatprep.mubr.bf16.mxu1 %v1377_v38  ;;  %1290 = vmatprep.subr.bf16.mxu0 %v1381_v39 }
  0x27   :  { %1321 = vmatprep.subr.bf16.mxu1 %v1381_v39 }
  0x28   :  { %1291 = vmatpush3.bf16.msra.mxu0 %v1381_v39 }
  0x29   :  { %1329 = vmatpush3.bf16.msra.mxu1 %v1381_v39  ;;  %1292 = vmatprep.subr.bf16.mxu0 %v1388_v44 }
  0x2a   :  { %1322 = vmatprep.subr.bf16.mxu1 %v1388_v44 }
  0x2b   :  { %671 = vmatmul.mubr.bf16.gmra.mrb[4].mxu0 %v1379_v40 }
  0x2c   :  { %768 = vmatmul.mubr.bf16.gmra.mrb[4].mxu1 %v1380_v41  ;;  %678 = vmatprep.mubr.bf16.mxu0 %v1382_v42 }
  0x2d   :  { %775 = vmatprep.mubr.bf16.mxu1 %v1384_v43  ;;  %1293 = vmatpush3.bf16.msra.mxu0 %v1388_v44 }
  0x2e   :  { %1330 = vmatpush3.bf16.msra.mxu1 %v1388_v44  ;;  %1294 = vmatprep.subr.bf16.mxu0 %v1395_v45 }
  0x2f   :  { %1323 = vmatprep.subr.bf16.mxu1 %v1395_v45 }
  0x31   :  { %1295 = vmatpush3.bf16.msra.mxu0 %v1395_v45 }
  0x32   :  { %1331 = vmatpush3.bf16.msra.mxu1 %v1395_v45  ;;  %1296 = vmatprep.subr.bf16.mxu0 %v1402_v50 }
  0x33   :  { %679 = vmatmul.mubr.bf16.gmra.mrb[8].mxu0 %v1386_v46  ;;  %1324 = vmatprep.subr.bf16.mxu1 %v1402_v50 }
  0x34   :  { %776 = vmatmul.mubr.bf16.gmra.mrb[8].mxu1 %v1387_v47  ;;  %686 = vmatprep.mubr.bf16.mxu0 %v1389_v48 }
  0x35   :  { %783 = vmatprep.mubr.bf16.mxu1 %v1391_v49  ;;  %1297 = vmatpush3.bf16.msra.mxu0 %v1402_v50 }
  0x36   :  { %1332 = vmatpush3.bf16.msra.mxu1 %v1402_v50  ;;  %1298 = vmatprep.subr.bf16.mxu0 %v1409_v51 }
  0x37   :  { %1325 = vmatprep.subr.bf16.mxu1 %v1409_v51 }
  0x39   :  { %1299 = vmatpush3.bf16.msra.mxu0 %v1409_v51 }
  0x3a   :  { %1333 = vmatpush3.bf16.msra.mxu1 %v1409_v51  ;;  %1300 = vmatprep.subr.bf16.mxu0 %v1416_v55 }
  0x3b   :  { %687 = vmatmul.mubr.bf16.gmra.mrb[12].mxu0 %v1393_v52  ;;  %1326 = vmatprep.subr.bf16.mxu1 %v1416_v55 }
  0x3c   :  { %784 = vmatmul.mubr.bf16.gmra.mrb[12].mxu1 %v1394_v53  ;;  %694 = vmatprep.mubr.bf16.mxu0 %v1396_v54 }
  0x3d   :  { %791 = vmatprep.mubr.bf16.mxu1 %v1398_v56  ;;  %1301 = vmatpush3.bf16.msra.mxu0 %v1416_v55 }
  0x3e   :  { %1334 = vmatpush3.bf16.msra.mxu1 %v1416_v55  ;;  %1302 = vmatprep.subr.bf16.mxu0 %v1423_v57 }
  0x3f   :  { %1327 = vmatprep.subr.bf16.mxu1 %v1423_v57 }
  0x41   :  { %1303 = vmatpush3.bf16.msra.mxu0 %v1423_v57 }
  0x42   :  { %1335 = vmatpush3.bf16.msra.mxu1 %v1423_v57 }
  0x43   :  { %695 = vmatmul.mubr.bf16.gmra.mrb[16].mxu0 %v1400_v58 }
  0x44   :  { %792 = vmatmul.mubr.bf16.gmra.mrb[16].mxu1 %v1401_v59  ;;  %702 = vmatprep.mubr.bf16.mxu0 %v1403_v60 }
  0x45   :  { %799 = vmatprep.mubr.bf16.mxu1 %v1405_v61 }
  0x4b   :  { %703 = vmatmul.mubr.bf16.gmra.mrb[20].mxu0 %v1407_v62 }
  0x4c   :  { %800 = vmatmul.mubr.bf16.gmra.mrb[20].mxu1 %v1408_v63  ;;  %710 = vmatprep.mubr.bf16.mxu0 %v1410_v0 }
  0x4d   :  { %807 = vmatprep.mubr.bf16.mxu1 %v1412_v1 }
  0x53   :  { %711 = vmatmul.mubr.bf16.gmra.mrb[24].mxu0 %v1414_v2 }
  0x54   :  { %808 = vmatmul.mubr.bf16.gmra.mrb[24].mxu1 %v1415_v3  ;;  %718 = vmatprep.mubr.bf16.mxu0 %v1417_v4 }
  0x55   :  { %815 = vmatprep.mubr.bf16.mxu1 %v1419_v5 }
  0x5b   :  { %719 = vmatmul.mubr.bf16.gmra.mrb[28].mxu0 %v1421_v6 }
  0x5c   :  { %816 = vmatmul.mubr.bf16.gmra.mrb[28].mxu1 %v1422_v7  ;;  %1304 = vmatprep.mubr.bf16.mxu0 %v1424_v8 }
  0x5d   :  { %1312 = vmatprep.mubr.bf16.mxu1 %v1425_v9 }
  0x63   :  { %1305 = vmatmul.mubr.bf16.vlgmr.msra.gmra.mrb[32].mxu0 %v1426_v10 }
  0x64   :  { %1313 = vmatmul.mubr.bf16.vlgmr.msra.gmra.mrb[32].mxu1 %v1427_v11  ;;  %1308 = vmatprep.mubr.bf16.mxu0 %v1428_v12 }
  0x65   :  { %1316 = vmatprep.mubr.bf16.mxu1 %v1429_v13 }
  0x6b   :  { %1309 = vmatmul.mubr.bf16.gmra.mrb[36].mxu0 %v1430_v14 }
  0x6c   :  { %1317 = vmatmul.mubr.bf16.gmra.mrb[36].mxu1 %v1431_v15 }
  0xf6   :  { %v1160_v16 = vpop.f32.mrb[0].mxu0 }
  0xf7   :  { %v1224_v17 = vpop.f32.mrb[0].mxu1  ;;  %v1161_v18 = vpop.f32.mrb[1].mxu0 }
  0xf8   :  { %v1162_v19 = vadd.f32 %v1161_v18, %v1160_v16  ;;  %v1225_v20 = vpop.f32.mrb[1].mxu1  ;;  %v1163_v21 = vpop.f32.mrb[2].mxu0 }
  0xf9   :  { %v1226_v22 = vadd.f32 %v1225_v20, %v1224_v17  ;;  %v1227_v23 = vpop.f32.mrb[2].mxu1  ;;  %v1164_v24 = vpop.f32.mrb[3].mxu0 }
  0xfa   :  { %v1165_v25 = vadd.f32 %v1164_v24, %v1163_v21  ;;  %v1228_v26 = vpop.f32.mrb[3].mxu1 }
  0xfb   :  { %v1229_v27 = vadd.f32 %v1228_v26, %v1227_v23  ;;  %v1697_v28 = vadd.f32 %v1226_v22, %v1162_v19 }
  0xfd   :  { %v1699_v29 = vadd.f32 %v1229_v27, %v1165_v25 }
  0xfe   :  { %v1166_v30 = vpop.f32.mrb[4].mxu0 }
  0xff   :  { %v1230_v31 = vpop.f32.mrb[4].mxu1  ;;  %v1167_v32 = vpop.f32.mrb[5].mxu0 }
 0x100   :  { %v1168_v33 = vadd.f32 %v1167_v32, %v1166_v30  ;;  %v1231_v34 = vpop.f32.mrb[5].mxu1  ;;  %v1169_v35 = vpop.f32.mrb[6].mxu0 }
 0x101   :  { %v1232_v36 = vadd.f32 %v1231_v34, %v1230_v31  ;;  %v1233_v37 = vpop.f32.mrb[6].mxu1  ;;  %v1170_v38 = vpop.f32.mrb[7].mxu0 }
 0x102   :  { %v1171_v39 = vadd.f32 %v1170_v38, %v1169_v35  ;;  %v1234_v40 = vpop.f32.mrb[7].mxu1 }
 0x103   :  { %v1235_v41 = vadd.f32 %v1234_v40, %v1233_v37  ;;  %v1701_v42 = vadd.f32 %v1232_v36, %v1168_v33 }
 0x105   :  { %v1703_v43 = vadd.f32 %v1235_v41, %v1171_v39 }
 0x106   :  { %v1172_v44 = vpop.f32.mrb[8].mxu0 }
 0x107   :  { %v1236_v45 = vpop.f32.mrb[8].mxu1  ;;  %v1173_v46 = vpop.f32.mrb[9].mxu0 }
 0x108   :  { %v1174_v47 = vadd.f32 %v1173_v46, %v1172_v44  ;;  %v1237_v48 = vpop.f32.mrb[9].mxu1  ;;  %v1175_v49 = vpop.f32.mrb[10].mxu0 }
 0x109   :  { %v1238_v50 = vadd.f32 %v1237_v48, %v1236_v45  ;;  %v1239_v51 = vpop.f32.mrb[10].mxu1  ;;  %v1176_v52 = vpop.f32.mrb[11].mxu0 }
 0x10a   :  { %v1177_v53 = vadd.f32 %v1176_v52, %v1175_v49  ;;  %v1240_v54 = vpop.f32.mrb[11].mxu1 }
 0x10b   :  { %v1241_v55 = vadd.f32 %v1240_v54, %v1239_v51  ;;  %v1705_v56 = vadd.f32 %v1238_v50, %v1174_v47 }
 0x10d   :  { %v1707_v57 = vadd.f32 %v1241_v55, %v1177_v53 }
 0x10e   :  { %v1178_v58 = vpop.f32.mrb[12].mxu0 }
 0x10f   :  { %v1242_v59 = vpop.f32.mrb[12].mxu1  ;;  %v1179_v60 = vpop.f32.mrb[13].mxu0 }
 0x110   :  { %v1180_v61 = vadd.f32 %v1179_v60, %v1178_v58  ;;  %v1243_v62 = vpop.f32.mrb[13].mxu1  ;;  %v1181_v63 = vpop.f32.mrb[14].mxu0 }
 0x111   :  { %v1244_v0 = vadd.f32 %v1243_v62, %v1242_v59  ;;  %v1245_v1 = vpop.f32.mrb[14].mxu1  ;;  %v1182_v2 = vpop.f32.mrb[15].mxu0 }
 0x112   :  { %v1183_v3 = vadd.f32 %v1182_v2, %v1181_v63  ;;  %v1246_v4 = vpop.f32.mrb[15].mxu1 }
 0x113   :  { %v1247_v5 = vadd.f32 %v1246_v4, %v1245_v1  ;;  %v1709_v6 = vadd.f32 %v1244_v0, %v1180_v61 }
 0x115   :  { %v1711_v7 = vadd.f32 %v1247_v5, %v1183_v3 }
 0x116   :  { %v1184_v8 = vpop.f32.mrb[16].mxu0 }
 0x117   :  { %v1248_v9 = vpop.f32.mrb[16].mxu1  ;;  %v1185_v10 = vpop.f32.mrb[17].mxu0 }
 0x118   :  { %v1186_v11 = vadd.f32 %v1185_v10, %v1184_v8  ;;  %v1249_v12 = vpop.f32.mrb[17].mxu1  ;;  %v1187_v13 = vpop.f32.mrb[18].mxu0 }
 0x119   :  { %v1250_v14 = vadd.f32 %v1249_v12, %v1248_v9  ;;  %v1251_v15 = vpop.f32.mrb[18].mxu1  ;;  %v1188_v16 = vpop.f32.mrb[19].mxu0  ;;  %v1724_v9 = vld [vmem:[%s1852_s2] ss:$0 sm:$0xff] }
 0x11a   :  { %v1189_v17 = vadd.f32 %v1188_v16, %v1187_v13  ;;  %v1252_v18 = vpop.f32.mrb[19].mxu1  ;;  %v997_v13 = vld [vmem:[%s1853_s3 + $0x10] sm:$0xff] }
 0x11b   :  { %v1253_v19 = vadd.f32 %v1252_v18, %v1251_v15  ;;  %v794_v20 = vadd.f32 %v1250_v14, %v1186_v11 }
 0x11d   :  { %v1713_v21 = vadd.f32 %v1253_v19, %v1189_v17  ;;  %v1005_v19 = vld [vmem:[%s1853_s3 + $0x50] sm:$0xff] }
 0x11e   :  { %v1190_v22 = vpop.f32.mrb[20].mxu0 }
 0x11f   :  { %v1254_v23 = vpop.f32.mrb[20].mxu1  ;;  %v1191_v24 = vpop.f32.mrb[21].mxu0 }
 0x120   :  { %v1192_v25 = vadd.f32 %v1191_v24, %v1190_v22  ;;  %v1255_v26 = vpop.f32.mrb[21].mxu1  ;;  %v1193_v27 = vpop.f32.mrb[22].mxu0 }
 0x121   :  { %v1256_v30 = vadd.f32 %v1255_v26, %v1254_v23  ;;  %v1257_v31 = vpop.f32.mrb[22].mxu1  ;;  %v1194_v32 = vpop.f32.mrb[23].mxu0 }
 0x122   :  { %v1195_v33 = vadd.f32 %v1194_v32, %v1193_v27  ;;  %v1258_v34 = vpop.f32.mrb[23].mxu1  ;;  %v1003_v27 = vld [vmem:[%s1853_s3 + $0x40] sm:$0xff] }
 0x123   :  { %v1259_v35 = vadd.f32 %v1258_v34, %v1257_v31  ;;  %v802_v36 = vadd.f32 %v1256_v30, %v1192_v25  ;;  %v998_v30 = vld [vmem:[%s1853_s3 + $0x18] sm:$0xff] }
 0x125   :  { %v805_v37 = vadd.f32 %v1259_v35, %v1195_v33  ;;  %v1006_v35 = vld [vmem:[%s1853_s3 + $0x58] sm:$0xff] }
 0x126   :  { %v1196_v38 = vpop.f32.mrb[24].mxu0 }
 0x127   :  { %v1260_v39 = vpop.f32.mrb[24].mxu1  ;;  %v1197_v40 = vpop.f32.mrb[25].mxu0 }
 0x128   :  { %v1198_v41 = vadd.f32 %v1197_v40, %v1196_v38  ;;  %v1261_v44 = vpop.f32.mrb[25].mxu1  ;;  %v1199_v45 = vpop.f32.mrb[26].mxu0 }
 0x129   :  { %v1262_v46 = vadd.f32 %v1261_v44, %v1260_v39  ;;  %v1263_v47 = vpop.f32.mrb[26].mxu1  ;;  %v1200_v48 = vpop.f32.mrb[27].mxu0 }
 0x12a   :  { %v1201_v49 = vadd.f32 %v1200_v48, %v1199_v45  ;;  %v1264_v50 = vpop.f32.mrb[27].mxu1 }
 0x12b   :  { %v1265_v51 = vadd.f32 %v1264_v50, %v1263_v47  ;;  %v1715_v52 = vadd.f32 %v1262_v46, %v1198_v41  ;;  %v1004_v41 = vld [vmem:[%s1853_s3 + $0x48] sm:$0xff] }
 0x12d   :  { %v1717_v53 = vadd.f32 %v1265_v51, %v1201_v49 }
 0x12e   :  { %v1202_v54 = vpop.f32.mrb[28].mxu0 }
 0x12f   :  { %v1266_v55 = vpop.f32.mrb[28].mxu1  ;;  %v1203_v58 = vpop.f32.mrb[29].mxu0 }
 0x130   :  { %v1204_v59 = vadd.f32 %v1203_v58, %v1202_v54  ;;  %v1267_v60 = vpop.f32.mrb[29].mxu1  ;;  %v1205_v61 = vpop.f32.mrb[30].mxu0 }
 0x131   :  { %v1268_v62 = vadd.f32 %v1267_v60, %v1266_v55  ;;  %v1269_v63 = vpop.f32.mrb[30].mxu1  ;;  %v1206_v0 = vpop.f32.mrb[31].mxu0 }
 0x132   :  { %v1207_v1 = vadd.f32 %v1206_v0, %v1205_v61  ;;  %v1270_v2 = vpop.f32.mrb[31].mxu1  ;;  %v1001_v0 = vld [vmem:[%s1853_s3 + $0x30] sm:$0xff] }
 0x133   :  { %v1271_v3 = vadd.f32 %v1270_v2, %v1269_v63  ;;  %v818_v4 = vadd.f32 %v1268_v62, %v1204_v59 }
 0x135   :  { %v1719_v5 = vadd.f32 %v1271_v3, %v1207_v1 }
 0x136   :  { %v1306_v8 = vpop.f32.mrb[32].mxu0 }
 0x137   :  { %v867_v10 = vadd.f32 %v1306_v8, %v1701_v42  ;;  %v1314_v11 = vpop.f32.mrb[32].mxu1  ;;  %v858_v12 = vpop.f32.mrb[33].mxu0  ;;  %v995_v42 = vld [vmem:[%s1853_s3] sm:$0xff] }
 0x138   :  { %v899_v14 = vadd.f32 %v1314_v11, %v802_v36  ;;  %v859_v15 = vadd.f32 %v858_v12, %v1697_v28  ;;  %v890_v16 = vpop.f32.mrb[33].mxu1  ;;  %v1307_v17 = vpop.f32.mrb[34].mxu0  ;;  %v996_v36 = vld [vmem:[%s1853_s3 + $0x8] sm:$0xff]  ;;  %v1009_v11 = vld [vmem:[%s1853_s3 + $0x70] sm:$0xff] }
 0x139   :  { %v981_v18 = vadd.f32 %v1724_v9, %v867_v10  ;;  %v891_v22 = vadd.f32 %v890_v16, %v794_v20  ;;  %v870_v23 = vadd.f32 %v1307_v17, %v1703_v43  ;;  %v1315_v24 = vpop.f32.mrb[34].mxu1  ;;  %v861_v25 = vpop.f32.mrb[35].mxu0 }
 0x13a   :  { %v989_v26 = vadd.f32 %v1724_v9, %v899_v14  ;;  %v979_v28 = vadd.f32 %v1724_v9, %v859_v15  ;;  %v902_v31 = vadd.f32 %v1315_v24, %v805_v37  ;;  %v862_v32 = vadd.f32 %v861_v25, %v1699_v29  ;;  %v893_v20 = vpop.f32.mrb[35].mxu1  ;;  %v1010_v24 = vld [vmem:[%s1853_s3 + $0x78] sm:$0xff] }
 0x13b   :  { %v1013_v33 = vadd.f32 %v997_v13, %v981_v18  ;;  %v987_v43 = vadd.f32 %v1724_v9, %v891_v22  ;;  %v982_v34 = vadd.f32 %v1724_v9, %v870_v23  ;;  %v894_v38 = vadd.f32 %v893_v20, %v1713_v21 }
 0x13c   :  { %v1021_v39 = vadd.f32 %v1005_v19, %v989_v26  ;;  %v1011_v37 = vadd.f32 %v995_v42, %v979_v28  ;;  %v990_v29 = vadd.f32 %v1724_v9, %v902_v31  ;;  %v980_v40 = vadd.f32 %v1724_v9, %v862_v32 }
 0x13d   :  { %v1029_v44 = vmax.f32 %v1013_v33, 0.0  ;;  %v1019_v45 = vadd.f32 %v1003_v27, %v987_v43  ;;  %v1014_v46 = vadd.f32 %v998_v30, %v982_v34  ;;  %v988_v47 = vadd.f32 %v1724_v9, %v894_v38  ;;  %v1008_v30 = vld [vmem:[%s1853_s3 + $0x68] sm:$0xff] }
 0x13e   :  { %v1037_v48 = vmax.f32 %v1021_v39, 0.0  ;;  %v1027_v49 = vmax.f32 %v1011_v37, 0.0  ;;  %v1022_v50 = vadd.f32 %v1006_v35, %v990_v29  ;;  %v1012_v51 = vadd.f32 %v996_v36, %v980_v40  ;;  %v1310_v21 = vpop.f32.mrb[36].mxu0 }
 0x13f   :  { %1045 = vst [vmem:[%s1854_s4 + $0x10] sm:$0xff] %v1029_v44  ;;  %v1035_v54 = vmax.f32 %v1019_v45, 0.0  ;;  %v1030_v55 = vmax.f32 %v1014_v46, 0.0  ;;  %v1020_v58 = vadd.f32 %v1004_v41, %v988_v47  ;;  %v883_v59 = vadd.f32 %v1310_v21, %v1709_v6  ;;  %v1318_v60 = vpop.f32.mrb[36].mxu1  ;;  %v874_v61 = vpop.f32.mrb[37].mxu0 }
 0x140   :  { %1053 = vst [vmem:[%s1854_s4 + $0x50] sm:$0xff] %v1037_v48  ;;  %1043 = vst [vmem:[%s1854_s4] sm:$0xff] %v1027_v49  ;;  %v1038_v62 = vmax.f32 %v1022_v50, 0.0  ;;  %v1028_v63 = vmax.f32 %v1012_v51, 0.0  ;;  %v915_v1 = vadd.f32 %v1318_v60, %v818_v4  ;;  %v875_v2 = vadd.f32 %v874_v61, %v1705_v56  ;;  %v906_v6 = vpop.f32.mrb[37].mxu1  ;;  %v1311_v3 = vpop.f32.mrb[38].mxu0  ;;  %v999_v56 = vld [vmem:[%s1853_s3 + $0x20] sm:$0xff] }
 0x141   :  { %1051 = vst [vmem:[%s1854_s4 + $0x40] sm:$0xff] %v1035_v54  ;;  %1046 = vst [vmem:[%s1854_s4 + $0x18] sm:$0xff] %v1030_v55  ;;  %v1036_v8 = vmax.f32 %v1020_v58, 0.0  ;;  %v985_v10 = vadd.f32 %v1724_v9, %v883_v59  ;;  %v907_v4 = vadd.f32 %v906_v6, %v1715_v52  ;;  %v886_v12 = vadd.f32 %v1311_v3, %v1711_v7  ;;  %v1319_v13 = vpop.f32.mrb[38].mxu1  ;;  %v877_v14 = vpop.f32.mrb[39].mxu0  ;;  %v1007_v52 = vld [vmem:[%s1853_s3 + $0x60] sm:$0xff] }
 0x142   :  { %1054 = vst [vmem:[%s1854_s4 + $0x58] sm:$0xff] %v1038_v62  ;;  %1044 = vst [vmem:[%s1854_s4 + $0x8] sm:$0xff] %v1028_v63  ;;  %v993_v15 = vadd.f32 %v1724_v9, %v915_v1  ;;  %v983_v16 = vadd.f32 %v1724_v9, %v875_v2  ;;  %v1002_v7 = vld [vmem:[%s1853_s3 + $0x38] sm:$0xff]  ;;  %v918_v17 = vadd.f32 %v1319_v13, %v1719_v5  ;;  %v909_v19 = vpop.f32.mrb[39].mxu1  ;;  %v1000_v5 = vld [vmem:[%s1853_s3 + $0x28] sm:$0xff] }
 0x143   :  { %v878_v18 = vadd.f32 %v877_v14, %v1707_v57  ;;  %1052 = vst [vmem:[%s1854_s4 + $0x48] sm:$0xff] %v1036_v8  ;;  %v1017_v42 = vadd.f32 %v1001_v0, %v985_v10  ;;  %v991_v22 = vadd.f32 %v1724_v9, %v907_v4  ;;  %v986_v23 = vadd.f32 %v1724_v9, %v886_v12 }
 0x144   :  { %v910_v57 = vadd.f32 %v909_v19, %v1717_v53  ;;  %v1025_v25 = vadd.f32 %v1009_v11, %v993_v15  ;;  %v1015_v26 = vadd.f32 %v999_v56, %v983_v16  ;;  %v994_v28 = vadd.f32 %v1724_v9, %v918_v17 }
 0x145   :  { %v984_v27 = vadd.f32 %v1724_v9, %v878_v18  ;;  %v1033_v31 = vmax.f32 %v1017_v42, 0.0  ;;  %v1023_v32 = vadd.f32 %v1007_v52, %v991_v22  ;;  %v1018_v20 = vadd.f32 %v1002_v7, %v986_v23 }
 0x146   :  { %v992_v33 = vadd.f32 %v1724_v9, %v910_v57  ;;  %v1041_v43 = vmax.f32 %v1025_v25, 0.0  ;;  %v1031_v34 = vmax.f32 %v1015_v26, 0.0  ;;  %v1026_v35 = vadd.f32 %v1010_v24, %v994_v28 }
 0x147   :  { %v1016_v36 = vadd.f32 %v1000_v5, %v984_v27  ;;  %1049 = vst [vmem:[%s1854_s4 + $0x30] sm:$0xff] %v1033_v31  ;;  %v1039_v53 = vmax.f32 %v1023_v32, 0.0  ;;  %v1034_v38 = vmax.f32 %v1018_v20, 0.0 }
 0x148   :  { %v1024_v39 = vadd.f32 %v1008_v30, %v992_v33  ;;  %1057 = vst [vmem:[%s1854_s4 + $0x70] sm:$0xff] %v1041_v43  ;;  %1047 = vst [vmem:[%s1854_s4 + $0x20] sm:$0xff] %v1031_v34  ;;  %v1042_v9 = vmax.f32 %v1026_v35, 0.0 }
 0x149   :  { %v1032_v37 = vmax.f32 %v1016_v36, 0.0  ;;  %1055 = vst [vmem:[%s1854_s4 + $0x60] sm:$0xff] %v1039_v53  ;;  %1050 = vst [vmem:[%s1854_s4 + $0x38] sm:$0xff] %v1034_v38 }
 0x14a   :  { %v1040_v29 = vmax.f32 %v1024_v39, 0.0  ;;  %1058 = vst [vmem:[%s1854_s4 + $0x78] sm:$0xff] %v1042_v9 }
 0x14b   :  { %1048 = vst [vmem:[%s1854_s4 + $0x28] sm:$0xff] %v1032_v37 }
 0x14c   :  { %1056 = vst [vmem:[%s1854_s4 + $0x68] sm:$0xff] %v1040_v29 }

// kernel: resnet18_forward.28
= control target key start
LH: loop header
LB: loop body
LE: loop exit
PB: predicated region body
PF: predicated region fallthrough
CT: control target
= control target key end

     0   :  { %s972_s1 = inlined_call_operand.vmem [shape: bf16[640,128], index: 1, kind: input, shape index: {}]   ;;  %s973_s0 = inlined_call_operand.vmem [shape: bf16[32,640], index: 0, kind: input, shape index: {}]   ;;  %s974_s2 = inlined_call_operand.vmem [shape: f32[1,128], index: 2, kind: input, shape index: {}]   ;;  %s975_s3 = inlined_call_operand.vmem [shape: f32[32,128], index: 3, kind: output, shape index: {}]  }
   0x1   :  { %v733_v0 = vld [vmem:[%s972_s1 + $0x40] sm:$0xff]   ;;  %v737_v4 = vld [vmem:[%s972_s1 + $0x48] sm:$0xff]   ;;  %v741_v8 = vld [vmem:[%s972_s1 + $0x50] sm:$0xff]  }
   0x2   :  { %v734_v1 = vld [vmem:[%s972_s1 + $0xc0] sm:$0xff]   ;;  %647 = vmatprep.subr.bf16.mxu0 %v733_v0  ;;  %v738_v5 = vld [vmem:[%s972_s1 + $0xc8] sm:$0xff]   ;;  %v742_v9 = vld [vmem:[%s972_s1 + $0xd0] sm:$0xff]  }
   0x3   :  { %v735_v2 = vld [vmem:[%s972_s1] sm:$0xff]   ;;  %675 = vmatprep.subr.bf16.mxu1 %v734_v1  ;;  %v739_v6 = vld [vmem:[%s972_s1 + $0x8] sm:$0xff]   ;;  %v743_v10 = vld [vmem:[%s972_s1 + $0x10] sm:$0xff]  }
   0x4   :  { %v736_v3 = vld [vmem:[%s972_s1 + $0x80] sm:$0xff]   ;;  %648 = vmatpush3.bf16.msra.mxu0 %v735_v2  ;;  %v740_v7 = vld [vmem:[%s972_s1 + $0x88] sm:$0xff]   ;;  %v744_v11 = vld [vmem:[%s972_s1 + $0x90] sm:$0xff]  }
   0x5   :  { %676 = vmatpush3.bf16.msra.mxu1 %v736_v3  ;;  %649 = vmatprep.subr.bf16.mxu0 %v737_v4  ;;  %v745_v12 = vld [vmem:[%s972_s1 + $0x58] sm:$0xff]   ;;  %v749_v16 = vld [vmem:[%s972_s1 + $0x60] sm:$0xff]   ;;  %v753_v20 = vld [vmem:[%s972_s1 + $0x68] sm:$0xff]  }
   0x6   :  { %677 = vmatprep.subr.bf16.mxu1 %v738_v5  ;;  %v746_v13 = vld [vmem:[%s972_s1 + $0xd8] sm:$0xff]   ;;  %v750_v17 = vld [vmem:[%s972_s1 + $0xe0] sm:$0xff]   ;;  %v754_v21 = vld [vmem:[%s972_s1 + $0xe8] sm:$0xff]  }
   0x7   :  { %v747_v14 = vld [vmem:[%s972_s1 + $0x18] sm:$0xff]   ;;  %v751_v18 = vld [vmem:[%s972_s1 + $0x20] sm:$0xff]   ;;  %v755_v22 = vld [vmem:[%s972_s1 + $0x28] sm:$0xff]  }
   0x8   :  { %650 = vmatpush3.bf16.msra.mxu0 %v739_v6  ;;  %v748_v15 = vld [vmem:[%s972_s1 + $0x98] sm:$0xff]   ;;  %v752_v19 = vld [vmem:[%s972_s1 + $0xa0] sm:$0xff]   ;;  %v756_v23 = vld [vmem:[%s972_s1 + $0xa8] sm:$0xff]  }
   0x9   :  { %678 = vmatpush3.bf16.msra.mxu1 %v740_v7  ;;  %651 = vmatprep.subr.bf16.mxu0 %v741_v8  ;;  %v757_v24 = vld [vmem:[%s972_s1 + $0x70] sm:$0xff]   ;;  %v761_v28 = vld [vmem:[%s972_s1 + $0x78] sm:$0xff]   ;;  %v770_v35 = vld [vmem:[%s973_s0 + $0xc] ss:$20 sps:$4 sm:$0xff]  }
   0xa   :  { %679 = vmatprep.subr.bf16.mxu1 %v742_v9  ;;  %v758_v25 = vld [vmem:[%s972_s1 + $0xf0] sm:$0xff]   ;;  %v762_v29 = vld [vmem:[%s972_s1 + $0xf8] sm:$0xff]   ;;  %v771_v36 = vld [vmem:[%s972_s1 + $0x100] sm:$0xff]   ;;  %492 = vmatprep.mubr.bf16.mxu1 %v770_v35 }
   0xb   :  { %v759_v26 = vld [vmem:[%s972_s1 + $0x30] sm:$0xff]   ;;  %v763_v30 = vld [vmem:[%s972_s1 + $0x38] sm:$0xff]   ;;  %v772_v37 = vld [vmem:[%s972_s1 + $0x108] sm:$0xff]  }
   0xc   :  { %652 = vmatpush3.bf16.msra.mxu0 %v743_v10  ;;  %v760_v27 = vld [vmem:[%s972_s1 + $0xb0] sm:$0xff]   ;;  %v764_v31 = vld [vmem:[%s972_s1 + $0xb8] sm:$0xff]   ;;  %v776_v39 = vld [vmem:[%s973_s0 + $0x2c] ss:$20 sps:$4 sm:$0xff]  }
   0xd   :  { %680 = vmatpush3.bf16.msra.mxu1 %v744_v11  ;;  %653 = vmatprep.subr.bf16.mxu0 %v745_v12  ;;  %v765_v32 = vld [vmem:[%s973_s0] ss:$20 sps:$4 sm:$0xff]   ;;  %v767_v33 = vld [vmem:[%s973_s0 + $0x4] ss:$20 sps:$4 sm:$0xff]   ;;  %v768_v34 = vld [vmem:[%s973_s0 + $0x8] ss:$20 sps:$4 sm:$0xff]  }
   0xe   :  { %681 = vmatprep.subr.bf16.mxu1 %v746_v13  ;;  %443 = vmatprep.mubr.bf16.mxu0 %v767_v33  ;;  %v773_v38 = vld [vmem:[%s972_s1 + $0x110] sm:$0xff]   ;;  %v774_v41 = vld [vmem:[%s972_s1 + $0x118] sm:$0xff]   ;;  %v775_v45 = vld [vmem:[%s972_s1 + $0x120] sm:$0xff]  }
   0xf   :  { %v778_v40 = vld [vmem:[%s973_s0 + $0x34] ss:$20 sps:$4 sm:$0xff]   ;;  %v782_v43 = vld [vmem:[%s973_s0 + $0x30] ss:$20 sps:$4 sm:$0xff]   ;;  %v784_v48 = vld [vmem:[%s972_s1 + $0x138] sm:$0xff]  }
  0x10   :  { %654 = vmatpush3.bf16.msra.mxu0 %v747_v14  ;;  %v781_v42 = vld [vmem:[%s973_s0 + $0x28] ss:$20 sps:$4 sm:$0xff]   ;;  %v785_v44 = vld [vmem:[%s973_s0 + $0x10] ss:$20 sps:$4 sm:$0xff]   ;;  %v786_v49 = vld [vmem:[%s973_s0 + $0x38] ss:$20 sps:$4 sm:$0xff]  }
  0x11   :  { %682 = vmatpush3.bf16.msra.mxu1 %v748_v15  ;;  %655 = vmatprep.subr.bf16.mxu0 %v749_v16  ;;  %v780_v46 = vld [vmem:[%s972_s1 + $0x128] sm:$0xff]   ;;  %v783_v47 = vld [vmem:[%s972_s1 + $0x130] sm:$0xff]   ;;  %v646_v15 = vld [vmem:[%s974_s2] ss:$0 sm:$0xff] }
  0x12   :  { %683 = vmatprep.subr.bf16.mxu1 %v750_v17 }
  0x14   :  { %656 = vmatpush3.bf16.msra.mxu0 %v751_v18 }
  0x15   :  { %684 = vmatpush3.bf16.msra.mxu1 %v752_v19  ;;  %657 = vmatprep.subr.bf16.mxu0 %v753_v20 }
  0x16   :  { %685 = vmatprep.subr.bf16.mxu1 %v754_v21 }
  0x18   :  { %658 = vmatpush3.bf16.msra.mxu0 %v755_v22 }
  0x19   :  { %686 = vmatpush3.bf16.msra.mxu1 %v756_v23  ;;  %659 = vmatprep.subr.bf16.mxu0 %v757_v24 }
  0x1a   :  { %687 = vmatprep.subr.bf16.mxu1 %v758_v25 }
  0x1c   :  { %660 = vmatpush3.bf16.msra.mxu0 %v759_v26 }
  0x1d   :  { %688 = vmatpush3.bf16.msra.mxu1 %v760_v27  ;;  %661 = vmatprep.subr.bf16.mxu0 %v761_v28 }
  0x1e   :  { %689 = vmatprep.subr.bf16.mxu1 %v762_v29 }
  0x20   :  { %662 = vmatpush3.bf16.msra.mxu0 %v763_v30 }
  0x21   :  { %690 = vmatpush3.bf16.msra.mxu1 %v764_v31  ;;  %713 = vmatprep.subr.bf16.mxu0 %v771_v36 }
  0x23   :  { %444 = vmatmul.mubr.bf16.vlgmr.msra.gmra.mrb[0].mxu0 %v765_v32 }
  0x24   :  { %493 = vmatmul.mubr.bf16.vlgmr.msra.gmra.mrb[0].mxu1 %v768_v34  ;;  %714 = vmatpush3.bf16.msra.mxu0 %v771_v36 }
  0x25   :  { %715 = vmatprep.subr.bf16.mxu0 %v772_v37  ;;  %451 = vmatprep.mubr.bf16.mxu0 %v776_v39 }
  0x26   :  { %500 = vmatprep.mubr.bf16.mxu1 %v778_v40 }
  0x28   :  { %716 = vmatpush3.bf16.msra.mxu0 %v772_v37 }
  0x29   :  { %717 = vmatprep.subr.bf16.mxu0 %v773_v38 }
  0x2b   :  { %452 = vmatmul.mubr.bf16.gmra.mrb[4].mxu0 %v781_v42 }
  0x2c   :  { %501 = vmatmul.mubr.bf16.gmra.mrb[4].mxu1 %v782_v43  ;;  %718 = vmatpush3.bf16.msra.mxu0 %v773_v38 }
  0x2d   :  { %719 = vmatprep.subr.bf16.mxu0 %v774_v41  ;;  %729 = vmatprep.mubr.bf16.mxu0 %v785_v44 }
  0x30   :  { %720 = vmatpush3.bf16.msra.mxu0 %v774_v41 }
  0x31   :  { %721 = vmatprep.subr.bf16.mxu0 %v775_v45 }
  0x34   :  { %722 = vmatpush3.bf16.msra.mxu0 %v775_v45 }
  0x35   :  { %723 = vmatprep.subr.bf16.mxu0 %v780_v46 }
  0x38   :  { %724 = vmatpush3.bf16.msra.mxu0 %v780_v46 }
  0x39   :  { %725 = vmatprep.subr.bf16.mxu0 %v783_v47 }
  0x3c   :  { %726 = vmatpush3.bf16.msra.mxu0 %v783_v47 }
  0x3d   :  { %727 = vmatprep.subr.bf16.mxu0 %v784_v48 }
  0x40   :  { %728 = vmatpush3.bf16.msra.mxu0 %v784_v48 }
  0x43   :  { %730 = vmatmul.mubr.bf16.vlgmr.msra.gmra.mrb[8].mxu0 %v786_v49 }
  0xf6   :  { %v663_v50 = vpop.f32.mrb[0].mxu0 }
  0xf7   :  { %v691_v51 = vpop.f32.mrb[0].mxu1  ;;  %v664_v52 = vpop.f32.mrb[1].mxu0 }
  0xf8   :  { %v665_v53 = vadd.f32 %v664_v52, %v663_v50  ;;  %v692_v54 = vpop.f32.mrb[1].mxu1  ;;  %v666_v55 = vpop.f32.mrb[2].mxu0 }
  0xf9   :  { %v693_v56 = vadd.f32 %v692_v54, %v691_v51  ;;  %v694_v57 = vpop.f32.mrb[2].mxu1  ;;  %v667_v58 = vpop.f32.mrb[3].mxu0 }
  0xfa   :  { %v668_v59 = vadd.f32 %v667_v58, %v666_v55  ;;  %v695_v60 = vpop.f32.mrb[3].mxu1 }
  0xfb   :  { %v696_v61 = vadd.f32 %v695_v60, %v694_v57  ;;  %v495_v62 = vadd.f32 %v693_v56, %v665_v53 }
  0xfd   :  { %v498_v63 = vadd.f32 %v696_v61, %v668_v59 }
  0xfe   :  { %v669_v0 = vpop.f32.mrb[4].mxu0 }
  0xff   :  { %v697_v1 = vpop.f32.mrb[4].mxu1  ;;  %v670_v2 = vpop.f32.mrb[5].mxu0 }
 0x100   :  { %v671_v3 = vadd.f32 %v670_v2, %v669_v0  ;;  %v698_v4 = vpop.f32.mrb[5].mxu1  ;;  %v672_v5 = vpop.f32.mrb[6].mxu0 }
 0x101   :  { %v699_v6 = vadd.f32 %v698_v4, %v697_v1  ;;  %v700_v7 = vpop.f32.mrb[6].mxu1  ;;  %v673_v8 = vpop.f32.mrb[7].mxu0 }
 0x102   :  { %v674_v9 = vadd.f32 %v673_v8, %v672_v5  ;;  %v701_v10 = vpop.f32.mrb[7].mxu1 }
 0x103   :  { %v702_v11 = vadd.f32 %v701_v10, %v700_v7  ;;  %v503_v12 = vadd.f32 %v699_v6, %v671_v3 }
 0x105   :  { %v506_v13 = vadd.f32 %v702_v11, %v674_v9 }
 0x116   :  { %v731_v14 = vpop.f32.mrb[8].mxu0 }
 0x117   :  { %v552_v16 = vadd.f32 %v731_v14, %v503_v12  ;;  %v543_v17 = vpop.f32.mrb[9].mxu0 }
 0x118   :  { %v544_v18 = vadd.f32 %v543_v17, %v495_v62  ;;  %v732_v19 = vpop.f32.mrb[10].mxu0 }
 0x119   :  { %v582_v20 = vadd.f32 %v646_v15, %v552_v16  ;;  %v555_v21 = vadd.f32 %v732_v19, %v506_v13  ;;  %v546_v22 = vpop.f32.mrb[11].mxu0 }
 0x11a   :  { %v580_v23 = vadd.f32 %v646_v15, %v544_v18  ;;  %v547_v24 = vadd.f32 %v546_v22, %v498_v63 }
 0x11b   :  { %v586_v25 = vmax.f32 %v582_v20, 0.0  ;;  %v583_v26 = vadd.f32 %v646_v15, %v555_v21 }
 0x11c   :  { %v584_v27 = vmax.f32 %v580_v23, 0.0  ;;  %v581_v28 = vadd.f32 %v646_v15, %v547_v24 }
 0x11d   :  { %590 = vst [vmem:[%s975_s3 + $0x10] sm:$0xff] %v586_v25  ;;  %v587_v29 = vmax.f32 %v583_v26, 0.0 }
 0x11e   :  { %588 = vst [vmem:[%s975_s3] sm:$0xff] %v584_v27  ;;  %v585_v30 = vmax.f32 %v581_v28, 0.0 }
 0x11f   :  { %591 = vst [vmem:[%s975_s3 + $0x18] sm:$0xff] %v587_v29 }
 0x120   :  { %589 = vst [vmem:[%s975_s3 + $0x8] sm:$0xff] %v585_v30 }

// kernel: resnet18_forward.29
= control target key start
LH: loop header
LB: loop body
LE: loop exit
PB: predicated region body
PF: predicated region fallthrough
CT: control target
= control target key end

     0   :  { %s306_s1 = inlined_call_operand.vmem [shape: bf16[128,128], index: 1, kind: input, shape index: {}]   ;;  %s307_s0 = inlined_call_operand.vmem [shape: bf16[32,128], index: 0, kind: input, shape index: {}]   ;;  %s308_s2 = inlined_call_operand.vmem [shape: f32[1,128], index: 2, kind: input, shape index: {}]   ;;  %s309_s3 = inlined_call_operand.vmem [shape: f32[32,128], index: 3, kind: output, shape index: {}]  }
   0x1   :  { %v231_v0 = vld [vmem:[%s306_s1] sm:$0xff]   ;;  %v232_v1 = vld [vmem:[%s306_s1 + $0x8] sm:$0xff]   ;;  %v233_v2 = vld [vmem:[%s306_s1 + $0x10] sm:$0xff]  }
   0x2   :  { %211 = vmatprep.subr.bf16.mxu0 %v231_v0  ;;  %v234_v3 = vld [vmem:[%s306_s1 + $0x18] sm:$0xff]   ;;  %v239_v4 = vld [vmem:[%s307_s0] sm:$0xff]   ;;  %v236_v6 = vld [vmem:[%s306_s1 + $0x28] sm:$0xff]  }
   0x3   :  { %212 = vmatpush3.bf16.msra.mxu0 %v231_v0  ;;  %227 = vmatprep.mubr.bf16.mxu0 %v239_v4  ;;  %v235_v5 = vld [vmem:[%s306_s1 + $0x20] sm:$0xff]   ;;  %v237_v7 = vld [vmem:[%s306_s1 + $0x30] sm:$0xff]   ;;  %v238_v8 = vld [vmem:[%s306_s1 + $0x38] sm:$0xff]  }
   0x4   :  { %213 = vmatprep.subr.bf16.mxu0 %v232_v1  ;;  %v240_v9 = vld [vmem:[%s307_s0 + $0x8] sm:$0xff]   ;;  %v200_v10 = vld [vmem:[%s308_s2] ss:$0 sm:$0xff] }
   0x7   :  { %214 = vmatpush3.bf16.msra.mxu0 %v232_v1 }
   0x8   :  { %215 = vmatprep.subr.bf16.mxu0 %v233_v2 }
   0xb   :  { %216 = vmatpush3.bf16.msra.mxu0 %v233_v2 }
   0xc   :  { %217 = vmatprep.subr.bf16.mxu0 %v234_v3 }
   0xf   :  { %218 = vmatpush3.bf16.msra.mxu0 %v234_v3 }
  0x10   :  { %219 = vmatprep.subr.bf16.mxu0 %v235_v5 }
  0x13   :  { %220 = vmatpush3.bf16.msra.mxu0 %v235_v5 }
  0x14   :  { %221 = vmatprep.subr.bf16.mxu0 %v236_v6 }
  0x17   :  { %222 = vmatpush3.bf16.msra.mxu0 %v236_v6 }
  0x18   :  { %223 = vmatprep.subr.bf16.mxu0 %v237_v7 }
  0x1b   :  { %224 = vmatpush3.bf16.msra.mxu0 %v237_v7 }
  0x1c   :  { %225 = vmatprep.subr.bf16.mxu0 %v238_v8 }
  0x1f   :  { %226 = vmatpush3.bf16.msra.mxu0 %v238_v8 }
  0x22   :  { %228 = vmatmul.mubr.bf16.vlgmr.msra.gmra.mrb[0].mxu0 %v240_v9 }
  0xf5   :  { %v229_v11 = vpop.f32.mrb[0].mxu0 }
  0xf6   :  { %v180_v12 = vadd.f32 %v229_v11, %v200_v10  ;;  %v141_v13 = vpop.f32.mrb[1].mxu0 }
  0xf7   :  { %v178_v14 = vadd.f32 %v200_v10, %v141_v13  ;;  %v230_v15 = vpop.f32.mrb[2].mxu0 }
  0xf8   :  { %184 = vst [vmem:[%s309_s3 + $0x10] sm:$0xff] %v180_v12  ;;  %v181_v16 = vadd.f32 %v230_v15, %v200_v10  ;;  %v144_v17 = vpop.f32.mrb[3].mxu0 }
  0xf9   :  { %182 = vst [vmem:[%s309_s3] sm:$0xff] %v178_v14  ;;  %v179_v18 = vadd.f32 %v200_v10, %v144_v17 }
  0xfa   :  { %185 = vst [vmem:[%s309_s3 + $0x18] sm:$0xff] %v181_v16 }
  0xfb   :  { %183 = vst [vmem:[%s309_s3 + $0x8] sm:$0xff] %v179_v18 }

// kernel: resnet18_forward.30
= control target key start
LH: loop header
LB: loop body
LE: loop exit
PB: predicated region body
PF: predicated region fallthrough
CT: control target
= control target key end

     0   :  { %s1662_s1 = inlined_call_operand.vmem [shape: bf16[1152,128], index: 1, kind: input, shape index: {}]   ;;  %s1663_s0 = inlined_call_operand.vmem [shape: bf16[32,1152], index: 0, kind: input, shape index: {}]   ;;  %s1664_s2 = inlined_call_operand.vmem [shape: f32[1,128], index: 2, kind: input, shape index: {}]   ;;  %s1665_s3 = inlined_call_operand.vmem [shape: f32[32,128], index: 3, kind: input, shape index: {}]   ;;  %s1666_s4 = inlined_call_operand.vmem [shape: f32[32,128], index: 4, kind: output, shape index: {}]  }
   0x1   :  { %v1242_v0 = vld [vmem:[%s1662_s1 + $0x40] sm:$0xff]   ;;  %v1246_v4 = vld [vmem:[%s1662_s1 + $0x48] sm:$0xff]   ;;  %v1250_v8 = vld [vmem:[%s1662_s1 + $0x50] sm:$0xff]  }
   0x2   :  { %v1243_v1 = vld [vmem:[%s1662_s1 + $0xc0] sm:$0xff]   ;;  %1100 = vmatprep.subr.bf16.mxu0 %v1242_v0  ;;  %v1247_v5 = vld [vmem:[%s1662_s1 + $0xc8] sm:$0xff]   ;;  %v1251_v9 = vld [vmem:[%s1662_s1 + $0xd0] sm:$0xff]  }
   0x3   :  { %v1244_v2 = vld [vmem:[%s1662_s1] sm:$0xff]   ;;  %1128 = vmatprep.subr.bf16.mxu1 %v1243_v1  ;;  %v1248_v6 = vld [vmem:[%s1662_s1 + $0x8] sm:$0xff]   ;;  %v1252_v10 = vld [vmem:[%s1662_s1 + $0x10] sm:$0xff]  }
   0x4   :  { %v1245_v3 = vld [vmem:[%s1662_s1 + $0x80] sm:$0xff]   ;;  %1101 = vmatpush3.bf16.msra.mxu0 %v1244_v2  ;;  %v1249_v7 = vld [vmem:[%s1662_s1 + $0x88] sm:$0xff]   ;;  %v1253_v11 = vld [vmem:[%s1662_s1 + $0x90] sm:$0xff]  }
   0x5   :  { %1129 = vmatpush3.bf16.msra.mxu1 %v1245_v3  ;;  %1102 = vmatprep.subr.bf16.mxu0 %v1246_v4  ;;  %v1254_v12 = vld [vmem:[%s1662_s1 + $0x58] sm:$0xff]   ;;  %v1258_v16 = vld [vmem:[%s1662_s1 + $0x60] sm:$0xff]   ;;  %v1262_v20 = vld [vmem:[%s1662_s1 + $0x68] sm:$0xff]  }
   0x6   :  { %1130 = vmatprep.subr.bf16.mxu1 %v1247_v5  ;;  %v1255_v13 = vld [vmem:[%s1662_s1 + $0xd8] sm:$0xff]   ;;  %v1259_v17 = vld [vmem:[%s1662_s1 + $0xe0] sm:$0xff]   ;;  %v1263_v21 = vld [vmem:[%s1662_s1 + $0xe8] sm:$0xff]  }
   0x7   :  { %v1256_v14 = vld [vmem:[%s1662_s1 + $0x18] sm:$0xff]   ;;  %v1260_v18 = vld [vmem:[%s1662_s1 + $0x20] sm:$0xff]   ;;  %v1264_v22 = vld [vmem:[%s1662_s1 + $0x28] sm:$0xff]  }
   0x8   :  { %1103 = vmatpush3.bf16.msra.mxu0 %v1248_v6  ;;  %v1257_v15 = vld [vmem:[%s1662_s1 + $0x98] sm:$0xff]   ;;  %v1261_v19 = vld [vmem:[%s1662_s1 + $0xa0] sm:$0xff]   ;;  %v1265_v23 = vld [vmem:[%s1662_s1 + $0xa8] sm:$0xff]  }
   0x9   :  { %1131 = vmatpush3.bf16.msra.mxu1 %v1249_v7  ;;  %1104 = vmatprep.subr.bf16.mxu0 %v1250_v8  ;;  %v1266_v24 = vld [vmem:[%s1662_s1 + $0x70] sm:$0xff]   ;;  %v1270_v28 = vld [vmem:[%s1662_s1 + $0x78] sm:$0xff]   ;;  %v1274_v32 = vld [vmem:[%s1663_s0] ss:$36 sps:$4 sm:$0xff]  }
   0xa   :  { %1132 = vmatprep.subr.bf16.mxu1 %v1251_v9  ;;  %v1267_v25 = vld [vmem:[%s1662_s1 + $0xf0] sm:$0xff]   ;;  %v1271_v29 = vld [vmem:[%s1662_s1 + $0xf8] sm:$0xff]   ;;  %v1276_v33 = vld [vmem:[%s1663_s0 + $0x4] ss:$36 sps:$4 sm:$0xff]  }
   0xb   :  { %v1268_v26 = vld [vmem:[%s1662_s1 + $0x30] sm:$0xff]   ;;  %v1272_v30 = vld [vmem:[%s1662_s1 + $0x38] sm:$0xff]   ;;  %v1277_v34 = vld [vmem:[%s1663_s0 + $0x8] ss:$36 sps:$4 sm:$0xff]   ;;  %750 = vmatprep.mubr.bf16.mxu0 %v1276_v33 }
   0xc   :  { %1105 = vmatpush3.bf16.msra.mxu0 %v1252_v10  ;;  %v1269_v27 = vld [vmem:[%s1662_s1 + $0xb0] sm:$0xff]   ;;  %v1273_v31 = vld [vmem:[%s1662_s1 + $0xb8] sm:$0xff]   ;;  %v1280_v36 = vld [vmem:[%s1662_s1 + $0x140] sm:$0xff]  }
   0xd   :  { %1133 = vmatpush3.bf16.msra.mxu1 %v1253_v11  ;;  %1106 = vmatprep.subr.bf16.mxu0 %v1254_v12  ;;  %v1279_v35 = vld [vmem:[%s1663_s0 + $0xc] ss:$36 sps:$4 sm:$0xff]   ;;  %v1281_v37 = vld [vmem:[%s1662_s1 + $0x100] sm:$0xff]   ;;  %v1292_v48 = vld [vmem:[%s1662_s1 + $0x158] sm:$0xff]  }
   0xe   :  { %1134 = vmatprep.subr.bf16.mxu1 %v1255_v13  ;;  %799 = vmatprep.mubr.bf16.mxu1 %v1279_v35  ;;  %v1282_v38 = vld [vmem:[%s1662_s1 + $0x1c0] sm:$0xff]   ;;  %v1284_v40 = vld [vmem:[%s1662_s1 + $0x148] sm:$0xff]   ;;  %v1288_v44 = vld [vmem:[%s1662_s1 + $0x150] sm:$0xff]  }
   0xf   :  { %v1283_v39 = vld [vmem:[%s1662_s1 + $0x180] sm:$0xff]   ;;  %v1285_v41 = vld [vmem:[%s1662_s1 + $0x108] sm:$0xff]   ;;  %v1289_v45 = vld [vmem:[%s1662_s1 + $0x110] sm:$0xff]  }
  0x10   :  { %1107 = vmatpush3.bf16.msra.mxu0 %v1256_v14  ;;  %v1286_v42 = vld [vmem:[%s1662_s1 + $0x1c8] sm:$0xff]   ;;  %v1290_v46 = vld [vmem:[%s1662_s1 + $0x1d0] sm:$0xff]   ;;  %v1293_v49 = vld [vmem:[%s1662_s1 + $0x118] sm:$0xff]  }
  0x11   :  { %1135 = vmatpush3.bf16.msra.mxu1 %v1257_v15  ;;  %1108 = vmatprep.subr.bf16.mxu0 %v1258_v16  ;;  %v1287_v43 = vld [vmem:[%s1662_s1 + $0x188] sm:$0xff]   ;;  %v1291_v47 = vld [vmem:[%s1662_s1 + $0x190] sm:$0xff]   ;;  %v1294_v50 = vld [vmem:[%s1662_s1 + $0x1d8] sm:$0xff]  }
  0x12   :  { %1136 = vmatprep.subr.bf16.mxu1 %v1259_v17  ;;  %v1295_v51 = vld [vmem:[%s1662_s1 + $0x198] sm:$0xff]   ;;  %v1296_v52 = vld [vmem:[%s1662_s1 + $0x160] sm:$0xff]   ;;  %v1300_v56 = vld [vmem:[%s1662_s1 + $0x168] sm:$0xff]  }
  0x13   :  { %v1297_v53 = vld [vmem:[%s1662_s1 + $0x120] sm:$0xff]   ;;  %v1301_v57 = vld [vmem:[%s1663_s0 + $0x4c] ss:$36 sps:$4 sm:$0xff]   ;;  %v1303_v58 = vld [vmem:[%s1663_s0 + $0x54] ss:$36 sps:$4 sm:$0xff]  }
  0x14   :  { %1109 = vmatpush3.bf16.msra.mxu0 %v1260_v18  ;;  %v1298_v54 = vld [vmem:[%s1662_s1 + $0x1e0] sm:$0xff]   ;;  %v1305_v59 = vld [vmem:[%s1662_s1 + $0x128] sm:$0xff]   ;;  %v1307_v61 = vld [vmem:[%s1663_s0 + $0x50] ss:$36 sps:$4 sm:$0xff]  }
  0x15   :  { %1137 = vmatpush3.bf16.msra.mxu1 %v1261_v19  ;;  %1110 = vmatprep.subr.bf16.mxu0 %v1262_v20  ;;  %v1299_v55 = vld [vmem:[%s1662_s1 + $0x1a0] sm:$0xff]   ;;  %v1306_v60 = vld [vmem:[%s1663_s0 + $0x48] ss:$36 sps:$4 sm:$0xff]   ;;  %v1310_v0 = vld [vmem:[%s1662_s1 + $0x170] sm:$0xff]  }
  0x16   :  { %1138 = vmatprep.subr.bf16.mxu1 %v1263_v21  ;;  %v1308_v62 = vld [vmem:[%s1662_s1 + $0x1e8] sm:$0xff]   ;;  %v1311_v1 = vld [vmem:[%s1662_s1 + $0x130] sm:$0xff]   ;;  %v1314_v4 = vld [vmem:[%s1662_s1 + $0x178] sm:$0xff]  }
  0x17   :  { %v1309_v63 = vld [vmem:[%s1662_s1 + $0x1a8] sm:$0xff]   ;;  %v1312_v2 = vld [vmem:[%s1662_s1 + $0x1f0] sm:$0xff]   ;;  %v1315_v5 = vld [vmem:[%s1662_s1 + $0x138] sm:$0xff]  }
  0x18   :  { %1111 = vmatpush3.bf16.msra.mxu0 %v1264_v22  ;;  %v1313_v3 = vld [vmem:[%s1662_s1 + $0x1b0] sm:$0xff]   ;;  %v1316_v6 = vld [vmem:[%s1662_s1 + $0x1f8] sm:$0xff]   ;;  %v1321_v10 = vld [vmem:[%s1662_s1 + $0x200] sm:$0xff]  }
  0x19   :  { %1139 = vmatpush3.bf16.msra.mxu1 %v1265_v23  ;;  %1112 = vmatprep.subr.bf16.mxu0 %v1266_v24  ;;  %v1317_v7 = vld [vmem:[%s1663_s0 + $0x10] ss:$36 sps:$4 sm:$0xff]   ;;  %v1320_v9 = vld [vmem:[%s1662_s1 + $0x1b8] sm:$0xff]   ;;  %v1325_v13 = vld [vmem:[%s1662_s1 + $0x208] sm:$0xff]  }
  0x1a   :  { %1140 = vmatprep.subr.bf16.mxu1 %v1267_v25  ;;  %v1319_v8 = vld [vmem:[%s1663_s0 + $0x14] ss:$36 sps:$4 sm:$0xff]   ;;  %v1324_v12 = vld [vmem:[%s1663_s0 + $0x1c] ss:$36 sps:$4 sm:$0xff]   ;;  %v1330_v17 = vld [vmem:[%s1663_s0 + $0x64] ss:$36 sps:$4 sm:$0xff]  }
  0x1b   :  { %v1322_v11 = vld [vmem:[%s1663_s0 + $0x18] ss:$36 sps:$4 sm:$0xff]   ;;  %v1329_v16 = vld [vmem:[%s1662_s1 + $0x210] sm:$0xff]   ;;  %v1332_v18 = vld [vmem:[%s1663_s0 + $0x60] ss:$36 sps:$4 sm:$0xff]  }
  0x1c   :  { %1113 = vmatpush3.bf16.msra.mxu0 %v1268_v26  ;;  %v1326_v14 = vld [vmem:[%s1663_s0 + $0x5c] ss:$36 sps:$4 sm:$0xff]   ;;  %v1335_v22 = vld [vmem:[%s1662_s1 + $0x228] sm:$0xff]   ;;  %v1336_v23 = vld [vmem:[%s1662_s1 + $0x230] sm:$0xff]  }
  0x1d   :  { %1141 = vmatpush3.bf16.msra.mxu1 %v1269_v27  ;;  %1114 = vmatprep.subr.bf16.mxu0 %v1270_v28  ;;  %v1328_v15 = vld [vmem:[%s1663_s0 + $0x58] ss:$36 sps:$4 sm:$0xff]   ;;  %v1334_v20 = vld [vmem:[%s1662_s1 + $0x220] sm:$0xff]   ;;  %v1339_v25 = vld [vmem:[%s1663_s0 + $0x68] ss:$36 sps:$4 sm:$0xff]  }
  0x1e   :  { %1142 = vmatprep.subr.bf16.mxu1 %v1271_v29  ;;  %v1333_v19 = vld [vmem:[%s1662_s1 + $0x218] sm:$0xff]   ;;  %v1338_v21 = vld [vmem:[%s1663_s0 + $0x20] ss:$36 sps:$4 sm:$0xff]  }
  0x1f   :  { %v1337_v24 = vld [vmem:[%s1662_s1 + $0x238] sm:$0xff]  }
  0x20   :  { %1115 = vmatpush3.bf16.msra.mxu0 %v1272_v30 }
  0x21   :  { %1143 = vmatpush3.bf16.msra.mxu1 %v1273_v31  ;;  %1156 = vmatprep.subr.bf16.mxu0 %v1280_v36 }
  0x22   :  { %1184 = vmatprep.subr.bf16.mxu1 %v1282_v38 }
  0x23   :  { %751 = vmatmul.mubr.bf16.vlgmr.msra.gmra.mrb[0].mxu0 %v1274_v32 }
  0x24   :  { %800 = vmatmul.mubr.bf16.vlgmr.msra.gmra.mrb[0].mxu1 %v1277_v34  ;;  %1157 = vmatpush3.bf16.msra.mxu0 %v1281_v37 }
  0x25   :  { %1185 = vmatpush3.bf16.msra.mxu1 %v1283_v39  ;;  %1158 = vmatprep.subr.bf16.mxu0 %v1284_v40 }
  0x26   :  { %1186 = vmatprep.subr.bf16.mxu1 %v1286_v42  ;;  %758 = vmatprep.mubr.bf16.mxu0 %v1301_v57 }
  0x27   :  { %807 = vmatprep.mubr.bf16.mxu1 %v1303_v58 }
  0x28   :  { %1159 = vmatpush3.bf16.msra.mxu0 %v1285_v41 }
  0x29   :  { %1187 = vmatpush3.bf16.msra.mxu1 %v1287_v43  ;;  %1160 = vmatprep.subr.bf16.mxu0 %v1288_v44 }
  0x2a   :  { %1188 = vmatprep.subr.bf16.mxu1 %v1290_v46 }
  0x2b   :  { %759 = vmatmul.mubr.bf16.gmra.mrb[4].mxu0 %v1306_v60 }
  0x2c   :  { %1161 = vmatpush3.bf16.msra.mxu0 %v1289_v45  ;;  %808 = vmatmul.mubr.bf16.gmra.mrb[4].mxu1 %v1307_v61 }
  0x2d   :  { %1189 = vmatpush3.bf16.msra.mxu1 %v1291_v47  ;;  %1162 = vmatprep.subr.bf16.mxu0 %v1292_v48 }
  0x2e   :  { %1190 = vmatprep.subr.bf16.mxu1 %v1294_v50  ;;  %848 = vmatprep.mubr.bf16.mxu0 %v1319_v8 }
  0x2f   :  { %897 = vmatprep.mubr.bf16.mxu1 %v1324_v12 }
  0x30   :  { %1163 = vmatpush3.bf16.msra.mxu0 %v1293_v49 }
  0x31   :  { %1191 = vmatpush3.bf16.msra.mxu1 %v1295_v51  ;;  %1164 = vmatprep.subr.bf16.mxu0 %v1296_v52 }
  0x32   :  { %1192 = vmatprep.subr.bf16.mxu1 %v1298_v54 }
  0x34   :  { %1165 = vmatpush3.bf16.msra.mxu0 %v1297_v53 }
  0x35   :  { %1193 = vmatpush3.bf16.msra.mxu1 %v1299_v55  ;;  %1166 = vmatprep.subr.bf16.mxu0 %v1300_v56 }
  0x36   :  { %1194 = vmatprep.subr.bf16.mxu1 %v1308_v62 }
  0x38   :  { %1167 = vmatpush3.bf16.msra.mxu0 %v1305_v59 }
  0x39   :  { %1195 = vmatpush3.bf16.msra.mxu1 %v1309_v63  ;;  %1168 = vmatprep.subr.bf16.mxu0 %v1310_v0 }
  0x3a   :  { %1196 = vmatprep.subr.bf16.mxu1 %v1312_v2 }
  0x3c   :  { %1169 = vmatpush3.bf16.msra.mxu0 %v1311_v1 }
  0x3d   :  { %1197 = vmatpush3.bf16.msra.mxu1 %v1313_v3  ;;  %1170 = vmatprep.subr.bf16.mxu0 %v1314_v4 }
  0x3e   :  { %1198 = vmatprep.subr.bf16.mxu1 %v1316_v6 }
  0x40   :  { %1171 = vmatpush3.bf16.msra.mxu0 %v1315_v5 }
  0x41   :  { %1199 = vmatpush3.bf16.msra.mxu1 %v1320_v9  ;;  %1222 = vmatprep.subr.bf16.mxu0 %v1321_v10 }
  0x43   :  { %849 = vmatmul.mubr.bf16.vlgmr.msra.gmra.mrb[8].mxu0 %v1317_v7 }
  0x44   :  { %1223 = vmatpush3.bf16.msra.mxu0 %v1321_v10  ;;  %898 = vmatmul.mubr.bf16.vlgmr.msra.gmra.mrb[8].mxu1 %v1322_v11 }
  0x45   :  { %1224 = vmatprep.subr.bf16.mxu0 %v1325_v13  ;;  %856 = vmatprep.mubr.bf16.mxu0 %v1326_v14 }
  0x46   :  { %905 = vmatprep.mubr.bf16.mxu1 %v1330_v17 }
  0x48   :  { %1225 = vmatpush3.bf16.msra.mxu0 %v1325_v13 }
  0x49   :  { %1226 = vmatprep.subr.bf16.mxu0 %v1329_v16 }
  0x4b   :  { %857 = vmatmul.mubr.bf16.gmra.mrb[12].mxu0 %v1328_v15 }
  0x4c   :  { %1227 = vmatpush3.bf16.msra.mxu0 %v1329_v16  ;;  %906 = vmatmul.mubr.bf16.gmra.mrb[12].mxu1 %v1332_v18 }
  0x4d   :  { %1228 = vmatprep.subr.bf16.mxu0 %v1333_v19  ;;  %1238 = vmatprep.mubr.bf16.mxu0 %v1338_v21 }
  0x50   :  { %1229 = vmatpush3.bf16.msra.mxu0 %v1333_v19 }
  0x51   :  { %1230 = vmatprep.subr.bf16.mxu0 %v1334_v20 }
  0x54   :  { %1231 = vmatpush3.bf16.msra.mxu0 %v1334_v20 }
  0x55   :  { %1232 = vmatprep.subr.bf16.mxu0 %v1335_v22 }
  0x58   :  { %1233 = vmatpush3.bf16.msra.mxu0 %v1335_v22 }
  0x59   :  { %1234 = vmatprep.subr.bf16.mxu0 %v1336_v23 }
  0x5c   :  { %1235 = vmatpush3.bf16.msra.mxu0 %v1336_v23  ;;  %v1099_v23 = vld [vmem:[%s1664_s2] ss:$0 sm:$0xff] }
  0x5d   :  { %1236 = vmatprep.subr.bf16.mxu0 %v1337_v24 }
  0x60   :  { %1237 = vmatpush3.bf16.msra.mxu0 %v1337_v24 }
  0x63   :  { %1239 = vmatmul.mubr.bf16.vlgmr.msra.gmra.mrb[16].mxu0 %v1339_v25 }
  0xf6   :  { %v1116_v26 = vpop.f32.mrb[0].mxu0 }
  0xf7   :  { %v1144_v27 = vpop.f32.mrb[0].mxu1  ;;  %v1117_v28 = vpop.f32.mrb[1].mxu0 }
  0xf8   :  { %v1118_v29 = vadd.f32 %v1117_v28, %v1116_v26  ;;  %v1145_v30 = vpop.f32.mrb[1].mxu1  ;;  %v1119_v31 = vpop.f32.mrb[2].mxu0  ;;  %v991_v26 = vld [vmem:[%s1665_s3 + $0x10] sm:$0xff] }
  0xf9   :  { %v1146_v32 = vadd.f32 %v1145_v30, %v1144_v27  ;;  %v1147_v33 = vpop.f32.mrb[2].mxu1  ;;  %v1120_v34 = vpop.f32.mrb[3].mxu0  ;;  %v989_v30 = vld [vmem:[%s1665_s3] sm:$0xff] }
  0xfa   :  { %v1121_v35 = vadd.f32 %v1120_v34, %v1119_v31  ;;  %v1148_v36 = vpop.f32.mrb[3].mxu1  ;;  %v992_v34 = vld [vmem:[%s1665_s3 + $0x18] sm:$0xff] }
  0xfb   :  { %v802_v37 = vadd.f32 %v1146_v32, %v1118_v29  ;;  %v1149_v38 = vadd.f32 %v1148_v36, %v1147_v33 }
  0xfd   :  { %v805_v39 = vadd.f32 %v1149_v38, %v1121_v35  ;;  %v990_v38 = vld [vmem:[%s1665_s3 + $0x8] sm:$0xff] }
  0xfe   :  { %v1122_v40 = vpop.f32.mrb[4].mxu0 }
  0xff   :  { %v1150_v41 = vpop.f32.mrb[4].mxu1  ;;  %v1123_v42 = vpop.f32.mrb[5].mxu0 }
 0x100   :  { %v1151_v43 = vpop.f32.mrb[5].mxu1  ;;  %v1124_v44 = vadd.f32 %v1123_v42, %v1122_v40  ;;  %v1125_v46 = vpop.f32.mrb[6].mxu0 }
 0x101   :  { %v1152_v45 = vadd.f32 %v1151_v43, %v1150_v41  ;;  %v1153_v47 = vpop.f32.mrb[6].mxu1  ;;  %v1126_v48 = vpop.f32.mrb[7].mxu0 }
 0x102   :  { %v1154_v49 = vpop.f32.mrb[7].mxu1  ;;  %v1127_v51 = vadd.f32 %v1126_v48, %v1125_v46 }
 0x103   :  { %v810_v50 = vadd.f32 %v1152_v45, %v1124_v44  ;;  %v1155_v52 = vadd.f32 %v1154_v49, %v1153_v47 }
 0x105   :  { %v813_v53 = vadd.f32 %v1155_v52, %v1127_v51 }
 0x116   :  { %v1172_v54 = vpop.f32.mrb[8].mxu0 }
 0x117   :  { %v1173_v55 = vpop.f32.mrb[9].mxu0  ;;  %v1200_v58 = vpop.f32.mrb[8].mxu1 }
 0x118   :  { %v1174_v56 = vadd.f32 %v1173_v55, %v1172_v54  ;;  %v1175_v57 = vpop.f32.mrb[10].mxu0  ;;  %v1201_v62 = vpop.f32.mrb[9].mxu1 }
 0x119   :  { %v1176_v59 = vpop.f32.mrb[11].mxu0  ;;  %v1202_v63 = vadd.f32 %v1201_v62, %v1200_v58  ;;  %v1203_v0 = vpop.f32.mrb[10].mxu1 }
 0x11a   :  { %v851_v60 = vadd.f32 %v1174_v56, %v802_v37  ;;  %v1177_v61 = vadd.f32 %v1176_v59, %v1175_v57  ;;  %v1204_v2 = vpop.f32.mrb[11].mxu1 }
 0x11b   :  { %v1205_v3 = vadd.f32 %v1204_v2, %v1203_v0 }
 0x11c   :  { %v854_v1 = vadd.f32 %v1177_v61, %v805_v39  ;;  %v900_v4 = vadd.f32 %v1202_v63, %v851_v60 }
 0x11e   :  { %v1178_v5 = vpop.f32.mrb[12].mxu0  ;;  %v903_v7 = vadd.f32 %v1205_v3, %v854_v1 }
 0x11f   :  { %v1179_v6 = vpop.f32.mrb[13].mxu0  ;;  %v1206_v10 = vpop.f32.mrb[12].mxu1 }
 0x120   :  { %v1180_v8 = vadd.f32 %v1179_v6, %v1178_v5  ;;  %v1181_v9 = vpop.f32.mrb[14].mxu0  ;;  %v1207_v14 = vpop.f32.mrb[13].mxu1 }
 0x121   :  { %v1182_v11 = vpop.f32.mrb[15].mxu0  ;;  %v1208_v15 = vadd.f32 %v1207_v14, %v1206_v10  ;;  %v1209_v16 = vpop.f32.mrb[14].mxu1 }
 0x122   :  { %v859_v12 = vadd.f32 %v1180_v8, %v810_v50  ;;  %v1183_v13 = vadd.f32 %v1182_v11, %v1181_v9  ;;  %v1210_v18 = vpop.f32.mrb[15].mxu1 }
 0x123   :  { %v1211_v19 = vadd.f32 %v1210_v18, %v1209_v16 }
 0x124   :  { %v862_v17 = vadd.f32 %v1183_v13, %v813_v53  ;;  %v908_v20 = vadd.f32 %v1208_v15, %v859_v12 }
 0x126   :  { %v911_v21 = vadd.f32 %v1211_v19, %v862_v17 }
 0x136   :  { %v1240_v22 = vpop.f32.mrb[16].mxu0 }
 0x137   :  { %v957_v24 = vadd.f32 %v1240_v22, %v908_v20  ;;  %v948_v25 = vpop.f32.mrb[17].mxu0 }
 0x138   :  { %v949_v27 = vadd.f32 %v948_v25, %v900_v4  ;;  %v1241_v28 = vpop.f32.mrb[18].mxu0 }
 0x139   :  { %v987_v29 = vadd.f32 %v1099_v23, %v957_v24  ;;  %v960_v31 = vadd.f32 %v1241_v28, %v911_v21  ;;  %v951_v32 = vpop.f32.mrb[19].mxu0 }
 0x13a   :  { %v985_v33 = vadd.f32 %v1099_v23, %v949_v27  ;;  %v952_v35 = vadd.f32 %v951_v32, %v903_v7 }
 0x13b   :  { %v995_v36 = vadd.f32 %v991_v26, %v987_v29  ;;  %v988_v37 = vadd.f32 %v1099_v23, %v960_v31 }
 0x13c   :  { %v993_v39 = vadd.f32 %v989_v30, %v985_v33  ;;  %v986_v40 = vadd.f32 %v1099_v23, %v952_v35 }
 0x13d   :  { %v999_v41 = vmax.f32 %v995_v36, 0.0  ;;  %v996_v42 = vadd.f32 %v992_v34, %v988_v37 }
 0x13e   :  { %v997_v43 = vmax.f32 %v993_v39, 0.0  ;;  %v994_v44 = vadd.f32 %v990_v38, %v986_v40 }
 0x13f   :  { %1003 = vst [vmem:[%s1666_s4 + $0x10] sm:$0xff] %v999_v41  ;;  %v1000_v45 = vmax.f32 %v996_v42, 0.0 }
 0x140   :  { %1001 = vst [vmem:[%s1666_s4] sm:$0xff] %v997_v43  ;;  %v998_v46 = vmax.f32 %v994_v44, 0.0 }
 0x141   :  { %1004 = vst [vmem:[%s1666_s4 + $0x18] sm:$0xff] %v1000_v45 }
 0x142   :  { %1002 = vst [vmem:[%s1666_s4 + $0x8] sm:$0xff] %v998_v46 }

// kernel: resnet18_forward.31
= control target key start
LH: loop header
LB: loop body
LE: loop exit
PB: predicated region body
PF: predicated region fallthrough
CT: control target
= control target key end

     0   :  { %s1634_s1 = inlined_call_operand.vmem [shape: bf16[1152,128], index: 1, kind: input, shape index: {}]   ;;  %s1635_s0 = inlined_call_operand.vmem [shape: bf16[32,1152], index: 0, kind: input, shape index: {}]   ;;  %s1636_s2 = inlined_call_operand.vmem [shape: f32[1,128], index: 2, kind: input, shape index: {}]   ;;  %s1637_s3 = inlined_call_operand.vmem [shape: f32[32,128], index: 3, kind: output, shape index: {}]  }
   0x1   :  { %v1231_v0 = vld [vmem:[%s1634_s1 + $0x40] sm:$0xff]   ;;  %v1235_v4 = vld [vmem:[%s1634_s1 + $0x48] sm:$0xff]   ;;  %v1239_v8 = vld [vmem:[%s1634_s1 + $0x50] sm:$0xff]  }
   0x2   :  { %v1232_v1 = vld [vmem:[%s1634_s1 + $0xc0] sm:$0xff]   ;;  %1089 = vmatprep.subr.bf16.mxu0 %v1231_v0  ;;  %v1236_v5 = vld [vmem:[%s1634_s1 + $0xc8] sm:$0xff]   ;;  %v1240_v9 = vld [vmem:[%s1634_s1 + $0xd0] sm:$0xff]  }
   0x3   :  { %v1233_v2 = vld [vmem:[%s1634_s1] sm:$0xff]   ;;  %1117 = vmatprep.subr.bf16.mxu1 %v1232_v1  ;;  %v1237_v6 = vld [vmem:[%s1634_s1 + $0x8] sm:$0xff]   ;;  %v1241_v10 = vld [vmem:[%s1634_s1 + $0x10] sm:$0xff]  }
   0x4   :  { %v1234_v3 = vld [vmem:[%s1634_s1 + $0x80] sm:$0xff]   ;;  %1090 = vmatpush3.bf16.msra.mxu0 %v1233_v2  ;;  %v1238_v7 = vld [vmem:[%s1634_s1 + $0x88] sm:$0xff]   ;;  %v1242_v11 = vld [vmem:[%s1634_s1 + $0x90] sm:$0xff]  }
   0x5   :  { %1118 = vmatpush3.bf16.msra.mxu1 %v1234_v3  ;;  %1091 = vmatprep.subr.bf16.mxu0 %v1235_v4  ;;  %v1243_v12 = vld [vmem:[%s1634_s1 + $0x58] sm:$0xff]   ;;  %v1247_v16 = vld [vmem:[%s1634_s1 + $0x60] sm:$0xff]   ;;  %v1251_v20 = vld [vmem:[%s1634_s1 + $0x68] sm:$0xff]  }
   0x6   :  { %1119 = vmatprep.subr.bf16.mxu1 %v1236_v5  ;;  %v1244_v13 = vld [vmem:[%s1634_s1 + $0xd8] sm:$0xff]   ;;  %v1248_v17 = vld [vmem:[%s1634_s1 + $0xe0] sm:$0xff]   ;;  %v1252_v21 = vld [vmem:[%s1634_s1 + $0xe8] sm:$0xff]  }
   0x7   :  { %v1245_v14 = vld [vmem:[%s1634_s1 + $0x18] sm:$0xff]   ;;  %v1249_v18 = vld [vmem:[%s1634_s1 + $0x20] sm:$0xff]   ;;  %v1253_v22 = vld [vmem:[%s1634_s1 + $0x28] sm:$0xff]  }
   0x8   :  { %1092 = vmatpush3.bf16.msra.mxu0 %v1237_v6  ;;  %v1246_v15 = vld [vmem:[%s1634_s1 + $0x98] sm:$0xff]   ;;  %v1250_v19 = vld [vmem:[%s1634_s1 + $0xa0] sm:$0xff]   ;;  %v1254_v23 = vld [vmem:[%s1634_s1 + $0xa8] sm:$0xff]  }
   0x9   :  { %1120 = vmatpush3.bf16.msra.mxu1 %v1238_v7  ;;  %1093 = vmatprep.subr.bf16.mxu0 %v1239_v8  ;;  %v1255_v24 = vld [vmem:[%s1634_s1 + $0x70] sm:$0xff]   ;;  %v1259_v28 = vld [vmem:[%s1634_s1 + $0x78] sm:$0xff]   ;;  %v1263_v32 = vld [vmem:[%s1635_s0] ss:$36 sps:$4 sm:$0xff]  }
   0xa   :  { %1121 = vmatprep.subr.bf16.mxu1 %v1240_v9  ;;  %v1256_v25 = vld [vmem:[%s1634_s1 + $0xf0] sm:$0xff]   ;;  %v1260_v29 = vld [vmem:[%s1634_s1 + $0xf8] sm:$0xff]   ;;  %v1265_v33 = vld [vmem:[%s1635_s0 + $0x4] ss:$36 sps:$4 sm:$0xff]  }
   0xb   :  { %v1257_v26 = vld [vmem:[%s1634_s1 + $0x30] sm:$0xff]   ;;  %v1261_v30 = vld [vmem:[%s1634_s1 + $0x38] sm:$0xff]   ;;  %v1266_v34 = vld [vmem:[%s1635_s0 + $0x8] ss:$36 sps:$4 sm:$0xff]   ;;  %747 = vmatprep.mubr.bf16.mxu0 %v1265_v33 }
   0xc   :  { %1094 = vmatpush3.bf16.msra.mxu0 %v1241_v10  ;;  %v1258_v27 = vld [vmem:[%s1634_s1 + $0xb0] sm:$0xff]   ;;  %v1262_v31 = vld [vmem:[%s1634_s1 + $0xb8] sm:$0xff]   ;;  %v1269_v36 = vld [vmem:[%s1634_s1 + $0x140] sm:$0xff]  }
   0xd   :  { %1122 = vmatpush3.bf16.msra.mxu1 %v1242_v11  ;;  %1095 = vmatprep.subr.bf16.mxu0 %v1243_v12  ;;  %v1268_v35 = vld [vmem:[%s1635_s0 + $0xc] ss:$36 sps:$4 sm:$0xff]   ;;  %v1270_v37 = vld [vmem:[%s1634_s1 + $0x100] sm:$0xff]   ;;  %v1281_v48 = vld [vmem:[%s1634_s1 + $0x158] sm:$0xff]  }
   0xe   :  { %1123 = vmatprep.subr.bf16.mxu1 %v1244_v13  ;;  %796 = vmatprep.mubr.bf16.mxu1 %v1268_v35  ;;  %v1271_v38 = vld [vmem:[%s1634_s1 + $0x1c0] sm:$0xff]   ;;  %v1273_v40 = vld [vmem:[%s1634_s1 + $0x148] sm:$0xff]   ;;  %v1277_v44 = vld [vmem:[%s1634_s1 + $0x150] sm:$0xff]  }
   0xf   :  { %v1272_v39 = vld [vmem:[%s1634_s1 + $0x180] sm:$0xff]   ;;  %v1274_v41 = vld [vmem:[%s1634_s1 + $0x108] sm:$0xff]   ;;  %v1278_v45 = vld [vmem:[%s1634_s1 + $0x110] sm:$0xff]  }
  0x10   :  { %1096 = vmatpush3.bf16.msra.mxu0 %v1245_v14  ;;  %v1275_v42 = vld [vmem:[%s1634_s1 + $0x1c8] sm:$0xff]   ;;  %v1279_v46 = vld [vmem:[%s1634_s1 + $0x1d0] sm:$0xff]   ;;  %v1282_v49 = vld [vmem:[%s1634_s1 + $0x118] sm:$0xff]  }
  0x11   :  { %1124 = vmatpush3.bf16.msra.mxu1 %v1246_v15  ;;  %1097 = vmatprep.subr.bf16.mxu0 %v1247_v16  ;;  %v1276_v43 = vld [vmem:[%s1634_s1 + $0x188] sm:$0xff]   ;;  %v1280_v47 = vld [vmem:[%s1634_s1 + $0x190] sm:$0xff]   ;;  %v1283_v50 = vld [vmem:[%s1634_s1 + $0x1d8] sm:$0xff]  }
  0x12   :  { %1125 = vmatprep.subr.bf16.mxu1 %v1248_v17  ;;  %v1284_v51 = vld [vmem:[%s1634_s1 + $0x198] sm:$0xff]   ;;  %v1285_v52 = vld [vmem:[%s1634_s1 + $0x160] sm:$0xff]   ;;  %v1289_v56 = vld [vmem:[%s1634_s1 + $0x168] sm:$0xff]  }
  0x13   :  { %v1286_v53 = vld [vmem:[%s1634_s1 + $0x120] sm:$0xff]   ;;  %v1290_v57 = vld [vmem:[%s1635_s0 + $0x4c] ss:$36 sps:$4 sm:$0xff]   ;;  %v1292_v58 = vld [vmem:[%s1635_s0 + $0x54] ss:$36 sps:$4 sm:$0xff]  }
  0x14   :  { %1098 = vmatpush3.bf16.msra.mxu0 %v1249_v18  ;;  %v1287_v54 = vld [vmem:[%s1634_s1 + $0x1e0] sm:$0xff]   ;;  %v1294_v59 = vld [vmem:[%s1634_s1 + $0x128] sm:$0xff]   ;;  %v1296_v61 = vld [vmem:[%s1635_s0 + $0x50] ss:$36 sps:$4 sm:$0xff]  }
  0x15   :  { %1126 = vmatpush3.bf16.msra.mxu1 %v1250_v19  ;;  %1099 = vmatprep.subr.bf16.mxu0 %v1251_v20  ;;  %v1288_v55 = vld [vmem:[%s1634_s1 + $0x1a0] sm:$0xff]   ;;  %v1295_v60 = vld [vmem:[%s1635_s0 + $0x48] ss:$36 sps:$4 sm:$0xff]   ;;  %v1299_v0 = vld [vmem:[%s1634_s1 + $0x170] sm:$0xff]  }
  0x16   :  { %1127 = vmatprep.subr.bf16.mxu1 %v1252_v21  ;;  %v1297_v62 = vld [vmem:[%s1634_s1 + $0x1e8] sm:$0xff]   ;;  %v1300_v1 = vld [vmem:[%s1634_s1 + $0x130] sm:$0xff]   ;;  %v1303_v4 = vld [vmem:[%s1634_s1 + $0x178] sm:$0xff]  }
  0x17   :  { %v1298_v63 = vld [vmem:[%s1634_s1 + $0x1a8] sm:$0xff]   ;;  %v1301_v2 = vld [vmem:[%s1634_s1 + $0x1f0] sm:$0xff]   ;;  %v1304_v5 = vld [vmem:[%s1634_s1 + $0x138] sm:$0xff]  }
  0x18   :  { %1100 = vmatpush3.bf16.msra.mxu0 %v1253_v22  ;;  %v1302_v3 = vld [vmem:[%s1634_s1 + $0x1b0] sm:$0xff]   ;;  %v1305_v6 = vld [vmem:[%s1634_s1 + $0x1f8] sm:$0xff]   ;;  %v1310_v10 = vld [vmem:[%s1634_s1 + $0x200] sm:$0xff]  }
  0x19   :  { %1128 = vmatpush3.bf16.msra.mxu1 %v1254_v23  ;;  %1101 = vmatprep.subr.bf16.mxu0 %v1255_v24  ;;  %v1306_v7 = vld [vmem:[%s1635_s0 + $0x10] ss:$36 sps:$4 sm:$0xff]   ;;  %v1309_v9 = vld [vmem:[%s1634_s1 + $0x1b8] sm:$0xff]   ;;  %v1314_v13 = vld [vmem:[%s1634_s1 + $0x208] sm:$0xff]  }
  0x1a   :  { %1129 = vmatprep.subr.bf16.mxu1 %v1256_v25  ;;  %v1308_v8 = vld [vmem:[%s1635_s0 + $0x14] ss:$36 sps:$4 sm:$0xff]   ;;  %v1313_v12 = vld [vmem:[%s1635_s0 + $0x1c] ss:$36 sps:$4 sm:$0xff]   ;;  %v1319_v17 = vld [vmem:[%s1635_s0 + $0x64] ss:$36 sps:$4 sm:$0xff]  }
  0x1b   :  { %v1311_v11 = vld [vmem:[%s1635_s0 + $0x18] ss:$36 sps:$4 sm:$0xff]   ;;  %v1318_v16 = vld [vmem:[%s1634_s1 + $0x210] sm:$0xff]   ;;  %v1321_v18 = vld [vmem:[%s1635_s0 + $0x60] ss:$36 sps:$4 sm:$0xff]  }
  0x1c   :  { %1102 = vmatpush3.bf16.msra.mxu0 %v1257_v26  ;;  %v1315_v14 = vld [vmem:[%s1635_s0 + $0x5c] ss:$36 sps:$4 sm:$0xff]   ;;  %v1324_v22 = vld [vmem:[%s1634_s1 + $0x228] sm:$0xff]   ;;  %v1325_v23 = vld [vmem:[%s1634_s1 + $0x230] sm:$0xff]  }
  0x1d   :  { %1130 = vmatpush3.bf16.msra.mxu1 %v1258_v27  ;;  %1103 = vmatprep.subr.bf16.mxu0 %v1259_v28  ;;  %v1317_v15 = vld [vmem:[%s1635_s0 + $0x58] ss:$36 sps:$4 sm:$0xff]   ;;  %v1323_v20 = vld [vmem:[%s1634_s1 + $0x220] sm:$0xff]   ;;  %v1328_v25 = vld [vmem:[%s1635_s0 + $0x68] ss:$36 sps:$4 sm:$0xff]  }
  0x1e   :  { %1131 = vmatprep.subr.bf16.mxu1 %v1260_v29  ;;  %v1322_v19 = vld [vmem:[%s1634_s1 + $0x218] sm:$0xff]   ;;  %v1327_v21 = vld [vmem:[%s1635_s0 + $0x20] ss:$36 sps:$4 sm:$0xff]  }
  0x1f   :  { %v1326_v24 = vld [vmem:[%s1634_s1 + $0x238] sm:$0xff]  }
  0x20   :  { %1104 = vmatpush3.bf16.msra.mxu0 %v1261_v30 }
  0x21   :  { %1132 = vmatpush3.bf16.msra.mxu1 %v1262_v31  ;;  %1145 = vmatprep.subr.bf16.mxu0 %v1269_v36 }
  0x22   :  { %1173 = vmatprep.subr.bf16.mxu1 %v1271_v38 }
  0x23   :  { %748 = vmatmul.mubr.bf16.vlgmr.msra.gmra.mrb[0].mxu0 %v1263_v32 }
  0x24   :  { %797 = vmatmul.mubr.bf16.vlgmr.msra.gmra.mrb[0].mxu1 %v1266_v34  ;;  %1146 = vmatpush3.bf16.msra.mxu0 %v1270_v37 }
  0x25   :  { %1174 = vmatpush3.bf16.msra.mxu1 %v1272_v39  ;;  %1147 = vmatprep.subr.bf16.mxu0 %v1273_v40 }
  0x26   :  { %1175 = vmatprep.subr.bf16.mxu1 %v1275_v42  ;;  %755 = vmatprep.mubr.bf16.mxu0 %v1290_v57 }
  0x27   :  { %804 = vmatprep.mubr.bf16.mxu1 %v1292_v58 }
  0x28   :  { %1148 = vmatpush3.bf16.msra.mxu0 %v1274_v41 }
  0x29   :  { %1176 = vmatpush3.bf16.msra.mxu1 %v1276_v43  ;;  %1149 = vmatprep.subr.bf16.mxu0 %v1277_v44 }
  0x2a   :  { %1177 = vmatprep.subr.bf16.mxu1 %v1279_v46 }
  0x2b   :  { %756 = vmatmul.mubr.bf16.gmra.mrb[4].mxu0 %v1295_v60 }
  0x2c   :  { %1150 = vmatpush3.bf16.msra.mxu0 %v1278_v45  ;;  %805 = vmatmul.mubr.bf16.gmra.mrb[4].mxu1 %v1296_v61 }
  0x2d   :  { %1178 = vmatpush3.bf16.msra.mxu1 %v1280_v47  ;;  %1151 = vmatprep.subr.bf16.mxu0 %v1281_v48 }
  0x2e   :  { %1179 = vmatprep.subr.bf16.mxu1 %v1283_v50  ;;  %845 = vmatprep.mubr.bf16.mxu0 %v1308_v8 }
  0x2f   :  { %894 = vmatprep.mubr.bf16.mxu1 %v1313_v12 }
  0x30   :  { %1152 = vmatpush3.bf16.msra.mxu0 %v1282_v49 }
  0x31   :  { %1180 = vmatpush3.bf16.msra.mxu1 %v1284_v51  ;;  %1153 = vmatprep.subr.bf16.mxu0 %v1285_v52 }
  0x32   :  { %1181 = vmatprep.subr.bf16.mxu1 %v1287_v54 }
  0x34   :  { %1154 = vmatpush3.bf16.msra.mxu0 %v1286_v53 }
  0x35   :  { %1182 = vmatpush3.bf16.msra.mxu1 %v1288_v55  ;;  %1155 = vmatprep.subr.bf16.mxu0 %v1289_v56 }
  0x36   :  { %1183 = vmatprep.subr.bf16.mxu1 %v1297_v62 }
  0x38   :  { %1156 = vmatpush3.bf16.msra.mxu0 %v1294_v59 }
  0x39   :  { %1184 = vmatpush3.bf16.msra.mxu1 %v1298_v63  ;;  %1157 = vmatprep.subr.bf16.mxu0 %v1299_v0 }
  0x3a   :  { %1185 = vmatprep.subr.bf16.mxu1 %v1301_v2 }
  0x3c   :  { %1158 = vmatpush3.bf16.msra.mxu0 %v1300_v1 }
  0x3d   :  { %1186 = vmatpush3.bf16.msra.mxu1 %v1302_v3  ;;  %1159 = vmatprep.subr.bf16.mxu0 %v1303_v4 }
  0x3e   :  { %1187 = vmatprep.subr.bf16.mxu1 %v1305_v6 }
  0x40   :  { %1160 = vmatpush3.bf16.msra.mxu0 %v1304_v5 }
  0x41   :  { %1188 = vmatpush3.bf16.msra.mxu1 %v1309_v9  ;;  %1211 = vmatprep.subr.bf16.mxu0 %v1310_v10 }
  0x43   :  { %846 = vmatmul.mubr.bf16.vlgmr.msra.gmra.mrb[8].mxu0 %v1306_v7 }
  0x44   :  { %1212 = vmatpush3.bf16.msra.mxu0 %v1310_v10  ;;  %895 = vmatmul.mubr.bf16.vlgmr.msra.gmra.mrb[8].mxu1 %v1311_v11 }
  0x45   :  { %1213 = vmatprep.subr.bf16.mxu0 %v1314_v13  ;;  %853 = vmatprep.mubr.bf16.mxu0 %v1315_v14 }
  0x46   :  { %902 = vmatprep.mubr.bf16.mxu1 %v1319_v17 }
  0x48   :  { %1214 = vmatpush3.bf16.msra.mxu0 %v1314_v13 }
  0x49   :  { %1215 = vmatprep.subr.bf16.mxu0 %v1318_v16 }
  0x4b   :  { %854 = vmatmul.mubr.bf16.gmra.mrb[12].mxu0 %v1317_v15 }
  0x4c   :  { %1216 = vmatpush3.bf16.msra.mxu0 %v1318_v16  ;;  %903 = vmatmul.mubr.bf16.gmra.mrb[12].mxu1 %v1321_v18 }
  0x4d   :  { %1217 = vmatprep.subr.bf16.mxu0 %v1322_v19  ;;  %1227 = vmatprep.mubr.bf16.mxu0 %v1327_v21 }
  0x50   :  { %1218 = vmatpush3.bf16.msra.mxu0 %v1322_v19 }
  0x51   :  { %1219 = vmatprep.subr.bf16.mxu0 %v1323_v20 }
  0x54   :  { %1220 = vmatpush3.bf16.msra.mxu0 %v1323_v20 }
  0x55   :  { %1221 = vmatprep.subr.bf16.mxu0 %v1324_v22 }
  0x58   :  { %1222 = vmatpush3.bf16.msra.mxu0 %v1324_v22 }
  0x59   :  { %1223 = vmatprep.subr.bf16.mxu0 %v1325_v23 }
  0x5c   :  { %1224 = vmatpush3.bf16.msra.mxu0 %v1325_v23  ;;  %v1088_v23 = vld [vmem:[%s1636_s2] ss:$0 sm:$0xff] }
  0x5d   :  { %1225 = vmatprep.subr.bf16.mxu0 %v1326_v24 }
  0x60   :  { %1226 = vmatpush3.bf16.msra.mxu0 %v1326_v24 }
  0x63   :  { %1228 = vmatmul.mubr.bf16.vlgmr.msra.gmra.mrb[16].mxu0 %v1328_v25 }
  0xf6   :  { %v1105_v26 = vpop.f32.mrb[0].mxu0 }
  0xf7   :  { %v1133_v27 = vpop.f32.mrb[0].mxu1  ;;  %v1106_v28 = vpop.f32.mrb[1].mxu0 }
  0xf8   :  { %v1107_v29 = vadd.f32 %v1106_v28, %v1105_v26  ;;  %v1134_v30 = vpop.f32.mrb[1].mxu1  ;;  %v1108_v31 = vpop.f32.mrb[2].mxu0 }
  0xf9   :  { %v1135_v32 = vadd.f32 %v1134_v30, %v1133_v27  ;;  %v1136_v33 = vpop.f32.mrb[2].mxu1  ;;  %v1109_v34 = vpop.f32.mrb[3].mxu0 }
  0xfa   :  { %v1110_v35 = vadd.f32 %v1109_v34, %v1108_v31  ;;  %v1137_v36 = vpop.f32.mrb[3].mxu1 }
  0xfb   :  { %v799_v37 = vadd.f32 %v1135_v32, %v1107_v29  ;;  %v1138_v38 = vadd.f32 %v1137_v36, %v1136_v33 }
  0xfd   :  { %v802_v39 = vadd.f32 %v1138_v38, %v1110_v35 }
  0xfe   :  { %v1111_v40 = vpop.f32.mrb[4].mxu0 }
  0xff   :  { %v1139_v41 = vpop.f32.mrb[4].mxu1  ;;  %v1112_v42 = vpop.f32.mrb[5].mxu0 }
 0x100   :  { %v1140_v43 = vpop.f32.mrb[5].mxu1  ;;  %v1113_v44 = vadd.f32 %v1112_v42, %v1111_v40  ;;  %v1114_v46 = vpop.f32.mrb[6].mxu0 }
 0x101   :  { %v1141_v45 = vadd.f32 %v1140_v43, %v1139_v41  ;;  %v1142_v47 = vpop.f32.mrb[6].mxu1  ;;  %v1115_v48 = vpop.f32.mrb[7].mxu0 }
 0x102   :  { %v1143_v49 = vpop.f32.mrb[7].mxu1  ;;  %v1116_v51 = vadd.f32 %v1115_v48, %v1114_v46 }
 0x103   :  { %v807_v50 = vadd.f32 %v1141_v45, %v1113_v44  ;;  %v1144_v52 = vadd.f32 %v1143_v49, %v1142_v47 }
 0x105   :  { %v810_v53 = vadd.f32 %v1144_v52, %v1116_v51 }
 0x116   :  { %v1161_v54 = vpop.f32.mrb[8].mxu0 }
 0x117   :  { %v1162_v55 = vpop.f32.mrb[9].mxu0  ;;  %v1189_v58 = vpop.f32.mrb[8].mxu1 }
 0x118   :  { %v1163_v56 = vadd.f32 %v1162_v55, %v1161_v54  ;;  %v1164_v57 = vpop.f32.mrb[10].mxu0  ;;  %v1190_v62 = vpop.f32.mrb[9].mxu1 }
 0x119   :  { %v1165_v59 = vpop.f32.mrb[11].mxu0  ;;  %v1191_v63 = vadd.f32 %v1190_v62, %v1189_v58  ;;  %v1192_v0 = vpop.f32.mrb[10].mxu1 }
 0x11a   :  { %v848_v60 = vadd.f32 %v1163_v56, %v799_v37  ;;  %v1166_v61 = vadd.f32 %v1165_v59, %v1164_v57  ;;  %v1193_v2 = vpop.f32.mrb[11].mxu1 }
 0x11b   :  { %v1194_v3 = vadd.f32 %v1193_v2, %v1192_v0 }
 0x11c   :  { %v851_v1 = vadd.f32 %v1166_v61, %v802_v39  ;;  %v897_v4 = vadd.f32 %v1191_v63, %v848_v60 }
 0x11e   :  { %v1167_v5 = vpop.f32.mrb[12].mxu0  ;;  %v900_v7 = vadd.f32 %v1194_v3, %v851_v1 }
 0x11f   :  { %v1168_v6 = vpop.f32.mrb[13].mxu0  ;;  %v1195_v10 = vpop.f32.mrb[12].mxu1 }
 0x120   :  { %v1169_v8 = vadd.f32 %v1168_v6, %v1167_v5  ;;  %v1170_v9 = vpop.f32.mrb[14].mxu0  ;;  %v1196_v14 = vpop.f32.mrb[13].mxu1 }
 0x121   :  { %v1171_v11 = vpop.f32.mrb[15].mxu0  ;;  %v1197_v15 = vadd.f32 %v1196_v14, %v1195_v10  ;;  %v1198_v16 = vpop.f32.mrb[14].mxu1 }
 0x122   :  { %v856_v12 = vadd.f32 %v1169_v8, %v807_v50  ;;  %v1172_v13 = vadd.f32 %v1171_v11, %v1170_v9  ;;  %v1199_v18 = vpop.f32.mrb[15].mxu1 }
 0x123   :  { %v1200_v19 = vadd.f32 %v1199_v18, %v1198_v16 }
 0x124   :  { %v859_v17 = vadd.f32 %v1172_v13, %v810_v53  ;;  %v905_v20 = vadd.f32 %v1197_v15, %v856_v12 }
 0x126   :  { %v908_v21 = vadd.f32 %v1200_v19, %v859_v17 }
 0x136   :  { %v1229_v22 = vpop.f32.mrb[16].mxu0 }
 0x137   :  { %v954_v24 = vadd.f32 %v1229_v22, %v905_v20  ;;  %v945_v25 = vpop.f32.mrb[17].mxu0 }
 0x138   :  { %v946_v26 = vadd.f32 %v945_v25, %v897_v4  ;;  %v1230_v27 = vpop.f32.mrb[18].mxu0 }
 0x139   :  { %v984_v28 = vadd.f32 %v1088_v23, %v954_v24  ;;  %v957_v29 = vadd.f32 %v1230_v27, %v908_v21  ;;  %v948_v30 = vpop.f32.mrb[19].mxu0 }
 0x13a   :  { %v982_v31 = vadd.f32 %v1088_v23, %v946_v26  ;;  %v949_v32 = vadd.f32 %v948_v30, %v900_v7 }
 0x13b   :  { %v988_v33 = vmax.f32 %v984_v28, 0.0  ;;  %v985_v34 = vadd.f32 %v1088_v23, %v957_v29 }
 0x13c   :  { %v986_v35 = vmax.f32 %v982_v31, 0.0  ;;  %v983_v36 = vadd.f32 %v1088_v23, %v949_v32 }
 0x13d   :  { %992 = vst [vmem:[%s1637_s3 + $0x10] sm:$0xff] %v988_v33  ;;  %v989_v37 = vmax.f32 %v985_v34, 0.0 }
 0x13e   :  { %990 = vst [vmem:[%s1637_s3] sm:$0xff] %v986_v35  ;;  %v987_v38 = vmax.f32 %v983_v36, 0.0 }
 0x13f   :  { %993 = vst [vmem:[%s1637_s3 + $0x18] sm:$0xff] %v989_v37 }
 0x140   :  { %991 = vst [vmem:[%s1637_s3 + $0x8] sm:$0xff] %v987_v38 }

// kernel: resnet18_forward.33
= control target key start
LH: loop header
LB: loop body
LE: loop exit
PB: predicated region body
PF: predicated region fallthrough
CT: control target
= control target key end

     0   :  { %s2099_s1 = inlined_call_operand.vmem [shape: bf16[1152,256], index: 1, kind: input, shape index: {}]   ;;  %s2100_s0 = inlined_call_operand.vmem [shape: bf16[16,1152], index: 0, kind: input, shape index: {}]   ;;  %s2101_s2 = inlined_call_operand.vmem [shape: f32[1,256], index: 2, kind: input, shape index: {}]   ;;  %s2102_s3 = inlined_call_operand.vmem [shape: f32[16,256], index: 3, kind: output, shape index: {}]  }
   0x1   :  { %v1375_v0 = vld [vmem:[%s2099_s1 + $0x4] ss:$8 sps:$4 sm:$0xff]   ;;  %v1379_v2 = vld [vmem:[%s2099_s1] ss:$8 sps:$4 sm:$0xff]   ;;  %v1381_v4 = vld [vmem:[%s2099_s1 + $0x14] ss:$8 sps:$4 sm:$0xff]  }
   0x2   :  { %v1377_v1 = vld [vmem:[%s2099_s1 + $0x204] ss:$8 sps:$4 sm:$0xff]   ;;  %947 = vmatprep.subr.bf16.mxu1 %v1375_v0  ;;  %v1380_v3 = vld [vmem:[%s2099_s1 + $0x200] ss:$8 sps:$4 sm:$0xff]   ;;  %v1383_v5 = vld [vmem:[%s2099_s1 + $0x214] ss:$8 sps:$4 sm:$0xff]  }
   0x3   :  { %1033 = vmatprep.subr.bf16.mxu0 %v1377_v1  ;;  %948 = vmatpush1.bf16.msra.mxu1 %v1379_v2  ;;  %v1385_v6 = vld [vmem:[%s2099_s1 + $0x10] ss:$8 sps:$4 sm:$0xff]   ;;  %v1387_v8 = vld [vmem:[%s2099_s1 + $0x24] ss:$8 sps:$4 sm:$0xff]   ;;  %v1391_v10 = vld [vmem:[%s2099_s1 + $0x20] ss:$8 sps:$4 sm:$0xff]  }
   0x4   :  { %1034 = vmatpush1.bf16.msra.mxu0 %v1380_v3  ;;  %949 = vmatprep.subr.bf16.mxu1 %v1381_v4  ;;  %v1386_v7 = vld [vmem:[%s2099_s1 + $0x210] ss:$8 sps:$4 sm:$0xff]   ;;  %v1389_v9 = vld [vmem:[%s2099_s1 + $0x224] ss:$8 sps:$4 sm:$0xff]   ;;  %v1392_v11 = vld [vmem:[%s2099_s1 + $0x220] ss:$8 sps:$4 sm:$0xff]  }
   0x5   :  { %1035 = vmatprep.subr.bf16.mxu0 %v1383_v5  ;;  %v1393_v12 = vld [vmem:[%s2099_s1 + $0x34] ss:$8 sps:$4 sm:$0xff]   ;;  %v1397_v14 = vld [vmem:[%s2099_s1 + $0x30] ss:$8 sps:$4 sm:$0xff]   ;;  %v1399_v16 = vld [vmem:[%s2099_s1 + $0x44] ss:$8 sps:$4 sm:$0xff]  }
   0x6   :  { %v1395_v13 = vld [vmem:[%s2099_s1 + $0x234] ss:$8 sps:$4 sm:$0xff]   ;;  %v1398_v15 = vld [vmem:[%s2099_s1 + $0x230] ss:$8 sps:$4 sm:$0xff]   ;;  %v1401_v17 = vld [vmem:[%s2099_s1 + $0x244] ss:$8 sps:$4 sm:$0xff]  }
   0x7   :  { %950 = vmatpush1.bf16.msra.mxu1 %v1385_v6  ;;  %v1403_v18 = vld [vmem:[%s2099_s1 + $0x40] ss:$8 sps:$4 sm:$0xff]   ;;  %v1405_v20 = vld [vmem:[%s2099_s1 + $0x54] ss:$8 sps:$4 sm:$0xff]   ;;  %v1409_v22 = vld [vmem:[%s2099_s1 + $0x50] ss:$8 sps:$4 sm:$0xff]  }
   0x8   :  { %1036 = vmatpush1.bf16.msra.mxu0 %v1386_v7  ;;  %951 = vmatprep.subr.bf16.mxu1 %v1387_v8  ;;  %v1404_v19 = vld [vmem:[%s2099_s1 + $0x240] ss:$8 sps:$4 sm:$0xff]   ;;  %v1407_v21 = vld [vmem:[%s2099_s1 + $0x254] ss:$8 sps:$4 sm:$0xff]   ;;  %v1410_v23 = vld [vmem:[%s2099_s1 + $0x250] ss:$8 sps:$4 sm:$0xff]  }
   0x9   :  { %1037 = vmatprep.subr.bf16.mxu0 %v1389_v9  ;;  %v1411_v24 = vld [vmem:[%s2099_s1 + $0x64] ss:$8 sps:$4 sm:$0xff]   ;;  %v1415_v26 = vld [vmem:[%s2099_s1 + $0x60] ss:$8 sps:$4 sm:$0xff]   ;;  %v1417_v28 = vld [vmem:[%s2099_s1 + $0x74] ss:$8 sps:$4 sm:$0xff]  }
   0xa   :  { %v1413_v25 = vld [vmem:[%s2099_s1 + $0x264] ss:$8 sps:$4 sm:$0xff]   ;;  %v1416_v27 = vld [vmem:[%s2099_s1 + $0x260] ss:$8 sps:$4 sm:$0xff]   ;;  %v1419_v29 = vld [vmem:[%s2099_s1 + $0x274] ss:$8 sps:$4 sm:$0xff]  }
   0xb   :  { %952 = vmatpush1.bf16.msra.mxu1 %v1391_v10  ;;  %v1421_v30 = vld [vmem:[%s2099_s1 + $0x70] ss:$8 sps:$4 sm:$0xff]   ;;  %v1423_v32 = vld [vmem:[%s2099_s1 + $0x84] ss:$8 sps:$4 sm:$0xff]   ;;  %v1427_v34 = vld [vmem:[%s2099_s1 + $0x80] ss:$8 sps:$4 sm:$0xff]  }
   0xc   :  { %1038 = vmatpush1.bf16.msra.mxu0 %v1392_v11  ;;  %953 = vmatprep.subr.bf16.mxu1 %v1393_v12  ;;  %v1422_v31 = vld [vmem:[%s2099_s1 + $0x270] ss:$8 sps:$4 sm:$0xff]   ;;  %v1425_v33 = vld [vmem:[%s2099_s1 + $0x284] ss:$8 sps:$4 sm:$0xff]   ;;  %v1428_v35 = vld [vmem:[%s2099_s1 + $0x280] ss:$8 sps:$4 sm:$0xff]  }
   0xd   :  { %1039 = vmatprep.subr.bf16.mxu0 %v1395_v13  ;;  %v1429_v36 = vld [vmem:[%s2099_s1 + $0x94] ss:$8 sps:$4 sm:$0xff]   ;;  %v1433_v38 = vld [vmem:[%s2099_s1 + $0x90] ss:$8 sps:$4 sm:$0xff]   ;;  %v1435_v40 = vld [vmem:[%s2099_s1 + $0xa4] ss:$8 sps:$4 sm:$0xff]  }
   0xe   :  { %v1431_v37 = vld [vmem:[%s2099_s1 + $0x294] ss:$8 sps:$4 sm:$0xff]   ;;  %v1434_v39 = vld [vmem:[%s2099_s1 + $0x290] ss:$8 sps:$4 sm:$0xff]   ;;  %v1437_v41 = vld [vmem:[%s2099_s1 + $0x2a4] ss:$8 sps:$4 sm:$0xff]  }
   0xf   :  { %954 = vmatpush1.bf16.msra.mxu1 %v1397_v14  ;;  %v1439_v42 = vld [vmem:[%s2099_s1 + $0xa0] ss:$8 sps:$4 sm:$0xff]   ;;  %v1441_v44 = vld [vmem:[%s2099_s1 + $0xb4] ss:$8 sps:$4 sm:$0xff]   ;;  %v1445_v46 = vld [vmem:[%s2099_s1 + $0xb0] ss:$8 sps:$4 sm:$0xff]  }
  0x10   :  { %1040 = vmatpush1.bf16.msra.mxu0 %v1398_v15  ;;  %955 = vmatprep.subr.bf16.mxu1 %v1399_v16  ;;  %v1440_v43 = vld [vmem:[%s2099_s1 + $0x2a0] ss:$8 sps:$4 sm:$0xff]   ;;  %v1443_v45 = vld [vmem:[%s2099_s1 + $0x2b4] ss:$8 sps:$4 sm:$0xff]   ;;  %v1446_v47 = vld [vmem:[%s2099_s1 + $0x2b0] ss:$8 sps:$4 sm:$0xff]  }
  0x11   :  { %1041 = vmatprep.subr.bf16.mxu0 %v1401_v17  ;;  %v1473_v48 = vld [vmem:[%s2100_s0 + $0x4] ss:$36 sps:$4 sm:$0xff]   ;;  %v1479_v51 = vld [vmem:[%s2100_s0 + $0x14] ss:$36 sps:$4 sm:$0xff]  }
  0x12   :  { %v1447_v49 = vld [vmem:[%s2099_s1 + $0xc4] ss:$8 sps:$4 sm:$0xff]   ;;  %979 = vmatprep.mubr.bf16.mxu1 %v1473_v48  ;;  %v1451_v52 = vld [vmem:[%s2099_s1 + $0xc0] ss:$8 sps:$4 sm:$0xff]   ;;  %v1453_v54 = vld [vmem:[%s2099_s1 + $0xd4] ss:$8 sps:$4 sm:$0xff]   ;;  %1065 = vmatprep.mubr.bf16.mxu0 %v1479_v51 }
  0x13   :  { %956 = vmatpush1.bf16.msra.mxu1 %v1403_v18  ;;  %v1449_v50 = vld [vmem:[%s2099_s1 + $0x2c4] ss:$8 sps:$4 sm:$0xff]   ;;  %v1452_v53 = vld [vmem:[%s2099_s1 + $0x2c0] ss:$8 sps:$4 sm:$0xff]   ;;  %v1455_v55 = vld [vmem:[%s2099_s1 + $0x2d4] ss:$8 sps:$4 sm:$0xff]  }
  0x14   :  { %1042 = vmatpush1.bf16.msra.mxu0 %v1404_v19  ;;  %957 = vmatprep.subr.bf16.mxu1 %v1405_v20  ;;  %v1457_v56 = vld [vmem:[%s2099_s1 + $0xd0] ss:$8 sps:$4 sm:$0xff]   ;;  %v1459_v58 = vld [vmem:[%s2099_s1 + $0xe4] ss:$8 sps:$4 sm:$0xff]   ;;  %v1463_v60 = vld [vmem:[%s2099_s1 + $0xe0] ss:$8 sps:$4 sm:$0xff]  }
  0x15   :  { %1043 = vmatprep.subr.bf16.mxu0 %v1407_v21  ;;  %v1458_v57 = vld [vmem:[%s2099_s1 + $0x2d0] ss:$8 sps:$4 sm:$0xff]   ;;  %v1461_v59 = vld [vmem:[%s2099_s1 + $0x2e4] ss:$8 sps:$4 sm:$0xff]   ;;  %v1464_v61 = vld [vmem:[%s2099_s1 + $0x2e0] ss:$8 sps:$4 sm:$0xff]  }
  0x16   :  { %v1465_v62 = vld [vmem:[%s2099_s1 + $0xf4] ss:$8 sps:$4 sm:$0xff]   ;;  %v1469_v0 = vld [vmem:[%s2099_s1 + $0xf0] ss:$8 sps:$4 sm:$0xff]   ;;  %v1476_v2 = vld [vmem:[%s2099_s1 + $0x104] ss:$8 sps:$4 sm:$0xff]  }
  0x17   :  { %958 = vmatpush1.bf16.msra.mxu1 %v1409_v22  ;;  %v1467_v63 = vld [vmem:[%s2099_s1 + $0x2f4] ss:$8 sps:$4 sm:$0xff]   ;;  %v1470_v1 = vld [vmem:[%s2099_s1 + $0x2f0] ss:$8 sps:$4 sm:$0xff]   ;;  %v1482_v3 = vld [vmem:[%s2099_s1 + $0x304] ss:$8 sps:$4 sm:$0xff]  }
  0x18   :  { %1044 = vmatpush1.bf16.msra.mxu0 %v1410_v23  ;;  %959 = vmatprep.subr.bf16.mxu1 %v1411_v24  ;;  %v1471_v4 = vld [vmem:[%s2100_s0] ss:$36 sps:$4 sm:$0xff]   ;;  %v1477_v6 = vld [vmem:[%s2100_s0 + $0x10] ss:$36 sps:$4 sm:$0xff]  }
  0x19   :  { %1045 = vmatprep.subr.bf16.mxu0 %v1413_v25  ;;  %v1474_v5 = vld [vmem:[%s2099_s1 + $0x100] ss:$8 sps:$4 sm:$0xff]   ;;  %v1485_v8 = vld [vmem:[%s2099_s1 + $0x114] ss:$8 sps:$4 sm:$0xff]   ;;  %v1483_v10 = vld [vmem:[%s2099_s1 + $0x110] ss:$8 sps:$4 sm:$0xff]  }
  0x1a   :  { %v1480_v7 = vld [vmem:[%s2099_s1 + $0x300] ss:$8 sps:$4 sm:$0xff]   ;;  %v1488_v9 = vld [vmem:[%s2099_s1 + $0x314] ss:$8 sps:$4 sm:$0xff]   ;;  %v1486_v11 = vld [vmem:[%s2099_s1 + $0x310] ss:$8 sps:$4 sm:$0xff]  }
  0x1b   :  { %960 = vmatpush1.bf16.msra.mxu1 %v1415_v26  ;;  %v1491_v12 = vld [vmem:[%s2099_s1 + $0x124] ss:$8 sps:$4 sm:$0xff]   ;;  %v1489_v14 = vld [vmem:[%s2099_s1 + $0x120] ss:$8 sps:$4 sm:$0xff]   ;;  %v1497_v16 = vld [vmem:[%s2099_s1 + $0x134] ss:$8 sps:$4 sm:$0xff]  }
  0x1c   :  { %1046 = vmatpush1.bf16.msra.mxu0 %v1416_v27  ;;  %961 = vmatprep.subr.bf16.mxu1 %v1417_v28  ;;  %v1494_v13 = vld [vmem:[%s2099_s1 + $0x324] ss:$8 sps:$4 sm:$0xff]   ;;  %v1492_v15 = vld [vmem:[%s2099_s1 + $0x320] ss:$8 sps:$4 sm:$0xff]   ;;  %v1500_v17 = vld [vmem:[%s2099_s1 + $0x334] ss:$8 sps:$4 sm:$0xff]  }
  0x1d   :  { %1047 = vmatprep.subr.bf16.mxu0 %v1419_v29  ;;  %v1495_v18 = vld [vmem:[%s2099_s1 + $0x130] ss:$8 sps:$4 sm:$0xff]   ;;  %v1503_v20 = vld [vmem:[%s2099_s1 + $0x144] ss:$8 sps:$4 sm:$0xff]   ;;  %v1501_v22 = vld [vmem:[%s2099_s1 + $0x140] ss:$8 sps:$4 sm:$0xff]  }
  0x1e   :  { %v1498_v19 = vld [vmem:[%s2099_s1 + $0x330] ss:$8 sps:$4 sm:$0xff]   ;;  %v1506_v21 = vld [vmem:[%s2099_s1 + $0x344] ss:$8 sps:$4 sm:$0xff]   ;;  %v1504_v23 = vld [vmem:[%s2099_s1 + $0x340] ss:$8 sps:$4 sm:$0xff]  }
  0x1f   :  { %962 = vmatpush1.bf16.msra.mxu1 %v1421_v30  ;;  %v1509_v24 = vld [vmem:[%s2099_s1 + $0x154] ss:$8 sps:$4 sm:$0xff]   ;;  %v1507_v26 = vld [vmem:[%s2099_s1 + $0x150] ss:$8 sps:$4 sm:$0xff]   ;;  %v1515_v28 = vld [vmem:[%s2099_s1 + $0x164] ss:$8 sps:$4 sm:$0xff]  }
  0x20   :  { %1048 = vmatpush1.bf16.msra.mxu0 %v1422_v31  ;;  %963 = vmatprep.subr.bf16.mxu1 %v1423_v32  ;;  %v1512_v25 = vld [vmem:[%s2099_s1 + $0x354] ss:$8 sps:$4 sm:$0xff]   ;;  %v1510_v27 = vld [vmem:[%s2099_s1 + $0x350] ss:$8 sps:$4 sm:$0xff]   ;;  %v1518_v29 = vld [vmem:[%s2099_s1 + $0x364] ss:$8 sps:$4 sm:$0xff]  }
  0x21   :  { %1049 = vmatprep.subr.bf16.mxu0 %v1425_v33  ;;  %v1513_v30 = vld [vmem:[%s2099_s1 + $0x160] ss:$8 sps:$4 sm:$0xff]   ;;  %v1521_v32 = vld [vmem:[%s2099_s1 + $0x174] ss:$8 sps:$4 sm:$0xff]  }
  0x22   :  { %v1516_v31 = vld [vmem:[%s2099_s1 + $0x360] ss:$8 sps:$4 sm:$0xff]   ;;  %v1524_v33 = vld [vmem:[%s2099_s1 + $0x374] ss:$8 sps:$4 sm:$0xff]  }
  0x23   :  { %964 = vmatpush1.bf16.msra.mxu1 %v1427_v34  ;;  %v1575_v34 = vld [vmem:[%s2100_s0 + $0xc] ss:$36 sps:$4 sm:$0xff]   ;;  %v1537_v48 = vld [vmem:[%s2099_s1 + $0x1a0] ss:$8 sps:$4 sm:$0xff]   ;;  %v1548_v51 = vld [vmem:[%s2099_s1 + $0x3b4] ss:$8 sps:$4 sm:$0xff]  }
  0x24   :  { %1050 = vmatpush1.bf16.msra.mxu0 %v1428_v35  ;;  %965 = vmatprep.subr.bf16.mxu1 %v1429_v36  ;;  %v1578_v35 = vld [vmem:[%s2100_s0 + $0x1c] ss:$36 sps:$4 sm:$0xff]   ;;  %v1519_v36 = vld [vmem:[%s2099_s1 + $0x170] ss:$8 sps:$4 sm:$0xff]  }
  0x25   :  { %1051 = vmatprep.subr.bf16.mxu0 %v1431_v37  ;;  %v1522_v37 = vld [vmem:[%s2099_s1 + $0x370] ss:$8 sps:$4 sm:$0xff]  }
  0x27   :  { %966 = vmatpush1.bf16.msra.mxu1 %v1433_v38  ;;  %v1527_v38 = vld [vmem:[%s2099_s1 + $0x184] ss:$8 sps:$4 sm:$0xff]  }
  0x28   :  { %1052 = vmatpush1.bf16.msra.mxu0 %v1434_v39  ;;  %967 = vmatprep.subr.bf16.mxu1 %v1435_v40  ;;  %v1530_v39 = vld [vmem:[%s2099_s1 + $0x384] ss:$8 sps:$4 sm:$0xff]   ;;  %v1525_v40 = vld [vmem:[%s2099_s1 + $0x180] ss:$8 sps:$4 sm:$0xff]  }
  0x29   :  { %1053 = vmatprep.subr.bf16.mxu0 %v1437_v41  ;;  %v1528_v41 = vld [vmem:[%s2099_s1 + $0x380] ss:$8 sps:$4 sm:$0xff]  }
  0x2b   :  { %968 = vmatpush1.bf16.msra.mxu1 %v1439_v42  ;;  %v1533_v42 = vld [vmem:[%s2099_s1 + $0x194] ss:$8 sps:$4 sm:$0xff]  }
  0x2c   :  { %1054 = vmatpush1.bf16.msra.mxu0 %v1440_v43  ;;  %969 = vmatprep.subr.bf16.mxu1 %v1441_v44  ;;  %v1536_v43 = vld [vmem:[%s2099_s1 + $0x394] ss:$8 sps:$4 sm:$0xff]   ;;  %v1531_v44 = vld [vmem:[%s2099_s1 + $0x190] ss:$8 sps:$4 sm:$0xff]  }
  0x2d   :  { %1055 = vmatprep.subr.bf16.mxu0 %v1443_v45  ;;  %v1534_v45 = vld [vmem:[%s2099_s1 + $0x390] ss:$8 sps:$4 sm:$0xff]  }
  0x2f   :  { %970 = vmatpush1.bf16.msra.mxu1 %v1445_v46  ;;  %v1539_v46 = vld [vmem:[%s2099_s1 + $0x1a4] ss:$8 sps:$4 sm:$0xff]  }
  0x30   :  { %1056 = vmatpush1.bf16.msra.mxu0 %v1446_v47  ;;  %971 = vmatprep.subr.bf16.mxu1 %v1447_v49  ;;  %v1542_v47 = vld [vmem:[%s2099_s1 + $0x3a4] ss:$8 sps:$4 sm:$0xff]   ;;  %v1540_v49 = vld [vmem:[%s2099_s1 + $0x3a0] ss:$8 sps:$4 sm:$0xff]  }
  0x31   :  { %1057 = vmatprep.subr.bf16.mxu0 %v1449_v50  ;;  %v1545_v50 = vld [vmem:[%s2099_s1 + $0x1b4] ss:$8 sps:$4 sm:$0xff]  }
  0x33   :  { %972 = vmatpush1.bf16.msra.mxu1 %v1451_v52  ;;  %v1543_v52 = vld [vmem:[%s2099_s1 + $0x1b0] ss:$8 sps:$4 sm:$0xff]  }
  0x34   :  { %1058 = vmatpush1.bf16.msra.mxu0 %v1452_v53  ;;  %973 = vmatprep.subr.bf16.mxu1 %v1453_v54  ;;  %v1546_v53 = vld [vmem:[%s2099_s1 + $0x3b0] ss:$8 sps:$4 sm:$0xff]   ;;  %v1551_v54 = vld [vmem:[%s2099_s1 + $0x1c4] ss:$8 sps:$4 sm:$0xff]  }
  0x35   :  { %1059 = vmatprep.subr.bf16.mxu0 %v1455_v55  ;;  %v1554_v55 = vld [vmem:[%s2099_s1 + $0x3c4] ss:$8 sps:$4 sm:$0xff]  }
  0x37   :  { %974 = vmatpush1.bf16.msra.mxu1 %v1457_v56  ;;  %v1549_v56 = vld [vmem:[%s2099_s1 + $0x1c0] ss:$8 sps:$4 sm:$0xff]  }
  0x38   :  { %1060 = vmatpush1.bf16.msra.mxu0 %v1458_v57  ;;  %975 = vmatprep.subr.bf16.mxu1 %v1459_v58  ;;  %v1552_v57 = vld [vmem:[%s2099_s1 + $0x3c0] ss:$8 sps:$4 sm:$0xff]   ;;  %v1557_v58 = vld [vmem:[%s2099_s1 + $0x1d4] ss:$8 sps:$4 sm:$0xff]  }
  0x39   :  { %1061 = vmatprep.subr.bf16.mxu0 %v1461_v59  ;;  %v1560_v59 = vld [vmem:[%s2099_s1 + $0x3d4] ss:$8 sps:$4 sm:$0xff]  }
  0x3b   :  { %976 = vmatpush1.bf16.msra.mxu1 %v1463_v60  ;;  %v1555_v60 = vld [vmem:[%s2099_s1 + $0x1d0] ss:$8 sps:$4 sm:$0xff]  }
  0x3c   :  { %1062 = vmatpush1.bf16.msra.mxu0 %v1464_v61  ;;  %977 = vmatprep.subr.bf16.mxu1 %v1465_v62  ;;  %v1558_v61 = vld [vmem:[%s2099_s1 + $0x3d0] ss:$8 sps:$4 sm:$0xff]   ;;  %v1563_v62 = vld [vmem:[%s2099_s1 + $0x1e4] ss:$8 sps:$4 sm:$0xff]  }
  0x3d   :  { %1063 = vmatprep.subr.bf16.mxu0 %v1467_v63  ;;  %v1566_v63 = vld [vmem:[%s2099_s1 + $0x3e4] ss:$8 sps:$4 sm:$0xff]  }
  0x3f   :  { %978 = vmatpush1.bf16.msra.mxu1 %v1469_v0  ;;  %v1561_v0 = vld [vmem:[%s2099_s1 + $0x1e0] ss:$8 sps:$4 sm:$0xff]  }
  0x40   :  { %1064 = vmatpush1.bf16.msra.mxu0 %v1470_v1  ;;  %990 = vmatprep.subr.bf16.mxu1 %v1476_v2  ;;  %v1564_v1 = vld [vmem:[%s2099_s1 + $0x3e0] ss:$8 sps:$4 sm:$0xff]   ;;  %v1569_v2 = vld [vmem:[%s2099_s1 + $0x1f4] ss:$8 sps:$4 sm:$0xff]  }
  0x41   :  { %1076 = vmatprep.subr.bf16.mxu0 %v1482_v3  ;;  %v1572_v3 = vld [vmem:[%s2099_s1 + $0x3f4] ss:$8 sps:$4 sm:$0xff]  }
  0x42   :  { %980 = vmatmul.mubr.bf16.vlgmr.msra.gmra.mrb[0].mxu1 %v1471_v4  ;;  %v1567_v4 = vld [vmem:[%s2099_s1 + $0x1f0] ss:$8 sps:$4 sm:$0xff]  }
  0x43   :  { %1066 = vmatmul.mubr.bf16.vlgmr.msra.gmra.mrb[0].mxu0 %v1477_v6  ;;  %991 = vmatpush1.bf16.msra.mxu1 %v1474_v5  ;;  %v1570_v5 = vld [vmem:[%s2099_s1 + $0x3f0] ss:$8 sps:$4 sm:$0xff]   ;;  %v1581_v6 = vld [vmem:[%s2099_s1 + $0x404] ss:$8 sps:$4 sm:$0xff]  }
  0x44   :  { %1077 = vmatpush1.bf16.msra.mxu0 %v1480_v7  ;;  %992 = vmatprep.subr.bf16.mxu1 %v1485_v8  ;;  %v1573_v7 = vld [vmem:[%s2100_s0 + $0x8] ss:$36 sps:$4 sm:$0xff]   ;;  %v1576_v8 = vld [vmem:[%s2100_s0 + $0x18] ss:$36 sps:$4 sm:$0xff]  }
  0x45   :  { %1078 = vmatprep.subr.bf16.mxu0 %v1488_v9  ;;  %1022 = vmatprep.mubr.bf16.mxu1 %v1575_v34  ;;  %v1579_v9 = vld [vmem:[%s2099_s1 + $0x400] ss:$8 sps:$4 sm:$0xff]  }
  0x46   :  { %1108 = vmatprep.mubr.bf16.mxu0 %v1578_v35 }
  0x47   :  { %993 = vmatpush1.bf16.msra.mxu1 %v1483_v10  ;;  %v1584_v10 = vld [vmem:[%s2099_s1 + $0x414] ss:$8 sps:$4 sm:$0xff]  }
  0x48   :  { %1079 = vmatpush1.bf16.msra.mxu0 %v1486_v11  ;;  %994 = vmatprep.subr.bf16.mxu1 %v1491_v12  ;;  %v1582_v11 = vld [vmem:[%s2099_s1 + $0x410] ss:$8 sps:$4 sm:$0xff]   ;;  %v1604_v12 = vmov 0  }
  0x49   :  { %1080 = vmatprep.subr.bf16.mxu0 %v1494_v13  ;;  %v1587_v13 = vld [vmem:[%s2099_s1 + $0x424] ss:$8 sps:$4 sm:$0xff]  }
  0x4b   :  { %995 = vmatpush1.bf16.msra.mxu1 %v1489_v14  ;;  %v1585_v14 = vld [vmem:[%s2099_s1 + $0x420] ss:$8 sps:$4 sm:$0xff]  }
  0x4c   :  { %1081 = vmatpush1.bf16.msra.mxu0 %v1492_v15  ;;  %996 = vmatprep.subr.bf16.mxu1 %v1497_v16  ;;  %v1590_v15 = vld [vmem:[%s2099_s1 + $0x434] ss:$8 sps:$4 sm:$0xff]   ;;  %v1588_v16 = vld [vmem:[%s2099_s1 + $0x430] ss:$8 sps:$4 sm:$0xff]  }
  0x4d   :  { %1082 = vmatprep.subr.bf16.mxu0 %v1500_v17  ;;  %v1593_v17 = vld [vmem:[%s2099_s1 + $0x444] ss:$8 sps:$4 sm:$0xff]  }
  0x4f   :  { %997 = vmatpush1.bf16.msra.mxu1 %v1495_v18  ;;  %v1591_v18 = vld [vmem:[%s2099_s1 + $0x440] ss:$8 sps:$4 sm:$0xff]  }
  0x50   :  { %1083 = vmatpush1.bf16.msra.mxu0 %v1498_v19  ;;  %998 = vmatprep.subr.bf16.mxu1 %v1503_v20  ;;  %v1596_v19 = vld [vmem:[%s2099_s1 + $0x454] ss:$8 sps:$4 sm:$0xff]   ;;  %v1594_v20 = vld [vmem:[%s2099_s1 + $0x450] ss:$8 sps:$4 sm:$0xff]  }
  0x51   :  { %1084 = vmatprep.subr.bf16.mxu0 %v1506_v21  ;;  %v1599_v21 = vld [vmem:[%s2099_s1 + $0x464] ss:$8 sps:$4 sm:$0xff]  }
  0x53   :  { %999 = vmatpush1.bf16.msra.mxu1 %v1501_v22  ;;  %v1597_v22 = vld [vmem:[%s2099_s1 + $0x460] ss:$8 sps:$4 sm:$0xff]  }
  0x54   :  { %1085 = vmatpush1.bf16.msra.mxu0 %v1504_v23  ;;  %1000 = vmatprep.subr.bf16.mxu1 %v1509_v24  ;;  %v1602_v23 = vld [vmem:[%s2099_s1 + $0x474] ss:$8 sps:$4 sm:$0xff]   ;;  %v1600_v24 = vld [vmem:[%s2099_s1 + $0x470] ss:$8 sps:$4 sm:$0xff]  }
  0x55   :  { %1086 = vmatprep.subr.bf16.mxu0 %v1512_v25  ;;  %v1603_v25 = vld [vmem:[%s2100_s0 + $0x20] ss:$36 sps:$4 sm:$0xff]  }
  0x57   :  { %1001 = vmatpush1.bf16.msra.mxu1 %v1507_v26 }
  0x58   :  { %1087 = vmatpush1.bf16.msra.mxu0 %v1510_v27  ;;  %1002 = vmatprep.subr.bf16.mxu1 %v1515_v28 }
  0x59   :  { %1088 = vmatprep.subr.bf16.mxu0 %v1518_v29 }
  0x5b   :  { %1003 = vmatpush1.bf16.msra.mxu1 %v1513_v30  ;;  %v1179_v30 = vlaneseq }
  0x5c   :  { %1089 = vmatpush1.bf16.msra.mxu0 %v1516_v31  ;;  %1004 = vmatprep.subr.bf16.mxu1 %v1521_v32 }
  0x5d   :  { %1090 = vmatprep.subr.bf16.mxu0 %v1524_v33  ;;  %v1180_v31 = vshrl.u32 %v1179_v30, 7  ;;  %v1177_v33 = vld [vmem:[%s2101_s2] sm:$0x3] }
  0x5f   :  { %1005 = vmatpush1.bf16.msra.mxu1 %v1519_v36  ;;  %v1181_v32 = vsub.s32 0, %v1180_v31  ;;  %v1185_v34 = vsub.s32 1, %v1180_v31 }
  0x60   :  { %1091 = vmatpush1.bf16.msra.mxu0 %v1522_v37  ;;  %1006 = vmatprep.subr.bf16.mxu1 %v1527_v38 }
  0x61   :  { %1092 = vmatprep.subr.bf16.mxu0 %v1530_v39  ;;  %v1182_v35 = vrot.slane %v1177_v33, %v1181_v32  ;;  %v1186_v37 = vrot.slane %v1177_v33, %v1185_v34 }
  0x63   :  { %1007 = vmatpush1.bf16.msra.mxu1 %v1525_v40 }
  0x64   :  { %1093 = vmatpush1.bf16.msra.mxu0 %v1528_v41  ;;  %1008 = vmatprep.subr.bf16.mxu1 %v1533_v42 }
  0x65   :  { %1094 = vmatprep.subr.bf16.mxu0 %v1536_v43 }
  0x67   :  { %1009 = vmatpush1.bf16.msra.mxu1 %v1531_v44 }
  0x68   :  { %1095 = vmatpush1.bf16.msra.mxu0 %v1534_v45  ;;  %1010 = vmatprep.subr.bf16.mxu1 %v1539_v46 }
  0x69   :  { %1096 = vmatprep.subr.bf16.mxu0 %v1542_v47 }
  0x6b   :  { %1011 = vmatpush1.bf16.msra.mxu1 %v1537_v48 }
  0x6c   :  { %1097 = vmatpush1.bf16.msra.mxu0 %v1540_v49  ;;  %1012 = vmatprep.subr.bf16.mxu1 %v1545_v50 }
  0x6d   :  { %1098 = vmatprep.subr.bf16.mxu0 %v1548_v51 }
  0x6f   :  { %1013 = vmatpush1.bf16.msra.mxu1 %v1543_v52 }
  0x70   :  { %1099 = vmatpush1.bf16.msra.mxu0 %v1546_v53  ;;  %1014 = vmatprep.subr.bf16.mxu1 %v1551_v54 }
  0x71   :  { %1100 = vmatprep.subr.bf16.mxu0 %v1554_v55 }
  0x73   :  { %1015 = vmatpush1.bf16.msra.mxu1 %v1549_v56 }
  0x74   :  { %1101 = vmatpush1.bf16.msra.mxu0 %v1552_v57  ;;  %1016 = vmatprep.subr.bf16.mxu1 %v1557_v58 }
  0x75   :  { %1102 = vmatprep.subr.bf16.mxu0 %v1560_v59 }
  0x77   :  { %1017 = vmatpush1.bf16.msra.mxu1 %v1555_v60 }
  0x78   :  { %1103 = vmatpush1.bf16.msra.mxu0 %v1558_v61  ;;  %1018 = vmatprep.subr.bf16.mxu1 %v1563_v62 }
  0x79   :  { %1104 = vmatprep.subr.bf16.mxu0 %v1566_v63 }
  0x7b   :  { %1019 = vmatpush1.bf16.msra.mxu1 %v1561_v0 }
  0x7c   :  { %1105 = vmatpush1.bf16.msra.mxu0 %v1564_v1  ;;  %1020 = vmatprep.subr.bf16.mxu1 %v1569_v2 }
  0x7d   :  { %1106 = vmatprep.subr.bf16.mxu0 %v1572_v3 }
  0x7f   :  { %1021 = vmatpush1.bf16.msra.mxu1 %v1567_v4 }
  0x80   :  { %1107 = vmatpush1.bf16.msra.mxu0 %v1570_v5 }
  0x81   :  { %1119 = vmatprep.subr.bf16.mxu0 %v1581_v6 }
  0x82   :  { %1023 = vmatmul.mubr.bf16.vlgmr.msra.gmra.mrb[0].mxu1 %v1573_v7 }
  0x83   :  { %1109 = vmatmul.mubr.bf16.vlgmr.msra.gmra.mrb[0].mxu0 %v1576_v8 }
  0x84   :  { %1120 = vmatpush1.bf16.msra.mxu0 %v1579_v9  ;;  %1151 = vmatprep.mubr.bf16.mxu0 %v1604_v12 }
  0x85   :  { %1121 = vmatprep.subr.bf16.mxu0 %v1584_v10 }
  0x88   :  { %1122 = vmatpush1.bf16.msra.mxu0 %v1582_v11 }
  0x89   :  { %1123 = vmatprep.subr.bf16.mxu0 %v1587_v13 }
  0x8c   :  { %1124 = vmatpush1.bf16.msra.mxu0 %v1585_v14 }
  0x8d   :  { %1125 = vmatprep.subr.bf16.mxu0 %v1590_v15 }
  0x90   :  { %1126 = vmatpush1.bf16.msra.mxu0 %v1588_v16 }
  0x91   :  { %1127 = vmatprep.subr.bf16.mxu0 %v1593_v17 }
  0x94   :  { %1128 = vmatpush1.bf16.msra.mxu0 %v1591_v18 }
  0x95   :  { %1129 = vmatprep.subr.bf16.mxu0 %v1596_v19 }
  0x98   :  { %1130 = vmatpush1.bf16.msra.mxu0 %v1594_v20 }
  0x99   :  { %1131 = vmatprep.subr.bf16.mxu0 %v1599_v21 }
  0x9c   :  { %1132 = vmatpush1.bf16.msra.mxu0 %v1597_v22 }
  0x9d   :  { %1133 = vmatprep.subr.bf16.mxu0 %v1602_v23 }
  0xa0   :  { %1134 = vmatpush1.bf16.msra.mxu0 %v1600_v24 }
  0xa3   :  { %1152 = vmatmul.mubr.bf16.vlgmr.msra.gmra.mrb[0].mxu0 %v1603_v25 }
 0x155   :  { %v1024_v26 = vpop.f32.mrb[0].mxu1 }
 0x156   :  { %v1026_v27 = vpop.f32.mrb[1].mxu1 }
 0x157   :  { %v1028_v28 = vpop.f32.mrb[2].mxu1 }
 0x158   :  { %v1030_v29 = vpop.f32.mrb[3].mxu1 }
 0x176   :  { %v1153_v36 = vpop.f32.mrb[0].mxu0 }
 0x177   :  { %v1358_v38 = vadd.f32 %v1153_v36, %v1024_v26  ;;  %v1155_v39 = vpop.f32.mrb[1].mxu0 }
 0x178   :  { %v1359_v40 = vadd.f32 %v1155_v39, %v1026_v27  ;;  %v1157_v41 = vpop.f32.mrb[2].mxu0 }
 0x179   :  { %v1189_v42 = vadd.f32 %v1358_v38, %v1182_v35  ;;  %v1360_v43 = vadd.f32 %v1157_v41, %v1028_v28  ;;  %v1159_v44 = vpop.f32.mrb[3].mxu0 }
 0x17a   :  { %v1190_v45 = vadd.f32 %v1359_v40, %v1186_v37  ;;  %v1361_v46 = vadd.f32 %v1159_v44, %v1030_v29 }
 0x17b   :  { %v1193_v47 = vmax.f32 %v1189_v42, 0.0  ;;  %v1191_v48 = vadd.f32 %v1360_v43, %v1182_v35 }
 0x17c   :  { %v1194_v49 = vmax.f32 %v1190_v45, 0.0  ;;  %v1192_v50 = vadd.f32 %v1361_v46, %v1186_v37 }
 0x17d   :  { %1197 = vst [vmem:[%s2102_s3] sm:$0xff] %v1193_v47  ;;  %v1195_v51 = vmax.f32 %v1191_v48, 0.0 }
 0x17e   :  { %1198 = vst [vmem:[%s2102_s3 + $0x8] sm:$0xff] %v1194_v49  ;;  %v1196_v52 = vmax.f32 %v1192_v50, 0.0 }
 0x17f   :  { %1199 = vst [vmem:[%s2102_s3 + $0x10] sm:$0xff] %v1195_v51 }
 0x180   :  { %1200 = vst [vmem:[%s2102_s3 + $0x18] sm:$0xff] %v1196_v52 }

// kernel: resnet18_forward.34
= control target key start
LH: loop header
LB: loop body
LE: loop exit
PB: predicated region body
PF: predicated region fallthrough
CT: control target
= control target key end

     0   :  { %v256_v1 = vmov 0   ;;  %v191_v18 = vlaneseq  ;;  %s343_s1 = inlined_call_operand.vmem [shape: bf16[128,256], index: 1, kind: input, shape index: {}]   ;;  %s344_s0 = inlined_call_operand.vmem [shape: bf16[16,128], index: 0, kind: input, shape index: {}]   ;;  %s345_s2 = inlined_call_operand.vmem [shape: f32[1,256], index: 2, kind: input, shape index: {}]   ;;  %s346_s3 = inlined_call_operand.vmem [shape: f32[16,256], index: 3, kind: output, shape index: {}]  }
   0x1   :  { %v231_v0 = vld [vmem:[%s343_s1 + $0x4] ss:$8 sps:$4 sm:$0xff]   ;;  %163 = vmatprep.mubr.bf16.mxu0 %v256_v1  ;;  %v233_v2 = vld [vmem:[%s343_s1] ss:$8 sps:$4 sm:$0xff]   ;;  %v234_v3 = vld [vmem:[%s343_s1 + $0x14] ss:$8 sps:$4 sm:$0xff]  }
   0x2   :  { %131 = vmatprep.subr.bf16.mxu0 %v231_v0  ;;  %v236_v4 = vld [vmem:[%s343_s1 + $0x10] ss:$8 sps:$4 sm:$0xff]   ;;  %v237_v5 = vld [vmem:[%s343_s1 + $0x24] ss:$8 sps:$4 sm:$0xff]   ;;  %v239_v6 = vld [vmem:[%s343_s1 + $0x20] ss:$8 sps:$4 sm:$0xff]  }
   0x3   :  { %132 = vmatpush1.bf16.msra.mxu0 %v233_v2  ;;  %v240_v7 = vld [vmem:[%s343_s1 + $0x34] ss:$8 sps:$4 sm:$0xff]   ;;  %v242_v8 = vld [vmem:[%s343_s1 + $0x30] ss:$8 sps:$4 sm:$0xff]   ;;  %v243_v9 = vld [vmem:[%s343_s1 + $0x44] ss:$8 sps:$4 sm:$0xff]  }
   0x4   :  { %133 = vmatprep.subr.bf16.mxu0 %v234_v3  ;;  %v245_v10 = vld [vmem:[%s343_s1 + $0x40] ss:$8 sps:$4 sm:$0xff]   ;;  %v246_v11 = vld [vmem:[%s343_s1 + $0x54] ss:$8 sps:$4 sm:$0xff]   ;;  %v248_v12 = vld [vmem:[%s343_s1 + $0x50] ss:$8 sps:$4 sm:$0xff]  }
   0x5   :  { %v249_v13 = vld [vmem:[%s343_s1 + $0x64] ss:$8 sps:$4 sm:$0xff]   ;;  %v251_v14 = vld [vmem:[%s343_s1 + $0x60] ss:$8 sps:$4 sm:$0xff]   ;;  %v252_v15 = vld [vmem:[%s343_s1 + $0x74] ss:$8 sps:$4 sm:$0xff]  }
   0x6   :  { %v254_v16 = vld [vmem:[%s343_s1 + $0x70] ss:$8 sps:$4 sm:$0xff]   ;;  %v255_v17 = vld [vmem:[%s344_s0] sm:$0xff]   ;;  %v192_v19 = vshrl.u32 %v191_v18, 7 }
   0x7   :  { %134 = vmatpush1.bf16.msra.mxu0 %v236_v4  ;;  %v189_v21 = vld [vmem:[%s345_s2] sm:$0x3] }
   0x8   :  { %135 = vmatprep.subr.bf16.mxu0 %v237_v5  ;;  %v193_v20 = vsub.s32 0, %v192_v19  ;;  %v197_v22 = vsub.s32 1, %v192_v19 }
   0xa   :  { %v194_v23 = vrot.slane %v189_v21, %v193_v20  ;;  %v198_v24 = vrot.slane %v189_v21, %v197_v22 }
   0xb   :  { %136 = vmatpush1.bf16.msra.mxu0 %v239_v6 }
   0xc   :  { %137 = vmatprep.subr.bf16.mxu0 %v240_v7 }
   0xf   :  { %138 = vmatpush1.bf16.msra.mxu0 %v242_v8 }
  0x10   :  { %139 = vmatprep.subr.bf16.mxu0 %v243_v9 }
  0x13   :  { %140 = vmatpush1.bf16.msra.mxu0 %v245_v10 }
  0x14   :  { %141 = vmatprep.subr.bf16.mxu0 %v246_v11 }
  0x17   :  { %142 = vmatpush1.bf16.msra.mxu0 %v248_v12 }
  0x18   :  { %143 = vmatprep.subr.bf16.mxu0 %v249_v13 }
  0x1b   :  { %144 = vmatpush1.bf16.msra.mxu0 %v251_v14 }
  0x1c   :  { %145 = vmatprep.subr.bf16.mxu0 %v252_v15 }
  0x1f   :  { %146 = vmatpush1.bf16.msra.mxu0 %v254_v16 }
  0x22   :  { %164 = vmatmul.mubr.bf16.vlgmr.msra.gmra.mrb[0].mxu0 %v255_v17 }
  0xf5   :  { %v165_v25 = vpop.f32.mrb[0].mxu0 }
  0xf6   :  { %v201_v26 = vadd.f32 %v194_v23, %v165_v25  ;;  %v167_v27 = vpop.f32.mrb[1].mxu0 }
  0xf7   :  { %v202_v28 = vadd.f32 %v198_v24, %v167_v27  ;;  %v169_v29 = vpop.f32.mrb[2].mxu0 }
  0xf8   :  { %205 = vst [vmem:[%s346_s3] sm:$0xff] %v201_v26  ;;  %v203_v30 = vadd.f32 %v194_v23, %v169_v29  ;;  %v171_v31 = vpop.f32.mrb[3].mxu0 }
  0xf9   :  { %206 = vst [vmem:[%s346_s3 + $0x8] sm:$0xff] %v202_v28  ;;  %v204_v32 = vadd.f32 %v198_v24, %v171_v31 }
  0xfa   :  { %207 = vst [vmem:[%s346_s3 + $0x10] sm:$0xff] %v203_v30 }
  0xfb   :  { %208 = vst [vmem:[%s346_s3 + $0x18] sm:$0xff] %v204_v32 }

// kernel: resnet18_forward.35
= control target key start
LH: loop header
LB: loop body
LE: loop exit
PB: predicated region body
PF: predicated region fallthrough
CT: control target
= control target key end

     0   :  { %s1365_s15 = smov 0   ;;  %s1367_s16 = smov 0   ;;  %s1531_s0 = inlined_call_operand.vmem [shape: bf16[16,2560], index: 0, kind: input, shape index: {}]   ;;  %s1532_s1 = inlined_call_operand.vmem [shape: bf16[2560,256], index: 1, kind: input, shape index: {}]   ;;  %s1533_s2 = inlined_call_operand.vmem [shape: f32[1,256], index: 2, kind: input, shape index: {}]   ;;  %s1534_s3 = inlined_call_operand.vmem [shape: f32[16,256], index: 3, kind: input, shape index: {}]   ;;  %s1535_s4 = inlined_call_operand.vmem [shape: f32[16,256], index: 4, kind: output, shape index: {}]  }
   0x1   :  { %s1369_s17 = smov 0   ;;  %s1371_s18 = smov 0  }
   0x2   :  { %s1373_s19 = smov 0  }
   0x3 LB: > { %s26_s20 = sadd.s32 1, %s1333_s18  ;;  %p49_p1 = scmp.ne.s32.totalorder %s1325_s16, %s1321_s15  ;;  %s1337_s19 = sphi %s1373_s19, %s14_s19   ;;  %s1333_s18 = sphi %s1371_s18, %s1539_s18   ;;  %s1329_s17 = sphi %s1369_s17, %s1538_s17   ;;  %s1325_s16 = sphi %s1367_s16, %s1537_s16   ;;  %s1321_s15 = sphi %s1365_s15, %s1536_s15  }
   0x4   : > { %p27_p0 = scmp.ge.s32.totalorder %s26_s20, 5  ;;  %p50_p2 = scmp.eq.s32.totalorder %s1337_s19, 0 }
   0x5   : > { %s42_s22 = sadd.s32 1, %s1325_s16  ;;  %p1067_p5 = scmp.ge.s32.totalorder %s1337_s19, 5 }
   0x6   : > { %s1541_s20 = smov (%p27_p0, %s26_s20), 0  ;;  %p51_p3 = por %p50_p2, %p49_p1 }
   0x7   : > { %s38_s21 = ssub.s32 %s1333_s18, %s1541_s20  ;;  %208 = sbr.rel (%p1067_p5) target bundleno = 21 (0x15), region = 24 }
   0x8   : > { %p40_p4 = scmp.eq.s32.totalorder %s38_s21, 0 }
   0xa   : > { %s1400_s23 = scalar_select %p40_p4, %s1325_s16, %s42_s22  }
   0xe   : > { %211 = sbr.rel (!%p51_p3) target bundleno = 21 (0x15), region = 28  ;;  %s213_s24 = sand.u32 (%p51_p3), 1, %s1325_s16  }
   0xf   : > { %s1150_s25 = sshll.u32 (%p51_p3), %s1333_s18, 4  ;;  %s1068_s26 = sshll.u32 (%p51_p3), %s213_s24, 5 }
  0x10   : > { %s221_s29 = scalar_lea.vmem (%p51_p3), %s1531_s0, %s1150_s25  ;;  %s215_s30 = scalar_lea.vmem (%p51_p3), [#allocation3], %s1068_s26 }
  0x11   : > { %v234_v0 = vld [vmem:[%s221_s29] sm:$0xff] (%p51_p3)  ;;  %v236_v1 = vld [vmem:[%s221_s29 + $0x8] sm:$0xff] (%p51_p3)  ;;  %v238_v2 = vld [vmem:[%s221_s29 + $0x50] sm:$0xff] (%p51_p3) }
  0x12   : > { %235 = vst [vmem:[%s215_s30] sm:$0xff] (%p51_p3), %v234_v0  ;;  %237 = vst [vmem:[%s215_s30 + $0x8] sm:$0xff] (%p51_p3), %v236_v1  ;;  %v240_v3 = vld [vmem:[%s221_s29 + $0x58] sm:$0xff] (%p51_p3) }
  0x13   : > { %239 = vst [vmem:[%s215_s30 + $0x10] sm:$0xff] (%p51_p3), %v238_v2  ;;  %241 = vst [vmem:[%s215_s30 + $0x18] sm:$0xff] (%p51_p3), %v240_v3 }
  0x15 PF: > { %p1071_p6 = scmp.ge.s32.totalorder %s1337_s19, 1  ;;  %p261_p7 = scmp.lt.s32.totalorder %s1337_s19, 6 }
  0x17   : > { %p262_p8 = pnand %p1071_p6, %p261_p7 }
  0x18   : > { %s268_s5 = sand.u32 (!%p262_p8), 1, %s1321_s15   ;;  %s1073_s6 = sshll.u32 (!%p262_p8), %s1329_s17, 6 }
  0x19   : > { %265 = sbr.rel (%p262_p8) target bundleno = 339 (0x153), region = 55  ;;  %s1072_s7 = sshll.u32 (!%p262_p8), %s268_s5, 5 }
  0x1a   : > { %p326_p9 = scmp.lt.s32.totalorder (!%p262_p8), %s1073_s6, 319  ;;  %s1417_s12 = scalar_lea.vmem (!%p262_p8), [#allocation3], %s1072_s7 }
  0x1b   : > { %p1076_p10 = scmp.ne.s32.totalorder (!%p262_p8), %s1329_s17, 0 }
  0x20   : > { %s1543_s6 = smov (!%p326_p9, %s1073_s6), 319  ;;  %368 = sbr.rel (%p1076_p10) target bundleno = 39 (0x27), region = 63 }
  0x21   : > { %s1151_s8 = sshll.u32 %s1543_s6, 3  ;;  %v1339_v4 = vmov (!%p1076_p10), 0.0  }
  0x22   : > { %s1415_s11 = scalar_lea.vmem %s1532_s1, %s1151_s8  ;;  %369 = vst [vmem:[#allocation2] sm:$0xff] (!%p1076_p10), %v1339_v4  ;;  %370 = vst [vmem:[#allocation2 + $0x8] sm:$0xff] (!%p1076_p10), %v1339_v4 }
  0x23   : > { %371 = vst [vmem:[#allocation2 + $0x10] sm:$0xff] (!%p1076_p10), %v1339_v4  ;;  %372 = vst [vmem:[#allocation2 + $0x18] sm:$0xff] (!%p1076_p10), %v1339_v4 }
  0x27 PF: > { %v1197_v5 = vld [vmem:[%s1415_s11 + $0x4] ss:$8 sps:$4 sm:$0xff]   ;;  %v1201_v7 = vld [vmem:[%s1415_s11] ss:$8 sps:$4 sm:$0xff]   ;;  %v1203_v9 = vld [vmem:[%s1415_s11 + $0x14] ss:$8 sps:$4 sm:$0xff]  }
  0x28   : > { %v1199_v6 = vld [vmem:[%s1415_s11 + $0x104] ss:$8 sps:$4 sm:$0xff]   ;;  %785 = vmatprep.subr.bf16.mxu1 %v1197_v5  ;;  %v1202_v8 = vld [vmem:[%s1415_s11 + $0x100] ss:$8 sps:$4 sm:$0xff]   ;;  %v1205_v10 = vld [vmem:[%s1415_s11 + $0x114] ss:$8 sps:$4 sm:$0xff]  }
  0x29   : > { %828 = vmatprep.subr.bf16.mxu0 %v1199_v6  ;;  %786 = vmatpush1.bf16.msra.mxu1 %v1201_v7  ;;  %v1207_v11 = vld [vmem:[%s1415_s11 + $0x10] ss:$8 sps:$4 sm:$0xff]   ;;  %v1209_v13 = vld [vmem:[%s1415_s11 + $0x24] ss:$8 sps:$4 sm:$0xff]   ;;  %v1213_v15 = vld [vmem:[%s1415_s11 + $0x20] ss:$8 sps:$4 sm:$0xff]  }
  0x2a   : > { %829 = vmatpush1.bf16.msra.mxu0 %v1202_v8  ;;  %787 = vmatprep.subr.bf16.mxu1 %v1203_v9  ;;  %v1208_v12 = vld [vmem:[%s1415_s11 + $0x110] ss:$8 sps:$4 sm:$0xff]   ;;  %v1211_v14 = vld [vmem:[%s1415_s11 + $0x124] ss:$8 sps:$4 sm:$0xff]   ;;  %v1214_v16 = vld [vmem:[%s1415_s11 + $0x120] ss:$8 sps:$4 sm:$0xff]  }
  0x2b   : > { %830 = vmatprep.subr.bf16.mxu0 %v1205_v10  ;;  %v1215_v17 = vld [vmem:[%s1415_s11 + $0x34] ss:$8 sps:$4 sm:$0xff]   ;;  %v1219_v19 = vld [vmem:[%s1415_s11 + $0x30] ss:$8 sps:$4 sm:$0xff]   ;;  %v1221_v21 = vld [vmem:[%s1415_s11 + $0x44] ss:$8 sps:$4 sm:$0xff]  }
  0x2c   : > { %v1217_v18 = vld [vmem:[%s1415_s11 + $0x134] ss:$8 sps:$4 sm:$0xff]   ;;  %v1220_v20 = vld [vmem:[%s1415_s11 + $0x130] ss:$8 sps:$4 sm:$0xff]   ;;  %v1223_v22 = vld [vmem:[%s1415_s11 + $0x144] ss:$8 sps:$4 sm:$0xff]  }
  0x2d   : > { %788 = vmatpush1.bf16.msra.mxu1 %v1207_v11  ;;  %v1225_v23 = vld [vmem:[%s1415_s11 + $0x40] ss:$8 sps:$4 sm:$0xff]   ;;  %v1227_v25 = vld [vmem:[%s1415_s11 + $0x54] ss:$8 sps:$4 sm:$0xff]   ;;  %v1231_v27 = vld [vmem:[%s1415_s11 + $0x50] ss:$8 sps:$4 sm:$0xff]  }
  0x2e   : > { %831 = vmatpush1.bf16.msra.mxu0 %v1208_v12  ;;  %789 = vmatprep.subr.bf16.mxu1 %v1209_v13  ;;  %v1226_v24 = vld [vmem:[%s1415_s11 + $0x140] ss:$8 sps:$4 sm:$0xff]   ;;  %v1229_v26 = vld [vmem:[%s1415_s11 + $0x154] ss:$8 sps:$4 sm:$0xff]   ;;  %v1232_v28 = vld [vmem:[%s1415_s11 + $0x150] ss:$8 sps:$4 sm:$0xff]  }
  0x2f   : > { %832 = vmatprep.subr.bf16.mxu0 %v1211_v14  ;;  %v1233_v29 = vld [vmem:[%s1415_s11 + $0x64] ss:$8 sps:$4 sm:$0xff]   ;;  %v1237_v31 = vld [vmem:[%s1415_s11 + $0x60] ss:$8 sps:$4 sm:$0xff]   ;;  %v1239_v33 = vld [vmem:[%s1415_s11 + $0x74] ss:$8 sps:$4 sm:$0xff]  }
  0x30   : > { %v1235_v30 = vld [vmem:[%s1415_s11 + $0x164] ss:$8 sps:$4 sm:$0xff]   ;;  %v1238_v32 = vld [vmem:[%s1415_s11 + $0x160] ss:$8 sps:$4 sm:$0xff]   ;;  %v1241_v34 = vld [vmem:[%s1415_s11 + $0x174] ss:$8 sps:$4 sm:$0xff]  }
  0x31   : > { %790 = vmatpush1.bf16.msra.mxu1 %v1213_v15  ;;  %v1243_v35 = vld [vmem:[%s1415_s11 + $0x70] ss:$8 sps:$4 sm:$0xff]   ;;  %v1245_v37 = vld [vmem:[%s1415_s11 + $0x84] ss:$8 sps:$4 sm:$0xff]   ;;  %v1249_v39 = vld [vmem:[%s1415_s11 + $0x80] ss:$8 sps:$4 sm:$0xff]  }
  0x32   : > { %833 = vmatpush1.bf16.msra.mxu0 %v1214_v16  ;;  %791 = vmatprep.subr.bf16.mxu1 %v1215_v17  ;;  %v1244_v36 = vld [vmem:[%s1415_s11 + $0x170] ss:$8 sps:$4 sm:$0xff]   ;;  %v1247_v38 = vld [vmem:[%s1415_s11 + $0x184] ss:$8 sps:$4 sm:$0xff]   ;;  %v1250_v40 = vld [vmem:[%s1415_s11 + $0x180] ss:$8 sps:$4 sm:$0xff]  }
  0x33   : > { %834 = vmatprep.subr.bf16.mxu0 %v1217_v18  ;;  %v1251_v41 = vld [vmem:[%s1415_s11 + $0x94] ss:$8 sps:$4 sm:$0xff]   ;;  %v1255_v43 = vld [vmem:[%s1415_s11 + $0x90] ss:$8 sps:$4 sm:$0xff]   ;;  %v1257_v45 = vld [vmem:[%s1415_s11 + $0xa4] ss:$8 sps:$4 sm:$0xff]  }
  0x34   : > { %v1253_v42 = vld [vmem:[%s1415_s11 + $0x194] ss:$8 sps:$4 sm:$0xff]   ;;  %v1256_v44 = vld [vmem:[%s1415_s11 + $0x190] ss:$8 sps:$4 sm:$0xff]   ;;  %v1259_v46 = vld [vmem:[%s1415_s11 + $0x1a4] ss:$8 sps:$4 sm:$0xff]  }
  0x35   : > { %792 = vmatpush1.bf16.msra.mxu1 %v1219_v19  ;;  %v1261_v47 = vld [vmem:[%s1415_s11 + $0xa0] ss:$8 sps:$4 sm:$0xff]   ;;  %v1263_v49 = vld [vmem:[%s1415_s11 + $0xb4] ss:$8 sps:$4 sm:$0xff]   ;;  %v1267_v51 = vld [vmem:[%s1415_s11 + $0xb0] ss:$8 sps:$4 sm:$0xff]  }
  0x36   : > { %835 = vmatpush1.bf16.msra.mxu0 %v1220_v20  ;;  %793 = vmatprep.subr.bf16.mxu1 %v1221_v21  ;;  %v1262_v48 = vld [vmem:[%s1415_s11 + $0x1a0] ss:$8 sps:$4 sm:$0xff]   ;;  %v1265_v50 = vld [vmem:[%s1415_s11 + $0x1b4] ss:$8 sps:$4 sm:$0xff]   ;;  %v1268_v53 = vld [vmem:[%s1415_s11 + $0x1b0] ss:$8 sps:$4 sm:$0xff]  }
  0x37   : > { %836 = vmatprep.subr.bf16.mxu0 %v1223_v22  ;;  %v1295_v52 = vld [vmem:[%s1417_s12 + $0x4] ss:$16 sps:$4 sm:$0xff]   ;;  %v1298_v56 = vld [vmem:[%s1417_s12 + $0xc] ss:$16 sps:$4 sm:$0xff]   ;;  %v1273_v57 = vld [vmem:[%s1415_s11 + $0xc0] ss:$8 sps:$4 sm:$0xff]  }
  0x38   : > { %v1269_v54 = vld [vmem:[%s1415_s11 + $0xc4] ss:$8 sps:$4 sm:$0xff]   ;;  %817 = vmatprep.mubr.bf16.mxu1 %v1295_v52  ;;  %860 = vmatprep.mubr.bf16.mxu0 %v1298_v56  ;;  %v1274_v58 = vld [vmem:[%s1415_s11 + $0x1c0] ss:$8 sps:$4 sm:$0xff]   ;;  %v1275_v59 = vld [vmem:[%s1415_s11 + $0xd4] ss:$8 sps:$4 sm:$0xff]  }
  0x39   : > { %794 = vmatpush1.bf16.msra.mxu1 %v1225_v23  ;;  %v1271_v55 = vld [vmem:[%s1415_s11 + $0x1c4] ss:$8 sps:$4 sm:$0xff]   ;;  %v1277_v60 = vld [vmem:[%s1415_s11 + $0x1d4] ss:$8 sps:$4 sm:$0xff]   ;;  %v1279_v61 = vld [vmem:[%s1415_s11 + $0xd0] ss:$8 sps:$4 sm:$0xff]  }
  0x3a   : > { %837 = vmatpush1.bf16.msra.mxu0 %v1226_v24  ;;  %795 = vmatprep.subr.bf16.mxu1 %v1227_v25  ;;  %v1280_v62 = vld [vmem:[%s1415_s11 + $0x1d0] ss:$8 sps:$4 sm:$0xff]   ;;  %v1281_v63 = vld [vmem:[%s1415_s11 + $0xe4] ss:$8 sps:$4 sm:$0xff]   ;;  %v1285_v1 = vld [vmem:[%s1415_s11 + $0xe0] ss:$8 sps:$4 sm:$0xff]  }
  0x3b   : > { %838 = vmatprep.subr.bf16.mxu0 %v1229_v26  ;;  %v1283_v0 = vld [vmem:[%s1415_s11 + $0x1e4] ss:$8 sps:$4 sm:$0xff]   ;;  %v1286_v2 = vld [vmem:[%s1415_s11 + $0x1e0] ss:$8 sps:$4 sm:$0xff]   ;;  %v1287_v3 = vld [vmem:[%s1415_s11 + $0xf4] ss:$8 sps:$4 sm:$0xff]  }
  0x3c   : > { %v1289_v4 = vld [vmem:[%s1415_s11 + $0x1f4] ss:$8 sps:$4 sm:$0xff]   ;;  %v1291_v5 = vld [vmem:[%s1415_s11 + $0xf0] ss:$8 sps:$4 sm:$0xff]   ;;  %v373_v10 = vld [vmem:[#allocation2] sm:$0xff]  ;;  %p1145_p11 = scmp.ne.s32.totalorder %s1329_s17, 4 }
  0x3d   : > { %796 = vmatpush1.bf16.msra.mxu1 %v1231_v27  ;;  %v1292_v6 = vld [vmem:[%s1415_s11 + $0x1f0] ss:$8 sps:$4 sm:$0xff]   ;;  %v374_v14 = vld [vmem:[#allocation2 + $0x8] sm:$0xff] }
  0x3e   : > { %839 = vmatpush1.bf16.msra.mxu0 %v1232_v28  ;;  %797 = vmatprep.subr.bf16.mxu1 %v1233_v29  ;;  %v1293_v7 = vld [vmem:[%s1417_s12] ss:$16 sps:$4 sm:$0xff]   ;;  %v1296_v8 = vld [vmem:[%s1417_s12 + $0x8] ss:$16 sps:$4 sm:$0xff]   ;;  %v889_v29 = vlaneseq (!%p1145_p11) }
  0x3f   : > { %840 = vmatprep.subr.bf16.mxu0 %v1235_v30  ;;  %v375_v18 = vld [vmem:[#allocation2 + $0x10] sm:$0xff]  ;;  %v376_v23 = vld [vmem:[#allocation2 + $0x18] sm:$0xff] }
  0x40   : > { %v890_v30 = vshrl.u32 (!%p1145_p11), %v889_v29, 7 }
  0x41   : > { %798 = vmatpush1.bf16.msra.mxu1 %v1237_v31  ;;  %v887_v31 = vld [vmem:[%s1533_s2] sm:$0x3] (!%p1145_p11) }
  0x42   : > { %841 = vmatpush1.bf16.msra.mxu0 %v1238_v32  ;;  %799 = vmatprep.subr.bf16.mxu1 %v1239_v33  ;;  %v891_v33 = vsub.s32 (!%p1145_p11), 0, %v890_v30 }
  0x43   : > { %842 = vmatprep.subr.bf16.mxu0 %v1241_v34  ;;  %v895_v34 = vsub.s32 (!%p1145_p11), 1, %v890_v30 }
  0x45   : > { %800 = vmatpush1.bf16.msra.mxu1 %v1243_v35 }
  0x46   : > { %843 = vmatpush1.bf16.msra.mxu0 %v1244_v36  ;;  %801 = vmatprep.subr.bf16.mxu1 %v1245_v37 }
  0x47   : > { %844 = vmatprep.subr.bf16.mxu0 %v1247_v38  ;;  %v892_v38 = vrot.slane (!%p1145_p11), %v887_v31, %v891_v33 }
  0x49   : > { %802 = vmatpush1.bf16.msra.mxu1 %v1249_v39  ;;  %v903_v39 = vld [vmem:[%s1534_s3] sm:$0xff] (!%p1145_p11) }
  0x4a   : > { %845 = vmatpush1.bf16.msra.mxu0 %v1250_v40  ;;  %803 = vmatprep.subr.bf16.mxu1 %v1251_v41  ;;  %v896_v40 = vrot.slane (!%p1145_p11), %v887_v31, %v895_v34  ;;  %v904_v41 = vld [vmem:[%s1534_s3 + $0x8] sm:$0xff] (!%p1145_p11) }
  0x4b   : > { %846 = vmatprep.subr.bf16.mxu0 %v1253_v42  ;;  %v905_v42 = vld [vmem:[%s1534_s3 + $0x10] sm:$0xff] (!%p1145_p11) }
  0x4d   : > { %804 = vmatpush1.bf16.msra.mxu1 %v1255_v43  ;;  %v906_v43 = vld [vmem:[%s1534_s3 + $0x18] sm:$0xff] (!%p1145_p11) }
  0x4e   : > { %847 = vmatpush1.bf16.msra.mxu0 %v1256_v44  ;;  %805 = vmatprep.subr.bf16.mxu1 %v1257_v45 }
  0x4f   : > { %848 = vmatprep.subr.bf16.mxu0 %v1259_v46 }
  0x51   : > { %806 = vmatpush1.bf16.msra.mxu1 %v1261_v47 }
  0x52   : > { %849 = vmatpush1.bf16.msra.mxu0 %v1262_v48  ;;  %807 = vmatprep.subr.bf16.mxu1 %v1263_v49 }
  0x53   : > { %850 = vmatprep.subr.bf16.mxu0 %v1265_v50 }
  0x55   : > { %808 = vmatpush1.bf16.msra.mxu1 %v1267_v51 }
  0x56   : > { %851 = vmatpush1.bf16.msra.mxu0 %v1268_v53  ;;  %809 = vmatprep.subr.bf16.mxu1 %v1269_v54 }
  0x57   : > { %852 = vmatprep.subr.bf16.mxu0 %v1271_v55 }
  0x59   : > { %810 = vmatpush1.bf16.msra.mxu1 %v1273_v57 }
  0x5a   : > { %853 = vmatpush1.bf16.msra.mxu0 %v1274_v58  ;;  %811 = vmatprep.subr.bf16.mxu1 %v1275_v59 }
  0x5b   : > { %854 = vmatprep.subr.bf16.mxu0 %v1277_v60 }
  0x5d   : > { %812 = vmatpush1.bf16.msra.mxu1 %v1279_v61 }
  0x5e   : > { %855 = vmatpush1.bf16.msra.mxu0 %v1280_v62  ;;  %813 = vmatprep.subr.bf16.mxu1 %v1281_v63 }
  0x5f   : > { %856 = vmatprep.subr.bf16.mxu0 %v1283_v0 }
  0x61   : > { %814 = vmatpush1.bf16.msra.mxu1 %v1285_v1 }
  0x62   : > { %857 = vmatpush1.bf16.msra.mxu0 %v1286_v2  ;;  %815 = vmatprep.subr.bf16.mxu1 %v1287_v3 }
  0x63   : > { %858 = vmatprep.subr.bf16.mxu0 %v1289_v4 }
  0x65   : > { %816 = vmatpush1.bf16.msra.mxu1 %v1291_v5 }
  0x66   : > { %859 = vmatpush1.bf16.msra.mxu0 %v1292_v6 }
  0x68   : > { %818 = vmatmul.mubr.bf16.vlgmr.msra.gmra.mrb[0].mxu1 %v1293_v7 }
  0x69   : > { %861 = vmatmul.mubr.bf16.vlgmr.msra.gmra.mrb[0].mxu0 %v1296_v8 }
 0x13b   : > { %v819_v9 = vpop.f32.mrb[0].mxu1 }
 0x13c   : > { %v862_v11 = vpop.f32.mrb[0].mxu0  ;;  %v821_v13 = vpop.f32.mrb[1].mxu1 }
 0x13d   : > { %v863_v12 = vadd.f32 %v862_v11, %v819_v9  ;;  %v864_v15 = vpop.f32.mrb[1].mxu0  ;;  %v823_v17 = vpop.f32.mrb[2].mxu1 }
 0x13e   : > { %v865_v16 = vadd.f32 %v864_v15, %v821_v13  ;;  %v866_v19 = vpop.f32.mrb[2].mxu0  ;;  %v825_v22 = vpop.f32.mrb[3].mxu1  ;;  %882 = sbr.rel (%p1145_p11) target bundleno = 339 (0x153), region = 67 }
 0x13f   : > { %v871_v20 = vadd.f32 %v863_v12, %v373_v10  ;;  %v867_v21 = vadd.f32 %v866_v19, %v823_v17  ;;  %v868_v24 = vpop.f32.mrb[3].mxu0 }
 0x140   : > { %v872_v25 = vadd.f32 %v865_v16, %v374_v14  ;;  %v869_v26 = vadd.f32 %v868_v24, %v825_v22 }
 0x141   : > { %875 = vst [vmem:[#allocation2] sm:$0xff] %v871_v20  ;;  %v873_v27 = vadd.f32 %v867_v21, %v375_v18 }
 0x142   : > { %876 = vst [vmem:[#allocation2 + $0x8] sm:$0xff] %v872_v25  ;;  %v874_v28 = vadd.f32 %v869_v26, %v376_v23 }
 0x143   : > { %877 = vst [vmem:[#allocation2 + $0x10] sm:$0xff] %v873_v27 }
 0x144   : > { %878 = vst [vmem:[#allocation2 + $0x18] sm:$0xff] %v874_v28 }
 0x148   : > { %v883_v32 = vld [vmem:[#allocation2] sm:$0xff] }
 0x149   : > { %v884_v35 = vld [vmem:[#allocation2 + $0x8] sm:$0xff]  ;;  %v899_v44 = vadd.f32 %v892_v38, %v883_v32 }
 0x14a   : > { %v885_v36 = vld [vmem:[#allocation2 + $0x10] sm:$0xff]  ;;  %v900_v45 = vadd.f32 %v896_v40, %v884_v35 }
 0x14b   : > { %v886_v37 = vld [vmem:[#allocation2 + $0x18] sm:$0xff]  ;;  %v901_v46 = vadd.f32 %v892_v38, %v885_v36  ;;  %v907_v48 = vadd.f32 %v903_v39, %v899_v44 }
 0x14c   : > { %v902_v47 = vadd.f32 %v896_v40, %v886_v37  ;;  %v908_v49 = vadd.f32 %v904_v41, %v900_v45 }
 0x14d   : > { %v909_v50 = vadd.f32 %v905_v42, %v901_v46  ;;  %v911_v52 = vmax.f32 %v907_v48, 0.0 }
 0x14e   : > { %v910_v51 = vadd.f32 %v906_v43, %v902_v47  ;;  %v912_v53 = vmax.f32 %v908_v49, 0.0 }
 0x14f   : > { %v913_v54 = vmax.f32 %v909_v50, 0.0  ;;  %915 = vst [vmem:[%s1535_s4] sm:$0xff] %v911_v52 }
 0x150   : > { %v914_v55 = vmax.f32 %v910_v51, 0.0  ;;  %916 = vst [vmem:[%s1535_s4 + $0x8] sm:$0xff] %v912_v53 }
 0x151   : > { %917 = vst [vmem:[%s1535_s4 + $0x10] sm:$0xff] %v913_v54 }
 0x152   : > { %918 = vst [vmem:[%s1535_s4 + $0x18] sm:$0xff] %v914_v55 }
 0x153 PF: > { %s14_s19 = sadd.s32 1, %s1337_s19   ;;  %s1536_s15 = smov %s1325_s16 }
 0x154   : > { %p11_p12 = scmp.ge.s32.totalorder %s14_s19, 7   ;;  %s1537_s16 = smov %s1400_s23 }
 0x155   : > { %s1538_s17 = smov %s1333_s18  ;;  %s1539_s18 = smov %s1541_s20 }
 0x156   :  { %13 = sbr.rel (!%p11_p12) target bundleno = 3 (0x3), region = 111 }

// kernel: resnet18_forward.36
= control target key start
LH: loop header
LB: loop body
LE: loop exit
PB: predicated region body
PF: predicated region fallthrough
CT: control target
= control target key end

     0   :  { %s1262_s12 = smov 0   ;;  %s1264_s13 = smov 0   ;;  %s1416_s0 = inlined_call_operand.vmem [shape: bf16[16,2560], index: 0, kind: input, shape index: {}]   ;;  %s1417_s1 = inlined_call_operand.vmem [shape: bf16[2560,256], index: 1, kind: input, shape index: {}]   ;;  %s1418_s2 = inlined_call_operand.vmem [shape: f32[1,256], index: 2, kind: input, shape index: {}]   ;;  %s1419_s3 = inlined_call_operand.vmem [shape: f32[16,256], index: 3, kind: output, shape index: {}]  }
   0x1   :  { %s1266_s14 = smov 0   ;;  %s1268_s15 = smov 0  }
   0x2   :  { %s1270_s16 = smov 0  }
   0x3 LB: > { %s25_s17 = sadd.s32 1, %s1235_s15  ;;  %p48_p1 = scmp.ne.s32.totalorder %s1227_s13, %s1223_s12  ;;  %s1239_s16 = sphi %s1270_s16, %s13_s16   ;;  %s1235_s15 = sphi %s1268_s15, %s1423_s15   ;;  %s1231_s14 = sphi %s1266_s14, %s1422_s14   ;;  %s1227_s13 = sphi %s1264_s13, %s1421_s13   ;;  %s1223_s12 = sphi %s1262_s12, %s1420_s12  }
   0x4   : > { %p26_p0 = scmp.ge.s32.totalorder %s25_s17, 5  ;;  %p49_p2 = scmp.eq.s32.totalorder %s1239_s16, 0 }
   0x5   : > { %s41_s19 = sadd.s32 1, %s1227_s13  ;;  %p969_p5 = scmp.ge.s32.totalorder %s1239_s16, 5 }
   0x6   : > { %s1425_s17 = smov (%p26_p0, %s25_s17), 0  ;;  %p50_p3 = por %p49_p2, %p48_p1 }
   0x7   : > { %s37_s18 = ssub.s32 %s1235_s15, %s1425_s17  ;;  %164 = sbr.rel (%p969_p5) target bundleno = 21 (0x15), region = 20 }
   0x8   : > { %p39_p4 = scmp.eq.s32.totalorder %s37_s18, 0 }
   0xa   : > { %s1297_s20 = scalar_select %p39_p4, %s1227_s13, %s41_s19  }
   0xe   : > { %167 = sbr.rel (!%p50_p3) target bundleno = 21 (0x15), region = 24  ;;  %s169_s21 = sand.u32 (%p50_p3), 1, %s1227_s13  }
   0xf   : > { %s1052_s22 = sshll.u32 (%p50_p3), %s1235_s15, 4  ;;  %s970_s23 = sshll.u32 (%p50_p3), %s169_s21, 5 }
  0x10   : > { %s177_s26 = scalar_lea.vmem (%p50_p3), %s1416_s0, %s1052_s22  ;;  %s171_s27 = scalar_lea.vmem (%p50_p3), [#allocation3], %s970_s23 }
  0x11   : > { %v190_v0 = vld [vmem:[%s177_s26] sm:$0xff] (%p50_p3)  ;;  %v192_v1 = vld [vmem:[%s177_s26 + $0x8] sm:$0xff] (%p50_p3)  ;;  %v194_v2 = vld [vmem:[%s177_s26 + $0x50] sm:$0xff] (%p50_p3) }
  0x12   : > { %191 = vst [vmem:[%s171_s27] sm:$0xff] (%p50_p3), %v190_v0  ;;  %193 = vst [vmem:[%s171_s27 + $0x8] sm:$0xff] (%p50_p3), %v192_v1  ;;  %v196_v3 = vld [vmem:[%s177_s26 + $0x58] sm:$0xff] (%p50_p3) }
  0x13   : > { %195 = vst [vmem:[%s171_s27 + $0x10] sm:$0xff] (%p50_p3), %v194_v2  ;;  %197 = vst [vmem:[%s171_s27 + $0x18] sm:$0xff] (%p50_p3), %v196_v3 }
  0x15 PF: > { %p973_p6 = scmp.ge.s32.totalorder %s1239_s16, 1  ;;  %p217_p7 = scmp.lt.s32.totalorder %s1239_s16, 6 }
  0x17   : > { %p218_p8 = pnand %p973_p6, %p217_p7 }
  0x18   : > { %s224_s28 = sand.u32 (!%p218_p8), 1, %s1223_s12   ;;  %s975_s29 = sshll.u32 (!%p218_p8), %s1231_s14, 6 }
  0x19   : > { %221 = sbr.rel (%p218_p8) target bundleno = 337 (0x151), region = 51  ;;  %s974_s30 = sshll.u32 (!%p218_p8), %s224_s28, 5 }
  0x1a   : > { %p270_p9 = scmp.lt.s32.totalorder (!%p218_p8), %s975_s29, 319  ;;  %s1314_s8 = scalar_lea.vmem (!%p218_p8), [#allocation3], %s974_s30 }
  0x1b   : > { %p978_p10 = scmp.ne.s32.totalorder (!%p218_p8), %s1231_s14, 0 }
  0x20   : > { %s1427_s29 = smov (!%p270_p9, %s975_s29), 319  ;;  %300 = sbr.rel (%p978_p10) target bundleno = 39 (0x27), region = 59 }
  0x21   : > { %s1053_s4 = sshll.u32 %s1427_s29, 3  ;;  %v1241_v4 = vmov (!%p978_p10), 0.0  }
  0x22   : > { %s1312_s7 = scalar_lea.vmem %s1417_s1, %s1053_s4  ;;  %301 = vst [vmem:[#allocation2] sm:$0xff] (!%p978_p10), %v1241_v4  ;;  %302 = vst [vmem:[#allocation2 + $0x8] sm:$0xff] (!%p978_p10), %v1241_v4 }
  0x23   : > { %303 = vst [vmem:[#allocation2 + $0x10] sm:$0xff] (!%p978_p10), %v1241_v4  ;;  %304 = vst [vmem:[#allocation2 + $0x18] sm:$0xff] (!%p978_p10), %v1241_v4 }
  0x27 PF: > { %v1099_v5 = vld [vmem:[%s1312_s7 + $0x4] ss:$8 sps:$4 sm:$0xff]   ;;  %v1103_v7 = vld [vmem:[%s1312_s7] ss:$8 sps:$4 sm:$0xff]   ;;  %v1105_v9 = vld [vmem:[%s1312_s7 + $0x14] ss:$8 sps:$4 sm:$0xff]  }
  0x28   : > { %v1101_v6 = vld [vmem:[%s1312_s7 + $0x104] ss:$8 sps:$4 sm:$0xff]   ;;  %717 = vmatprep.subr.bf16.mxu1 %v1099_v5  ;;  %v1104_v8 = vld [vmem:[%s1312_s7 + $0x100] ss:$8 sps:$4 sm:$0xff]   ;;  %v1107_v10 = vld [vmem:[%s1312_s7 + $0x114] ss:$8 sps:$4 sm:$0xff]  }
  0x29   : > { %760 = vmatprep.subr.bf16.mxu0 %v1101_v6  ;;  %718 = vmatpush1.bf16.msra.mxu1 %v1103_v7  ;;  %v1109_v11 = vld [vmem:[%s1312_s7 + $0x10] ss:$8 sps:$4 sm:$0xff]   ;;  %v1111_v13 = vld [vmem:[%s1312_s7 + $0x24] ss:$8 sps:$4 sm:$0xff]   ;;  %v1115_v15 = vld [vmem:[%s1312_s7 + $0x20] ss:$8 sps:$4 sm:$0xff]  }
  0x2a   : > { %761 = vmatpush1.bf16.msra.mxu0 %v1104_v8  ;;  %719 = vmatprep.subr.bf16.mxu1 %v1105_v9  ;;  %v1110_v12 = vld [vmem:[%s1312_s7 + $0x110] ss:$8 sps:$4 sm:$0xff]   ;;  %v1113_v14 = vld [vmem:[%s1312_s7 + $0x124] ss:$8 sps:$4 sm:$0xff]   ;;  %v1116_v16 = vld [vmem:[%s1312_s7 + $0x120] ss:$8 sps:$4 sm:$0xff]  }
  0x2b   : > { %762 = vmatprep.subr.bf16.mxu0 %v1107_v10  ;;  %v1117_v17 = vld [vmem:[%s1312_s7 + $0x34] ss:$8 sps:$4 sm:$0xff]   ;;  %v1121_v19 = vld [vmem:[%s1312_s7 + $0x30] ss:$8 sps:$4 sm:$0xff]   ;;  %v1123_v21 = vld [vmem:[%s1312_s7 + $0x44] ss:$8 sps:$4 sm:$0xff]  }
  0x2c   : > { %v1119_v18 = vld [vmem:[%s1312_s7 + $0x134] ss:$8 sps:$4 sm:$0xff]   ;;  %v1122_v20 = vld [vmem:[%s1312_s7 + $0x130] ss:$8 sps:$4 sm:$0xff]   ;;  %v1125_v22 = vld [vmem:[%s1312_s7 + $0x144] ss:$8 sps:$4 sm:$0xff]  }
  0x2d   : > { %720 = vmatpush1.bf16.msra.mxu1 %v1109_v11  ;;  %v1127_v23 = vld [vmem:[%s1312_s7 + $0x40] ss:$8 sps:$4 sm:$0xff]   ;;  %v1129_v25 = vld [vmem:[%s1312_s7 + $0x54] ss:$8 sps:$4 sm:$0xff]   ;;  %v1133_v27 = vld [vmem:[%s1312_s7 + $0x50] ss:$8 sps:$4 sm:$0xff]  }
  0x2e   : > { %763 = vmatpush1.bf16.msra.mxu0 %v1110_v12  ;;  %721 = vmatprep.subr.bf16.mxu1 %v1111_v13  ;;  %v1128_v24 = vld [vmem:[%s1312_s7 + $0x140] ss:$8 sps:$4 sm:$0xff]   ;;  %v1131_v26 = vld [vmem:[%s1312_s7 + $0x154] ss:$8 sps:$4 sm:$0xff]   ;;  %v1134_v28 = vld [vmem:[%s1312_s7 + $0x150] ss:$8 sps:$4 sm:$0xff]  }
  0x2f   : > { %764 = vmatprep.subr.bf16.mxu0 %v1113_v14  ;;  %v1135_v29 = vld [vmem:[%s1312_s7 + $0x64] ss:$8 sps:$4 sm:$0xff]   ;;  %v1139_v31 = vld [vmem:[%s1312_s7 + $0x60] ss:$8 sps:$4 sm:$0xff]   ;;  %v1141_v33 = vld [vmem:[%s1312_s7 + $0x74] ss:$8 sps:$4 sm:$0xff]  }
  0x30   : > { %v1137_v30 = vld [vmem:[%s1312_s7 + $0x164] ss:$8 sps:$4 sm:$0xff]   ;;  %v1140_v32 = vld [vmem:[%s1312_s7 + $0x160] ss:$8 sps:$4 sm:$0xff]   ;;  %v1143_v34 = vld [vmem:[%s1312_s7 + $0x174] ss:$8 sps:$4 sm:$0xff]  }
  0x31   : > { %722 = vmatpush1.bf16.msra.mxu1 %v1115_v15  ;;  %v1145_v35 = vld [vmem:[%s1312_s7 + $0x70] ss:$8 sps:$4 sm:$0xff]   ;;  %v1147_v37 = vld [vmem:[%s1312_s7 + $0x84] ss:$8 sps:$4 sm:$0xff]   ;;  %v1151_v39 = vld [vmem:[%s1312_s7 + $0x80] ss:$8 sps:$4 sm:$0xff]  }
  0x32   : > { %765 = vmatpush1.bf16.msra.mxu0 %v1116_v16  ;;  %723 = vmatprep.subr.bf16.mxu1 %v1117_v17  ;;  %v1146_v36 = vld [vmem:[%s1312_s7 + $0x170] ss:$8 sps:$4 sm:$0xff]   ;;  %v1149_v38 = vld [vmem:[%s1312_s7 + $0x184] ss:$8 sps:$4 sm:$0xff]   ;;  %v1152_v40 = vld [vmem:[%s1312_s7 + $0x180] ss:$8 sps:$4 sm:$0xff]  }
  0x33   : > { %766 = vmatprep.subr.bf16.mxu0 %v1119_v18  ;;  %v1153_v41 = vld [vmem:[%s1312_s7 + $0x94] ss:$8 sps:$4 sm:$0xff]   ;;  %v1157_v43 = vld [vmem:[%s1312_s7 + $0x90] ss:$8 sps:$4 sm:$0xff]   ;;  %v1159_v45 = vld [vmem:[%s1312_s7 + $0xa4] ss:$8 sps:$4 sm:$0xff]  }
  0x34   : > { %v1155_v42 = vld [vmem:[%s1312_s7 + $0x194] ss:$8 sps:$4 sm:$0xff]   ;;  %v1158_v44 = vld [vmem:[%s1312_s7 + $0x190] ss:$8 sps:$4 sm:$0xff]   ;;  %v1161_v46 = vld [vmem:[%s1312_s7 + $0x1a4] ss:$8 sps:$4 sm:$0xff]  }
  0x35   : > { %724 = vmatpush1.bf16.msra.mxu1 %v1121_v19  ;;  %v1163_v47 = vld [vmem:[%s1312_s7 + $0xa0] ss:$8 sps:$4 sm:$0xff]   ;;  %v1165_v49 = vld [vmem:[%s1312_s7 + $0xb4] ss:$8 sps:$4 sm:$0xff]   ;;  %v1169_v51 = vld [vmem:[%s1312_s7 + $0xb0] ss:$8 sps:$4 sm:$0xff]  }
  0x36   : > { %767 = vmatpush1.bf16.msra.mxu0 %v1122_v20  ;;  %725 = vmatprep.subr.bf16.mxu1 %v1123_v21  ;;  %v1164_v48 = vld [vmem:[%s1312_s7 + $0x1a0] ss:$8 sps:$4 sm:$0xff]   ;;  %v1167_v50 = vld [vmem:[%s1312_s7 + $0x1b4] ss:$8 sps:$4 sm:$0xff]   ;;  %v1170_v53 = vld [vmem:[%s1312_s7 + $0x1b0] ss:$8 sps:$4 sm:$0xff]  }
  0x37   : > { %768 = vmatprep.subr.bf16.mxu0 %v1125_v22  ;;  %v1197_v52 = vld [vmem:[%s1314_s8 + $0x4] ss:$16 sps:$4 sm:$0xff]   ;;  %v1200_v56 = vld [vmem:[%s1314_s8 + $0xc] ss:$16 sps:$4 sm:$0xff]   ;;  %v1175_v57 = vld [vmem:[%s1312_s7 + $0xc0] ss:$8 sps:$4 sm:$0xff]  }
  0x38   : > { %v1171_v54 = vld [vmem:[%s1312_s7 + $0xc4] ss:$8 sps:$4 sm:$0xff]   ;;  %749 = vmatprep.mubr.bf16.mxu1 %v1197_v52  ;;  %792 = vmatprep.mubr.bf16.mxu0 %v1200_v56  ;;  %v1176_v58 = vld [vmem:[%s1312_s7 + $0x1c0] ss:$8 sps:$4 sm:$0xff]   ;;  %v1177_v59 = vld [vmem:[%s1312_s7 + $0xd4] ss:$8 sps:$4 sm:$0xff]  }
  0x39   : > { %726 = vmatpush1.bf16.msra.mxu1 %v1127_v23  ;;  %v1173_v55 = vld [vmem:[%s1312_s7 + $0x1c4] ss:$8 sps:$4 sm:$0xff]   ;;  %v1179_v60 = vld [vmem:[%s1312_s7 + $0x1d4] ss:$8 sps:$4 sm:$0xff]   ;;  %v1181_v61 = vld [vmem:[%s1312_s7 + $0xd0] ss:$8 sps:$4 sm:$0xff]  }
  0x3a   : > { %769 = vmatpush1.bf16.msra.mxu0 %v1128_v24  ;;  %727 = vmatprep.subr.bf16.mxu1 %v1129_v25  ;;  %v1182_v62 = vld [vmem:[%s1312_s7 + $0x1d0] ss:$8 sps:$4 sm:$0xff]   ;;  %v1183_v63 = vld [vmem:[%s1312_s7 + $0xe4] ss:$8 sps:$4 sm:$0xff]   ;;  %v1187_v1 = vld [vmem:[%s1312_s7 + $0xe0] ss:$8 sps:$4 sm:$0xff]  }
  0x3b   : > { %770 = vmatprep.subr.bf16.mxu0 %v1131_v26  ;;  %v1185_v0 = vld [vmem:[%s1312_s7 + $0x1e4] ss:$8 sps:$4 sm:$0xff]   ;;  %v1188_v2 = vld [vmem:[%s1312_s7 + $0x1e0] ss:$8 sps:$4 sm:$0xff]   ;;  %v1189_v3 = vld [vmem:[%s1312_s7 + $0xf4] ss:$8 sps:$4 sm:$0xff]  }
  0x3c   : > { %v1191_v4 = vld [vmem:[%s1312_s7 + $0x1f4] ss:$8 sps:$4 sm:$0xff]   ;;  %v1193_v5 = vld [vmem:[%s1312_s7 + $0xf0] ss:$8 sps:$4 sm:$0xff]   ;;  %v305_v10 = vld [vmem:[#allocation2] sm:$0xff]  ;;  %p1047_p11 = scmp.ne.s32.totalorder %s1231_s14, 4 }
  0x3d   : > { %728 = vmatpush1.bf16.msra.mxu1 %v1133_v27  ;;  %v1194_v6 = vld [vmem:[%s1312_s7 + $0x1f0] ss:$8 sps:$4 sm:$0xff]   ;;  %v306_v14 = vld [vmem:[#allocation2 + $0x8] sm:$0xff] }
  0x3e   : > { %771 = vmatpush1.bf16.msra.mxu0 %v1134_v28  ;;  %729 = vmatprep.subr.bf16.mxu1 %v1135_v29  ;;  %v1195_v7 = vld [vmem:[%s1314_s8] ss:$16 sps:$4 sm:$0xff]   ;;  %v1198_v8 = vld [vmem:[%s1314_s8 + $0x8] ss:$16 sps:$4 sm:$0xff]   ;;  %v821_v29 = vlaneseq (!%p1047_p11) }
  0x3f   : > { %772 = vmatprep.subr.bf16.mxu0 %v1137_v30  ;;  %v307_v18 = vld [vmem:[#allocation2 + $0x10] sm:$0xff]  ;;  %v308_v23 = vld [vmem:[#allocation2 + $0x18] sm:$0xff] }
  0x40   : > { %v822_v30 = vshrl.u32 (!%p1047_p11), %v821_v29, 7 }
  0x41   : > { %730 = vmatpush1.bf16.msra.mxu1 %v1139_v31  ;;  %v819_v31 = vld [vmem:[%s1418_s2] sm:$0x3] (!%p1047_p11) }
  0x42   : > { %773 = vmatpush1.bf16.msra.mxu0 %v1140_v32  ;;  %731 = vmatprep.subr.bf16.mxu1 %v1141_v33  ;;  %v823_v33 = vsub.s32 (!%p1047_p11), 0, %v822_v30 }
  0x43   : > { %774 = vmatprep.subr.bf16.mxu0 %v1143_v34  ;;  %v827_v34 = vsub.s32 (!%p1047_p11), 1, %v822_v30 }
  0x45   : > { %732 = vmatpush1.bf16.msra.mxu1 %v1145_v35 }
  0x46   : > { %775 = vmatpush1.bf16.msra.mxu0 %v1146_v36  ;;  %733 = vmatprep.subr.bf16.mxu1 %v1147_v37 }
  0x47   : > { %776 = vmatprep.subr.bf16.mxu0 %v1149_v38  ;;  %v824_v38 = vrot.slane (!%p1047_p11), %v819_v31, %v823_v33 }
  0x49   : > { %734 = vmatpush1.bf16.msra.mxu1 %v1151_v39  ;;  %v828_v39 = vrot.slane (!%p1047_p11), %v819_v31, %v827_v34 }
  0x4a   : > { %777 = vmatpush1.bf16.msra.mxu0 %v1152_v40  ;;  %735 = vmatprep.subr.bf16.mxu1 %v1153_v41 }
  0x4b   : > { %778 = vmatprep.subr.bf16.mxu0 %v1155_v42 }
  0x4d   : > { %736 = vmatpush1.bf16.msra.mxu1 %v1157_v43 }
  0x4e   : > { %779 = vmatpush1.bf16.msra.mxu0 %v1158_v44  ;;  %737 = vmatprep.subr.bf16.mxu1 %v1159_v45 }
  0x4f   : > { %780 = vmatprep.subr.bf16.mxu0 %v1161_v46 }
  0x51   : > { %738 = vmatpush1.bf16.msra.mxu1 %v1163_v47 }
  0x52   : > { %781 = vmatpush1.bf16.msra.mxu0 %v1164_v48  ;;  %739 = vmatprep.subr.bf16.mxu1 %v1165_v49 }
  0x53   : > { %782 = vmatprep.subr.bf16.mxu0 %v1167_v50 }
  0x55   : > { %740 = vmatpush1.bf16.msra.mxu1 %v1169_v51 }
  0x56   : > { %783 = vmatpush1.bf16.msra.mxu0 %v1170_v53  ;;  %741 = vmatprep.subr.bf16.mxu1 %v1171_v54 }
  0x57   : > { %784 = vmatprep.subr.bf16.mxu0 %v1173_v55 }
  0x59   : > { %742 = vmatpush1.bf16.msra.mxu1 %v1175_v57 }
  0x5a   : > { %785 = vmatpush1.bf16.msra.mxu0 %v1176_v58  ;;  %743 = vmatprep.subr.bf16.mxu1 %v1177_v59 }
  0x5b   : > { %786 = vmatprep.subr.bf16.mxu0 %v1179_v60 }
  0x5d   : > { %744 = vmatpush1.bf16.msra.mxu1 %v1181_v61 }
  0x5e   : > { %787 = vmatpush1.bf16.msra.mxu0 %v1182_v62  ;;  %745 = vmatprep.subr.bf16.mxu1 %v1183_v63 }
  0x5f   : > { %788 = vmatprep.subr.bf16.mxu0 %v1185_v0 }
  0x61   : > { %746 = vmatpush1.bf16.msra.mxu1 %v1187_v1 }
  0x62   : > { %789 = vmatpush1.bf16.msra.mxu0 %v1188_v2  ;;  %747 = vmatprep.subr.bf16.mxu1 %v1189_v3 }
  0x63   : > { %790 = vmatprep.subr.bf16.mxu0 %v1191_v4 }
  0x65   : > { %748 = vmatpush1.bf16.msra.mxu1 %v1193_v5 }
  0x66   : > { %791 = vmatpush1.bf16.msra.mxu0 %v1194_v6 }
  0x68   : > { %750 = vmatmul.mubr.bf16.vlgmr.msra.gmra.mrb[0].mxu1 %v1195_v7 }
  0x69   : > { %793 = vmatmul.mubr.bf16.vlgmr.msra.gmra.mrb[0].mxu0 %v1198_v8 }
 0x13b   : > { %v751_v9 = vpop.f32.mrb[0].mxu1 }
 0x13c   : > { %v794_v11 = vpop.f32.mrb[0].mxu0  ;;  %v753_v13 = vpop.f32.mrb[1].mxu1 }
 0x13d   : > { %v795_v12 = vadd.f32 %v794_v11, %v751_v9  ;;  %v796_v15 = vpop.f32.mrb[1].mxu0  ;;  %v755_v17 = vpop.f32.mrb[2].mxu1 }
 0x13e   : > { %v797_v16 = vadd.f32 %v796_v15, %v753_v13  ;;  %v798_v19 = vpop.f32.mrb[2].mxu0  ;;  %v757_v22 = vpop.f32.mrb[3].mxu1  ;;  %814 = sbr.rel (%p1047_p11) target bundleno = 337 (0x151), region = 63 }
 0x13f   : > { %v803_v20 = vadd.f32 %v795_v12, %v305_v10  ;;  %v799_v21 = vadd.f32 %v798_v19, %v755_v17  ;;  %v800_v24 = vpop.f32.mrb[3].mxu0 }
 0x140   : > { %v804_v25 = vadd.f32 %v797_v16, %v306_v14  ;;  %v801_v26 = vadd.f32 %v800_v24, %v757_v22 }
 0x141   : > { %807 = vst [vmem:[#allocation2] sm:$0xff] %v803_v20  ;;  %v805_v27 = vadd.f32 %v799_v21, %v307_v18 }
 0x142   : > { %808 = vst [vmem:[#allocation2 + $0x8] sm:$0xff] %v804_v25  ;;  %v806_v28 = vadd.f32 %v801_v26, %v308_v23 }
 0x143   : > { %809 = vst [vmem:[#allocation2 + $0x10] sm:$0xff] %v805_v27 }
 0x144   : > { %810 = vst [vmem:[#allocation2 + $0x18] sm:$0xff] %v806_v28 }
 0x148   : > { %v815_v32 = vld [vmem:[#allocation2] sm:$0xff] }
 0x149   : > { %v816_v35 = vld [vmem:[#allocation2 + $0x8] sm:$0xff]  ;;  %v831_v40 = vadd.f32 %v824_v38, %v815_v32 }
 0x14a   : > { %v817_v36 = vld [vmem:[#allocation2 + $0x10] sm:$0xff]  ;;  %v832_v41 = vadd.f32 %v828_v39, %v816_v35 }
 0x14b   : > { %v818_v37 = vld [vmem:[#allocation2 + $0x18] sm:$0xff]  ;;  %v833_v42 = vadd.f32 %v824_v38, %v817_v36  ;;  %v835_v44 = vmax.f32 %v831_v40, 0.0 }
 0x14c   : > { %v834_v43 = vadd.f32 %v828_v39, %v818_v37  ;;  %v836_v45 = vmax.f32 %v832_v41, 0.0 }
 0x14d   : > { %v837_v46 = vmax.f32 %v833_v42, 0.0  ;;  %839 = vst [vmem:[%s1419_s3] sm:$0xff] %v835_v44 }
 0x14e   : > { %v838_v47 = vmax.f32 %v834_v43, 0.0  ;;  %840 = vst [vmem:[%s1419_s3 + $0x8] sm:$0xff] %v836_v45 }
 0x14f   : > { %841 = vst [vmem:[%s1419_s3 + $0x10] sm:$0xff] %v837_v46 }
 0x150   : > { %842 = vst [vmem:[%s1419_s3 + $0x18] sm:$0xff] %v838_v47 }
 0x151 PF: > { %s13_s16 = sadd.s32 1, %s1239_s16   ;;  %s1420_s12 = smov %s1227_s13 }
 0x152   : > { %p10_p12 = scmp.ge.s32.totalorder %s13_s16, 7   ;;  %s1421_s13 = smov %s1297_s20 }
 0x153   : > { %s1422_s14 = smov %s1235_s15  ;;  %s1423_s15 = smov %s1425_s17 }
 0x154   :  { %12 = sbr.rel (!%p10_p12) target bundleno = 3 (0x3), region = 104 }

// kernel: resnet18_forward.38
= control target key start
LH: loop header
LB: loop body
LE: loop exit
PB: predicated region body
PF: predicated region fallthrough
CT: control target
= control target key end

     0   :  { %s2028_s0 = inlined_call_operand.vmem [shape: bf16[16,2560], index: 0, kind: input, shape index: {}]   ;;  %s2029_s1 = inlined_call_operand.vmem [shape: bf16[2560,512], index: 1, kind: input, shape index: {}]   ;;  %s2030_s2 = inlined_call_operand.vmem [shape: f32[1,512], index: 2, kind: input, shape index: {}]   ;;  %s2031_s3 = inlined_call_operand.vmem [shape: f32[16,512], index: 3, kind: output, shape index: {}]  }
   0x1   :  { %2033 = sst [smem:[#allocation7_spill]] %s2028_s0 }
   0x2   :  { %2034 = sst [smem:[#allocation8_spill]] %s2029_s1 }
   0x3   :  { %s1642_s12 = smov 0   ;;  %s1644_s13 = smov 0  }
   0x4   :  { %s1646_s14 = smov 0   ;;  %s1648_s15 = smov 0  }
   0x5   :  { %s1650_s16 = smov 0   ;;  %s1652_s17 = smov 0  }
   0x6   :  { %s1654_s18 = smov 0   ;;  %s1656_s19 = smov 0  }
   0x7   :  { %s1658_s20 = smov 0   ;;  %s1660_s21 = smov 0  }
   0x8   :  { %s1662_s22 = smov 0  }
   0x9 LB: > { %s1243_s23 = sadd.s32 4294967295, %s1619_s22   ;;  %s25_s24 = sadd.s32 1, %s1611_s20  ;;  %s1619_s22 = sphi %s1662_s22, %s13_s22   ;;  %s1615_s21 = sphi %s1660_s21, %s2051_s21   ;;  %s1611_s20 = sphi %s1658_s20, %s2050_s20   ;;  %s1607_s19 = sphi %s1656_s19, %s2049_s19   ;;  %s1603_s18 = sphi %s1654_s18, %s2048_s18   ;;  %s1599_s17 = sphi %s1652_s17, %s2047_s17   ;;  %s1595_s16 = sphi %s1650_s16, %s2046_s16   ;;  %s1591_s15 = sphi %s1648_s15, %s2045_s15   ;;  %s1587_s14 = sphi %s1646_s14, %s2044_s14   ;;  %s1583_s13 = sphi %s1644_s13, %s2043_s13   ;;  %s1579_s12 = sphi %s1642_s12, %s2042_s12  }
   0xa   : > { %p26_p0 = scmp.ge.s32.totalorder %s25_s24, 5  ;;  %s28_s25 = sadd.s32 1, %s1615_s21 }
   0xb   : > { %s41_s26 = sadd.s32 1, %s1599_s17  ;;  %p48_p1 = scmp.ne.s32.totalorder %s1599_s17, %s1595_s16 }
   0xc   : > { %s2053_s24 = smov (%p26_p0, %s25_s24), 0  ;;  %s2055_s25 = smov (!%p26_p0, %s28_s25), %s1615_s21 }
   0xd   : > { %s37_s27 = ssub.s32 %s1611_s20, %s2053_s24  ;;  %p49_p2 = scmp.eq.s32.totalorder %s1619_s22, 0 }
   0xe   : > { %p30_p3 = scmp.ge.s32.totalorder %s2055_s25, 2  ;;  %p39_p4 = scmp.eq.s32.totalorder %s37_s27, 0 }
   0xf   : > { %p1709_p5 = por %p49_p2, %p48_p1  ;;  %s69_s29 = sadd.s32 1, %s1591_s15 }
  0x10   : > { %s2057_s25 = smov (%p30_p3, %s2055_s25), 0  ;;  %p76_p6 = scmp.ne.s32.totalorder %s1591_s15, %s1587_s14 }
  0x11   : > { %2036 = sst [smem:[#allocation6_spill]] %s2057_s25  ;;  %s65_s4 = ssub.s32 %s1615_s21, %s2057_s25 }
  0x12   : > { %s1717_s30 = scalar_select %p39_p4, %s1599_s17, %s41_s26  }
  0x13   : > { %s66_s5 = sor.u32 %s65_s4, %s37_s27  ;;  %p121_p7 = scmp.eq.s32.totalorder %s65_s4, 0 }
  0x14   : > { %p67_p8 = scmp.eq.s32.totalorder %s66_s5, 0  ;;  %p1723_p9 = por %p76_p6, %p49_p2 }
  0x15   : > { %s123_s7 = sadd.s32 1, %s1583_s13  ;;  %p133_p10 = scmp.ne.s32.totalorder %s1583_s13, %s1579_s12 }
  0x16   : > { %s1731_s8 = scalar_select %p67_p8, %s1591_s15, %s69_s29  }
  0x17   : > { %s1734_s9 = scalar_select %p121_p7, %s1583_s13, %s123_s7  }
  0x18   : > { %p134_p11 = scmp.eq.s32.totalorder %s1243_s23, 9  ;;  %p1246_p13 = scmp.ge.s32.totalorder %s1619_s22, 10 }
  0x1a   : > { %p1736_p12 = por %p134_p11, %p133_p10  ;;  %156 = sbr.rel (%p1246_p13) target bundleno = 87 (0x57), region = 16 }
  0x21   : > { %159 = sbr.rel (!%p1709_p5) target bundleno = 45 (0x2d), region = 20  ;;  %s161_s11 = sand.u32 (%p1709_p5), 1, %s1599_s17  }
  0x22   : > { %s1335_s26 = sshll.u32 (%p1709_p5), %s1611_s20, 4  ;;  %s1247_s27 = sshll.u32 (%p1709_p5), %s161_s11, 5 }
  0x23   : > { %s2039_s0 = sld [smem:[#allocation7_spill]] (%p1709_p5)  ;;  %s163_s23 = scalar_lea.vmem (%p1709_p5), [#allocation3], %s1247_s27 }
  0x29   : > { %s169_s5 = scalar_lea.vmem %s2039_s0, %s1335_s26 }
  0x2a   : > { %v182_v0 = vld [vmem:[%s169_s5] sm:$0xff]  ;;  %v184_v1 = vld [vmem:[%s169_s5 + $0x8] sm:$0xff]  ;;  %v186_v2 = vld [vmem:[%s169_s5 + $0x50] sm:$0xff] }
  0x2b   : > { %183 = vst [vmem:[%s163_s23] sm:$0xff] %v182_v0  ;;  %185 = vst [vmem:[%s163_s23 + $0x8] sm:$0xff] %v184_v1  ;;  %v188_v3 = vld [vmem:[%s169_s5 + $0x58] sm:$0xff] }
  0x2c   : > { %187 = vst [vmem:[%s163_s23 + $0x10] sm:$0xff] %v186_v2  ;;  %189 = vst [vmem:[%s163_s23 + $0x18] sm:$0xff] %v188_v3 }
  0x2d PF: > { %195 = sbr.rel (!%p1723_p9) target bundleno = 87 (0x57), region = 43  ;;  %s197_s28 = sand.u32 (%p1723_p9), 1, %s1591_s15  }
  0x2e   : > { %s1252_s7 = sshll.u32 (%p1723_p9), %s1615_s21, 1  ;;  %s1250_s11 = sshll.u32 (%p1723_p9), %s197_s28, 9 }
  0x2f   : > { %s1336_s26 = sshll.u32 (%p1723_p9), %s1611_s20, 8  ;;  %s2040_s1 = sld [smem:[#allocation8_spill]] (%p1723_p9) }
  0x30   : > { %s203_s29 = sadd.s32 (%p1723_p9), %s1336_s26, %s1252_s7  ;;  %s1761_s6 = scalar_lea.vmem (%p1723_p9), [#allocation4], %s1250_s11 }
  0x31   : > { %s1254_s4 = sshll.u32 (%p1723_p9), %s203_s29, 2 }
  0x35   : > { %s1756_s25 = scalar_lea.vmem %s2040_s1, %s1254_s4 }
  0x36   : > { %v359_v4 = vld [vmem:[%s1756_s25] sm:$0xff]  ;;  %v361_v5 = vld [vmem:[%s1756_s25 + $0x10] sm:$0xff] }
  0x37   : > { %v363_v6 = vld [vmem:[%s1756_s25 + $0x20] sm:$0xff]  ;;  %360 = vst [vmem:[%s1761_s6] sm:$0xff] %v359_v4  ;;  %362 = vst [vmem:[%s1761_s6 + $0x8] sm:$0xff] %v361_v5  ;;  %v365_v7 = vld [vmem:[%s1756_s25 + $0x30] sm:$0xff] }
  0x38   : > { %364 = vst [vmem:[%s1761_s6 + $0x10] sm:$0xff] %v363_v6  ;;  %v367_v8 = vld [vmem:[%s1756_s25 + $0x40] sm:$0xff]  ;;  %v369_v9 = vld [vmem:[%s1756_s25 + $0x50] sm:$0xff]  ;;  %366 = vst [vmem:[%s1761_s6 + $0x18] sm:$0xff] %v365_v7 }
  0x39   : > { %368 = vst [vmem:[%s1761_s6 + $0x20] sm:$0xff] %v367_v8  ;;  %370 = vst [vmem:[%s1761_s6 + $0x28] sm:$0xff] %v369_v9  ;;  %v371_v10 = vld [vmem:[%s1756_s25 + $0x60] sm:$0xff]  ;;  %v373_v11 = vld [vmem:[%s1756_s25 + $0x70] sm:$0xff] }
  0x3a   : > { %v375_v12 = vld [vmem:[%s1756_s25 + $0x80] sm:$0xff]  ;;  %372 = vst [vmem:[%s1761_s6 + $0x30] sm:$0xff] %v371_v10  ;;  %374 = vst [vmem:[%s1761_s6 + $0x38] sm:$0xff] %v373_v11  ;;  %v377_v13 = vld [vmem:[%s1756_s25 + $0x90] sm:$0xff] }
  0x3b   : > { %376 = vst [vmem:[%s1761_s6 + $0x40] sm:$0xff] %v375_v12  ;;  %v379_v14 = vld [vmem:[%s1756_s25 + $0xa0] sm:$0xff]  ;;  %v381_v15 = vld [vmem:[%s1756_s25 + $0xb0] sm:$0xff]  ;;  %378 = vst [vmem:[%s1761_s6 + $0x48] sm:$0xff] %v377_v13 }
  0x3c   : > { %380 = vst [vmem:[%s1761_s6 + $0x50] sm:$0xff] %v379_v14  ;;  %382 = vst [vmem:[%s1761_s6 + $0x58] sm:$0xff] %v381_v15  ;;  %v383_v16 = vld [vmem:[%s1756_s25 + $0xc0] sm:$0xff]  ;;  %v385_v17 = vld [vmem:[%s1756_s25 + $0xd0] sm:$0xff] }
  0x3d   : > { %v387_v18 = vld [vmem:[%s1756_s25 + $0xe0] sm:$0xff]  ;;  %384 = vst [vmem:[%s1761_s6 + $0x60] sm:$0xff] %v383_v16  ;;  %386 = vst [vmem:[%s1761_s6 + $0x68] sm:$0xff] %v385_v17  ;;  %v389_v19 = vld [vmem:[%s1756_s25 + $0xf0] sm:$0xff] }
  0x3e   : > { %388 = vst [vmem:[%s1761_s6 + $0x70] sm:$0xff] %v387_v18  ;;  %v391_v20 = vld [vmem:[%s1756_s25 + $0x100] sm:$0xff]  ;;  %v393_v21 = vld [vmem:[%s1756_s25 + $0x110] sm:$0xff]  ;;  %390 = vst [vmem:[%s1761_s6 + $0x78] sm:$0xff] %v389_v19 }
  0x3f   : > { %392 = vst [vmem:[%s1761_s6 + $0x80] sm:$0xff] %v391_v20  ;;  %394 = vst [vmem:[%s1761_s6 + $0x88] sm:$0xff] %v393_v21  ;;  %v395_v22 = vld [vmem:[%s1756_s25 + $0x120] sm:$0xff]  ;;  %v397_v23 = vld [vmem:[%s1756_s25 + $0x130] sm:$0xff] }
  0x40   : > { %v399_v24 = vld [vmem:[%s1756_s25 + $0x140] sm:$0xff]  ;;  %396 = vst [vmem:[%s1761_s6 + $0x90] sm:$0xff] %v395_v22  ;;  %398 = vst [vmem:[%s1761_s6 + $0x98] sm:$0xff] %v397_v23  ;;  %v401_v25 = vld [vmem:[%s1756_s25 + $0x150] sm:$0xff] }
  0x41   : > { %400 = vst [vmem:[%s1761_s6 + $0xa0] sm:$0xff] %v399_v24  ;;  %v403_v26 = vld [vmem:[%s1756_s25 + $0x160] sm:$0xff]  ;;  %v405_v27 = vld [vmem:[%s1756_s25 + $0x170] sm:$0xff]  ;;  %402 = vst [vmem:[%s1761_s6 + $0xa8] sm:$0xff] %v401_v25 }
  0x42   : > { %404 = vst [vmem:[%s1761_s6 + $0xb0] sm:$0xff] %v403_v26  ;;  %406 = vst [vmem:[%s1761_s6 + $0xb8] sm:$0xff] %v405_v27  ;;  %v407_v28 = vld [vmem:[%s1756_s25 + $0x180] sm:$0xff]  ;;  %v409_v29 = vld [vmem:[%s1756_s25 + $0x190] sm:$0xff] }
  0x43   : > { %v411_v30 = vld [vmem:[%s1756_s25 + $0x1a0] sm:$0xff]  ;;  %408 = vst [vmem:[%s1761_s6 + $0xc0] sm:$0xff] %v407_v28  ;;  %410 = vst [vmem:[%s1761_s6 + $0xc8] sm:$0xff] %v409_v29  ;;  %v413_v31 = vld [vmem:[%s1756_s25 + $0x1b0] sm:$0xff] }
  0x44   : > { %412 = vst [vmem:[%s1761_s6 + $0xd0] sm:$0xff] %v411_v30  ;;  %v415_v32 = vld [vmem:[%s1756_s25 + $0x1c0] sm:$0xff]  ;;  %v417_v33 = vld [vmem:[%s1756_s25 + $0x1d0] sm:$0xff]  ;;  %414 = vst [vmem:[%s1761_s6 + $0xd8] sm:$0xff] %v413_v31 }
  0x45   : > { %416 = vst [vmem:[%s1761_s6 + $0xe0] sm:$0xff] %v415_v32  ;;  %418 = vst [vmem:[%s1761_s6 + $0xe8] sm:$0xff] %v417_v33  ;;  %v419_v34 = vld [vmem:[%s1756_s25 + $0x1e0] sm:$0xff]  ;;  %v421_v35 = vld [vmem:[%s1756_s25 + $0x1f0] sm:$0xff] }
  0x46   : > { %v423_v36 = vld [vmem:[%s1756_s25 + $0x200] sm:$0xff]  ;;  %420 = vst [vmem:[%s1761_s6 + $0xf0] sm:$0xff] %v419_v34  ;;  %422 = vst [vmem:[%s1761_s6 + $0xf8] sm:$0xff] %v421_v35  ;;  %v425_v37 = vld [vmem:[%s1756_s25 + $0x210] sm:$0xff] }
  0x47   : > { %424 = vst [vmem:[%s1761_s6 + $0x100] sm:$0xff] %v423_v36  ;;  %v427_v38 = vld [vmem:[%s1756_s25 + $0x220] sm:$0xff]  ;;  %v429_v39 = vld [vmem:[%s1756_s25 + $0x230] sm:$0xff]  ;;  %426 = vst [vmem:[%s1761_s6 + $0x108] sm:$0xff] %v425_v37 }
  0x48   : > { %428 = vst [vmem:[%s1761_s6 + $0x110] sm:$0xff] %v427_v38  ;;  %430 = vst [vmem:[%s1761_s6 + $0x118] sm:$0xff] %v429_v39  ;;  %v431_v40 = vld [vmem:[%s1756_s25 + $0x240] sm:$0xff]  ;;  %v433_v41 = vld [vmem:[%s1756_s25 + $0x250] sm:$0xff] }
  0x49   : > { %v435_v42 = vld [vmem:[%s1756_s25 + $0x260] sm:$0xff]  ;;  %432 = vst [vmem:[%s1761_s6 + $0x120] sm:$0xff] %v431_v40  ;;  %434 = vst [vmem:[%s1761_s6 + $0x128] sm:$0xff] %v433_v41  ;;  %v437_v43 = vld [vmem:[%s1756_s25 + $0x270] sm:$0xff] }
  0x4a   : > { %436 = vst [vmem:[%s1761_s6 + $0x130] sm:$0xff] %v435_v42  ;;  %v439_v44 = vld [vmem:[%s1756_s25 + $0x280] sm:$0xff]  ;;  %v441_v45 = vld [vmem:[%s1756_s25 + $0x290] sm:$0xff]  ;;  %438 = vst [vmem:[%s1761_s6 + $0x138] sm:$0xff] %v437_v43 }
  0x4b   : > { %440 = vst [vmem:[%s1761_s6 + $0x140] sm:$0xff] %v439_v44  ;;  %442 = vst [vmem:[%s1761_s6 + $0x148] sm:$0xff] %v441_v45  ;;  %v443_v46 = vld [vmem:[%s1756_s25 + $0x2a0] sm:$0xff]  ;;  %v445_v47 = vld [vmem:[%s1756_s25 + $0x2b0] sm:$0xff] }
  0x4c   : > { %v447_v48 = vld [vmem:[%s1756_s25 + $0x2c0] sm:$0xff]  ;;  %444 = vst [vmem:[%s1761_s6 + $0x150] sm:$0xff] %v443_v46  ;;  %446 = vst [vmem:[%s1761_s6 + $0x158] sm:$0xff] %v445_v47  ;;  %v449_v49 = vld [vmem:[%s1756_s25 + $0x2d0] sm:$0xff] }
  0x4d   : > { %448 = vst [vmem:[%s1761_s6 + $0x160] sm:$0xff] %v447_v48  ;;  %v451_v50 = vld [vmem:[%s1756_s25 + $0x2e0] sm:$0xff]  ;;  %v453_v51 = vld [vmem:[%s1756_s25 + $0x2f0] sm:$0xff]  ;;  %450 = vst [vmem:[%s1761_s6 + $0x168] sm:$0xff] %v449_v49 }
  0x4e   : > { %452 = vst [vmem:[%s1761_s6 + $0x170] sm:$0xff] %v451_v50  ;;  %454 = vst [vmem:[%s1761_s6 + $0x178] sm:$0xff] %v453_v51  ;;  %v455_v52 = vld [vmem:[%s1756_s25 + $0x300] sm:$0xff]  ;;  %v457_v53 = vld [vmem:[%s1756_s25 + $0x310] sm:$0xff] }
  0x4f   : > { %v459_v54 = vld [vmem:[%s1756_s25 + $0x320] sm:$0xff]  ;;  %456 = vst [vmem:[%s1761_s6 + $0x180] sm:$0xff] %v455_v52  ;;  %458 = vst [vmem:[%s1761_s6 + $0x188] sm:$0xff] %v457_v53  ;;  %v461_v55 = vld [vmem:[%s1756_s25 + $0x330] sm:$0xff] }
  0x50   : > { %460 = vst [vmem:[%s1761_s6 + $0x190] sm:$0xff] %v459_v54  ;;  %v463_v56 = vld [vmem:[%s1756_s25 + $0x340] sm:$0xff]  ;;  %v465_v57 = vld [vmem:[%s1756_s25 + $0x350] sm:$0xff]  ;;  %462 = vst [vmem:[%s1761_s6 + $0x198] sm:$0xff] %v461_v55 }
  0x51   : > { %464 = vst [vmem:[%s1761_s6 + $0x1a0] sm:$0xff] %v463_v56  ;;  %466 = vst [vmem:[%s1761_s6 + $0x1a8] sm:$0xff] %v465_v57  ;;  %v467_v58 = vld [vmem:[%s1756_s25 + $0x360] sm:$0xff]  ;;  %v469_v59 = vld [vmem:[%s1756_s25 + $0x370] sm:$0xff] }
  0x52   : > { %v471_v60 = vld [vmem:[%s1756_s25 + $0x380] sm:$0xff]  ;;  %468 = vst [vmem:[%s1761_s6 + $0x1b0] sm:$0xff] %v467_v58  ;;  %470 = vst [vmem:[%s1761_s6 + $0x1b8] sm:$0xff] %v469_v59  ;;  %v473_v61 = vld [vmem:[%s1756_s25 + $0x390] sm:$0xff] }
  0x53   : > { %472 = vst [vmem:[%s1761_s6 + $0x1c0] sm:$0xff] %v471_v60  ;;  %v475_v62 = vld [vmem:[%s1756_s25 + $0x3a0] sm:$0xff]  ;;  %v477_v63 = vld [vmem:[%s1756_s25 + $0x3b0] sm:$0xff]  ;;  %474 = vst [vmem:[%s1761_s6 + $0x1c8] sm:$0xff] %v473_v61 }
  0x54   : > { %476 = vst [vmem:[%s1761_s6 + $0x1d0] sm:$0xff] %v475_v62  ;;  %478 = vst [vmem:[%s1761_s6 + $0x1d8] sm:$0xff] %v477_v63  ;;  %v479_v0 = vld [vmem:[%s1756_s25 + $0x3c0] sm:$0xff]  ;;  %v481_v1 = vld [vmem:[%s1756_s25 + $0x3d0] sm:$0xff] }
  0x55   : > { %v483_v2 = vld [vmem:[%s1756_s25 + $0x3e0] sm:$0xff]  ;;  %480 = vst [vmem:[%s1761_s6 + $0x1e0] sm:$0xff] %v479_v0  ;;  %482 = vst [vmem:[%s1761_s6 + $0x1e8] sm:$0xff] %v481_v1  ;;  %v485_v3 = vld [vmem:[%s1756_s25 + $0x3f0] sm:$0xff] }
  0x56   : > { %484 = vst [vmem:[%s1761_s6 + $0x1f0] sm:$0xff] %v483_v2  ;;  %486 = vst [vmem:[%s1761_s6 + $0x1f8] sm:$0xff] %v485_v3 }
  0x57 PF: > { %p1255_p0 = scmp.ge.s32.totalorder %s1619_s22, 1  ;;  %p499_p1 = scmp.lt.s32.totalorder %s1619_s22, 11 }
  0x59   : > { %p500_p2 = pnand %p1255_p0, %p499_p1 }
  0x5a   : > { %s506_s0 = sand.u32 (!%p500_p2), 1, %s1595_s16   ;;  %s513_s5 = sand.u32 (!%p500_p2), 1, %s1587_s14  }
  0x5b   : > { %503 = sbr.rel (%p500_p2) target bundleno = 411 (0x19b), region = 85  ;;  %s1256_s23 = sshll.u32 (!%p500_p2), %s506_s0, 5 }
  0x5c   : > { %s1257_s28 = sshll.u32 (!%p500_p2), %s513_s5, 9  ;;  %s540_s7 = sand.u32 (!%p500_p2), 1, %s1579_s12  }
  0x5d   : > { %s1259_s11 = sshll.u32 (!%p500_p2), %s1607_s19, 1  ;;  %s1258_s25 = sshll.u32 (!%p500_p2), %s540_s7, 5 }
  0x5e   : > { %p548_p3 = scmp.lt.s32.totalorder (!%p500_p2), %s1259_s11, 3  ;;  %s1900_s27 = scalar_lea.vmem (!%p500_p2), [#allocation3], %s1256_s23 }
  0x5f   : > { %s1902_s6 = scalar_lea.vmem (!%p500_p2), [#allocation4], %s1257_s28  ;;  %s1904_s1 = scalar_lea.vmem (!%p500_p2), [#allocation5], %s1258_s25 }
  0x60   : > { %p1260_p4 = scmp.ne.s32.totalorder (!%p500_p2), %s1603_s18, 0 }
  0x62   : > { %s2059_s11 = smov (!%p548_p3, %s1259_s11), 3  ;;  %557 = sbr.rel (%p1260_p4) target bundleno = 105 (0x69), region = 97 }
  0x63   : > { %s550_s4 = scalar_lea.vmem %s2030_s2, %s2059_s11  ;;  %v1621_v4 = vmov (!%p1260_p4), 0.0  }
  0x64   : > { %558 = vst [vmem:[#allocation2] sm:$0xff] (!%p1260_p4), %v1621_v4  ;;  %559 = vst [vmem:[#allocation2 + $0x8] sm:$0xff] (!%p1260_p4), %v1621_v4 }
  0x65   : > { %560 = vst [vmem:[#allocation2 + $0x10] sm:$0xff] (!%p1260_p4), %v1621_v4  ;;  %561 = vst [vmem:[#allocation2 + $0x18] sm:$0xff] (!%p1260_p4), %v1621_v4 }
  0x69 PF: > { %v1431_v5 = vld [vmem:[%s1902_s6 + $0x4] ss:$8 sps:$4 sm:$0xff]   ;;  %v1435_v7 = vld [vmem:[%s1902_s6] ss:$8 sps:$4 sm:$0xff]   ;;  %v1437_v9 = vld [vmem:[%s1902_s6 + $0x14] ss:$8 sps:$4 sm:$0xff]  }
  0x6a   : > { %v1433_v6 = vld [vmem:[%s1902_s6 + $0x104] ss:$8 sps:$4 sm:$0xff]   ;;  %974 = vmatprep.subr.bf16.mxu1 %v1431_v5  ;;  %v1436_v8 = vld [vmem:[%s1902_s6 + $0x100] ss:$8 sps:$4 sm:$0xff]   ;;  %v1439_v10 = vld [vmem:[%s1902_s6 + $0x114] ss:$8 sps:$4 sm:$0xff]  }
  0x6b   : > { %1017 = vmatprep.subr.bf16.mxu0 %v1433_v6  ;;  %975 = vmatpush1.bf16.msra.mxu1 %v1435_v7  ;;  %v1441_v11 = vld [vmem:[%s1902_s6 + $0x10] ss:$8 sps:$4 sm:$0xff]   ;;  %v1443_v13 = vld [vmem:[%s1902_s6 + $0x24] ss:$8 sps:$4 sm:$0xff]   ;;  %v1447_v15 = vld [vmem:[%s1902_s6 + $0x20] ss:$8 sps:$4 sm:$0xff]  }
  0x6c   : > { %1018 = vmatpush1.bf16.msra.mxu0 %v1436_v8  ;;  %976 = vmatprep.subr.bf16.mxu1 %v1437_v9  ;;  %v1442_v12 = vld [vmem:[%s1902_s6 + $0x110] ss:$8 sps:$4 sm:$0xff]   ;;  %v1445_v14 = vld [vmem:[%s1902_s6 + $0x124] ss:$8 sps:$4 sm:$0xff]   ;;  %v1448_v16 = vld [vmem:[%s1902_s6 + $0x120] ss:$8 sps:$4 sm:$0xff]  }
  0x6d   : > { %1019 = vmatprep.subr.bf16.mxu0 %v1439_v10  ;;  %v1449_v17 = vld [vmem:[%s1902_s6 + $0x34] ss:$8 sps:$4 sm:$0xff]   ;;  %v1453_v19 = vld [vmem:[%s1902_s6 + $0x30] ss:$8 sps:$4 sm:$0xff]   ;;  %v1455_v21 = vld [vmem:[%s1902_s6 + $0x44] ss:$8 sps:$4 sm:$0xff]  }
  0x6e   : > { %v1451_v18 = vld [vmem:[%s1902_s6 + $0x134] ss:$8 sps:$4 sm:$0xff]   ;;  %v1454_v20 = vld [vmem:[%s1902_s6 + $0x130] ss:$8 sps:$4 sm:$0xff]   ;;  %v1457_v22 = vld [vmem:[%s1902_s6 + $0x144] ss:$8 sps:$4 sm:$0xff]  }
  0x6f   : > { %977 = vmatpush1.bf16.msra.mxu1 %v1441_v11  ;;  %v1459_v23 = vld [vmem:[%s1902_s6 + $0x40] ss:$8 sps:$4 sm:$0xff]   ;;  %v1461_v25 = vld [vmem:[%s1902_s6 + $0x54] ss:$8 sps:$4 sm:$0xff]   ;;  %v1465_v27 = vld [vmem:[%s1902_s6 + $0x50] ss:$8 sps:$4 sm:$0xff]  }
  0x70   : > { %1020 = vmatpush1.bf16.msra.mxu0 %v1442_v12  ;;  %978 = vmatprep.subr.bf16.mxu1 %v1443_v13  ;;  %v1460_v24 = vld [vmem:[%s1902_s6 + $0x140] ss:$8 sps:$4 sm:$0xff]   ;;  %v1463_v26 = vld [vmem:[%s1902_s6 + $0x154] ss:$8 sps:$4 sm:$0xff]   ;;  %v1466_v28 = vld [vmem:[%s1902_s6 + $0x150] ss:$8 sps:$4 sm:$0xff]  }
  0x71   : > { %1021 = vmatprep.subr.bf16.mxu0 %v1445_v14  ;;  %v1467_v29 = vld [vmem:[%s1902_s6 + $0x64] ss:$8 sps:$4 sm:$0xff]   ;;  %v1471_v31 = vld [vmem:[%s1902_s6 + $0x60] ss:$8 sps:$4 sm:$0xff]   ;;  %v1473_v33 = vld [vmem:[%s1902_s6 + $0x74] ss:$8 sps:$4 sm:$0xff]  }
  0x72   : > { %v1469_v30 = vld [vmem:[%s1902_s6 + $0x164] ss:$8 sps:$4 sm:$0xff]   ;;  %v1472_v32 = vld [vmem:[%s1902_s6 + $0x160] ss:$8 sps:$4 sm:$0xff]   ;;  %v1475_v34 = vld [vmem:[%s1902_s6 + $0x174] ss:$8 sps:$4 sm:$0xff]  }
  0x73   : > { %979 = vmatpush1.bf16.msra.mxu1 %v1447_v15  ;;  %v1477_v35 = vld [vmem:[%s1902_s6 + $0x70] ss:$8 sps:$4 sm:$0xff]   ;;  %v1479_v37 = vld [vmem:[%s1902_s6 + $0x84] ss:$8 sps:$4 sm:$0xff]   ;;  %v1483_v39 = vld [vmem:[%s1902_s6 + $0x80] ss:$8 sps:$4 sm:$0xff]  }
  0x74   : > { %1022 = vmatpush1.bf16.msra.mxu0 %v1448_v16  ;;  %980 = vmatprep.subr.bf16.mxu1 %v1449_v17  ;;  %v1478_v36 = vld [vmem:[%s1902_s6 + $0x170] ss:$8 sps:$4 sm:$0xff]   ;;  %v1481_v38 = vld [vmem:[%s1902_s6 + $0x184] ss:$8 sps:$4 sm:$0xff]   ;;  %v1484_v40 = vld [vmem:[%s1902_s6 + $0x180] ss:$8 sps:$4 sm:$0xff]  }
  0x75   : > { %1023 = vmatprep.subr.bf16.mxu0 %v1451_v18  ;;  %v1485_v41 = vld [vmem:[%s1902_s6 + $0x94] ss:$8 sps:$4 sm:$0xff]   ;;  %v1489_v43 = vld [vmem:[%s1902_s6 + $0x90] ss:$8 sps:$4 sm:$0xff]   ;;  %v1491_v45 = vld [vmem:[%s1902_s6 + $0xa4] ss:$8 sps:$4 sm:$0xff]  }
  0x76   : > { %v1487_v42 = vld [vmem:[%s1902_s6 + $0x194] ss:$8 sps:$4 sm:$0xff]   ;;  %v1490_v44 = vld [vmem:[%s1902_s6 + $0x190] ss:$8 sps:$4 sm:$0xff]   ;;  %v1493_v46 = vld [vmem:[%s1902_s6 + $0x1a4] ss:$8 sps:$4 sm:$0xff]  }
  0x77   : > { %981 = vmatpush1.bf16.msra.mxu1 %v1453_v19  ;;  %v1495_v47 = vld [vmem:[%s1902_s6 + $0xa0] ss:$8 sps:$4 sm:$0xff]   ;;  %v1497_v49 = vld [vmem:[%s1902_s6 + $0xb4] ss:$8 sps:$4 sm:$0xff]   ;;  %v1501_v51 = vld [vmem:[%s1902_s6 + $0xb0] ss:$8 sps:$4 sm:$0xff]  }
  0x78   : > { %1024 = vmatpush1.bf16.msra.mxu0 %v1454_v20  ;;  %982 = vmatprep.subr.bf16.mxu1 %v1455_v21  ;;  %v1496_v48 = vld [vmem:[%s1902_s6 + $0x1a0] ss:$8 sps:$4 sm:$0xff]   ;;  %v1499_v50 = vld [vmem:[%s1902_s6 + $0x1b4] ss:$8 sps:$4 sm:$0xff]   ;;  %v1502_v53 = vld [vmem:[%s1902_s6 + $0x1b0] ss:$8 sps:$4 sm:$0xff]  }
  0x79   : > { %1025 = vmatprep.subr.bf16.mxu0 %v1457_v22  ;;  %v1529_v52 = vld [vmem:[%s1900_s27 + $0x4] ss:$16 sps:$4 sm:$0xff]   ;;  %v1532_v56 = vld [vmem:[%s1900_s27 + $0xc] ss:$16 sps:$4 sm:$0xff]   ;;  %v1507_v57 = vld [vmem:[%s1902_s6 + $0xc0] ss:$8 sps:$4 sm:$0xff]  }
  0x7a   : > { %v1503_v54 = vld [vmem:[%s1902_s6 + $0xc4] ss:$8 sps:$4 sm:$0xff]   ;;  %1006 = vmatprep.mubr.bf16.mxu1 %v1529_v52  ;;  %1049 = vmatprep.mubr.bf16.mxu0 %v1532_v56  ;;  %v1508_v58 = vld [vmem:[%s1902_s6 + $0x1c0] ss:$8 sps:$4 sm:$0xff]   ;;  %v1509_v59 = vld [vmem:[%s1902_s6 + $0xd4] ss:$8 sps:$4 sm:$0xff]  }
  0x7b   : > { %983 = vmatpush1.bf16.msra.mxu1 %v1459_v23  ;;  %v1505_v55 = vld [vmem:[%s1902_s6 + $0x1c4] ss:$8 sps:$4 sm:$0xff]   ;;  %v1511_v60 = vld [vmem:[%s1902_s6 + $0x1d4] ss:$8 sps:$4 sm:$0xff]   ;;  %v1513_v61 = vld [vmem:[%s1902_s6 + $0xd0] ss:$8 sps:$4 sm:$0xff]  }
  0x7c   : > { %1026 = vmatpush1.bf16.msra.mxu0 %v1460_v24  ;;  %984 = vmatprep.subr.bf16.mxu1 %v1461_v25  ;;  %v1514_v62 = vld [vmem:[%s1902_s6 + $0x1d0] ss:$8 sps:$4 sm:$0xff]   ;;  %v1515_v63 = vld [vmem:[%s1902_s6 + $0xe4] ss:$8 sps:$4 sm:$0xff]   ;;  %v1519_v1 = vld [vmem:[%s1902_s6 + $0xe0] ss:$8 sps:$4 sm:$0xff]  }
  0x7d   : > { %1027 = vmatprep.subr.bf16.mxu0 %v1463_v26  ;;  %v1517_v0 = vld [vmem:[%s1902_s6 + $0x1e4] ss:$8 sps:$4 sm:$0xff]   ;;  %v1520_v2 = vld [vmem:[%s1902_s6 + $0x1e0] ss:$8 sps:$4 sm:$0xff]   ;;  %v1521_v3 = vld [vmem:[%s1902_s6 + $0xf4] ss:$8 sps:$4 sm:$0xff]  }
  0x7e   : > { %v1523_v4 = vld [vmem:[%s1902_s6 + $0x1f4] ss:$8 sps:$4 sm:$0xff]   ;;  %v1525_v5 = vld [vmem:[%s1902_s6 + $0xf0] ss:$8 sps:$4 sm:$0xff]   ;;  %v562_v10 = vld [vmem:[#allocation2] sm:$0xff]  ;;  %p1329_p5 = scmp.ne.s32.totalorder %s1603_s18, 4 }
  0x7f   : > { %985 = vmatpush1.bf16.msra.mxu1 %v1465_v27  ;;  %v1526_v6 = vld [vmem:[%s1902_s6 + $0x1f0] ss:$8 sps:$4 sm:$0xff]   ;;  %v563_v14 = vld [vmem:[#allocation2 + $0x8] sm:$0xff] }
  0x80   : > { %1028 = vmatpush1.bf16.msra.mxu0 %v1466_v28  ;;  %986 = vmatprep.subr.bf16.mxu1 %v1467_v29  ;;  %v1527_v7 = vld [vmem:[%s1900_s27] ss:$16 sps:$4 sm:$0xff]   ;;  %v1530_v8 = vld [vmem:[%s1900_s27 + $0x8] ss:$16 sps:$4 sm:$0xff]   ;;  %v1078_v29 = vlaneseq (!%p1329_p5) }
  0x81   : > { %1029 = vmatprep.subr.bf16.mxu0 %v1469_v30  ;;  %v564_v18 = vld [vmem:[#allocation2 + $0x10] sm:$0xff]  ;;  %v565_v23 = vld [vmem:[#allocation2 + $0x18] sm:$0xff] }
  0x82   : > { %v1079_v30 = vshrl.u32 (!%p1329_p5), %v1078_v29, 7 }
  0x83   : > { %987 = vmatpush1.bf16.msra.mxu1 %v1471_v31  ;;  %v1076_v31 = vld [vmem:[%s550_s4] sm:$0x3] (!%p1329_p5) }
  0x84   : > { %1030 = vmatpush1.bf16.msra.mxu0 %v1472_v32  ;;  %988 = vmatprep.subr.bf16.mxu1 %v1473_v33  ;;  %v1080_v33 = vsub.s32 (!%p1329_p5), 0, %v1079_v30 }
  0x85   : > { %1031 = vmatprep.subr.bf16.mxu0 %v1475_v34  ;;  %v1084_v34 = vsub.s32 (!%p1329_p5), 1, %v1079_v30 }
  0x87   : > { %989 = vmatpush1.bf16.msra.mxu1 %v1477_v35 }
  0x88   : > { %1032 = vmatpush1.bf16.msra.mxu0 %v1478_v36  ;;  %990 = vmatprep.subr.bf16.mxu1 %v1479_v37 }
  0x89   : > { %1033 = vmatprep.subr.bf16.mxu0 %v1481_v38  ;;  %v1081_v38 = vrot.slane (!%p1329_p5), %v1076_v31, %v1080_v33 }
  0x8b   : > { %991 = vmatpush1.bf16.msra.mxu1 %v1483_v39  ;;  %v1085_v39 = vrot.slane (!%p1329_p5), %v1076_v31, %v1084_v34 }
  0x8c   : > { %1034 = vmatpush1.bf16.msra.mxu0 %v1484_v40  ;;  %992 = vmatprep.subr.bf16.mxu1 %v1485_v41 }
  0x8d   : > { %1035 = vmatprep.subr.bf16.mxu0 %v1487_v42 }
  0x8f   : > { %993 = vmatpush1.bf16.msra.mxu1 %v1489_v43 }
  0x90   : > { %1036 = vmatpush1.bf16.msra.mxu0 %v1490_v44  ;;  %994 = vmatprep.subr.bf16.mxu1 %v1491_v45 }
  0x91   : > { %1037 = vmatprep.subr.bf16.mxu0 %v1493_v46 }
  0x93   : > { %995 = vmatpush1.bf16.msra.mxu1 %v1495_v47 }
  0x94   : > { %1038 = vmatpush1.bf16.msra.mxu0 %v1496_v48  ;;  %996 = vmatprep.subr.bf16.mxu1 %v1497_v49 }
  0x95   : > { %1039 = vmatprep.subr.bf16.mxu0 %v1499_v50 }
  0x97   : > { %997 = vmatpush1.bf16.msra.mxu1 %v1501_v51 }
  0x98   : > { %1040 = vmatpush1.bf16.msra.mxu0 %v1502_v53  ;;  %998 = vmatprep.subr.bf16.mxu1 %v1503_v54 }
  0x99   : > { %1041 = vmatprep.subr.bf16.mxu0 %v1505_v55 }
  0x9b   : > { %999 = vmatpush1.bf16.msra.mxu1 %v1507_v57 }
  0x9c   : > { %1042 = vmatpush1.bf16.msra.mxu0 %v1508_v58  ;;  %1000 = vmatprep.subr.bf16.mxu1 %v1509_v59 }
  0x9d   : > { %1043 = vmatprep.subr.bf16.mxu0 %v1511_v60 }
  0x9f   : > { %1001 = vmatpush1.bf16.msra.mxu1 %v1513_v61 }
  0xa0   : > { %1044 = vmatpush1.bf16.msra.mxu0 %v1514_v62  ;;  %1002 = vmatprep.subr.bf16.mxu1 %v1515_v63 }
  0xa1   : > { %1045 = vmatprep.subr.bf16.mxu0 %v1517_v0 }
  0xa3   : > { %1003 = vmatpush1.bf16.msra.mxu1 %v1519_v1 }
  0xa4   : > { %1046 = vmatpush1.bf16.msra.mxu0 %v1520_v2  ;;  %1004 = vmatprep.subr.bf16.mxu1 %v1521_v3 }
  0xa5   : > { %1047 = vmatprep.subr.bf16.mxu0 %v1523_v4 }
  0xa7   : > { %1005 = vmatpush1.bf16.msra.mxu1 %v1525_v5 }
  0xa8   : > { %1048 = vmatpush1.bf16.msra.mxu0 %v1526_v6 }
  0xaa   : > { %1007 = vmatmul.mubr.bf16.vlgmr.msra.gmra.mrb[0].mxu1 %v1527_v7 }
  0xab   : > { %1050 = vmatmul.mubr.bf16.vlgmr.msra.gmra.mrb[0].mxu0 %v1530_v8 }
 0x17d   : > { %v1008_v9 = vpop.f32.mrb[0].mxu1 }
 0x17e   : > { %v1051_v11 = vpop.f32.mrb[0].mxu0  ;;  %v1010_v13 = vpop.f32.mrb[1].mxu1 }
 0x17f   : > { %v1052_v12 = vadd.f32 %v1051_v11, %v1008_v9  ;;  %v1053_v15 = vpop.f32.mrb[1].mxu0  ;;  %v1012_v17 = vpop.f32.mrb[2].mxu1 }
 0x180   : > { %v1054_v16 = vadd.f32 %v1053_v15, %v1010_v13  ;;  %v1055_v19 = vpop.f32.mrb[2].mxu0  ;;  %v1014_v22 = vpop.f32.mrb[3].mxu1  ;;  %1071 = sbr.rel (%p1329_p5) target bundleno = 403 (0x193), region = 101 }
 0x181   : > { %v1060_v20 = vadd.f32 %v1052_v12, %v562_v10  ;;  %v1056_v21 = vadd.f32 %v1055_v19, %v1012_v17  ;;  %v1057_v24 = vpop.f32.mrb[3].mxu0 }
 0x182   : > { %v1061_v25 = vadd.f32 %v1054_v16, %v563_v14  ;;  %v1058_v26 = vadd.f32 %v1057_v24, %v1014_v22 }
 0x183   : > { %1064 = vst [vmem:[#allocation2] sm:$0xff] %v1060_v20  ;;  %v1062_v27 = vadd.f32 %v1056_v21, %v564_v18 }
 0x184   : > { %1065 = vst [vmem:[#allocation2 + $0x8] sm:$0xff] %v1061_v25  ;;  %v1063_v28 = vadd.f32 %v1058_v26, %v565_v23 }
 0x185   : > { %1066 = vst [vmem:[#allocation2 + $0x10] sm:$0xff] %v1062_v27 }
 0x186   : > { %1067 = vst [vmem:[#allocation2 + $0x18] sm:$0xff] %v1063_v28 }
 0x18a   : > { %v1072_v32 = vld [vmem:[#allocation2] sm:$0xff] }
 0x18b   : > { %v1073_v35 = vld [vmem:[#allocation2 + $0x8] sm:$0xff]  ;;  %v1088_v40 = vadd.f32 %v1081_v38, %v1072_v32 }
 0x18c   : > { %v1074_v36 = vld [vmem:[#allocation2 + $0x10] sm:$0xff]  ;;  %v1089_v41 = vadd.f32 %v1085_v39, %v1073_v35 }
 0x18d   : > { %v1075_v37 = vld [vmem:[#allocation2 + $0x18] sm:$0xff]  ;;  %v1090_v42 = vadd.f32 %v1081_v38, %v1074_v36  ;;  %v1092_v44 = vmax.f32 %v1088_v40, 0.0 }
 0x18e   : > { %v1091_v43 = vadd.f32 %v1085_v39, %v1075_v37  ;;  %v1093_v45 = vmax.f32 %v1089_v41, 0.0 }
 0x18f   : > { %v1094_v46 = vmax.f32 %v1090_v42, 0.0  ;;  %1096 = vst [vmem:[%s1904_s1] sm:$0xff] %v1092_v44 }
 0x190   : > { %v1095_v47 = vmax.f32 %v1091_v43, 0.0  ;;  %1097 = vst [vmem:[%s1904_s1 + $0x8] sm:$0xff] %v1093_v45 }
 0x191   : > { %1098 = vst [vmem:[%s1904_s1 + $0x10] sm:$0xff] %v1094_v46 }
 0x192   : > { %1099 = vst [vmem:[%s1904_s1 + $0x18] sm:$0xff] %v1095_v47 }
 0x193 PF: > { %1106 = sbr.rel (!%p1736_p12) target bundleno = 411 (0x19b), region = 105  ;;  %s1337_s16 = sshll.u32 (%p1736_p12), %s1607_s19, 4 }
 0x194   : > { %s1112_s5 = scalar_lea.vmem (%p1736_p12), %s2031_s3, %s1337_s16 }
 0x196   : > { %v1125_v48 = vld [vmem:[%s1904_s1] sm:$0xff] (%p1736_p12) }
 0x197   : > { %v1127_v49 = vld [vmem:[%s1904_s1 + $0x8] sm:$0xff] (%p1736_p12)  ;;  %1126 = vst [vmem:[%s1112_s5] sm:$0xff] (%p1736_p12), %v1125_v48 }
 0x198   : > { %v1129_v50 = vld [vmem:[%s1904_s1 + $0x10] sm:$0xff] (%p1736_p12)  ;;  %1128 = vst [vmem:[%s1112_s5 + $0x8] sm:$0xff] (%p1736_p12), %v1127_v49 }
 0x199   : > { %v1131_v51 = vld [vmem:[%s1904_s1 + $0x18] sm:$0xff] (%p1736_p12)  ;;  %1130 = vst [vmem:[%s1112_s5 + $0x20] sm:$0xff] (%p1736_p12), %v1129_v50 }
 0x19a   : > { %1132 = vst [vmem:[%s1112_s5 + $0x28] sm:$0xff] %v1131_v51 }
 0x19b PF: > { %s13_s22 = sadd.s32 1, %s1619_s22   ;;  %s2041_s10 = sld [smem:[#allocation6_spill]] }
 0x19c   : > { %p10_p6 = scmp.ge.s32.totalorder %s13_s22, 12   ;;  %s2042_s12 = smov %s1583_s13 }
 0x19d   : > { %s2043_s13 = smov %s1734_s9  ;;  %s2044_s14 = smov %s1591_s15 }
 0x19e   : > { %s2045_s15 = smov %s1731_s8  ;;  %s2046_s16 = smov %s1599_s17 }
 0x19f   : > { %s2047_s17 = smov %s1717_s30  ;;  %s2048_s18 = smov %s1611_s20 }
 0x1a0   : > { %s2049_s19 = smov %s1615_s21  ;;  %s2050_s20 = smov %s2053_s24 }
 0x1a1   : > { %s2051_s21 = smov %s2041_s10  ;;  %12 = sbr.rel (!%p10_p6) target bundleno = 9 (0x9), region = 170 }

// kernel: resnet18_forward.39
= control target key start
LH: loop header
LB: loop body
LE: loop exit
PB: predicated region body
PF: predicated region fallthrough
CT: control target
= control target key end

     0   :  { %s1052_s12 = smov 0   ;;  %s1054_s13 = smov 0   ;;  %s1240_s0 = inlined_call_operand.vmem [shape: bf16[16,256], index: 0, kind: input, shape index: {}]   ;;  %s1241_s1 = inlined_call_operand.vmem [shape: bf16[256,512], index: 1, kind: input, shape index: {}]   ;;  %s1242_s2 = inlined_call_operand.vmem [shape: f32[1,512], index: 2, kind: input, shape index: {}]   ;;  %s1243_s3 = inlined_call_operand.vmem [shape: f32[16,512], index: 3, kind: output, shape index: {}]  }
   0x1   :  { %s1056_s14 = smov 0   ;;  %s1058_s15 = smov 0  }
   0x2   :  { %s1060_s16 = smov 0  }
   0x3 LB: > { %s28_s17 = sadd.s32 1, %s1026_s15  ;;  %s848_s18 = sadd.s32 4294967295, %s1030_s16   ;;  %s1030_s16 = sphi %s1060_s16, %s13_s16   ;;  %s1026_s15 = sphi %s1058_s15, %s1248_s15   ;;  %s1022_s14 = sphi %s1056_s14, %s1247_s14   ;;  %s1018_s13 = sphi %s1054_s13, %s1246_s13   ;;  %s1014_s12 = sphi %s1052_s12, %s1245_s12  }
   0x4   : > { %p30_p0 = scmp.ge.s32.totalorder %s28_s17, 2  ;;  %p76_p1 = scmp.ne.s32.totalorder %s1018_s13, %s1014_s12 }
   0x5   : > { %p77_p2 = scmp.eq.s32.totalorder %s1030_s16, 0  ;;  %p134_p4 = scmp.eq.s32.totalorder %s848_s18, 1 }
   0x6   : > { %s1250_s17 = smov (%p30_p0, %s28_s17), 0  ;;  %s69_s20 = sadd.s32 1, %s1018_s13 }
   0x7   : > { %p78_p3 = por %p77_p2, %p76_p1  ;;  %s65_s19 = ssub.s32 %s1026_s15, %s1250_s17 }
   0x8   : > { %p67_p5 = scmp.eq.s32.totalorder %s65_s19, 0  ;;  %p1087_p6 = por %p134_p4, %p76_p1 }
   0x9   : > { %p852_p7 = scmp.ge.s32.totalorder %s1030_s16, 2 }
   0xa   : > { %s1092_s22 = scalar_select %p67_p5, %s1018_s13, %s69_s20  }
   0xb   : > { %171 = sbr.rel (%p852_p7) target bundleno = 38 (0x26), region = 20 }
  0x12   : > { %174 = sbr.rel (!%p78_p3) target bundleno = 38 (0x26), region = 24  ;;  %s176_s23 = sand.u32 (%p78_p3), 1, %s1018_s13  }
  0x13   : > { %s899_s24 = sshll.u32 (%p78_p3), %s1026_s15, 3  ;;  %s853_s25 = sshll.u32 (%p78_p3), %s176_s23, 8 }
  0x14   : > { %s1100_s28 = scalar_lea.vmem (%p78_p3), %s1241_s1, %s899_s24  ;;  %s1105_s29 = scalar_lea.vmem (%p78_p3), [#allocation3], %s853_s25 }
  0x15   : > { %v274_v0 = vld [vmem:[%s1100_s28] sm:$0xff] (%p78_p3)  ;;  %v276_v1 = vld [vmem:[%s1100_s28 + $0x10] sm:$0xff] (%p78_p3) }
  0x16   : > { %v278_v2 = vld [vmem:[%s1100_s28 + $0x20] sm:$0xff] (%p78_p3)  ;;  %275 = vst [vmem:[%s1105_s29] sm:$0xff] (%p78_p3), %v274_v0  ;;  %277 = vst [vmem:[%s1105_s29 + $0x8] sm:$0xff] (%p78_p3), %v276_v1  ;;  %v280_v3 = vld [vmem:[%s1100_s28 + $0x30] sm:$0xff] (%p78_p3) }
  0x17   : > { %279 = vst [vmem:[%s1105_s29 + $0x10] sm:$0xff] (%p78_p3), %v278_v2  ;;  %v282_v4 = vld [vmem:[%s1100_s28 + $0x40] sm:$0xff] (%p78_p3)  ;;  %v284_v5 = vld [vmem:[%s1100_s28 + $0x50] sm:$0xff] (%p78_p3)  ;;  %281 = vst [vmem:[%s1105_s29 + $0x18] sm:$0xff] (%p78_p3), %v280_v3 }
  0x18   : > { %283 = vst [vmem:[%s1105_s29 + $0x20] sm:$0xff] (%p78_p3), %v282_v4  ;;  %285 = vst [vmem:[%s1105_s29 + $0x28] sm:$0xff] (%p78_p3), %v284_v5  ;;  %v286_v6 = vld [vmem:[%s1100_s28 + $0x60] sm:$0xff] (%p78_p3)  ;;  %v288_v7 = vld [vmem:[%s1100_s28 + $0x70] sm:$0xff] (%p78_p3) }
  0x19   : > { %v290_v8 = vld [vmem:[%s1100_s28 + $0x80] sm:$0xff]  ;;  %287 = vst [vmem:[%s1105_s29 + $0x30] sm:$0xff] %v286_v6  ;;  %289 = vst [vmem:[%s1105_s29 + $0x38] sm:$0xff] %v288_v7  ;;  %v292_v9 = vld [vmem:[%s1100_s28 + $0x90] sm:$0xff] }
  0x1a   : > { %291 = vst [vmem:[%s1105_s29 + $0x40] sm:$0xff] %v290_v8  ;;  %v294_v10 = vld [vmem:[%s1100_s28 + $0xa0] sm:$0xff]  ;;  %v296_v11 = vld [vmem:[%s1100_s28 + $0xb0] sm:$0xff]  ;;  %293 = vst [vmem:[%s1105_s29 + $0x48] sm:$0xff] %v292_v9 }
  0x1b   : > { %295 = vst [vmem:[%s1105_s29 + $0x50] sm:$0xff] %v294_v10  ;;  %297 = vst [vmem:[%s1105_s29 + $0x58] sm:$0xff] %v296_v11  ;;  %v298_v12 = vld [vmem:[%s1100_s28 + $0xc0] sm:$0xff]  ;;  %v300_v13 = vld [vmem:[%s1100_s28 + $0xd0] sm:$0xff] }
  0x1c   : > { %v302_v14 = vld [vmem:[%s1100_s28 + $0xe0] sm:$0xff]  ;;  %299 = vst [vmem:[%s1105_s29 + $0x60] sm:$0xff] %v298_v12  ;;  %301 = vst [vmem:[%s1105_s29 + $0x68] sm:$0xff] %v300_v13  ;;  %v304_v15 = vld [vmem:[%s1100_s28 + $0xf0] sm:$0xff] }
  0x1d   : > { %303 = vst [vmem:[%s1105_s29 + $0x70] sm:$0xff] %v302_v14  ;;  %v306_v16 = vld [vmem:[%s1100_s28 + $0x100] sm:$0xff]  ;;  %v308_v17 = vld [vmem:[%s1100_s28 + $0x110] sm:$0xff]  ;;  %305 = vst [vmem:[%s1105_s29 + $0x78] sm:$0xff] %v304_v15 }
  0x1e   : > { %307 = vst [vmem:[%s1105_s29 + $0x80] sm:$0xff] %v306_v16  ;;  %309 = vst [vmem:[%s1105_s29 + $0x88] sm:$0xff] %v308_v17  ;;  %v310_v18 = vld [vmem:[%s1100_s28 + $0x120] sm:$0xff]  ;;  %v312_v19 = vld [vmem:[%s1100_s28 + $0x130] sm:$0xff] }
  0x1f   : > { %v314_v20 = vld [vmem:[%s1100_s28 + $0x140] sm:$0xff]  ;;  %311 = vst [vmem:[%s1105_s29 + $0x90] sm:$0xff] %v310_v18  ;;  %313 = vst [vmem:[%s1105_s29 + $0x98] sm:$0xff] %v312_v19  ;;  %v316_v21 = vld [vmem:[%s1100_s28 + $0x150] sm:$0xff] }
  0x20   : > { %315 = vst [vmem:[%s1105_s29 + $0xa0] sm:$0xff] %v314_v20  ;;  %v318_v22 = vld [vmem:[%s1100_s28 + $0x160] sm:$0xff]  ;;  %v320_v23 = vld [vmem:[%s1100_s28 + $0x170] sm:$0xff]  ;;  %317 = vst [vmem:[%s1105_s29 + $0xa8] sm:$0xff] %v316_v21 }
  0x21   : > { %319 = vst [vmem:[%s1105_s29 + $0xb0] sm:$0xff] %v318_v22  ;;  %321 = vst [vmem:[%s1105_s29 + $0xb8] sm:$0xff] %v320_v23  ;;  %v322_v24 = vld [vmem:[%s1100_s28 + $0x180] sm:$0xff]  ;;  %v324_v25 = vld [vmem:[%s1100_s28 + $0x190] sm:$0xff] }
  0x22   : > { %v326_v26 = vld [vmem:[%s1100_s28 + $0x1a0] sm:$0xff]  ;;  %323 = vst [vmem:[%s1105_s29 + $0xc0] sm:$0xff] %v322_v24  ;;  %325 = vst [vmem:[%s1105_s29 + $0xc8] sm:$0xff] %v324_v25  ;;  %v328_v27 = vld [vmem:[%s1100_s28 + $0x1b0] sm:$0xff] }
  0x23   : > { %327 = vst [vmem:[%s1105_s29 + $0xd0] sm:$0xff] %v326_v26  ;;  %v330_v28 = vld [vmem:[%s1100_s28 + $0x1c0] sm:$0xff]  ;;  %v332_v29 = vld [vmem:[%s1100_s28 + $0x1d0] sm:$0xff]  ;;  %329 = vst [vmem:[%s1105_s29 + $0xd8] sm:$0xff] %v328_v27 }
  0x24   : > { %331 = vst [vmem:[%s1105_s29 + $0xe0] sm:$0xff] %v330_v28  ;;  %333 = vst [vmem:[%s1105_s29 + $0xe8] sm:$0xff] %v332_v29  ;;  %v334_v30 = vld [vmem:[%s1100_s28 + $0x1e0] sm:$0xff]  ;;  %v336_v31 = vld [vmem:[%s1100_s28 + $0x1f0] sm:$0xff] }
  0x25   : > { %335 = vst [vmem:[%s1105_s29 + $0xf0] sm:$0xff] %v334_v30  ;;  %337 = vst [vmem:[%s1105_s29 + $0xf8] sm:$0xff] %v336_v31 }
  0x26 PF: > { %p856_p8 = scmp.ge.s32.totalorder %s1030_s16, 1  ;;  %p350_p9 = scmp.lt.s32.totalorder %s1030_s16, 3 }
  0x28   : > { %p351_p10 = pnand %p856_p8, %p350_p9 }
  0x29   : > { %s357_s30 = sand.u32 (!%p351_p10), 1, %s1014_s12   ;;  %v991_v32 = vld [vmem:[%s1240_s0 + $0x4] ss:$8 sps:$4 sm:$0xff] (!%p351_p10)   ;;  %v989_v1 = vld [vmem:[%s1240_s0] ss:$8 sps:$4 sm:$0xff] (!%p351_p10)   ;;  %s859_s10 = sshll.u32 (!%p351_p10), %s1022_s14, 1  ;;  %v690_v2 = vlaneseq (!%p351_p10) }
  0x2a   : > { %354 = sbr.rel (%p351_p10) target bundleno = 335 (0x14f), region = 66  ;;  %s857_s4 = sshll.u32 (!%p351_p10), %s357_s30, 8  ;;  %662 = vmatprep.mubr.bf16.mxu0 (!%p351_p10), %v991_v32 }
  0x2b   : > { %s1176_s7 = scalar_lea.vmem (!%p351_p10), [#allocation3], %s857_s4  ;;  %p408_p11 = scmp.lt.s32.totalorder (!%p351_p10), %s859_s10, 3  ;;  %v691_v3 = vshrl.u32 (!%p351_p10), %v690_v2, 7 }
  0x2c   : > { %v941_v33 = vld [vmem:[%s1176_s7 + $0x4] ss:$8 sps:$4 sm:$0xff] (!%p351_p10)   ;;  %v943_v34 = vld [vmem:[%s1176_s7] ss:$8 sps:$4 sm:$0xff] (!%p351_p10)   ;;  %v944_v35 = vld [vmem:[%s1176_s7 + $0x14] ss:$8 sps:$4 sm:$0xff] (!%p351_p10)  }
  0x2d   : > { %630 = vmatprep.subr.bf16.mxu0 (!%p351_p10), %v941_v33  ;;  %v946_v36 = vld [vmem:[%s1176_s7 + $0x10] ss:$8 sps:$4 sm:$0xff] (!%p351_p10)   ;;  %v947_v37 = vld [vmem:[%s1176_s7 + $0x24] ss:$8 sps:$4 sm:$0xff] (!%p351_p10)   ;;  %v949_v38 = vld [vmem:[%s1176_s7 + $0x20] ss:$8 sps:$4 sm:$0xff] (!%p351_p10)  }
  0x2e   : > { %631 = vmatpush1.bf16.msra.mxu0 (!%p351_p10), %v943_v34  ;;  %v950_v39 = vld [vmem:[%s1176_s7 + $0x34] ss:$8 sps:$4 sm:$0xff] (!%p351_p10)   ;;  %v952_v40 = vld [vmem:[%s1176_s7 + $0x30] ss:$8 sps:$4 sm:$0xff] (!%p351_p10)   ;;  %v953_v41 = vld [vmem:[%s1176_s7 + $0x44] ss:$8 sps:$4 sm:$0xff] (!%p351_p10)  }
  0x2f   : > { %632 = vmatprep.subr.bf16.mxu0 (!%p351_p10), %v944_v35  ;;  %v955_v42 = vld [vmem:[%s1176_s7 + $0x40] ss:$8 sps:$4 sm:$0xff] (!%p351_p10)   ;;  %v956_v43 = vld [vmem:[%s1176_s7 + $0x54] ss:$8 sps:$4 sm:$0xff] (!%p351_p10)   ;;  %v958_v44 = vld [vmem:[%s1176_s7 + $0x50] ss:$8 sps:$4 sm:$0xff] (!%p351_p10)  }
  0x30   : > { %v959_v45 = vld [vmem:[%s1176_s7 + $0x64] ss:$8 sps:$4 sm:$0xff] (!%p351_p10)   ;;  %v961_v46 = vld [vmem:[%s1176_s7 + $0x60] ss:$8 sps:$4 sm:$0xff] (!%p351_p10)   ;;  %v962_v47 = vld [vmem:[%s1176_s7 + $0x74] ss:$8 sps:$4 sm:$0xff] (!%p351_p10)  }
  0x31   : > { %v964_v48 = vld [vmem:[%s1176_s7 + $0x70] ss:$8 sps:$4 sm:$0xff]   ;;  %v965_v49 = vld [vmem:[%s1176_s7 + $0x84] ss:$8 sps:$4 sm:$0xff]   ;;  %v967_v50 = vld [vmem:[%s1176_s7 + $0x80] ss:$8 sps:$4 sm:$0xff]  }
  0x32   : > { %633 = vmatpush1.bf16.msra.mxu0 %v946_v36  ;;  %v968_v51 = vld [vmem:[%s1176_s7 + $0x94] ss:$8 sps:$4 sm:$0xff]   ;;  %v970_v52 = vld [vmem:[%s1176_s7 + $0x90] ss:$8 sps:$4 sm:$0xff]   ;;  %v971_v53 = vld [vmem:[%s1176_s7 + $0xa4] ss:$8 sps:$4 sm:$0xff]  }
  0x33   : > { %634 = vmatprep.subr.bf16.mxu0 %v947_v37  ;;  %v973_v54 = vld [vmem:[%s1176_s7 + $0xa0] ss:$8 sps:$4 sm:$0xff]   ;;  %v974_v55 = vld [vmem:[%s1176_s7 + $0xb4] ss:$8 sps:$4 sm:$0xff]   ;;  %v976_v56 = vld [vmem:[%s1176_s7 + $0xb0] ss:$8 sps:$4 sm:$0xff]  }
  0x34   : > { %v977_v57 = vld [vmem:[%s1176_s7 + $0xc4] ss:$8 sps:$4 sm:$0xff]   ;;  %v979_v58 = vld [vmem:[%s1176_s7 + $0xc0] ss:$8 sps:$4 sm:$0xff]   ;;  %v980_v59 = vld [vmem:[%s1176_s7 + $0xd4] ss:$8 sps:$4 sm:$0xff]  }
  0x35   : > { %v982_v60 = vld [vmem:[%s1176_s7 + $0xd0] ss:$8 sps:$4 sm:$0xff]   ;;  %v983_v61 = vld [vmem:[%s1176_s7 + $0xe4] ss:$8 sps:$4 sm:$0xff]   ;;  %v985_v62 = vld [vmem:[%s1176_s7 + $0xe0] ss:$8 sps:$4 sm:$0xff]  }
  0x36   : > { %635 = vmatpush1.bf16.msra.mxu0 %v949_v38  ;;  %v986_v63 = vld [vmem:[%s1176_s7 + $0xf4] ss:$8 sps:$4 sm:$0xff]   ;;  %v988_v0 = vld [vmem:[%s1176_s7 + $0xf0] ss:$8 sps:$4 sm:$0xff]   ;;  %s1252_s10 = smov (!%p408_p11, %s859_s10), 3  ;;  %v692_v4 = vsub.s32 0, %v691_v3 }
  0x37   : > { %636 = vmatprep.subr.bf16.mxu0 %v950_v39  ;;  %s410_s19 = scalar_lea.vmem %s1242_s2, %s1252_s10  ;;  %v696_v6 = vsub.s32 1, %v691_v3  ;;  %s858_s20 = sshll.u32 %s357_s30, 5 }
  0x38   : > { %v688_v5 = vld [vmem:[%s410_s19] sm:$0x3]  ;;  %s392_s23 = scalar_lea.vmem [#allocation4], %s858_s20  ;;  %s900_s12 = sshll.u32 (%p1087_p6), %s1022_s14, 4 }
  0x39   : > { %v693_v7 = vrot.slane %v688_v5, %v692_v4  ;;  %v697_v8 = vrot.slane %v688_v5, %v696_v6  ;;  %s720_s26 = scalar_lea.vmem (%p1087_p6), %s1243_s3, %s900_s12 }
  0x3a   : > { %637 = vmatpush1.bf16.msra.mxu0 %v952_v40 }
  0x3b   : > { %638 = vmatprep.subr.bf16.mxu0 %v953_v41 }
  0x3e   : > { %639 = vmatpush1.bf16.msra.mxu0 %v955_v42 }
  0x3f   : > { %640 = vmatprep.subr.bf16.mxu0 %v956_v43 }
  0x42   : > { %641 = vmatpush1.bf16.msra.mxu0 %v958_v44 }
  0x43   : > { %642 = vmatprep.subr.bf16.mxu0 %v959_v45 }
  0x46   : > { %643 = vmatpush1.bf16.msra.mxu0 %v961_v46 }
  0x47   : > { %644 = vmatprep.subr.bf16.mxu0 %v962_v47 }
  0x4a   : > { %645 = vmatpush1.bf16.msra.mxu0 %v964_v48 }
  0x4b   : > { %646 = vmatprep.subr.bf16.mxu0 %v965_v49 }
  0x4e   : > { %647 = vmatpush1.bf16.msra.mxu0 %v967_v50 }
  0x4f   : > { %648 = vmatprep.subr.bf16.mxu0 %v968_v51 }
  0x52   : > { %649 = vmatpush1.bf16.msra.mxu0 %v970_v52 }
  0x53   : > { %650 = vmatprep.subr.bf16.mxu0 %v971_v53 }
  0x56   : > { %651 = vmatpush1.bf16.msra.mxu0 %v973_v54 }
  0x57   : > { %652 = vmatprep.subr.bf16.mxu0 %v974_v55 }
  0x5a   : > { %653 = vmatpush1.bf16.msra.mxu0 %v976_v56 }
  0x5b   : > { %654 = vmatprep.subr.bf16.mxu0 %v977_v57 }
  0x5e   : > { %655 = vmatpush1.bf16.msra.mxu0 %v979_v58 }
  0x5f   : > { %656 = vmatprep.subr.bf16.mxu0 %v980_v59 }
  0x62   : > { %657 = vmatpush1.bf16.msra.mxu0 %v982_v60 }
  0x63   : > { %658 = vmatprep.subr.bf16.mxu0 %v983_v61 }
  0x66   : > { %659 = vmatpush1.bf16.msra.mxu0 %v985_v62 }
  0x67   : > { %660 = vmatprep.subr.bf16.mxu0 %v986_v63 }
  0x6a   : > { %661 = vmatpush1.bf16.msra.mxu0 %v988_v0 }
  0x6d   : > { %663 = vmatmul.mubr.bf16.vlgmr.msra.gmra.mrb[0].mxu0 %v989_v1 }
 0x140   : > { %v664_v9 = vpop.f32.mrb[0].mxu0  ;;  %714 = sbr.rel (!%p1087_p6) target bundleno = 335 (0x14f), region = 82 }
 0x141   : > { %v700_v10 = vadd.f32 %v693_v7, %v664_v9  ;;  %v666_v11 = vpop.f32.mrb[1].mxu0 }
 0x142   : > { %v701_v12 = vadd.f32 %v697_v8, %v666_v11  ;;  %v668_v13 = vpop.f32.mrb[2].mxu0 }
 0x143   : > { %704 = vst [vmem:[%s392_s23] sm:$0xff] %v700_v10  ;;  %v702_v14 = vadd.f32 %v693_v7, %v668_v13  ;;  %v670_v15 = vpop.f32.mrb[3].mxu0 }
 0x144   : > { %705 = vst [vmem:[%s392_s23 + $0x8] sm:$0xff] %v701_v12  ;;  %v703_v16 = vadd.f32 %v697_v8, %v670_v15 }
 0x145   : > { %706 = vst [vmem:[%s392_s23 + $0x10] sm:$0xff] %v702_v14 }
 0x146   : > { %707 = vst [vmem:[%s392_s23 + $0x18] sm:$0xff] %v703_v16 }
 0x14a   : > { %v733_v17 = vld [vmem:[%s392_s23] sm:$0xff] }
 0x14b   : > { %v735_v18 = vld [vmem:[%s392_s23 + $0x8] sm:$0xff]  ;;  %734 = vst [vmem:[%s720_s26] sm:$0xff] %v733_v17 }
 0x14c   : > { %v737_v19 = vld [vmem:[%s392_s23 + $0x10] sm:$0xff]  ;;  %736 = vst [vmem:[%s720_s26 + $0x8] sm:$0xff] %v735_v18 }
 0x14d   : > { %v739_v20 = vld [vmem:[%s392_s23 + $0x18] sm:$0xff]  ;;  %738 = vst [vmem:[%s720_s26 + $0x20] sm:$0xff] %v737_v19 }
 0x14e   : > { %740 = vst [vmem:[%s720_s26 + $0x28] sm:$0xff] %v739_v20 }
 0x14f PF: > { %s13_s16 = sadd.s32 1, %s1030_s16   ;;  %s1245_s12 = smov %s1018_s13 }
 0x150   : > { %p10_p12 = scmp.ge.s32.totalorder %s13_s16, 4   ;;  %s1246_s13 = smov %s1092_s22 }
 0x151   : > { %s1247_s14 = smov %s1026_s15  ;;  %s1248_s15 = smov %s1250_s17 }
 0x152   :  { %12 = sbr.rel (!%p10_p12) target bundleno = 3 (0x3), region = 142 }

// kernel: resnet18_forward.40
= control target key start
LH: loop header
LB: loop body
LE: loop exit
PB: predicated region body
PF: predicated region fallthrough
CT: control target
= control target key end

     0   :  { %s2170_s0 = inlined_call_operand.vmem [shape: bf16[16,4608], index: 0, kind: input, shape index: {}]   ;;  %s2171_s1 = inlined_call_operand.vmem [shape: bf16[4608,512], index: 1, kind: input, shape index: {}]   ;;  %s2172_s2 = inlined_call_operand.vmem [shape: f32[1,512], index: 2, kind: input, shape index: {}]   ;;  %s2173_s3 = inlined_call_operand.vmem [shape: f32[16,512], index: 3, kind: input, shape index: {}]   ;;  %s2174_s4 = inlined_call_operand.vmem [shape: f32[16,512], index: 4, kind: output, shape index: {}]  }
   0x1   :  { %2177 = sst [smem:[#allocation10_spill]] %s2170_s0 }
   0x2   :  { %s1761_s15 = smov 0   ;;  %s1763_s16 = smov 0  }
   0x3   :  { %s1765_s17 = smov 0   ;;  %s1767_s18 = smov 0  }
   0x4   :  { %s1769_s19 = smov 0   ;;  %s1771_s20 = smov 0  }
   0x5   :  { %s1773_s21 = smov 0   ;;  %s1775_s22 = smov 0  }
   0x6   :  { %s1777_s23 = smov 0   ;;  %s1779_s24 = smov 0  }
   0x7   :  { %s1781_s25 = smov 0  }
   0x8 LB: > { %s1352_s26 = sadd.s32 4294967295, %s1733_s25   ;;  %s26_s27 = sadd.s32 1, %s1725_s23  ;;  %s1733_s25 = sphi %s1781_s25, %s14_s25   ;;  %s1729_s24 = sphi %s1779_s24, %s2198_s24   ;;  %s1725_s23 = sphi %s1777_s23, %s2197_s23   ;;  %s1721_s22 = sphi %s1775_s22, %s2196_s22   ;;  %s1717_s21 = sphi %s1773_s21, %s2195_s21   ;;  %s1713_s20 = sphi %s1771_s20, %s2194_s20   ;;  %s1709_s19 = sphi %s1769_s19, %s2193_s19   ;;  %s1705_s18 = sphi %s1767_s18, %s2192_s18   ;;  %s1701_s17 = sphi %s1765_s17, %s2191_s17   ;;  %s1697_s16 = sphi %s1763_s16, %s2190_s16   ;;  %s1693_s15 = sphi %s1761_s15, %s2189_s15  }
   0x9   : > { %p27_p0 = scmp.ge.s32.totalorder %s26_s27, 9  ;;  %s29_s28 = sadd.s32 1, %s1729_s24 }
   0xa   : > { %s42_s29 = sadd.s32 1, %s1713_s20  ;;  %p49_p1 = scmp.ne.s32.totalorder %s1713_s20, %s1709_s19 }
   0xb   : > { %s2200_s27 = smov (%p27_p0, %s26_s27), 0  ;;  %s2202_s28 = smov (!%p27_p0, %s29_s28), %s1729_s24 }
   0xc   : > { %2178 = sst [smem:[#allocation7_spill]] %s2200_s27  ;;  %s38_s30 = ssub.s32 %s1725_s23, %s2200_s27 }
   0xd   : > { %p50_p2 = scmp.eq.s32.totalorder %s1733_s25, 0  ;;  %p31_p3 = scmp.ge.s32.totalorder %s2202_s28, 2 }
   0xe   : > { %p40_p4 = scmp.eq.s32.totalorder %s38_s30, 0  ;;  %s70_s6 = sadd.s32 1, %s1705_s18 }
   0xf   : > { %p1830_p5 = por %p50_p2, %p49_p1  ;;  %s2204_s28 = smov (%p31_p3, %s2202_s28), 0 }
  0x10   : > { %2180 = sst [smem:[#allocation8_spill]] %s2204_s28  ;;  %s66_s8 = ssub.s32 %s1729_s24, %s2204_s28 }
  0x11   : > { %s1838_s7 = scalar_select %p40_p4, %s1713_s20, %s42_s29  }
  0x12   : > { %p77_p6 = scmp.ne.s32.totalorder %s1705_s18, %s1701_s17  ;;  %s67_s9 = sor.u32 %s66_s8, %s38_s30 }
  0x13   : > { %2181 = sst [smem:[#allocation9_spill]] %s1838_s7  ;;  %p122_p7 = scmp.eq.s32.totalorder %s66_s8, 0 }
  0x14   : > { %p68_p8 = scmp.eq.s32.totalorder %s67_s9, 0  ;;  %p1846_p9 = por %p77_p6, %p50_p2 }
  0x15   : > { %s124_s11 = sadd.s32 1, %s1697_s16  ;;  %p131_p10 = scmp.ne.s32.totalorder %s1697_s16, %s1693_s15 }
  0x16   : > { %s1854_s12 = scalar_select %p68_p8, %s1705_s18, %s70_s6  }
  0x17   : > { %s1857_s13 = scalar_select %p122_p7, %s1697_s16, %s124_s11  }
  0x18   : > { %p1861_p11 = por %p131_p10, %p50_p2  ;;  %p163_p12 = scmp.eq.s32.totalorder %s1352_s26, 17 }
  0x19   : > { %p1355_p0 = scmp.ge.s32.totalorder %s1733_s25, 18 }
  0x1a   : > { %p1865_p13 = por %p163_p12, %p131_p10 }
  0x1b   : > { %185 = sbr.rel (%p1355_p0) target bundleno = 92 (0x5c), region = 16 }
  0x22   : > { %188 = sbr.rel (!%p1830_p5) target bundleno = 46 (0x2e), region = 20  ;;  %s190_s30 = sand.u32 (%p1830_p5), 1, %s1713_s20  }
  0x23   : > { %s1448_s6 = sshll.u32 (%p1830_p5), %s1725_s23, 4  ;;  %s1356_s8 = sshll.u32 (%p1830_p5), %s190_s30, 5 }
  0x24   : > { %s2185_s0 = sld [smem:[#allocation10_spill]] (%p1830_p5)  ;;  %s192_s26 = scalar_lea.vmem (%p1830_p5), [#allocation3], %s1356_s8 }
  0x2a   : > { %s198_s28 = scalar_lea.vmem %s2185_s0, %s1448_s6 }
  0x2b   : > { %v211_v0 = vld [vmem:[%s198_s28] sm:$0xff]  ;;  %v213_v1 = vld [vmem:[%s198_s28 + $0x8] sm:$0xff]  ;;  %v215_v2 = vld [vmem:[%s198_s28 + $0x90] sm:$0xff] }
  0x2c   : > { %212 = vst [vmem:[%s192_s26] sm:$0xff] %v211_v0  ;;  %214 = vst [vmem:[%s192_s26 + $0x8] sm:$0xff] %v213_v1  ;;  %v217_v3 = vld [vmem:[%s198_s28 + $0x98] sm:$0xff] }
  0x2d   : > { %216 = vst [vmem:[%s192_s26 + $0x10] sm:$0xff] %v215_v2  ;;  %218 = vst [vmem:[%s192_s26 + $0x18] sm:$0xff] %v217_v3 }
  0x2e PF: > { %224 = sbr.rel (!%p1846_p9) target bundleno = 85 (0x55), region = 43  ;;  %s226_s5 = sand.u32 (%p1846_p9), 1, %s1705_s18  }
  0x2f   : > { %s1361_s30 = sshll.u32 (%p1846_p9), %s1729_s24, 1  ;;  %s1359_s9 = sshll.u32 (%p1846_p9), %s226_s5, 9 }
  0x30   : > { %s1449_s6 = sshll.u32 (%p1846_p9), %s1725_s23, 8  ;;  %s1890_s28 = scalar_lea.vmem (%p1846_p9), [#allocation4], %s1359_s9 }
  0x31   : > { %s232_s11 = sadd.s32 (%p1846_p9), %s1449_s6, %s1361_s30 }
  0x32   : > { %s1363_s0 = sshll.u32 (%p1846_p9), %s232_s11, 2 }
  0x33   : > { %s1885_s7 = scalar_lea.vmem (%p1846_p9), %s2171_s1, %s1363_s0 }
  0x34   : > { %v388_v4 = vld [vmem:[%s1885_s7] sm:$0xff] (%p1846_p9)  ;;  %v390_v5 = vld [vmem:[%s1885_s7 + $0x10] sm:$0xff] (%p1846_p9) }
  0x35   : > { %v392_v6 = vld [vmem:[%s1885_s7 + $0x20] sm:$0xff]  ;;  %389 = vst [vmem:[%s1890_s28] sm:$0xff] %v388_v4  ;;  %391 = vst [vmem:[%s1890_s28 + $0x8] sm:$0xff] %v390_v5  ;;  %v394_v7 = vld [vmem:[%s1885_s7 + $0x30] sm:$0xff] }
  0x36   : > { %393 = vst [vmem:[%s1890_s28 + $0x10] sm:$0xff] %v392_v6  ;;  %v396_v8 = vld [vmem:[%s1885_s7 + $0x40] sm:$0xff]  ;;  %v398_v9 = vld [vmem:[%s1885_s7 + $0x50] sm:$0xff]  ;;  %395 = vst [vmem:[%s1890_s28 + $0x18] sm:$0xff] %v394_v7 }
  0x37   : > { %397 = vst [vmem:[%s1890_s28 + $0x20] sm:$0xff] %v396_v8  ;;  %399 = vst [vmem:[%s1890_s28 + $0x28] sm:$0xff] %v398_v9  ;;  %v400_v10 = vld [vmem:[%s1885_s7 + $0x60] sm:$0xff]  ;;  %v402_v11 = vld [vmem:[%s1885_s7 + $0x70] sm:$0xff] }
  0x38   : > { %v404_v12 = vld [vmem:[%s1885_s7 + $0x80] sm:$0xff]  ;;  %401 = vst [vmem:[%s1890_s28 + $0x30] sm:$0xff] %v400_v10  ;;  %403 = vst [vmem:[%s1890_s28 + $0x38] sm:$0xff] %v402_v11  ;;  %v406_v13 = vld [vmem:[%s1885_s7 + $0x90] sm:$0xff] }
  0x39   : > { %405 = vst [vmem:[%s1890_s28 + $0x40] sm:$0xff] %v404_v12  ;;  %v408_v14 = vld [vmem:[%s1885_s7 + $0xa0] sm:$0xff]  ;;  %v410_v15 = vld [vmem:[%s1885_s7 + $0xb0] sm:$0xff]  ;;  %407 = vst [vmem:[%s1890_s28 + $0x48] sm:$0xff] %v406_v13 }
  0x3a   : > { %409 = vst [vmem:[%s1890_s28 + $0x50] sm:$0xff] %v408_v14  ;;  %411 = vst [vmem:[%s1890_s28 + $0x58] sm:$0xff] %v410_v15  ;;  %v412_v16 = vld [vmem:[%s1885_s7 + $0xc0] sm:$0xff]  ;;  %v414_v17 = vld [vmem:[%s1885_s7 + $0xd0] sm:$0xff] }
  0x3b   : > { %v416_v18 = vld [vmem:[%s1885_s7 + $0xe0] sm:$0xff]  ;;  %413 = vst [vmem:[%s1890_s28 + $0x60] sm:$0xff] %v412_v16  ;;  %415 = vst [vmem:[%s1890_s28 + $0x68] sm:$0xff] %v414_v17  ;;  %v418_v19 = vld [vmem:[%s1885_s7 + $0xf0] sm:$0xff] }
  0x3c   : > { %417 = vst [vmem:[%s1890_s28 + $0x70] sm:$0xff] %v416_v18  ;;  %v420_v20 = vld [vmem:[%s1885_s7 + $0x100] sm:$0xff]  ;;  %v422_v21 = vld [vmem:[%s1885_s7 + $0x110] sm:$0xff]  ;;  %419 = vst [vmem:[%s1890_s28 + $0x78] sm:$0xff] %v418_v19 }
  0x3d   : > { %421 = vst [vmem:[%s1890_s28 + $0x80] sm:$0xff] %v420_v20  ;;  %423 = vst [vmem:[%s1890_s28 + $0x88] sm:$0xff] %v422_v21  ;;  %v424_v22 = vld [vmem:[%s1885_s7 + $0x120] sm:$0xff]  ;;  %v426_v23 = vld [vmem:[%s1885_s7 + $0x130] sm:$0xff] }
  0x3e   : > { %v428_v24 = vld [vmem:[%s1885_s7 + $0x140] sm:$0xff]  ;;  %425 = vst [vmem:[%s1890_s28 + $0x90] sm:$0xff] %v424_v22  ;;  %427 = vst [vmem:[%s1890_s28 + $0x98] sm:$0xff] %v426_v23  ;;  %v430_v25 = vld [vmem:[%s1885_s7 + $0x150] sm:$0xff] }
  0x3f   : > { %429 = vst [vmem:[%s1890_s28 + $0xa0] sm:$0xff] %v428_v24  ;;  %v432_v26 = vld [vmem:[%s1885_s7 + $0x160] sm:$0xff]  ;;  %v434_v27 = vld [vmem:[%s1885_s7 + $0x170] sm:$0xff]  ;;  %431 = vst [vmem:[%s1890_s28 + $0xa8] sm:$0xff] %v430_v25 }
  0x40   : > { %433 = vst [vmem:[%s1890_s28 + $0xb0] sm:$0xff] %v432_v26  ;;  %435 = vst [vmem:[%s1890_s28 + $0xb8] sm:$0xff] %v434_v27  ;;  %v436_v28 = vld [vmem:[%s1885_s7 + $0x180] sm:$0xff]  ;;  %v438_v29 = vld [vmem:[%s1885_s7 + $0x190] sm:$0xff] }
  0x41   : > { %v440_v30 = vld [vmem:[%s1885_s7 + $0x1a0] sm:$0xff]  ;;  %437 = vst [vmem:[%s1890_s28 + $0xc0] sm:$0xff] %v436_v28  ;;  %439 = vst [vmem:[%s1890_s28 + $0xc8] sm:$0xff] %v438_v29  ;;  %v442_v31 = vld [vmem:[%s1885_s7 + $0x1b0] sm:$0xff] }
  0x42   : > { %441 = vst [vmem:[%s1890_s28 + $0xd0] sm:$0xff] %v440_v30  ;;  %v444_v32 = vld [vmem:[%s1885_s7 + $0x1c0] sm:$0xff]  ;;  %v446_v33 = vld [vmem:[%s1885_s7 + $0x1d0] sm:$0xff]  ;;  %443 = vst [vmem:[%s1890_s28 + $0xd8] sm:$0xff] %v442_v31 }
  0x43   : > { %445 = vst [vmem:[%s1890_s28 + $0xe0] sm:$0xff] %v444_v32  ;;  %447 = vst [vmem:[%s1890_s28 + $0xe8] sm:$0xff] %v446_v33  ;;  %v448_v34 = vld [vmem:[%s1885_s7 + $0x1e0] sm:$0xff]  ;;  %v450_v35 = vld [vmem:[%s1885_s7 + $0x1f0] sm:$0xff] }
  0x44   : > { %v452_v36 = vld [vmem:[%s1885_s7 + $0x200] sm:$0xff]  ;;  %449 = vst [vmem:[%s1890_s28 + $0xf0] sm:$0xff] %v448_v34  ;;  %451 = vst [vmem:[%s1890_s28 + $0xf8] sm:$0xff] %v450_v35  ;;  %v454_v37 = vld [vmem:[%s1885_s7 + $0x210] sm:$0xff] }
  0x45   : > { %453 = vst [vmem:[%s1890_s28 + $0x100] sm:$0xff] %v452_v36  ;;  %v456_v38 = vld [vmem:[%s1885_s7 + $0x220] sm:$0xff]  ;;  %v458_v39 = vld [vmem:[%s1885_s7 + $0x230] sm:$0xff]  ;;  %455 = vst [vmem:[%s1890_s28 + $0x108] sm:$0xff] %v454_v37 }
  0x46   : > { %457 = vst [vmem:[%s1890_s28 + $0x110] sm:$0xff] %v456_v38  ;;  %459 = vst [vmem:[%s1890_s28 + $0x118] sm:$0xff] %v458_v39  ;;  %v460_v40 = vld [vmem:[%s1885_s7 + $0x240] sm:$0xff]  ;;  %v462_v41 = vld [vmem:[%s1885_s7 + $0x250] sm:$0xff] }
  0x47   : > { %v464_v42 = vld [vmem:[%s1885_s7 + $0x260] sm:$0xff]  ;;  %461 = vst [vmem:[%s1890_s28 + $0x120] sm:$0xff] %v460_v40  ;;  %463 = vst [vmem:[%s1890_s28 + $0x128] sm:$0xff] %v462_v41  ;;  %v466_v43 = vld [vmem:[%s1885_s7 + $0x270] sm:$0xff] }
  0x48   : > { %465 = vst [vmem:[%s1890_s28 + $0x130] sm:$0xff] %v464_v42  ;;  %v468_v44 = vld [vmem:[%s1885_s7 + $0x280] sm:$0xff]  ;;  %v470_v45 = vld [vmem:[%s1885_s7 + $0x290] sm:$0xff]  ;;  %467 = vst [vmem:[%s1890_s28 + $0x138] sm:$0xff] %v466_v43 }
  0x49   : > { %469 = vst [vmem:[%s1890_s28 + $0x140] sm:$0xff] %v468_v44  ;;  %471 = vst [vmem:[%s1890_s28 + $0x148] sm:$0xff] %v470_v45  ;;  %v472_v46 = vld [vmem:[%s1885_s7 + $0x2a0] sm:$0xff]  ;;  %v474_v47 = vld [vmem:[%s1885_s7 + $0x2b0] sm:$0xff] }
  0x4a   : > { %v476_v48 = vld [vmem:[%s1885_s7 + $0x2c0] sm:$0xff]  ;;  %473 = vst [vmem:[%s1890_s28 + $0x150] sm:$0xff] %v472_v46  ;;  %475 = vst [vmem:[%s1890_s28 + $0x158] sm:$0xff] %v474_v47  ;;  %v478_v49 = vld [vmem:[%s1885_s7 + $0x2d0] sm:$0xff] }
  0x4b   : > { %477 = vst [vmem:[%s1890_s28 + $0x160] sm:$0xff] %v476_v48  ;;  %v480_v50 = vld [vmem:[%s1885_s7 + $0x2e0] sm:$0xff]  ;;  %v482_v51 = vld [vmem:[%s1885_s7 + $0x2f0] sm:$0xff]  ;;  %479 = vst [vmem:[%s1890_s28 + $0x168] sm:$0xff] %v478_v49 }
  0x4c   : > { %481 = vst [vmem:[%s1890_s28 + $0x170] sm:$0xff] %v480_v50  ;;  %483 = vst [vmem:[%s1890_s28 + $0x178] sm:$0xff] %v482_v51  ;;  %v484_v52 = vld [vmem:[%s1885_s7 + $0x300] sm:$0xff]  ;;  %v486_v53 = vld [vmem:[%s1885_s7 + $0x310] sm:$0xff] }
  0x4d   : > { %v488_v54 = vld [vmem:[%s1885_s7 + $0x320] sm:$0xff]  ;;  %485 = vst [vmem:[%s1890_s28 + $0x180] sm:$0xff] %v484_v52  ;;  %487 = vst [vmem:[%s1890_s28 + $0x188] sm:$0xff] %v486_v53  ;;  %v490_v55 = vld [vmem:[%s1885_s7 + $0x330] sm:$0xff] }
  0x4e   : > { %489 = vst [vmem:[%s1890_s28 + $0x190] sm:$0xff] %v488_v54  ;;  %v492_v56 = vld [vmem:[%s1885_s7 + $0x340] sm:$0xff]  ;;  %v494_v57 = vld [vmem:[%s1885_s7 + $0x350] sm:$0xff]  ;;  %491 = vst [vmem:[%s1890_s28 + $0x198] sm:$0xff] %v490_v55 }
  0x4f   : > { %493 = vst [vmem:[%s1890_s28 + $0x1a0] sm:$0xff] %v492_v56  ;;  %495 = vst [vmem:[%s1890_s28 + $0x1a8] sm:$0xff] %v494_v57  ;;  %v496_v58 = vld [vmem:[%s1885_s7 + $0x360] sm:$0xff]  ;;  %v498_v59 = vld [vmem:[%s1885_s7 + $0x370] sm:$0xff] }
  0x50   : > { %v500_v60 = vld [vmem:[%s1885_s7 + $0x380] sm:$0xff]  ;;  %497 = vst [vmem:[%s1890_s28 + $0x1b0] sm:$0xff] %v496_v58  ;;  %499 = vst [vmem:[%s1890_s28 + $0x1b8] sm:$0xff] %v498_v59  ;;  %v502_v61 = vld [vmem:[%s1885_s7 + $0x390] sm:$0xff] }
  0x51   : > { %501 = vst [vmem:[%s1890_s28 + $0x1c0] sm:$0xff] %v500_v60  ;;  %v504_v62 = vld [vmem:[%s1885_s7 + $0x3a0] sm:$0xff]  ;;  %v506_v63 = vld [vmem:[%s1885_s7 + $0x3b0] sm:$0xff]  ;;  %503 = vst [vmem:[%s1890_s28 + $0x1c8] sm:$0xff] %v502_v61 }
  0x52   : > { %505 = vst [vmem:[%s1890_s28 + $0x1d0] sm:$0xff] %v504_v62  ;;  %507 = vst [vmem:[%s1890_s28 + $0x1d8] sm:$0xff] %v506_v63  ;;  %v508_v0 = vld [vmem:[%s1885_s7 + $0x3c0] sm:$0xff]  ;;  %v510_v1 = vld [vmem:[%s1885_s7 + $0x3d0] sm:$0xff] }
  0x53   : > { %v512_v2 = vld [vmem:[%s1885_s7 + $0x3e0] sm:$0xff]  ;;  %509 = vst [vmem:[%s1890_s28 + $0x1e0] sm:$0xff] %v508_v0  ;;  %511 = vst [vmem:[%s1890_s28 + $0x1e8] sm:$0xff] %v510_v1  ;;  %v514_v3 = vld [vmem:[%s1885_s7 + $0x3f0] sm:$0xff] }
  0x54   : > { %513 = vst [vmem:[%s1890_s28 + $0x1f0] sm:$0xff] %v512_v2  ;;  %515 = vst [vmem:[%s1890_s28 + $0x1f8] sm:$0xff] %v514_v3 }
  0x55 PF: > { %529 = sbr.rel (!%p1861_p11) target bundleno = 92 (0x5c), region = 85  ;;  %s531_s0 = sand.u32 (%p1861_p11), 1, %s1697_s16  }
  0x56   : > { %s1450_s27 = sshll.u32 (%p1861_p11), %s1729_s24, 4  ;;  %s1364_s10 = sshll.u32 (%p1861_p11), %s531_s0, 5 }
  0x57   : > { %s539_s30 = scalar_lea.vmem (%p1861_p11), %s2173_s3, %s1450_s27  ;;  %s533_s9 = scalar_lea.vmem (%p1861_p11), [#allocation5], %s1364_s10 }
  0x58   : > { %v552_v4 = vld [vmem:[%s539_s30] sm:$0xff] (%p1861_p11)  ;;  %v554_v5 = vld [vmem:[%s539_s30 + $0x8] sm:$0xff] (%p1861_p11) }
  0x59   : > { %v556_v6 = vld [vmem:[%s539_s30 + $0x20] sm:$0xff] (%p1861_p11)  ;;  %553 = vst [vmem:[%s533_s9] sm:$0xff] (%p1861_p11), %v552_v4  ;;  %555 = vst [vmem:[%s533_s9 + $0x8] sm:$0xff] (%p1861_p11), %v554_v5  ;;  %v558_v7 = vld [vmem:[%s539_s30 + $0x28] sm:$0xff] (%p1861_p11) }
  0x5a   : > { %557 = vst [vmem:[%s533_s9 + $0x10] sm:$0xff] (%p1861_p11), %v556_v6  ;;  %559 = vst [vmem:[%s533_s9 + $0x18] sm:$0xff] (%p1861_p11), %v558_v7 }
  0x5c PF: > { %p1367_p1 = scmp.ge.s32.totalorder %s1733_s25, 1  ;;  %p564_p2 = scmp.lt.s32.totalorder %s1733_s25, 19 }
  0x5e   : > { %p565_p3 = pnand %p1367_p1, %p564_p2 }
  0x5f   : > { %s571_s7 = sand.u32 (!%p565_p3), 1, %s1709_s19   ;;  %s578_s14 = sand.u32 (!%p565_p3), 1, %s1701_s17  }
  0x60   : > { %568 = sbr.rel (%p565_p3) target bundleno = 418 (0x1a2), region = 108  ;;  %s1368_s6 = sshll.u32 (!%p565_p3), %s571_s7, 5 }
  0x61   : > { %s1369_s11 = sshll.u32 (!%p565_p3), %s578_s14, 9  ;;  %s585_s8 = sand.u32 (!%p565_p3), 1, %s1693_s15  }
  0x62   : > { %s1372_s28 = sshll.u32 (!%p565_p3), %s1721_s22, 1  ;;  %s1370_s0 = sshll.u32 (!%p565_p3), %s585_s8, 5 }
  0x63   : > { %p626_p4 = scmp.lt.s32.totalorder (!%p565_p3), %s1372_s28, 3  ;;  %s2036_s5 = scalar_lea.vmem (!%p565_p3), [#allocation3], %s1368_s6 }
  0x64   : > { %s2038_s30 = scalar_lea.vmem (!%p565_p3), [#allocation4], %s1369_s11  ;;  %s2040_s9 = scalar_lea.vmem (!%p565_p3), [#allocation5], %s1370_s0 }
  0x65   : > { %s2042_s17 = scalar_lea.vmem (!%p565_p3), [#allocation6], %s1370_s0  ;;  %p1373_p5 = scmp.ne.s32.totalorder (!%p565_p3), %s1717_s21, 0 }
  0x67   : > { %s2206_s28 = smov (!%p626_p4, %s1372_s28), 3  ;;  %637 = sbr.rel (%p1373_p5) target bundleno = 110 (0x6e), region = 124 }
  0x68   : > { %s628_s26 = scalar_lea.vmem %s2172_s2, %s2206_s28  ;;  %v1735_v8 = vmov (!%p1373_p5), 0.0  }
  0x69   : > { %638 = vst [vmem:[#allocation2] sm:$0xff] (!%p1373_p5), %v1735_v8  ;;  %639 = vst [vmem:[#allocation2 + $0x8] sm:$0xff] (!%p1373_p5), %v1735_v8 }
  0x6a   : > { %640 = vst [vmem:[#allocation2 + $0x10] sm:$0xff] (!%p1373_p5), %v1735_v8  ;;  %641 = vst [vmem:[#allocation2 + $0x18] sm:$0xff] (!%p1373_p5), %v1735_v8 }
  0x6e PF: > { %v1545_v9 = vld [vmem:[%s2038_s30 + $0x4] ss:$8 sps:$4 sm:$0xff]   ;;  %v1549_v11 = vld [vmem:[%s2038_s30] ss:$8 sps:$4 sm:$0xff]   ;;  %v1551_v13 = vld [vmem:[%s2038_s30 + $0x14] ss:$8 sps:$4 sm:$0xff]  }
  0x6f   : > { %v1547_v10 = vld [vmem:[%s2038_s30 + $0x104] ss:$8 sps:$4 sm:$0xff]   ;;  %1054 = vmatprep.subr.bf16.mxu1 %v1545_v9  ;;  %v1550_v12 = vld [vmem:[%s2038_s30 + $0x100] ss:$8 sps:$4 sm:$0xff]   ;;  %v1553_v14 = vld [vmem:[%s2038_s30 + $0x114] ss:$8 sps:$4 sm:$0xff]  }
  0x70   : > { %1097 = vmatprep.subr.bf16.mxu0 %v1547_v10  ;;  %1055 = vmatpush1.bf16.msra.mxu1 %v1549_v11  ;;  %v1555_v15 = vld [vmem:[%s2038_s30 + $0x10] ss:$8 sps:$4 sm:$0xff]   ;;  %v1557_v17 = vld [vmem:[%s2038_s30 + $0x24] ss:$8 sps:$4 sm:$0xff]   ;;  %v1561_v19 = vld [vmem:[%s2038_s30 + $0x20] ss:$8 sps:$4 sm:$0xff]  }
  0x71   : > { %1098 = vmatpush1.bf16.msra.mxu0 %v1550_v12  ;;  %1056 = vmatprep.subr.bf16.mxu1 %v1551_v13  ;;  %v1556_v16 = vld [vmem:[%s2038_s30 + $0x110] ss:$8 sps:$4 sm:$0xff]   ;;  %v1559_v18 = vld [vmem:[%s2038_s30 + $0x124] ss:$8 sps:$4 sm:$0xff]   ;;  %v1562_v20 = vld [vmem:[%s2038_s30 + $0x120] ss:$8 sps:$4 sm:$0xff]  }
  0x72   : > { %1099 = vmatprep.subr.bf16.mxu0 %v1553_v14  ;;  %v1563_v21 = vld [vmem:[%s2038_s30 + $0x34] ss:$8 sps:$4 sm:$0xff]   ;;  %v1567_v23 = vld [vmem:[%s2038_s30 + $0x30] ss:$8 sps:$4 sm:$0xff]   ;;  %v1569_v25 = vld [vmem:[%s2038_s30 + $0x44] ss:$8 sps:$4 sm:$0xff]  }
  0x73   : > { %v1565_v22 = vld [vmem:[%s2038_s30 + $0x134] ss:$8 sps:$4 sm:$0xff]   ;;  %v1568_v24 = vld [vmem:[%s2038_s30 + $0x130] ss:$8 sps:$4 sm:$0xff]   ;;  %v1571_v26 = vld [vmem:[%s2038_s30 + $0x144] ss:$8 sps:$4 sm:$0xff]  }
  0x74   : > { %1057 = vmatpush1.bf16.msra.mxu1 %v1555_v15  ;;  %v1573_v27 = vld [vmem:[%s2038_s30 + $0x40] ss:$8 sps:$4 sm:$0xff]   ;;  %v1575_v29 = vld [vmem:[%s2038_s30 + $0x54] ss:$8 sps:$4 sm:$0xff]   ;;  %v1579_v31 = vld [vmem:[%s2038_s30 + $0x50] ss:$8 sps:$4 sm:$0xff]  }
  0x75   : > { %1100 = vmatpush1.bf16.msra.mxu0 %v1556_v16  ;;  %1058 = vmatprep.subr.bf16.mxu1 %v1557_v17  ;;  %v1574_v28 = vld [vmem:[%s2038_s30 + $0x140] ss:$8 sps:$4 sm:$0xff]   ;;  %v1577_v30 = vld [vmem:[%s2038_s30 + $0x154] ss:$8 sps:$4 sm:$0xff]   ;;  %v1580_v32 = vld [vmem:[%s2038_s30 + $0x150] ss:$8 sps:$4 sm:$0xff]  }
  0x76   : > { %1101 = vmatprep.subr.bf16.mxu0 %v1559_v18  ;;  %v1581_v33 = vld [vmem:[%s2038_s30 + $0x64] ss:$8 sps:$4 sm:$0xff]   ;;  %v1585_v35 = vld [vmem:[%s2038_s30 + $0x60] ss:$8 sps:$4 sm:$0xff]   ;;  %v1587_v37 = vld [vmem:[%s2038_s30 + $0x74] ss:$8 sps:$4 sm:$0xff]  }
  0x77   : > { %v1583_v34 = vld [vmem:[%s2038_s30 + $0x164] ss:$8 sps:$4 sm:$0xff]   ;;  %v1586_v36 = vld [vmem:[%s2038_s30 + $0x160] ss:$8 sps:$4 sm:$0xff]   ;;  %v1589_v38 = vld [vmem:[%s2038_s30 + $0x174] ss:$8 sps:$4 sm:$0xff]  }
  0x78   : > { %1059 = vmatpush1.bf16.msra.mxu1 %v1561_v19  ;;  %v1591_v39 = vld [vmem:[%s2038_s30 + $0x70] ss:$8 sps:$4 sm:$0xff]   ;;  %v1593_v41 = vld [vmem:[%s2038_s30 + $0x84] ss:$8 sps:$4 sm:$0xff]   ;;  %v1597_v43 = vld [vmem:[%s2038_s30 + $0x80] ss:$8 sps:$4 sm:$0xff]  }
  0x79   : > { %1102 = vmatpush1.bf16.msra.mxu0 %v1562_v20  ;;  %1060 = vmatprep.subr.bf16.mxu1 %v1563_v21  ;;  %v1592_v40 = vld [vmem:[%s2038_s30 + $0x170] ss:$8 sps:$4 sm:$0xff]   ;;  %v1595_v42 = vld [vmem:[%s2038_s30 + $0x184] ss:$8 sps:$4 sm:$0xff]   ;;  %v1598_v44 = vld [vmem:[%s2038_s30 + $0x180] ss:$8 sps:$4 sm:$0xff]  }
  0x7a   : > { %1103 = vmatprep.subr.bf16.mxu0 %v1565_v22  ;;  %v1599_v45 = vld [vmem:[%s2038_s30 + $0x94] ss:$8 sps:$4 sm:$0xff]   ;;  %v1603_v47 = vld [vmem:[%s2038_s30 + $0x90] ss:$8 sps:$4 sm:$0xff]   ;;  %v1605_v49 = vld [vmem:[%s2038_s30 + $0xa4] ss:$8 sps:$4 sm:$0xff]  }
  0x7b   : > { %v1601_v46 = vld [vmem:[%s2038_s30 + $0x194] ss:$8 sps:$4 sm:$0xff]   ;;  %v1604_v48 = vld [vmem:[%s2038_s30 + $0x190] ss:$8 sps:$4 sm:$0xff]   ;;  %v1607_v50 = vld [vmem:[%s2038_s30 + $0x1a4] ss:$8 sps:$4 sm:$0xff]  }
  0x7c   : > { %1061 = vmatpush1.bf16.msra.mxu1 %v1567_v23  ;;  %v1609_v51 = vld [vmem:[%s2038_s30 + $0xa0] ss:$8 sps:$4 sm:$0xff]   ;;  %v1611_v53 = vld [vmem:[%s2038_s30 + $0xb4] ss:$8 sps:$4 sm:$0xff]   ;;  %v1615_v55 = vld [vmem:[%s2038_s30 + $0xb0] ss:$8 sps:$4 sm:$0xff]  }
  0x7d   : > { %1104 = vmatpush1.bf16.msra.mxu0 %v1568_v24  ;;  %1062 = vmatprep.subr.bf16.mxu1 %v1569_v25  ;;  %v1610_v52 = vld [vmem:[%s2038_s30 + $0x1a0] ss:$8 sps:$4 sm:$0xff]   ;;  %v1613_v54 = vld [vmem:[%s2038_s30 + $0x1b4] ss:$8 sps:$4 sm:$0xff]   ;;  %v1616_v57 = vld [vmem:[%s2038_s30 + $0x1b0] ss:$8 sps:$4 sm:$0xff]  }
  0x7e   : > { %1105 = vmatprep.subr.bf16.mxu0 %v1571_v26  ;;  %v1643_v56 = vld [vmem:[%s2036_s5 + $0x4] ss:$16 sps:$4 sm:$0xff]   ;;  %v1646_v60 = vld [vmem:[%s2036_s5 + $0xc] ss:$16 sps:$4 sm:$0xff]   ;;  %v1621_v61 = vld [vmem:[%s2038_s30 + $0xc0] ss:$8 sps:$4 sm:$0xff]  }
  0x7f   : > { %v1617_v58 = vld [vmem:[%s2038_s30 + $0xc4] ss:$8 sps:$4 sm:$0xff]   ;;  %1086 = vmatprep.mubr.bf16.mxu1 %v1643_v56  ;;  %1129 = vmatprep.mubr.bf16.mxu0 %v1646_v60  ;;  %v1622_v62 = vld [vmem:[%s2038_s30 + $0x1c0] ss:$8 sps:$4 sm:$0xff]   ;;  %v1623_v63 = vld [vmem:[%s2038_s30 + $0xd4] ss:$8 sps:$4 sm:$0xff]  }
  0x80   : > { %1063 = vmatpush1.bf16.msra.mxu1 %v1573_v27  ;;  %v1619_v59 = vld [vmem:[%s2038_s30 + $0x1c4] ss:$8 sps:$4 sm:$0xff]   ;;  %v1625_v0 = vld [vmem:[%s2038_s30 + $0x1d4] ss:$8 sps:$4 sm:$0xff]   ;;  %v1627_v1 = vld [vmem:[%s2038_s30 + $0xd0] ss:$8 sps:$4 sm:$0xff]  }
  0x81   : > { %1106 = vmatpush1.bf16.msra.mxu0 %v1574_v28  ;;  %1064 = vmatprep.subr.bf16.mxu1 %v1575_v29  ;;  %v1628_v2 = vld [vmem:[%s2038_s30 + $0x1d0] ss:$8 sps:$4 sm:$0xff]   ;;  %v1629_v3 = vld [vmem:[%s2038_s30 + $0xe4] ss:$8 sps:$4 sm:$0xff]   ;;  %v1633_v5 = vld [vmem:[%s2038_s30 + $0xe0] ss:$8 sps:$4 sm:$0xff]  }
  0x82   : > { %1107 = vmatprep.subr.bf16.mxu0 %v1577_v30  ;;  %v1631_v4 = vld [vmem:[%s2038_s30 + $0x1e4] ss:$8 sps:$4 sm:$0xff]   ;;  %v1634_v6 = vld [vmem:[%s2038_s30 + $0x1e0] ss:$8 sps:$4 sm:$0xff]   ;;  %v1635_v7 = vld [vmem:[%s2038_s30 + $0xf4] ss:$8 sps:$4 sm:$0xff]  }
  0x83   : > { %v1637_v8 = vld [vmem:[%s2038_s30 + $0x1f4] ss:$8 sps:$4 sm:$0xff]   ;;  %v1639_v9 = vld [vmem:[%s2038_s30 + $0xf0] ss:$8 sps:$4 sm:$0xff]   ;;  %v642_v14 = vld [vmem:[#allocation2] sm:$0xff]  ;;  %p1442_p6 = scmp.ne.s32.totalorder %s1717_s21, 8 }
  0x84   : > { %1065 = vmatpush1.bf16.msra.mxu1 %v1579_v31  ;;  %v1640_v10 = vld [vmem:[%s2038_s30 + $0x1f0] ss:$8 sps:$4 sm:$0xff]   ;;  %v643_v18 = vld [vmem:[#allocation2 + $0x8] sm:$0xff] }
  0x85   : > { %1108 = vmatpush1.bf16.msra.mxu0 %v1580_v32  ;;  %1066 = vmatprep.subr.bf16.mxu1 %v1581_v33  ;;  %v1641_v11 = vld [vmem:[%s2036_s5] ss:$16 sps:$4 sm:$0xff]   ;;  %v1644_v12 = vld [vmem:[%s2036_s5 + $0x8] ss:$16 sps:$4 sm:$0xff]   ;;  %v1158_v33 = vlaneseq (!%p1442_p6) }
  0x86   : > { %1109 = vmatprep.subr.bf16.mxu0 %v1583_v34  ;;  %v644_v22 = vld [vmem:[#allocation2 + $0x10] sm:$0xff]  ;;  %v645_v27 = vld [vmem:[#allocation2 + $0x18] sm:$0xff] }
  0x87   : > { %v1159_v34 = vshrl.u32 (!%p1442_p6), %v1158_v33, 7 }
  0x88   : > { %1067 = vmatpush1.bf16.msra.mxu1 %v1585_v35  ;;  %v1156_v35 = vld [vmem:[%s628_s26] sm:$0x3] (!%p1442_p6) }
  0x89   : > { %1110 = vmatpush1.bf16.msra.mxu0 %v1586_v36  ;;  %1068 = vmatprep.subr.bf16.mxu1 %v1587_v37  ;;  %v1160_v37 = vsub.s32 (!%p1442_p6), 0, %v1159_v34 }
  0x8a   : > { %1111 = vmatprep.subr.bf16.mxu0 %v1589_v38  ;;  %v1164_v38 = vsub.s32 (!%p1442_p6), 1, %v1159_v34 }
  0x8c   : > { %1069 = vmatpush1.bf16.msra.mxu1 %v1591_v39 }
  0x8d   : > { %1112 = vmatpush1.bf16.msra.mxu0 %v1592_v40  ;;  %1070 = vmatprep.subr.bf16.mxu1 %v1593_v41 }
  0x8e   : > { %1113 = vmatprep.subr.bf16.mxu0 %v1595_v42  ;;  %v1161_v42 = vrot.slane (!%p1442_p6), %v1156_v35, %v1160_v37 }
  0x90   : > { %1071 = vmatpush1.bf16.msra.mxu1 %v1597_v43  ;;  %v1172_v43 = vld [vmem:[%s2040_s9] sm:$0xff] (!%p1442_p6) }
  0x91   : > { %1114 = vmatpush1.bf16.msra.mxu0 %v1598_v44  ;;  %1072 = vmatprep.subr.bf16.mxu1 %v1599_v45  ;;  %v1165_v44 = vrot.slane (!%p1442_p6), %v1156_v35, %v1164_v38  ;;  %v1173_v45 = vld [vmem:[%s2040_s9 + $0x8] sm:$0xff] (!%p1442_p6) }
  0x92   : > { %1115 = vmatprep.subr.bf16.mxu0 %v1601_v46  ;;  %v1174_v46 = vld [vmem:[%s2040_s9 + $0x10] sm:$0xff] (!%p1442_p6) }
  0x94   : > { %1073 = vmatpush1.bf16.msra.mxu1 %v1603_v47  ;;  %v1175_v47 = vld [vmem:[%s2040_s9 + $0x18] sm:$0xff] (!%p1442_p6) }
  0x95   : > { %1116 = vmatpush1.bf16.msra.mxu0 %v1604_v48  ;;  %1074 = vmatprep.subr.bf16.mxu1 %v1605_v49 }
  0x96   : > { %1117 = vmatprep.subr.bf16.mxu0 %v1607_v50 }
  0x98   : > { %1075 = vmatpush1.bf16.msra.mxu1 %v1609_v51 }
  0x99   : > { %1118 = vmatpush1.bf16.msra.mxu0 %v1610_v52  ;;  %1076 = vmatprep.subr.bf16.mxu1 %v1611_v53 }
  0x9a   : > { %1119 = vmatprep.subr.bf16.mxu0 %v1613_v54 }
  0x9c   : > { %1077 = vmatpush1.bf16.msra.mxu1 %v1615_v55 }
  0x9d   : > { %1120 = vmatpush1.bf16.msra.mxu0 %v1616_v57  ;;  %1078 = vmatprep.subr.bf16.mxu1 %v1617_v58 }
  0x9e   : > { %1121 = vmatprep.subr.bf16.mxu0 %v1619_v59 }
  0xa0   : > { %1079 = vmatpush1.bf16.msra.mxu1 %v1621_v61 }
  0xa1   : > { %1122 = vmatpush1.bf16.msra.mxu0 %v1622_v62  ;;  %1080 = vmatprep.subr.bf16.mxu1 %v1623_v63 }
  0xa2   : > { %1123 = vmatprep.subr.bf16.mxu0 %v1625_v0 }
  0xa4   : > { %1081 = vmatpush1.bf16.msra.mxu1 %v1627_v1 }
  0xa5   : > { %1124 = vmatpush1.bf16.msra.mxu0 %v1628_v2  ;;  %1082 = vmatprep.subr.bf16.mxu1 %v1629_v3 }
  0xa6   : > { %1125 = vmatprep.subr.bf16.mxu0 %v1631_v4 }
  0xa8   : > { %1083 = vmatpush1.bf16.msra.mxu1 %v1633_v5 }
  0xa9   : > { %1126 = vmatpush1.bf16.msra.mxu0 %v1634_v6  ;;  %1084 = vmatprep.subr.bf16.mxu1 %v1635_v7 }
  0xaa   : > { %1127 = vmatprep.subr.bf16.mxu0 %v1637_v8 }
  0xac   : > { %1085 = vmatpush1.bf16.msra.mxu1 %v1639_v9 }
  0xad   : > { %1128 = vmatpush1.bf16.msra.mxu0 %v1640_v10 }
  0xaf   : > { %1087 = vmatmul.mubr.bf16.vlgmr.msra.gmra.mrb[0].mxu1 %v1641_v11 }
  0xb0   : > { %1130 = vmatmul.mubr.bf16.vlgmr.msra.gmra.mrb[0].mxu0 %v1644_v12 }
 0x182   : > { %v1088_v13 = vpop.f32.mrb[0].mxu1 }
 0x183   : > { %v1131_v15 = vpop.f32.mrb[0].mxu0  ;;  %v1090_v17 = vpop.f32.mrb[1].mxu1 }
 0x184   : > { %v1132_v16 = vadd.f32 %v1131_v15, %v1088_v13  ;;  %v1133_v19 = vpop.f32.mrb[1].mxu0  ;;  %v1092_v21 = vpop.f32.mrb[2].mxu1 }
 0x185   : > { %v1134_v20 = vadd.f32 %v1133_v19, %v1090_v17  ;;  %v1135_v23 = vpop.f32.mrb[2].mxu0  ;;  %v1094_v26 = vpop.f32.mrb[3].mxu1  ;;  %1151 = sbr.rel (%p1442_p6) target bundleno = 410 (0x19a), region = 128 }
 0x186   : > { %v1140_v24 = vadd.f32 %v1132_v16, %v642_v14  ;;  %v1136_v25 = vadd.f32 %v1135_v23, %v1092_v21  ;;  %v1137_v28 = vpop.f32.mrb[3].mxu0 }
 0x187   : > { %v1141_v29 = vadd.f32 %v1134_v20, %v643_v18  ;;  %v1138_v30 = vadd.f32 %v1137_v28, %v1094_v26 }
 0x188   : > { %1144 = vst [vmem:[#allocation2] sm:$0xff] %v1140_v24  ;;  %v1142_v31 = vadd.f32 %v1136_v25, %v644_v22 }
 0x189   : > { %1145 = vst [vmem:[#allocation2 + $0x8] sm:$0xff] %v1141_v29  ;;  %v1143_v32 = vadd.f32 %v1138_v30, %v645_v27 }
 0x18a   : > { %1146 = vst [vmem:[#allocation2 + $0x10] sm:$0xff] %v1142_v31 }
 0x18b   : > { %1147 = vst [vmem:[#allocation2 + $0x18] sm:$0xff] %v1143_v32 }
 0x18f   : > { %v1152_v36 = vld [vmem:[#allocation2] sm:$0xff] }
 0x190   : > { %v1153_v39 = vld [vmem:[#allocation2 + $0x8] sm:$0xff]  ;;  %v1168_v48 = vadd.f32 %v1161_v42, %v1152_v36 }
 0x191   : > { %v1154_v40 = vld [vmem:[#allocation2 + $0x10] sm:$0xff]  ;;  %v1169_v49 = vadd.f32 %v1165_v44, %v1153_v39 }
 0x192   : > { %v1155_v41 = vld [vmem:[#allocation2 + $0x18] sm:$0xff]  ;;  %v1170_v50 = vadd.f32 %v1161_v42, %v1154_v40  ;;  %v1176_v52 = vadd.f32 %v1172_v43, %v1168_v48 }
 0x193   : > { %v1171_v51 = vadd.f32 %v1165_v44, %v1155_v41  ;;  %v1177_v53 = vadd.f32 %v1173_v45, %v1169_v49 }
 0x194   : > { %v1178_v54 = vadd.f32 %v1174_v46, %v1170_v50  ;;  %v1180_v56 = vmax.f32 %v1176_v52, 0.0 }
 0x195   : > { %v1179_v55 = vadd.f32 %v1175_v47, %v1171_v51  ;;  %v1181_v57 = vmax.f32 %v1177_v53, 0.0 }
 0x196   : > { %v1182_v58 = vmax.f32 %v1178_v54, 0.0  ;;  %1184 = vst [vmem:[%s2042_s17] sm:$0xff] %v1180_v56 }
 0x197   : > { %v1183_v59 = vmax.f32 %v1179_v55, 0.0  ;;  %1185 = vst [vmem:[%s2042_s17 + $0x8] sm:$0xff] %v1181_v57 }
 0x198   : > { %1186 = vst [vmem:[%s2042_s17 + $0x10] sm:$0xff] %v1182_v58 }
 0x199   : > { %1187 = vst [vmem:[%s2042_s17 + $0x18] sm:$0xff] %v1183_v59 }
 0x19a PF: > { %1194 = sbr.rel (!%p1865_p13) target bundleno = 418 (0x1a2), region = 132  ;;  %s1451_s21 = sshll.u32 (%p1865_p13), %s1721_s22, 4 }
 0x19b   : > { %s1200_s6 = scalar_lea.vmem (%p1865_p13), %s2174_s4, %s1451_s21 }
 0x19d   : > { %v1213_v60 = vld [vmem:[%s2042_s17] sm:$0xff] (%p1865_p13) }
 0x19e   : > { %v1215_v61 = vld [vmem:[%s2042_s17 + $0x8] sm:$0xff] (%p1865_p13)  ;;  %1214 = vst [vmem:[%s1200_s6] sm:$0xff] (%p1865_p13), %v1213_v60 }
 0x19f   : > { %v1217_v62 = vld [vmem:[%s2042_s17 + $0x10] sm:$0xff] (%p1865_p13)  ;;  %1216 = vst [vmem:[%s1200_s6 + $0x8] sm:$0xff] (%p1865_p13), %v1215_v61 }
 0x1a0   : > { %v1219_v63 = vld [vmem:[%s2042_s17 + $0x18] sm:$0xff] (%p1865_p13)  ;;  %1218 = vst [vmem:[%s1200_s6 + $0x20] sm:$0xff] (%p1865_p13), %v1217_v62 }
 0x1a1   : > { %1220 = vst [vmem:[%s1200_s6 + $0x28] sm:$0xff] %v1219_v63 }
 0x1a2 PF: > { %s14_s25 = sadd.s32 1, %s1733_s25   ;;  %s2186_s22 = sld [smem:[#allocation9_spill]] }
 0x1a3   : > { %p11_p7 = scmp.ge.s32.totalorder %s14_s25, 20   ;;  %s2187_s29 = sld [smem:[#allocation7_spill]] }
 0x1a4   : > { %s2188_s11 = sld [smem:[#allocation8_spill]]  ;;  %s2189_s15 = smov %s1697_s16 }
 0x1a5   : > { %s2190_s16 = smov %s1857_s13  ;;  %s2191_s17 = smov %s1705_s18 }
 0x1a6   : > { %s2192_s18 = smov %s1854_s12  ;;  %s2193_s19 = smov %s1713_s20 }
 0x1a7   : > { %s2195_s21 = smov %s1725_s23  ;;  %13 = sbr.rel (!%p11_p7) target bundleno = 8 (0x8), region = 205 }
 0x1a8   : > { %s2194_s20 = smov %s2186_s22  ;;  %s2196_s22 = smov %s1729_s24 }
 0x1a9   : > { %s2197_s23 = smov %s2187_s29 }
 0x1aa   : > { %s2198_s24 = smov %s2188_s11 }

// kernel: resnet18_forward.41
= control target key start
LH: loop header
LB: loop body
LE: loop exit
PB: predicated region body
PF: predicated region fallthrough
CT: control target
= control target key end

     0   :  { %s2028_s0 = inlined_call_operand.vmem [shape: bf16[16,4608], index: 0, kind: input, shape index: {}]   ;;  %s2029_s1 = inlined_call_operand.vmem [shape: bf16[4608,512], index: 1, kind: input, shape index: {}]   ;;  %s2030_s2 = inlined_call_operand.vmem [shape: f32[1,512], index: 2, kind: input, shape index: {}]   ;;  %s2031_s3 = inlined_call_operand.vmem [shape: f32[16,512], index: 3, kind: output, shape index: {}]  }
   0x1   :  { %2033 = sst [smem:[#allocation7_spill]] %s2028_s0 }
   0x2   :  { %2034 = sst [smem:[#allocation8_spill]] %s2029_s1 }
   0x3   :  { %s1642_s12 = smov 0   ;;  %s1644_s13 = smov 0  }
   0x4   :  { %s1646_s14 = smov 0   ;;  %s1648_s15 = smov 0  }
   0x5   :  { %s1650_s16 = smov 0   ;;  %s1652_s17 = smov 0  }
   0x6   :  { %s1654_s18 = smov 0   ;;  %s1656_s19 = smov 0  }
   0x7   :  { %s1658_s20 = smov 0   ;;  %s1660_s21 = smov 0  }
   0x8   :  { %s1662_s22 = smov 0  }
   0x9 LB: > { %s1243_s23 = sadd.s32 4294967295, %s1619_s22   ;;  %s25_s24 = sadd.s32 1, %s1611_s20  ;;  %s1619_s22 = sphi %s1662_s22, %s13_s22   ;;  %s1615_s21 = sphi %s1660_s21, %s2051_s21   ;;  %s1611_s20 = sphi %s1658_s20, %s2050_s20   ;;  %s1607_s19 = sphi %s1656_s19, %s2049_s19   ;;  %s1603_s18 = sphi %s1654_s18, %s2048_s18   ;;  %s1599_s17 = sphi %s1652_s17, %s2047_s17   ;;  %s1595_s16 = sphi %s1650_s16, %s2046_s16   ;;  %s1591_s15 = sphi %s1648_s15, %s2045_s15   ;;  %s1587_s14 = sphi %s1646_s14, %s2044_s14   ;;  %s1583_s13 = sphi %s1644_s13, %s2043_s13   ;;  %s1579_s12 = sphi %s1642_s12, %s2042_s12  }
   0xa   : > { %p26_p0 = scmp.ge.s32.totalorder %s25_s24, 9  ;;  %s28_s25 = sadd.s32 1, %s1615_s21 }
   0xb   : > { %s41_s26 = sadd.s32 1, %s1599_s17  ;;  %p48_p1 = scmp.ne.s32.totalorder %s1599_s17, %s1595_s16 }
   0xc   : > { %s2053_s24 = smov (%p26_p0, %s25_s24), 0  ;;  %s2055_s25 = smov (!%p26_p0, %s28_s25), %s1615_s21 }
   0xd   : > { %s37_s27 = ssub.s32 %s1611_s20, %s2053_s24  ;;  %p49_p2 = scmp.eq.s32.totalorder %s1619_s22, 0 }
   0xe   : > { %p30_p3 = scmp.ge.s32.totalorder %s2055_s25, 2  ;;  %p39_p4 = scmp.eq.s32.totalorder %s37_s27, 0 }
   0xf   : > { %p1709_p5 = por %p49_p2, %p48_p1  ;;  %s69_s29 = sadd.s32 1, %s1591_s15 }
  0x10   : > { %s2057_s25 = smov (%p30_p3, %s2055_s25), 0  ;;  %p76_p6 = scmp.ne.s32.totalorder %s1591_s15, %s1587_s14 }
  0x11   : > { %2036 = sst [smem:[#allocation6_spill]] %s2057_s25  ;;  %s65_s4 = ssub.s32 %s1615_s21, %s2057_s25 }
  0x12   : > { %s1717_s30 = scalar_select %p39_p4, %s1599_s17, %s41_s26  }
  0x13   : > { %s66_s5 = sor.u32 %s65_s4, %s37_s27  ;;  %p121_p7 = scmp.eq.s32.totalorder %s65_s4, 0 }
  0x14   : > { %p67_p8 = scmp.eq.s32.totalorder %s66_s5, 0  ;;  %p1723_p9 = por %p76_p6, %p49_p2 }
  0x15   : > { %s123_s7 = sadd.s32 1, %s1583_s13  ;;  %p133_p10 = scmp.ne.s32.totalorder %s1583_s13, %s1579_s12 }
  0x16   : > { %s1731_s8 = scalar_select %p67_p8, %s1591_s15, %s69_s29  }
  0x17   : > { %s1734_s9 = scalar_select %p121_p7, %s1583_s13, %s123_s7  }
  0x18   : > { %p134_p11 = scmp.eq.s32.totalorder %s1243_s23, 17  ;;  %p1246_p13 = scmp.ge.s32.totalorder %s1619_s22, 18 }
  0x1a   : > { %p1736_p12 = por %p134_p11, %p133_p10  ;;  %156 = sbr.rel (%p1246_p13) target bundleno = 87 (0x57), region = 16 }
  0x21   : > { %159 = sbr.rel (!%p1709_p5) target bundleno = 45 (0x2d), region = 20  ;;  %s161_s11 = sand.u32 (%p1709_p5), 1, %s1599_s17  }
  0x22   : > { %s1335_s26 = sshll.u32 (%p1709_p5), %s1611_s20, 4  ;;  %s1247_s27 = sshll.u32 (%p1709_p5), %s161_s11, 5 }
  0x23   : > { %s2039_s0 = sld [smem:[#allocation7_spill]] (%p1709_p5)  ;;  %s163_s23 = scalar_lea.vmem (%p1709_p5), [#allocation3], %s1247_s27 }
  0x29   : > { %s169_s5 = scalar_lea.vmem %s2039_s0, %s1335_s26 }
  0x2a   : > { %v182_v0 = vld [vmem:[%s169_s5] sm:$0xff]  ;;  %v184_v1 = vld [vmem:[%s169_s5 + $0x8] sm:$0xff]  ;;  %v186_v2 = vld [vmem:[%s169_s5 + $0x90] sm:$0xff] }
  0x2b   : > { %183 = vst [vmem:[%s163_s23] sm:$0xff] %v182_v0  ;;  %185 = vst [vmem:[%s163_s23 + $0x8] sm:$0xff] %v184_v1  ;;  %v188_v3 = vld [vmem:[%s169_s5 + $0x98] sm:$0xff] }
  0x2c   : > { %187 = vst [vmem:[%s163_s23 + $0x10] sm:$0xff] %v186_v2  ;;  %189 = vst [vmem:[%s163_s23 + $0x18] sm:$0xff] %v188_v3 }
  0x2d PF: > { %195 = sbr.rel (!%p1723_p9) target bundleno = 87 (0x57), region = 43  ;;  %s197_s28 = sand.u32 (%p1723_p9), 1, %s1591_s15  }
  0x2e   : > { %s1252_s7 = sshll.u32 (%p1723_p9), %s1615_s21, 1  ;;  %s1250_s11 = sshll.u32 (%p1723_p9), %s197_s28, 9 }
  0x2f   : > { %s1336_s26 = sshll.u32 (%p1723_p9), %s1611_s20, 8  ;;  %s2040_s1 = sld [smem:[#allocation8_spill]] (%p1723_p9) }
  0x30   : > { %s203_s29 = sadd.s32 (%p1723_p9), %s1336_s26, %s1252_s7  ;;  %s1761_s6 = scalar_lea.vmem (%p1723_p9), [#allocation4], %s1250_s11 }
  0x31   : > { %s1254_s4 = sshll.u32 (%p1723_p9), %s203_s29, 2 }
  0x35   : > { %s1756_s25 = scalar_lea.vmem %s2040_s1, %s1254_s4 }
  0x36   : > { %v359_v4 = vld [vmem:[%s1756_s25] sm:$0xff]  ;;  %v361_v5 = vld [vmem:[%s1756_s25 + $0x10] sm:$0xff] }
  0x37   : > { %v363_v6 = vld [vmem:[%s1756_s25 + $0x20] sm:$0xff]  ;;  %360 = vst [vmem:[%s1761_s6] sm:$0xff] %v359_v4  ;;  %362 = vst [vmem:[%s1761_s6 + $0x8] sm:$0xff] %v361_v5  ;;  %v365_v7 = vld [vmem:[%s1756_s25 + $0x30] sm:$0xff] }
  0x38   : > { %364 = vst [vmem:[%s1761_s6 + $0x10] sm:$0xff] %v363_v6  ;;  %v367_v8 = vld [vmem:[%s1756_s25 + $0x40] sm:$0xff]  ;;  %v369_v9 = vld [vmem:[%s1756_s25 + $0x50] sm:$0xff]  ;;  %366 = vst [vmem:[%s1761_s6 + $0x18] sm:$0xff] %v365_v7 }
  0x39   : > { %368 = vst [vmem:[%s1761_s6 + $0x20] sm:$0xff] %v367_v8  ;;  %370 = vst [vmem:[%s1761_s6 + $0x28] sm:$0xff] %v369_v9  ;;  %v371_v10 = vld [vmem:[%s1756_s25 + $0x60] sm:$0xff]  ;;  %v373_v11 = vld [vmem:[%s1756_s25 + $0x70] sm:$0xff] }
  0x3a   : > { %v375_v12 = vld [vmem:[%s1756_s25 + $0x80] sm:$0xff]  ;;  %372 = vst [vmem:[%s1761_s6 + $0x30] sm:$0xff] %v371_v10  ;;  %374 = vst [vmem:[%s1761_s6 + $0x38] sm:$0xff] %v373_v11  ;;  %v377_v13 = vld [vmem:[%s1756_s25 + $0x90] sm:$0xff] }
  0x3b   : > { %376 = vst [vmem:[%s1761_s6 + $0x40] sm:$0xff] %v375_v12  ;;  %v379_v14 = vld [vmem:[%s1756_s25 + $0xa0] sm:$0xff]  ;;  %v381_v15 = vld [vmem:[%s1756_s25 + $0xb0] sm:$0xff]  ;;  %378 = vst [vmem:[%s1761_s6 + $0x48] sm:$0xff] %v377_v13 }
  0x3c   : > { %380 = vst [vmem:[%s1761_s6 + $0x50] sm:$0xff] %v379_v14  ;;  %382 = vst [vmem:[%s1761_s6 + $0x58] sm:$0xff] %v381_v15  ;;  %v383_v16 = vld [vmem:[%s1756_s25 + $0xc0] sm:$0xff]  ;;  %v385_v17 = vld [vmem:[%s1756_s25 + $0xd0] sm:$0xff] }
  0x3d   : > { %v387_v18 = vld [vmem:[%s1756_s25 + $0xe0] sm:$0xff]  ;;  %384 = vst [vmem:[%s1761_s6 + $0x60] sm:$0xff] %v383_v16  ;;  %386 = vst [vmem:[%s1761_s6 + $0x68] sm:$0xff] %v385_v17  ;;  %v389_v19 = vld [vmem:[%s1756_s25 + $0xf0] sm:$0xff] }
  0x3e   : > { %388 = vst [vmem:[%s1761_s6 + $0x70] sm:$0xff] %v387_v18  ;;  %v391_v20 = vld [vmem:[%s1756_s25 + $0x100] sm:$0xff]  ;;  %v393_v21 = vld [vmem:[%s1756_s25 + $0x110] sm:$0xff]  ;;  %390 = vst [vmem:[%s1761_s6 + $0x78] sm:$0xff] %v389_v19 }
  0x3f   : > { %392 = vst [vmem:[%s1761_s6 + $0x80] sm:$0xff] %v391_v20  ;;  %394 = vst [vmem:[%s1761_s6 + $0x88] sm:$0xff] %v393_v21  ;;  %v395_v22 = vld [vmem:[%s1756_s25 + $0x120] sm:$0xff]  ;;  %v397_v23 = vld [vmem:[%s1756_s25 + $0x130] sm:$0xff] }
  0x40   : > { %v399_v24 = vld [vmem:[%s1756_s25 + $0x140] sm:$0xff]  ;;  %396 = vst [vmem:[%s1761_s6 + $0x90] sm:$0xff] %v395_v22  ;;  %398 = vst [vmem:[%s1761_s6 + $0x98] sm:$0xff] %v397_v23  ;;  %v401_v25 = vld [vmem:[%s1756_s25 + $0x150] sm:$0xff] }
  0x41   : > { %400 = vst [vmem:[%s1761_s6 + $0xa0] sm:$0xff] %v399_v24  ;;  %v403_v26 = vld [vmem:[%s1756_s25 + $0x160] sm:$0xff]  ;;  %v405_v27 = vld [vmem:[%s1756_s25 + $0x170] sm:$0xff]  ;;  %402 = vst [vmem:[%s1761_s6 + $0xa8] sm:$0xff] %v401_v25 }
  0x42   : > { %404 = vst [vmem:[%s1761_s6 + $0xb0] sm:$0xff] %v403_v26  ;;  %406 = vst [vmem:[%s1761_s6 + $0xb8] sm:$0xff] %v405_v27  ;;  %v407_v28 = vld [vmem:[%s1756_s25 + $0x180] sm:$0xff]  ;;  %v409_v29 = vld [vmem:[%s1756_s25 + $0x190] sm:$0xff] }
  0x43   : > { %v411_v30 = vld [vmem:[%s1756_s25 + $0x1a0] sm:$0xff]  ;;  %408 = vst [vmem:[%s1761_s6 + $0xc0] sm:$0xff] %v407_v28  ;;  %410 = vst [vmem:[%s1761_s6 + $0xc8] sm:$0xff] %v409_v29  ;;  %v413_v31 = vld [vmem:[%s1756_s25 + $0x1b0] sm:$0xff] }
  0x44   : > { %412 = vst [vmem:[%s1761_s6 + $0xd0] sm:$0xff] %v411_v30  ;;  %v415_v32 = vld [vmem:[%s1756_s25 + $0x1c0] sm:$0xff]  ;;  %v417_v33 = vld [vmem:[%s1756_s25 + $0x1d0] sm:$0xff]  ;;  %414 = vst [vmem:[%s1761_s6 + $0xd8] sm:$0xff] %v413_v31 }
  0x45   : > { %416 = vst [vmem:[%s1761_s6 + $0xe0] sm:$0xff] %v415_v32  ;;  %418 = vst [vmem:[%s1761_s6 + $0xe8] sm:$0xff] %v417_v33  ;;  %v419_v34 = vld [vmem:[%s1756_s25 + $0x1e0] sm:$0xff]  ;;  %v421_v35 = vld [vmem:[%s1756_s25 + $0x1f0] sm:$0xff] }
  0x46   : > { %v423_v36 = vld [vmem:[%s1756_s25 + $0x200] sm:$0xff]  ;;  %420 = vst [vmem:[%s1761_s6 + $0xf0] sm:$0xff] %v419_v34  ;;  %422 = vst [vmem:[%s1761_s6 + $0xf8] sm:$0xff] %v421_v35  ;;  %v425_v37 = vld [vmem:[%s1756_s25 + $0x210] sm:$0xff] }
  0x47   : > { %424 = vst [vmem:[%s1761_s6 + $0x100] sm:$0xff] %v423_v36  ;;  %v427_v38 = vld [vmem:[%s1756_s25 + $0x220] sm:$0xff]  ;;  %v429_v39 = vld [vmem:[%s1756_s25 + $0x230] sm:$0xff]  ;;  %426 = vst [vmem:[%s1761_s6 + $0x108] sm:$0xff] %v425_v37 }
  0x48   : > { %428 = vst [vmem:[%s1761_s6 + $0x110] sm:$0xff] %v427_v38  ;;  %430 = vst [vmem:[%s1761_s6 + $0x118] sm:$0xff] %v429_v39  ;;  %v431_v40 = vld [vmem:[%s1756_s25 + $0x240] sm:$0xff]  ;;  %v433_v41 = vld [vmem:[%s1756_s25 + $0x250] sm:$0xff] }
  0x49   : > { %v435_v42 = vld [vmem:[%s1756_s25 + $0x260] sm:$0xff]  ;;  %432 = vst [vmem:[%s1761_s6 + $0x120] sm:$0xff] %v431_v40  ;;  %434 = vst [vmem:[%s1761_s6 + $0x128] sm:$0xff] %v433_v41  ;;  %v437_v43 = vld [vmem:[%s1756_s25 + $0x270] sm:$0xff] }
  0x4a   : > { %436 = vst [vmem:[%s1761_s6 + $0x130] sm:$0xff] %v435_v42  ;;  %v439_v44 = vld [vmem:[%s1756_s25 + $0x280] sm:$0xff]  ;;  %v441_v45 = vld [vmem:[%s1756_s25 + $0x290] sm:$0xff]  ;;  %438 = vst [vmem:[%s1761_s6 + $0x138] sm:$0xff] %v437_v43 }
  0x4b   : > { %440 = vst [vmem:[%s1761_s6 + $0x140] sm:$0xff] %v439_v44  ;;  %442 = vst [vmem:[%s1761_s6 + $0x148] sm:$0xff] %v441_v45  ;;  %v443_v46 = vld [vmem:[%s1756_s25 + $0x2a0] sm:$0xff]  ;;  %v445_v47 = vld [vmem:[%s1756_s25 + $0x2b0] sm:$0xff] }
  0x4c   : > { %v447_v48 = vld [vmem:[%s1756_s25 + $0x2c0] sm:$0xff]  ;;  %444 = vst [vmem:[%s1761_s6 + $0x150] sm:$0xff] %v443_v46  ;;  %446 = vst [vmem:[%s1761_s6 + $0x158] sm:$0xff] %v445_v47  ;;  %v449_v49 = vld [vmem:[%s1756_s25 + $0x2d0] sm:$0xff] }
  0x4d   : > { %448 = vst [vmem:[%s1761_s6 + $0x160] sm:$0xff] %v447_v48  ;;  %v451_v50 = vld [vmem:[%s1756_s25 + $0x2e0] sm:$0xff]  ;;  %v453_v51 = vld [vmem:[%s1756_s25 + $0x2f0] sm:$0xff]  ;;  %450 = vst [vmem:[%s1761_s6 + $0x168] sm:$0xff] %v449_v49 }
  0x4e   : > { %452 = vst [vmem:[%s1761_s6 + $0x170] sm:$0xff] %v451_v50  ;;  %454 = vst [vmem:[%s1761_s6 + $0x178] sm:$0xff] %v453_v51  ;;  %v455_v52 = vld [vmem:[%s1756_s25 + $0x300] sm:$0xff]  ;;  %v457_v53 = vld [vmem:[%s1756_s25 + $0x310] sm:$0xff] }
  0x4f   : > { %v459_v54 = vld [vmem:[%s1756_s25 + $0x320] sm:$0xff]  ;;  %456 = vst [vmem:[%s1761_s6 + $0x180] sm:$0xff] %v455_v52  ;;  %458 = vst [vmem:[%s1761_s6 + $0x188] sm:$0xff] %v457_v53  ;;  %v461_v55 = vld [vmem:[%s1756_s25 + $0x330] sm:$0xff] }
  0x50   : > { %460 = vst [vmem:[%s1761_s6 + $0x190] sm:$0xff] %v459_v54  ;;  %v463_v56 = vld [vmem:[%s1756_s25 + $0x340] sm:$0xff]  ;;  %v465_v57 = vld [vmem:[%s1756_s25 + $0x350] sm:$0xff]  ;;  %462 = vst [vmem:[%s1761_s6 + $0x198] sm:$0xff] %v461_v55 }
  0x51   : > { %464 = vst [vmem:[%s1761_s6 + $0x1a0] sm:$0xff] %v463_v56  ;;  %466 = vst [vmem:[%s1761_s6 + $0x1a8] sm:$0xff] %v465_v57  ;;  %v467_v58 = vld [vmem:[%s1756_s25 + $0x360] sm:$0xff]  ;;  %v469_v59 = vld [vmem:[%s1756_s25 + $0x370] sm:$0xff] }
  0x52   : > { %v471_v60 = vld [vmem:[%s1756_s25 + $0x380] sm:$0xff]  ;;  %468 = vst [vmem:[%s1761_s6 + $0x1b0] sm:$0xff] %v467_v58  ;;  %470 = vst [vmem:[%s1761_s6 + $0x1b8] sm:$0xff] %v469_v59  ;;  %v473_v61 = vld [vmem:[%s1756_s25 + $0x390] sm:$0xff] }
  0x53   : > { %472 = vst [vmem:[%s1761_s6 + $0x1c0] sm:$0xff] %v471_v60  ;;  %v475_v62 = vld [vmem:[%s1756_s25 + $0x3a0] sm:$0xff]  ;;  %v477_v63 = vld [vmem:[%s1756_s25 + $0x3b0] sm:$0xff]  ;;  %474 = vst [vmem:[%s1761_s6 + $0x1c8] sm:$0xff] %v473_v61 }
  0x54   : > { %476 = vst [vmem:[%s1761_s6 + $0x1d0] sm:$0xff] %v475_v62  ;;  %478 = vst [vmem:[%s1761_s6 + $0x1d8] sm:$0xff] %v477_v63  ;;  %v479_v0 = vld [vmem:[%s1756_s25 + $0x3c0] sm:$0xff]  ;;  %v481_v1 = vld [vmem:[%s1756_s25 + $0x3d0] sm:$0xff] }
  0x55   : > { %v483_v2 = vld [vmem:[%s1756_s25 + $0x3e0] sm:$0xff]  ;;  %480 = vst [vmem:[%s1761_s6 + $0x1e0] sm:$0xff] %v479_v0  ;;  %482 = vst [vmem:[%s1761_s6 + $0x1e8] sm:$0xff] %v481_v1  ;;  %v485_v3 = vld [vmem:[%s1756_s25 + $0x3f0] sm:$0xff] }
  0x56   : > { %484 = vst [vmem:[%s1761_s6 + $0x1f0] sm:$0xff] %v483_v2  ;;  %486 = vst [vmem:[%s1761_s6 + $0x1f8] sm:$0xff] %v485_v3 }
  0x57 PF: > { %p1255_p0 = scmp.ge.s32.totalorder %s1619_s22, 1  ;;  %p499_p1 = scmp.lt.s32.totalorder %s1619_s22, 19 }
  0x59   : > { %p500_p2 = pnand %p1255_p0, %p499_p1 }
  0x5a   : > { %s506_s0 = sand.u32 (!%p500_p2), 1, %s1595_s16   ;;  %s513_s5 = sand.u32 (!%p500_p2), 1, %s1587_s14  }
  0x5b   : > { %503 = sbr.rel (%p500_p2) target bundleno = 411 (0x19b), region = 85  ;;  %s1256_s23 = sshll.u32 (!%p500_p2), %s506_s0, 5 }
  0x5c   : > { %s1257_s28 = sshll.u32 (!%p500_p2), %s513_s5, 9  ;;  %s540_s7 = sand.u32 (!%p500_p2), 1, %s1579_s12  }
  0x5d   : > { %s1259_s11 = sshll.u32 (!%p500_p2), %s1607_s19, 1  ;;  %s1258_s25 = sshll.u32 (!%p500_p2), %s540_s7, 5 }
  0x5e   : > { %p548_p3 = scmp.lt.s32.totalorder (!%p500_p2), %s1259_s11, 3  ;;  %s1900_s27 = scalar_lea.vmem (!%p500_p2), [#allocation3], %s1256_s23 }
  0x5f   : > { %s1902_s6 = scalar_lea.vmem (!%p500_p2), [#allocation4], %s1257_s28  ;;  %s1904_s1 = scalar_lea.vmem (!%p500_p2), [#allocation5], %s1258_s25 }
  0x60   : > { %p1260_p4 = scmp.ne.s32.totalorder (!%p500_p2), %s1603_s18, 0 }
  0x62   : > { %s2059_s11 = smov (!%p548_p3, %s1259_s11), 3  ;;  %557 = sbr.rel (%p1260_p4) target bundleno = 105 (0x69), region = 97 }
  0x63   : > { %s550_s4 = scalar_lea.vmem %s2030_s2, %s2059_s11  ;;  %v1621_v4 = vmov (!%p1260_p4), 0.0  }
  0x64   : > { %558 = vst [vmem:[#allocation2] sm:$0xff] (!%p1260_p4), %v1621_v4  ;;  %559 = vst [vmem:[#allocation2 + $0x8] sm:$0xff] (!%p1260_p4), %v1621_v4 }
  0x65   : > { %560 = vst [vmem:[#allocation2 + $0x10] sm:$0xff] (!%p1260_p4), %v1621_v4  ;;  %561 = vst [vmem:[#allocation2 + $0x18] sm:$0xff] (!%p1260_p4), %v1621_v4 }
  0x69 PF: > { %v1431_v5 = vld [vmem:[%s1902_s6 + $0x4] ss:$8 sps:$4 sm:$0xff]   ;;  %v1435_v7 = vld [vmem:[%s1902_s6] ss:$8 sps:$4 sm:$0xff]   ;;  %v1437_v9 = vld [vmem:[%s1902_s6 + $0x14] ss:$8 sps:$4 sm:$0xff]  }
  0x6a   : > { %v1433_v6 = vld [vmem:[%s1902_s6 + $0x104] ss:$8 sps:$4 sm:$0xff]   ;;  %974 = vmatprep.subr.bf16.mxu1 %v1431_v5  ;;  %v1436_v8 = vld [vmem:[%s1902_s6 + $0x100] ss:$8 sps:$4 sm:$0xff]   ;;  %v1439_v10 = vld [vmem:[%s1902_s6 + $0x114] ss:$8 sps:$4 sm:$0xff]  }
  0x6b   : > { %1017 = vmatprep.subr.bf16.mxu0 %v1433_v6  ;;  %975 = vmatpush1.bf16.msra.mxu1 %v1435_v7  ;;  %v1441_v11 = vld [vmem:[%s1902_s6 + $0x10] ss:$8 sps:$4 sm:$0xff]   ;;  %v1443_v13 = vld [vmem:[%s1902_s6 + $0x24] ss:$8 sps:$4 sm:$0xff]   ;;  %v1447_v15 = vld [vmem:[%s1902_s6 + $0x20] ss:$8 sps:$4 sm:$0xff]  }
  0x6c   : > { %1018 = vmatpush1.bf16.msra.mxu0 %v1436_v8  ;;  %976 = vmatprep.subr.bf16.mxu1 %v1437_v9  ;;  %v1442_v12 = vld [vmem:[%s1902_s6 + $0x110] ss:$8 sps:$4 sm:$0xff]   ;;  %v1445_v14 = vld [vmem:[%s1902_s6 + $0x124] ss:$8 sps:$4 sm:$0xff]   ;;  %v1448_v16 = vld [vmem:[%s1902_s6 + $0x120] ss:$8 sps:$4 sm:$0xff]  }
  0x6d   : > { %1019 = vmatprep.subr.bf16.mxu0 %v1439_v10  ;;  %v1449_v17 = vld [vmem:[%s1902_s6 + $0x34] ss:$8 sps:$4 sm:$0xff]   ;;  %v1453_v19 = vld [vmem:[%s1902_s6 + $0x30] ss:$8 sps:$4 sm:$0xff]   ;;  %v1455_v21 = vld [vmem:[%s1902_s6 + $0x44] ss:$8 sps:$4 sm:$0xff]  }
  0x6e   : > { %v1451_v18 = vld [vmem:[%s1902_s6 + $0x134] ss:$8 sps:$4 sm:$0xff]   ;;  %v1454_v20 = vld [vmem:[%s1902_s6 + $0x130] ss:$8 sps:$4 sm:$0xff]   ;;  %v1457_v22 = vld [vmem:[%s1902_s6 + $0x144] ss:$8 sps:$4 sm:$0xff]  }
  0x6f   : > { %977 = vmatpush1.bf16.msra.mxu1 %v1441_v11  ;;  %v1459_v23 = vld [vmem:[%s1902_s6 + $0x40] ss:$8 sps:$4 sm:$0xff]   ;;  %v1461_v25 = vld [vmem:[%s1902_s6 + $0x54] ss:$8 sps:$4 sm:$0xff]   ;;  %v1465_v27 = vld [vmem:[%s1902_s6 + $0x50] ss:$8 sps:$4 sm:$0xff]  }
  0x70   : > { %1020 = vmatpush1.bf16.msra.mxu0 %v1442_v12  ;;  %978 = vmatprep.subr.bf16.mxu1 %v1443_v13  ;;  %v1460_v24 = vld [vmem:[%s1902_s6 + $0x140] ss:$8 sps:$4 sm:$0xff]   ;;  %v1463_v26 = vld [vmem:[%s1902_s6 + $0x154] ss:$8 sps:$4 sm:$0xff]   ;;  %v1466_v28 = vld [vmem:[%s1902_s6 + $0x150] ss:$8 sps:$4 sm:$0xff]  }
  0x71   : > { %1021 = vmatprep.subr.bf16.mxu0 %v1445_v14  ;;  %v1467_v29 = vld [vmem:[%s1902_s6 + $0x64] ss:$8 sps:$4 sm:$0xff]   ;;  %v1471_v31 = vld [vmem:[%s1902_s6 + $0x60] ss:$8 sps:$4 sm:$0xff]   ;;  %v1473_v33 = vld [vmem:[%s1902_s6 + $0x74] ss:$8 sps:$4 sm:$0xff]  }
  0x72   : > { %v1469_v30 = vld [vmem:[%s1902_s6 + $0x164] ss:$8 sps:$4 sm:$0xff]   ;;  %v1472_v32 = vld [vmem:[%s1902_s6 + $0x160] ss:$8 sps:$4 sm:$0xff]   ;;  %v1475_v34 = vld [vmem:[%s1902_s6 + $0x174] ss:$8 sps:$4 sm:$0xff]  }
  0x73   : > { %979 = vmatpush1.bf16.msra.mxu1 %v1447_v15  ;;  %v1477_v35 = vld [vmem:[%s1902_s6 + $0x70] ss:$8 sps:$4 sm:$0xff]   ;;  %v1479_v37 = vld [vmem:[%s1902_s6 + $0x84] ss:$8 sps:$4 sm:$0xff]   ;;  %v1483_v39 = vld [vmem:[%s1902_s6 + $0x80] ss:$8 sps:$4 sm:$0xff]  }
  0x74   : > { %1022 = vmatpush1.bf16.msra.mxu0 %v1448_v16  ;;  %980 = vmatprep.subr.bf16.mxu1 %v1449_v17  ;;  %v1478_v36 = vld [vmem:[%s1902_s6 + $0x170] ss:$8 sps:$4 sm:$0xff]   ;;  %v1481_v38 = vld [vmem:[%s1902_s6 + $0x184] ss:$8 sps:$4 sm:$0xff]   ;;  %v1484_v40 = vld [vmem:[%s1902_s6 + $0x180] ss:$8 sps:$4 sm:$0xff]  }
  0x75   : > { %1023 = vmatprep.subr.bf16.mxu0 %v1451_v18  ;;  %v1485_v41 = vld [vmem:[%s1902_s6 + $0x94] ss:$8 sps:$4 sm:$0xff]   ;;  %v1489_v43 = vld [vmem:[%s1902_s6 + $0x90] ss:$8 sps:$4 sm:$0xff]   ;;  %v1491_v45 = vld [vmem:[%s1902_s6 + $0xa4] ss:$8 sps:$4 sm:$0xff]  }
  0x76   : > { %v1487_v42 = vld [vmem:[%s1902_s6 + $0x194] ss:$8 sps:$4 sm:$0xff]   ;;  %v1490_v44 = vld [vmem:[%s1902_s6 + $0x190] ss:$8 sps:$4 sm:$0xff]   ;;  %v1493_v46 = vld [vmem:[%s1902_s6 + $0x1a4] ss:$8 sps:$4 sm:$0xff]  }
  0x77   : > { %981 = vmatpush1.bf16.msra.mxu1 %v1453_v19  ;;  %v1495_v47 = vld [vmem:[%s1902_s6 + $0xa0] ss:$8 sps:$4 sm:$0xff]   ;;  %v1497_v49 = vld [vmem:[%s1902_s6 + $0xb4] ss:$8 sps:$4 sm:$0xff]   ;;  %v1501_v51 = vld [vmem:[%s1902_s6 + $0xb0] ss:$8 sps:$4 sm:$0xff]  }
  0x78   : > { %1024 = vmatpush1.bf16.msra.mxu0 %v1454_v20  ;;  %982 = vmatprep.subr.bf16.mxu1 %v1455_v21  ;;  %v1496_v48 = vld [vmem:[%s1902_s6 + $0x1a0] ss:$8 sps:$4 sm:$0xff]   ;;  %v1499_v50 = vld [vmem:[%s1902_s6 + $0x1b4] ss:$8 sps:$4 sm:$0xff]   ;;  %v1502_v53 = vld [vmem:[%s1902_s6 + $0x1b0] ss:$8 sps:$4 sm:$0xff]  }
  0x79   : > { %1025 = vmatprep.subr.bf16.mxu0 %v1457_v22  ;;  %v1529_v52 = vld [vmem:[%s1900_s27 + $0x4] ss:$16 sps:$4 sm:$0xff]   ;;  %v1532_v56 = vld [vmem:[%s1900_s27 + $0xc] ss:$16 sps:$4 sm:$0xff]   ;;  %v1507_v57 = vld [vmem:[%s1902_s6 + $0xc0] ss:$8 sps:$4 sm:$0xff]  }
  0x7a   : > { %v1503_v54 = vld [vmem:[%s1902_s6 + $0xc4] ss:$8 sps:$4 sm:$0xff]   ;;  %1006 = vmatprep.mubr.bf16.mxu1 %v1529_v52  ;;  %1049 = vmatprep.mubr.bf16.mxu0 %v1532_v56  ;;  %v1508_v58 = vld [vmem:[%s1902_s6 + $0x1c0] ss:$8 sps:$4 sm:$0xff]   ;;  %v1509_v59 = vld [vmem:[%s1902_s6 + $0xd4] ss:$8 sps:$4 sm:$0xff]  }
  0x7b   : > { %983 = vmatpush1.bf16.msra.mxu1 %v1459_v23  ;;  %v1505_v55 = vld [vmem:[%s1902_s6 + $0x1c4] ss:$8 sps:$4 sm:$0xff]   ;;  %v1511_v60 = vld [vmem:[%s1902_s6 + $0x1d4] ss:$8 sps:$4 sm:$0xff]   ;;  %v1513_v61 = vld [vmem:[%s1902_s6 + $0xd0] ss:$8 sps:$4 sm:$0xff]  }
  0x7c   : > { %1026 = vmatpush1.bf16.msra.mxu0 %v1460_v24  ;;  %984 = vmatprep.subr.bf16.mxu1 %v1461_v25  ;;  %v1514_v62 = vld [vmem:[%s1902_s6 + $0x1d0] ss:$8 sps:$4 sm:$0xff]   ;;  %v1515_v63 = vld [vmem:[%s1902_s6 + $0xe4] ss:$8 sps:$4 sm:$0xff]   ;;  %v1519_v1 = vld [vmem:[%s1902_s6 + $0xe0] ss:$8 sps:$4 sm:$0xff]  }
  0x7d   : > { %1027 = vmatprep.subr.bf16.mxu0 %v1463_v26  ;;  %v1517_v0 = vld [vmem:[%s1902_s6 + $0x1e4] ss:$8 sps:$4 sm:$0xff]   ;;  %v1520_v2 = vld [vmem:[%s1902_s6 + $0x1e0] ss:$8 sps:$4 sm:$0xff]   ;;  %v1521_v3 = vld [vmem:[%s1902_s6 + $0xf4] ss:$8 sps:$4 sm:$0xff]  }
  0x7e   : > { %v1523_v4 = vld [vmem:[%s1902_s6 + $0x1f4] ss:$8 sps:$4 sm:$0xff]   ;;  %v1525_v5 = vld [vmem:[%s1902_s6 + $0xf0] ss:$8 sps:$4 sm:$0xff]   ;;  %v562_v10 = vld [vmem:[#allocation2] sm:$0xff]  ;;  %p1329_p5 = scmp.ne.s32.totalorder %s1603_s18, 8 }
  0x7f   : > { %985 = vmatpush1.bf16.msra.mxu1 %v1465_v27  ;;  %v1526_v6 = vld [vmem:[%s1902_s6 + $0x1f0] ss:$8 sps:$4 sm:$0xff]   ;;  %v563_v14 = vld [vmem:[#allocation2 + $0x8] sm:$0xff] }
  0x80   : > { %1028 = vmatpush1.bf16.msra.mxu0 %v1466_v28  ;;  %986 = vmatprep.subr.bf16.mxu1 %v1467_v29  ;;  %v1527_v7 = vld [vmem:[%s1900_s27] ss:$16 sps:$4 sm:$0xff]   ;;  %v1530_v8 = vld [vmem:[%s1900_s27 + $0x8] ss:$16 sps:$4 sm:$0xff]   ;;  %v1078_v29 = vlaneseq (!%p1329_p5) }
  0x81   : > { %1029 = vmatprep.subr.bf16.mxu0 %v1469_v30  ;;  %v564_v18 = vld [vmem:[#allocation2 + $0x10] sm:$0xff]  ;;  %v565_v23 = vld [vmem:[#allocation2 + $0x18] sm:$0xff] }
  0x82   : > { %v1079_v30 = vshrl.u32 (!%p1329_p5), %v1078_v29, 7 }
  0x83   : > { %987 = vmatpush1.bf16.msra.mxu1 %v1471_v31  ;;  %v1076_v31 = vld [vmem:[%s550_s4] sm:$0x3] (!%p1329_p5) }
  0x84   : > { %1030 = vmatpush1.bf16.msra.mxu0 %v1472_v32  ;;  %988 = vmatprep.subr.bf16.mxu1 %v1473_v33  ;;  %v1080_v33 = vsub.s32 (!%p1329_p5), 0, %v1079_v30 }
  0x85   : > { %1031 = vmatprep.subr.bf16.mxu0 %v1475_v34  ;;  %v1084_v34 = vsub.s32 (!%p1329_p5), 1, %v1079_v30 }
  0x87   : > { %989 = vmatpush1.bf16.msra.mxu1 %v1477_v35 }
  0x88   : > { %1032 = vmatpush1.bf16.msra.mxu0 %v1478_v36  ;;  %990 = vmatprep.subr.bf16.mxu1 %v1479_v37 }
  0x89   : > { %1033 = vmatprep.subr.bf16.mxu0 %v1481_v38  ;;  %v1081_v38 = vrot.slane (!%p1329_p5), %v1076_v31, %v1080_v33 }
  0x8b   : > { %991 = vmatpush1.bf16.msra.mxu1 %v1483_v39  ;;  %v1085_v39 = vrot.slane (!%p1329_p5), %v1076_v31, %v1084_v34 }
  0x8c   : > { %1034 = vmatpush1.bf16.msra.mxu0 %v1484_v40  ;;  %992 = vmatprep.subr.bf16.mxu1 %v1485_v41 }
  0x8d   : > { %1035 = vmatprep.subr.bf16.mxu0 %v1487_v42 }
  0x8f   : > { %993 = vmatpush1.bf16.msra.mxu1 %v1489_v43 }
  0x90   : > { %1036 = vmatpush1.bf16.msra.mxu0 %v1490_v44  ;;  %994 = vmatprep.subr.bf16.mxu1 %v1491_v45 }
  0x91   : > { %1037 = vmatprep.subr.bf16.mxu0 %v1493_v46 }
  0x93   : > { %995 = vmatpush1.bf16.msra.mxu1 %v1495_v47 }
  0x94   : > { %1038 = vmatpush1.bf16.msra.mxu0 %v1496_v48  ;;  %996 = vmatprep.subr.bf16.mxu1 %v1497_v49 }
  0x95   : > { %1039 = vmatprep.subr.bf16.mxu0 %v1499_v50 }
  0x97   : > { %997 = vmatpush1.bf16.msra.mxu1 %v1501_v51 }
  0x98   : > { %1040 = vmatpush1.bf16.msra.mxu0 %v1502_v53  ;;  %998 = vmatprep.subr.bf16.mxu1 %v1503_v54 }
  0x99   : > { %1041 = vmatprep.subr.bf16.mxu0 %v1505_v55 }
  0x9b   : > { %999 = vmatpush1.bf16.msra.mxu1 %v1507_v57 }
  0x9c   : > { %1042 = vmatpush1.bf16.msra.mxu0 %v1508_v58  ;;  %1000 = vmatprep.subr.bf16.mxu1 %v1509_v59 }
  0x9d   : > { %1043 = vmatprep.subr.bf16.mxu0 %v1511_v60 }
  0x9f   : > { %1001 = vmatpush1.bf16.msra.mxu1 %v1513_v61 }
  0xa0   : > { %1044 = vmatpush1.bf16.msra.mxu0 %v1514_v62  ;;  %1002 = vmatprep.subr.bf16.mxu1 %v1515_v63 }
  0xa1   : > { %1045 = vmatprep.subr.bf16.mxu0 %v1517_v0 }
  0xa3   : > { %1003 = vmatpush1.bf16.msra.mxu1 %v1519_v1 }
  0xa4   : > { %1046 = vmatpush1.bf16.msra.mxu0 %v1520_v2  ;;  %1004 = vmatprep.subr.bf16.mxu1 %v1521_v3 }
  0xa5   : > { %1047 = vmatprep.subr.bf16.mxu0 %v1523_v4 }
  0xa7   : > { %1005 = vmatpush1.bf16.msra.mxu1 %v1525_v5 }
  0xa8   : > { %1048 = vmatpush1.bf16.msra.mxu0 %v1526_v6 }
  0xaa   : > { %1007 = vmatmul.mubr.bf16.vlgmr.msra.gmra.mrb[0].mxu1 %v1527_v7 }
  0xab   : > { %1050 = vmatmul.mubr.bf16.vlgmr.msra.gmra.mrb[0].mxu0 %v1530_v8 }
 0x17d   : > { %v1008_v9 = vpop.f32.mrb[0].mxu1 }
 0x17e   : > { %v1051_v11 = vpop.f32.mrb[0].mxu0  ;;  %v1010_v13 = vpop.f32.mrb[1].mxu1 }
 0x17f   : > { %v1052_v12 = vadd.f32 %v1051_v11, %v1008_v9  ;;  %v1053_v15 = vpop.f32.mrb[1].mxu0  ;;  %v1012_v17 = vpop.f32.mrb[2].mxu1 }
 0x180   : > { %v1054_v16 = vadd.f32 %v1053_v15, %v1010_v13  ;;  %v1055_v19 = vpop.f32.mrb[2].mxu0  ;;  %v1014_v22 = vpop.f32.mrb[3].mxu1  ;;  %1071 = sbr.rel (%p1329_p5) target bundleno = 403 (0x193), region = 101 }
 0x181   : > { %v1060_v20 = vadd.f32 %v1052_v12, %v562_v10  ;;  %v1056_v21 = vadd.f32 %v1055_v19, %v1012_v17  ;;  %v1057_v24 = vpop.f32.mrb[3].mxu0 }
 0x182   : > { %v1061_v25 = vadd.f32 %v1054_v16, %v563_v14  ;;  %v1058_v26 = vadd.f32 %v1057_v24, %v1014_v22 }
 0x183   : > { %1064 = vst [vmem:[#allocation2] sm:$0xff] %v1060_v20  ;;  %v1062_v27 = vadd.f32 %v1056_v21, %v564_v18 }
 0x184   : > { %1065 = vst [vmem:[#allocation2 + $0x8] sm:$0xff] %v1061_v25  ;;  %v1063_v28 = vadd.f32 %v1058_v26, %v565_v23 }
 0x185   : > { %1066 = vst [vmem:[#allocation2 + $0x10] sm:$0xff] %v1062_v27 }
 0x186   : > { %1067 = vst [vmem:[#allocation2 + $0x18] sm:$0xff] %v1063_v28 }
 0x18a   : > { %v1072_v32 = vld [vmem:[#allocation2] sm:$0xff] }
 0x18b   : > { %v1073_v35 = vld [vmem:[#allocation2 + $0x8] sm:$0xff]  ;;  %v1088_v40 = vadd.f32 %v1081_v38, %v1072_v32 }
 0x18c   : > { %v1074_v36 = vld [vmem:[#allocation2 + $0x10] sm:$0xff]  ;;  %v1089_v41 = vadd.f32 %v1085_v39, %v1073_v35 }
 0x18d   : > { %v1075_v37 = vld [vmem:[#allocation2 + $0x18] sm:$0xff]  ;;  %v1090_v42 = vadd.f32 %v1081_v38, %v1074_v36  ;;  %v1092_v44 = vmax.f32 %v1088_v40, 0.0 }
 0x18e   : > { %v1091_v43 = vadd.f32 %v1085_v39, %v1075_v37  ;;  %v1093_v45 = vmax.f32 %v1089_v41, 0.0 }
 0x18f   : > { %v1094_v46 = vmax.f32 %v1090_v42, 0.0  ;;  %1096 = vst [vmem:[%s1904_s1] sm:$0xff] %v1092_v44 }
 0x190   : > { %v1095_v47 = vmax.f32 %v1091_v43, 0.0  ;;  %1097 = vst [vmem:[%s1904_s1 + $0x8] sm:$0xff] %v1093_v45 }
 0x191   : > { %1098 = vst [vmem:[%s1904_s1 + $0x10] sm:$0xff] %v1094_v46 }
 0x192   : > { %1099 = vst [vmem:[%s1904_s1 + $0x18] sm:$0xff] %v1095_v47 }
 0x193 PF: > { %1106 = sbr.rel (!%p1736_p12) target bundleno = 411 (0x19b), region = 105  ;;  %s1337_s16 = sshll.u32 (%p1736_p12), %s1607_s19, 4 }
 0x194   : > { %s1112_s5 = scalar_lea.vmem (%p1736_p12), %s2031_s3, %s1337_s16 }
 0x196   : > { %v1125_v48 = vld [vmem:[%s1904_s1] sm:$0xff] (%p1736_p12) }
 0x197   : > { %v1127_v49 = vld [vmem:[%s1904_s1 + $0x8] sm:$0xff] (%p1736_p12)  ;;  %1126 = vst [vmem:[%s1112_s5] sm:$0xff] (%p1736_p12), %v1125_v48 }
 0x198   : > { %v1129_v50 = vld [vmem:[%s1904_s1 + $0x10] sm:$0xff] (%p1736_p12)  ;;  %1128 = vst [vmem:[%s1112_s5 + $0x8] sm:$0xff] (%p1736_p12), %v1127_v49 }
 0x199   : > { %v1131_v51 = vld [vmem:[%s1904_s1 + $0x18] sm:$0xff] (%p1736_p12)  ;;  %1130 = vst [vmem:[%s1112_s5 + $0x20] sm:$0xff] (%p1736_p12), %v1129_v50 }
 0x19a   : > { %1132 = vst [vmem:[%s1112_s5 + $0x28] sm:$0xff] %v1131_v51 }
 0x19b PF: > { %s13_s22 = sadd.s32 1, %s1619_s22   ;;  %s2041_s10 = sld [smem:[#allocation6_spill]] }
 0x19c   : > { %p10_p6 = scmp.ge.s32.totalorder %s13_s22, 20   ;;  %s2042_s12 = smov %s1583_s13 }
 0x19d   : > { %s2043_s13 = smov %s1734_s9  ;;  %s2044_s14 = smov %s1591_s15 }
 0x19e   : > { %s2045_s15 = smov %s1731_s8  ;;  %s2046_s16 = smov %s1599_s17 }
 0x19f   : > { %s2047_s17 = smov %s1717_s30  ;;  %s2048_s18 = smov %s1611_s20 }
 0x1a0   : > { %s2049_s19 = smov %s1615_s21  ;;  %s2050_s20 = smov %s2053_s24 }
 0x1a1   : > { %s2051_s21 = smov %s2041_s10  ;;  %12 = sbr.rel (!%p10_p6) target bundleno = 9 (0x9), region = 170 }

// kernel: resnet18_forward.43
= control target key start
LH: loop header
LB: loop body
LE: loop exit
PB: predicated region body
PF: predicated region fallthrough
CT: control target
= control target key end

     0   :  { %s1516_s12 = smov 0   ;;  %s1518_s13 = smov 0   ;;  %s1806_s0 = inlined_call_operand.vmem [shape: bf16[16,512], index: 0, kind: input, shape index: {}]   ;;  %s1807_s1 = inlined_call_operand.vmem [shape: bf16[512,1024], index: 1, kind: input, shape index: {}]   ;;  %s1808_s2 = inlined_call_operand.vmem [shape: f32[1,1024], index: 2, kind: input, shape index: {}]   ;;  %s1809_s3 = inlined_call_operand.vmem [shape: f32[16,1024], index: 3, kind: output, shape index: {}]  }
   0x1   :  { %s1520_s14 = smov 0   ;;  %s1522_s15 = smov 0  }
   0x2   :  { %s1524_s16 = smov 0  }
   0x3 LB: > { %s28_s17 = sadd.s32 1, %s1490_s15  ;;  %s1223_s18 = sadd.s32 4294967295, %s1494_s16   ;;  %s1494_s16 = sphi %s1524_s16, %s13_s16   ;;  %s1490_s15 = sphi %s1522_s15, %s1814_s15   ;;  %s1486_s14 = sphi %s1520_s14, %s1813_s14   ;;  %s1482_s13 = sphi %s1518_s13, %s1812_s13   ;;  %s1478_s12 = sphi %s1516_s12, %s1811_s12  }
   0x4   : > { %p30_p0 = scmp.ge.s32.totalorder %s28_s17, 4  ;;  %p76_p1 = scmp.ne.s32.totalorder %s1482_s13, %s1478_s12 }
   0x5   : > { %p77_p2 = scmp.eq.s32.totalorder %s1494_s16, 0  ;;  %p134_p4 = scmp.eq.s32.totalorder %s1223_s18, 3 }
   0x6   : > { %s1816_s17 = smov (%p30_p0, %s28_s17), 0  ;;  %s69_s20 = sadd.s32 1, %s1482_s13 }
   0x7   : > { %p78_p3 = por %p77_p2, %p76_p1  ;;  %s65_s19 = ssub.s32 %s1490_s15, %s1816_s17 }
   0x8   : > { %p67_p5 = scmp.eq.s32.totalorder %s65_s19, 0  ;;  %p1551_p6 = por %p134_p4, %p76_p1 }
   0x9   : > { %p1227_p7 = scmp.ge.s32.totalorder %s1494_s16, 4 }
   0xa   : > { %s1556_s22 = scalar_select %p67_p5, %s1482_s13, %s69_s20  }
   0xb   : > { %171 = sbr.rel (%p1227_p7) target bundleno = 86 (0x56), region = 20 }
  0x12   : > { %174 = sbr.rel (!%p78_p3) target bundleno = 86 (0x56), region = 24  ;;  %s176_s23 = sand.u32 (%p78_p3), 1, %s1482_s13  }
  0x13   : > { %s1308_s24 = sshll.u32 (%p78_p3), %s1490_s15, 3  ;;  %s1228_s25 = sshll.u32 (%p78_p3), %s176_s23, 9 }
  0x14   : > { %s1564_s28 = scalar_lea.vmem (%p78_p3), %s1807_s1, %s1308_s24  ;;  %s1569_s29 = scalar_lea.vmem (%p78_p3), [#allocation3], %s1228_s25 }
  0x15   : > { %v338_v0 = vld [vmem:[%s1564_s28] sm:$0xff] (%p78_p3) }
  0x16   : > { %v340_v1 = vld [vmem:[%s1564_s28 + $0x20] sm:$0xff] (%p78_p3)  ;;  %339 = vst [vmem:[%s1569_s29] sm:$0xff] (%p78_p3), %v338_v0 }
  0x17   : > { %v342_v2 = vld [vmem:[%s1564_s28 + $0x40] sm:$0xff] (%p78_p3)  ;;  %341 = vst [vmem:[%s1569_s29 + $0x8] sm:$0xff] (%p78_p3), %v340_v1 }
  0x18   : > { %343 = vst [vmem:[%s1569_s29 + $0x10] sm:$0xff] (%p78_p3), %v342_v2  ;;  %v344_v3 = vld [vmem:[%s1564_s28 + $0x60] sm:$0xff] (%p78_p3) }
  0x19   : > { %v346_v4 = vld [vmem:[%s1564_s28 + $0x80] sm:$0xff]  ;;  %345 = vst [vmem:[%s1569_s29 + $0x18] sm:$0xff] %v344_v3 }
  0x1a   : > { %v348_v5 = vld [vmem:[%s1564_s28 + $0xa0] sm:$0xff]  ;;  %347 = vst [vmem:[%s1569_s29 + $0x20] sm:$0xff] %v346_v4 }
  0x1b   : > { %349 = vst [vmem:[%s1569_s29 + $0x28] sm:$0xff] %v348_v5  ;;  %v350_v6 = vld [vmem:[%s1564_s28 + $0xc0] sm:$0xff] }
  0x1c   : > { %v352_v7 = vld [vmem:[%s1564_s28 + $0xe0] sm:$0xff]  ;;  %351 = vst [vmem:[%s1569_s29 + $0x30] sm:$0xff] %v350_v6 }
  0x1d   : > { %v354_v8 = vld [vmem:[%s1564_s28 + $0x100] sm:$0xff]  ;;  %353 = vst [vmem:[%s1569_s29 + $0x38] sm:$0xff] %v352_v7 }
  0x1e   : > { %355 = vst [vmem:[%s1569_s29 + $0x40] sm:$0xff] %v354_v8  ;;  %v356_v9 = vld [vmem:[%s1564_s28 + $0x120] sm:$0xff] }
  0x1f   : > { %v358_v10 = vld [vmem:[%s1564_s28 + $0x140] sm:$0xff]  ;;  %357 = vst [vmem:[%s1569_s29 + $0x48] sm:$0xff] %v356_v9 }
  0x20   : > { %v360_v11 = vld [vmem:[%s1564_s28 + $0x160] sm:$0xff]  ;;  %359 = vst [vmem:[%s1569_s29 + $0x50] sm:$0xff] %v358_v10 }
  0x21   : > { %361 = vst [vmem:[%s1569_s29 + $0x58] sm:$0xff] %v360_v11  ;;  %v362_v12 = vld [vmem:[%s1564_s28 + $0x180] sm:$0xff] }
  0x22   : > { %v364_v13 = vld [vmem:[%s1564_s28 + $0x1a0] sm:$0xff]  ;;  %363 = vst [vmem:[%s1569_s29 + $0x60] sm:$0xff] %v362_v12 }
  0x23   : > { %v366_v14 = vld [vmem:[%s1564_s28 + $0x1c0] sm:$0xff]  ;;  %365 = vst [vmem:[%s1569_s29 + $0x68] sm:$0xff] %v364_v13 }
  0x24   : > { %367 = vst [vmem:[%s1569_s29 + $0x70] sm:$0xff] %v366_v14  ;;  %v368_v15 = vld [vmem:[%s1564_s28 + $0x1e0] sm:$0xff] }
  0x25   : > { %v370_v16 = vld [vmem:[%s1564_s28 + $0x200] sm:$0xff]  ;;  %369 = vst [vmem:[%s1569_s29 + $0x78] sm:$0xff] %v368_v15 }
  0x26   : > { %v372_v17 = vld [vmem:[%s1564_s28 + $0x220] sm:$0xff]  ;;  %371 = vst [vmem:[%s1569_s29 + $0x80] sm:$0xff] %v370_v16 }
  0x27   : > { %373 = vst [vmem:[%s1569_s29 + $0x88] sm:$0xff] %v372_v17  ;;  %v374_v18 = vld [vmem:[%s1564_s28 + $0x240] sm:$0xff] }
  0x28   : > { %v376_v19 = vld [vmem:[%s1564_s28 + $0x260] sm:$0xff]  ;;  %375 = vst [vmem:[%s1569_s29 + $0x90] sm:$0xff] %v374_v18 }
  0x29   : > { %v378_v20 = vld [vmem:[%s1564_s28 + $0x280] sm:$0xff]  ;;  %377 = vst [vmem:[%s1569_s29 + $0x98] sm:$0xff] %v376_v19 }
  0x2a   : > { %379 = vst [vmem:[%s1569_s29 + $0xa0] sm:$0xff] %v378_v20  ;;  %v380_v21 = vld [vmem:[%s1564_s28 + $0x2a0] sm:$0xff] }
  0x2b   : > { %v382_v22 = vld [vmem:[%s1564_s28 + $0x2c0] sm:$0xff]  ;;  %381 = vst [vmem:[%s1569_s29 + $0xa8] sm:$0xff] %v380_v21 }
  0x2c   : > { %v384_v23 = vld [vmem:[%s1564_s28 + $0x2e0] sm:$0xff]  ;;  %383 = vst [vmem:[%s1569_s29 + $0xb0] sm:$0xff] %v382_v22 }
  0x2d   : > { %385 = vst [vmem:[%s1569_s29 + $0xb8] sm:$0xff] %v384_v23  ;;  %v386_v24 = vld [vmem:[%s1564_s28 + $0x300] sm:$0xff] }
  0x2e   : > { %v388_v25 = vld [vmem:[%s1564_s28 + $0x320] sm:$0xff]  ;;  %387 = vst [vmem:[%s1569_s29 + $0xc0] sm:$0xff] %v386_v24 }
  0x2f   : > { %v390_v26 = vld [vmem:[%s1564_s28 + $0x340] sm:$0xff]  ;;  %389 = vst [vmem:[%s1569_s29 + $0xc8] sm:$0xff] %v388_v25 }
  0x30   : > { %391 = vst [vmem:[%s1569_s29 + $0xd0] sm:$0xff] %v390_v26  ;;  %v392_v27 = vld [vmem:[%s1564_s28 + $0x360] sm:$0xff] }
  0x31   : > { %v394_v28 = vld [vmem:[%s1564_s28 + $0x380] sm:$0xff]  ;;  %393 = vst [vmem:[%s1569_s29 + $0xd8] sm:$0xff] %v392_v27 }
  0x32   : > { %v396_v29 = vld [vmem:[%s1564_s28 + $0x3a0] sm:$0xff]  ;;  %395 = vst [vmem:[%s1569_s29 + $0xe0] sm:$0xff] %v394_v28 }
  0x33   : > { %397 = vst [vmem:[%s1569_s29 + $0xe8] sm:$0xff] %v396_v29  ;;  %v398_v30 = vld [vmem:[%s1564_s28 + $0x3c0] sm:$0xff] }
  0x34   : > { %v400_v31 = vld [vmem:[%s1564_s28 + $0x3e0] sm:$0xff]  ;;  %399 = vst [vmem:[%s1569_s29 + $0xf0] sm:$0xff] %v398_v30 }
  0x35   : > { %v402_v32 = vld [vmem:[%s1564_s28 + $0x400] sm:$0xff]  ;;  %401 = vst [vmem:[%s1569_s29 + $0xf8] sm:$0xff] %v400_v31 }
  0x36   : > { %403 = vst [vmem:[%s1569_s29 + $0x100] sm:$0xff] %v402_v32  ;;  %v404_v33 = vld [vmem:[%s1564_s28 + $0x420] sm:$0xff] }
  0x37   : > { %v406_v34 = vld [vmem:[%s1564_s28 + $0x440] sm:$0xff]  ;;  %405 = vst [vmem:[%s1569_s29 + $0x108] sm:$0xff] %v404_v33 }
  0x38   : > { %v408_v35 = vld [vmem:[%s1564_s28 + $0x460] sm:$0xff]  ;;  %407 = vst [vmem:[%s1569_s29 + $0x110] sm:$0xff] %v406_v34 }
  0x39   : > { %409 = vst [vmem:[%s1569_s29 + $0x118] sm:$0xff] %v408_v35  ;;  %v410_v36 = vld [vmem:[%s1564_s28 + $0x480] sm:$0xff] }
  0x3a   : > { %v412_v37 = vld [vmem:[%s1564_s28 + $0x4a0] sm:$0xff]  ;;  %411 = vst [vmem:[%s1569_s29 + $0x120] sm:$0xff] %v410_v36 }
  0x3b   : > { %v414_v38 = vld [vmem:[%s1564_s28 + $0x4c0] sm:$0xff]  ;;  %413 = vst [vmem:[%s1569_s29 + $0x128] sm:$0xff] %v412_v37 }
  0x3c   : > { %415 = vst [vmem:[%s1569_s29 + $0x130] sm:$0xff] %v414_v38  ;;  %v416_v39 = vld [vmem:[%s1564_s28 + $0x4e0] sm:$0xff] }
  0x3d   : > { %v418_v40 = vld [vmem:[%s1564_s28 + $0x500] sm:$0xff]  ;;  %417 = vst [vmem:[%s1569_s29 + $0x138] sm:$0xff] %v416_v39 }
  0x3e   : > { %v420_v41 = vld [vmem:[%s1564_s28 + $0x520] sm:$0xff]  ;;  %419 = vst [vmem:[%s1569_s29 + $0x140] sm:$0xff] %v418_v40 }
  0x3f   : > { %421 = vst [vmem:[%s1569_s29 + $0x148] sm:$0xff] %v420_v41  ;;  %v422_v42 = vld [vmem:[%s1564_s28 + $0x540] sm:$0xff] }
  0x40   : > { %v424_v43 = vld [vmem:[%s1564_s28 + $0x560] sm:$0xff]  ;;  %423 = vst [vmem:[%s1569_s29 + $0x150] sm:$0xff] %v422_v42 }
  0x41   : > { %v426_v44 = vld [vmem:[%s1564_s28 + $0x580] sm:$0xff]  ;;  %425 = vst [vmem:[%s1569_s29 + $0x158] sm:$0xff] %v424_v43 }
  0x42   : > { %427 = vst [vmem:[%s1569_s29 + $0x160] sm:$0xff] %v426_v44  ;;  %v428_v45 = vld [vmem:[%s1564_s28 + $0x5a0] sm:$0xff] }
  0x43   : > { %v430_v46 = vld [vmem:[%s1564_s28 + $0x5c0] sm:$0xff]  ;;  %429 = vst [vmem:[%s1569_s29 + $0x168] sm:$0xff] %v428_v45 }
  0x44   : > { %v432_v47 = vld [vmem:[%s1564_s28 + $0x5e0] sm:$0xff]  ;;  %431 = vst [vmem:[%s1569_s29 + $0x170] sm:$0xff] %v430_v46 }
  0x45   : > { %433 = vst [vmem:[%s1569_s29 + $0x178] sm:$0xff] %v432_v47  ;;  %v434_v48 = vld [vmem:[%s1564_s28 + $0x600] sm:$0xff] }
  0x46   : > { %v436_v49 = vld [vmem:[%s1564_s28 + $0x620] sm:$0xff]  ;;  %435 = vst [vmem:[%s1569_s29 + $0x180] sm:$0xff] %v434_v48 }
  0x47   : > { %v438_v50 = vld [vmem:[%s1564_s28 + $0x640] sm:$0xff]  ;;  %437 = vst [vmem:[%s1569_s29 + $0x188] sm:$0xff] %v436_v49 }
  0x48   : > { %439 = vst [vmem:[%s1569_s29 + $0x190] sm:$0xff] %v438_v50  ;;  %v440_v51 = vld [vmem:[%s1564_s28 + $0x660] sm:$0xff] }
  0x49   : > { %v442_v52 = vld [vmem:[%s1564_s28 + $0x680] sm:$0xff]  ;;  %441 = vst [vmem:[%s1569_s29 + $0x198] sm:$0xff] %v440_v51 }
  0x4a   : > { %v444_v53 = vld [vmem:[%s1564_s28 + $0x6a0] sm:$0xff]  ;;  %443 = vst [vmem:[%s1569_s29 + $0x1a0] sm:$0xff] %v442_v52 }
  0x4b   : > { %445 = vst [vmem:[%s1569_s29 + $0x1a8] sm:$0xff] %v444_v53  ;;  %v446_v54 = vld [vmem:[%s1564_s28 + $0x6c0] sm:$0xff] }
  0x4c   : > { %v448_v55 = vld [vmem:[%s1564_s28 + $0x6e0] sm:$0xff]  ;;  %447 = vst [vmem:[%s1569_s29 + $0x1b0] sm:$0xff] %v446_v54 }
  0x4d   : > { %v450_v56 = vld [vmem:[%s1564_s28 + $0x700] sm:$0xff]  ;;  %449 = vst [vmem:[%s1569_s29 + $0x1b8] sm:$0xff] %v448_v55 }
  0x4e   : > { %451 = vst [vmem:[%s1569_s29 + $0x1c0] sm:$0xff] %v450_v56  ;;  %v452_v57 = vld [vmem:[%s1564_s28 + $0x720] sm:$0xff] }
  0x4f   : > { %v454_v58 = vld [vmem:[%s1564_s28 + $0x740] sm:$0xff]  ;;  %453 = vst [vmem:[%s1569_s29 + $0x1c8] sm:$0xff] %v452_v57 }
  0x50   : > { %v456_v59 = vld [vmem:[%s1564_s28 + $0x760] sm:$0xff]  ;;  %455 = vst [vmem:[%s1569_s29 + $0x1d0] sm:$0xff] %v454_v58 }
  0x51   : > { %457 = vst [vmem:[%s1569_s29 + $0x1d8] sm:$0xff] %v456_v59  ;;  %v458_v60 = vld [vmem:[%s1564_s28 + $0x780] sm:$0xff] }
  0x52   : > { %v460_v61 = vld [vmem:[%s1564_s28 + $0x7a0] sm:$0xff]  ;;  %459 = vst [vmem:[%s1569_s29 + $0x1e0] sm:$0xff] %v458_v60 }
  0x53   : > { %v462_v62 = vld [vmem:[%s1564_s28 + $0x7c0] sm:$0xff]  ;;  %461 = vst [vmem:[%s1569_s29 + $0x1e8] sm:$0xff] %v460_v61 }
  0x54   : > { %463 = vst [vmem:[%s1569_s29 + $0x1f0] sm:$0xff] %v462_v62  ;;  %v464_v63 = vld [vmem:[%s1564_s28 + $0x7e0] sm:$0xff] }
  0x55   : > { %465 = vst [vmem:[%s1569_s29 + $0x1f8] sm:$0xff] %v464_v63 }
  0x56 PF: > { %p1231_p8 = scmp.ge.s32.totalorder %s1494_s16, 1  ;;  %p478_p9 = scmp.lt.s32.totalorder %s1494_s16, 5 }
  0x58   : > { %p479_p10 = pnand %p1231_p8, %p478_p9 }
  0x59   : > { %s485_s30 = sand.u32 (!%p479_p10), 1, %s1478_s12   ;;  %v1452_v0 = vld [vmem:[%s1806_s0 + $0x4] ss:$16 sps:$4 sm:$0xff] (!%p479_p10)   ;;  %v1455_v1 = vld [vmem:[%s1806_s0 + $0xc] ss:$16 sps:$4 sm:$0xff] (!%p479_p10)   ;;  %s1234_s20 = sshll.u32 (!%p479_p10), %s1486_s14, 1 }
  0x5a   : > { %482 = sbr.rel (%p479_p10) target bundleno = 386 (0x182), region = 66  ;;  %s1232_s4 = sshll.u32 (!%p479_p10), %s485_s30, 9  ;;  %994 = vmatprep.mubr.bf16.mxu1 (!%p479_p10), %v1452_v0  ;;  %1037 = vmatprep.mubr.bf16.mxu0 (!%p479_p10), %v1455_v1 }
  0x5b   : > { %s1707_s9 = scalar_lea.vmem (!%p479_p10), [#allocation3], %s1232_s4  ;;  %p536_p11 = scmp.lt.s32.totalorder (!%p479_p10), %s1234_s20, 7 }
  0x5c   : > { %v1354_v2 = vld [vmem:[%s1707_s9 + $0x4] ss:$8 sps:$4 sm:$0xff] (!%p479_p10)   ;;  %v1358_v4 = vld [vmem:[%s1707_s9] ss:$8 sps:$4 sm:$0xff] (!%p479_p10)   ;;  %v1360_v6 = vld [vmem:[%s1707_s9 + $0x14] ss:$8 sps:$4 sm:$0xff] (!%p479_p10)  }
  0x5d   : > { %v1356_v3 = vld [vmem:[%s1707_s9 + $0x104] ss:$8 sps:$4 sm:$0xff] (!%p479_p10)   ;;  %962 = vmatprep.subr.bf16.mxu1 (!%p479_p10), %v1354_v2  ;;  %v1359_v5 = vld [vmem:[%s1707_s9 + $0x100] ss:$8 sps:$4 sm:$0xff] (!%p479_p10)   ;;  %v1362_v7 = vld [vmem:[%s1707_s9 + $0x114] ss:$8 sps:$4 sm:$0xff] (!%p479_p10)  }
  0x5e   : > { %1005 = vmatprep.subr.bf16.mxu0 (!%p479_p10), %v1356_v3  ;;  %963 = vmatpush1.bf16.msra.mxu1 (!%p479_p10), %v1358_v4  ;;  %v1364_v8 = vld [vmem:[%s1707_s9 + $0x10] ss:$8 sps:$4 sm:$0xff] (!%p479_p10)   ;;  %v1366_v10 = vld [vmem:[%s1707_s9 + $0x24] ss:$8 sps:$4 sm:$0xff] (!%p479_p10)   ;;  %v1370_v12 = vld [vmem:[%s1707_s9 + $0x20] ss:$8 sps:$4 sm:$0xff] (!%p479_p10)   ;;  %v1065_v4 = vlaneseq (!%p479_p10) }
  0x5f   : > { %1006 = vmatpush1.bf16.msra.mxu0 (!%p479_p10), %v1359_v5  ;;  %964 = vmatprep.subr.bf16.mxu1 (!%p479_p10), %v1360_v6  ;;  %v1365_v9 = vld [vmem:[%s1707_s9 + $0x110] ss:$8 sps:$4 sm:$0xff] (!%p479_p10)   ;;  %v1368_v11 = vld [vmem:[%s1707_s9 + $0x124] ss:$8 sps:$4 sm:$0xff] (!%p479_p10)   ;;  %v1371_v13 = vld [vmem:[%s1707_s9 + $0x120] ss:$8 sps:$4 sm:$0xff] (!%p479_p10)  }
  0x60   : > { %1007 = vmatprep.subr.bf16.mxu0 (!%p479_p10), %v1362_v7  ;;  %v1372_v14 = vld [vmem:[%s1707_s9 + $0x34] ss:$8 sps:$4 sm:$0xff] (!%p479_p10)   ;;  %v1376_v16 = vld [vmem:[%s1707_s9 + $0x30] ss:$8 sps:$4 sm:$0xff] (!%p479_p10)   ;;  %v1378_v18 = vld [vmem:[%s1707_s9 + $0x44] ss:$8 sps:$4 sm:$0xff] (!%p479_p10)  }
  0x61   : > { %v1374_v15 = vld [vmem:[%s1707_s9 + $0x134] ss:$8 sps:$4 sm:$0xff]   ;;  %v1377_v17 = vld [vmem:[%s1707_s9 + $0x130] ss:$8 sps:$4 sm:$0xff]   ;;  %v1380_v19 = vld [vmem:[%s1707_s9 + $0x144] ss:$8 sps:$4 sm:$0xff]  }
  0x62   : > { %965 = vmatpush1.bf16.msra.mxu1 %v1364_v8  ;;  %v1382_v20 = vld [vmem:[%s1707_s9 + $0x40] ss:$8 sps:$4 sm:$0xff]   ;;  %v1384_v22 = vld [vmem:[%s1707_s9 + $0x54] ss:$8 sps:$4 sm:$0xff]   ;;  %v1388_v24 = vld [vmem:[%s1707_s9 + $0x50] ss:$8 sps:$4 sm:$0xff]  }
  0x63   : > { %1008 = vmatpush1.bf16.msra.mxu0 %v1365_v9  ;;  %966 = vmatprep.subr.bf16.mxu1 %v1366_v10  ;;  %v1383_v21 = vld [vmem:[%s1707_s9 + $0x140] ss:$8 sps:$4 sm:$0xff]   ;;  %v1386_v23 = vld [vmem:[%s1707_s9 + $0x154] ss:$8 sps:$4 sm:$0xff]   ;;  %v1389_v25 = vld [vmem:[%s1707_s9 + $0x150] ss:$8 sps:$4 sm:$0xff]  }
  0x64   : > { %1009 = vmatprep.subr.bf16.mxu0 %v1368_v11  ;;  %v1390_v26 = vld [vmem:[%s1707_s9 + $0x64] ss:$8 sps:$4 sm:$0xff]   ;;  %v1394_v28 = vld [vmem:[%s1707_s9 + $0x60] ss:$8 sps:$4 sm:$0xff]   ;;  %v1396_v30 = vld [vmem:[%s1707_s9 + $0x74] ss:$8 sps:$4 sm:$0xff]  }
  0x65   : > { %v1392_v27 = vld [vmem:[%s1707_s9 + $0x164] ss:$8 sps:$4 sm:$0xff]   ;;  %v1395_v29 = vld [vmem:[%s1707_s9 + $0x160] ss:$8 sps:$4 sm:$0xff]   ;;  %v1398_v31 = vld [vmem:[%s1707_s9 + $0x174] ss:$8 sps:$4 sm:$0xff]  }
  0x66   : > { %967 = vmatpush1.bf16.msra.mxu1 %v1370_v12  ;;  %v1400_v32 = vld [vmem:[%s1707_s9 + $0x70] ss:$8 sps:$4 sm:$0xff]   ;;  %v1402_v34 = vld [vmem:[%s1707_s9 + $0x84] ss:$8 sps:$4 sm:$0xff]   ;;  %v1406_v36 = vld [vmem:[%s1707_s9 + $0x80] ss:$8 sps:$4 sm:$0xff]  }
  0x67   : > { %1010 = vmatpush1.bf16.msra.mxu0 %v1371_v13  ;;  %968 = vmatprep.subr.bf16.mxu1 %v1372_v14  ;;  %v1401_v33 = vld [vmem:[%s1707_s9 + $0x170] ss:$8 sps:$4 sm:$0xff]   ;;  %v1404_v35 = vld [vmem:[%s1707_s9 + $0x184] ss:$8 sps:$4 sm:$0xff]   ;;  %v1407_v37 = vld [vmem:[%s1707_s9 + $0x180] ss:$8 sps:$4 sm:$0xff]  }
  0x68   : > { %1011 = vmatprep.subr.bf16.mxu0 %v1374_v15  ;;  %v1408_v38 = vld [vmem:[%s1707_s9 + $0x94] ss:$8 sps:$4 sm:$0xff]   ;;  %v1412_v40 = vld [vmem:[%s1707_s9 + $0x90] ss:$8 sps:$4 sm:$0xff]   ;;  %v1414_v42 = vld [vmem:[%s1707_s9 + $0xa4] ss:$8 sps:$4 sm:$0xff]  }
  0x69   : > { %v1410_v39 = vld [vmem:[%s1707_s9 + $0x194] ss:$8 sps:$4 sm:$0xff]   ;;  %v1413_v41 = vld [vmem:[%s1707_s9 + $0x190] ss:$8 sps:$4 sm:$0xff]   ;;  %v1416_v43 = vld [vmem:[%s1707_s9 + $0x1a4] ss:$8 sps:$4 sm:$0xff]  }
  0x6a   : > { %969 = vmatpush1.bf16.msra.mxu1 %v1376_v16  ;;  %v1418_v44 = vld [vmem:[%s1707_s9 + $0xa0] ss:$8 sps:$4 sm:$0xff]   ;;  %v1420_v46 = vld [vmem:[%s1707_s9 + $0xb4] ss:$8 sps:$4 sm:$0xff]   ;;  %v1424_v48 = vld [vmem:[%s1707_s9 + $0xb0] ss:$8 sps:$4 sm:$0xff]  }
  0x6b   : > { %1012 = vmatpush1.bf16.msra.mxu0 %v1377_v17  ;;  %970 = vmatprep.subr.bf16.mxu1 %v1378_v18  ;;  %v1419_v45 = vld [vmem:[%s1707_s9 + $0x1a0] ss:$8 sps:$4 sm:$0xff]   ;;  %v1422_v47 = vld [vmem:[%s1707_s9 + $0x1b4] ss:$8 sps:$4 sm:$0xff]   ;;  %v1425_v49 = vld [vmem:[%s1707_s9 + $0x1b0] ss:$8 sps:$4 sm:$0xff]  }
  0x6c   : > { %1013 = vmatprep.subr.bf16.mxu0 %v1380_v19  ;;  %v1426_v50 = vld [vmem:[%s1707_s9 + $0xc4] ss:$8 sps:$4 sm:$0xff]   ;;  %v1430_v52 = vld [vmem:[%s1707_s9 + $0xc0] ss:$8 sps:$4 sm:$0xff]   ;;  %v1432_v54 = vld [vmem:[%s1707_s9 + $0xd4] ss:$8 sps:$4 sm:$0xff]  }
  0x6d   : > { %v1428_v51 = vld [vmem:[%s1707_s9 + $0x1c4] ss:$8 sps:$4 sm:$0xff]   ;;  %v1431_v53 = vld [vmem:[%s1707_s9 + $0x1c0] ss:$8 sps:$4 sm:$0xff]   ;;  %v1434_v55 = vld [vmem:[%s1707_s9 + $0x1d4] ss:$8 sps:$4 sm:$0xff]  }
  0x6e   : > { %971 = vmatpush1.bf16.msra.mxu1 %v1382_v20  ;;  %v1436_v56 = vld [vmem:[%s1707_s9 + $0xd0] ss:$8 sps:$4 sm:$0xff]   ;;  %v1438_v58 = vld [vmem:[%s1707_s9 + $0xe4] ss:$8 sps:$4 sm:$0xff]   ;;  %v1442_v60 = vld [vmem:[%s1707_s9 + $0xe0] ss:$8 sps:$4 sm:$0xff]  }
  0x6f   : > { %1014 = vmatpush1.bf16.msra.mxu0 %v1383_v21  ;;  %972 = vmatprep.subr.bf16.mxu1 %v1384_v22  ;;  %v1437_v57 = vld [vmem:[%s1707_s9 + $0x1d0] ss:$8 sps:$4 sm:$0xff]   ;;  %v1440_v59 = vld [vmem:[%s1707_s9 + $0x1e4] ss:$8 sps:$4 sm:$0xff]   ;;  %v1443_v61 = vld [vmem:[%s1707_s9 + $0x1e0] ss:$8 sps:$4 sm:$0xff]  }
  0x70   : > { %1015 = vmatprep.subr.bf16.mxu0 %v1386_v23  ;;  %v1444_v62 = vld [vmem:[%s1707_s9 + $0xf4] ss:$8 sps:$4 sm:$0xff]   ;;  %v1448_v0 = vld [vmem:[%s1707_s9 + $0xf0] ss:$8 sps:$4 sm:$0xff]   ;;  %s1818_s20 = smov (!%p536_p11, %s1234_s20), 7  ;;  %v1066_v5 = vshrl.u32 %v1065_v4, 7 }
  0x71   : > { %v1446_v63 = vld [vmem:[%s1707_s9 + $0x1f4] ss:$8 sps:$4 sm:$0xff]   ;;  %v1449_v1 = vld [vmem:[%s1707_s9 + $0x1f0] ss:$8 sps:$4 sm:$0xff]   ;;  %s538_s25 = scalar_lea.vmem %s1808_s2, %s1818_s20  ;;  %s1233_s26 = sshll.u32 %s485_s30, 5 }
  0x72   : > { %973 = vmatpush1.bf16.msra.mxu1 %v1388_v24  ;;  %v1450_v2 = vld [vmem:[%s1806_s0] ss:$16 sps:$4 sm:$0xff]   ;;  %v1453_v3 = vld [vmem:[%s1806_s0 + $0x8] ss:$16 sps:$4 sm:$0xff]   ;;  %v1067_v6 = vsub.s32 0, %v1066_v5  ;;  %v1071_v8 = vsub.s32 1, %v1066_v5 }
  0x73   : > { %1016 = vmatpush1.bf16.msra.mxu0 %v1389_v25  ;;  %974 = vmatprep.subr.bf16.mxu1 %v1390_v26  ;;  %v1063_v7 = vld [vmem:[%s538_s25] sm:$0x3]  ;;  %s520_s27 = scalar_lea.vmem [#allocation4], %s1233_s26  ;;  %s1309_s12 = sshll.u32 (%p1551_p6), %s1486_s14, 4 }
  0x74   : > { %1017 = vmatprep.subr.bf16.mxu0 %v1392_v27  ;;  %v1068_v9 = vrot.slane %v1063_v7, %v1067_v6  ;;  %v1072_v12 = vrot.slane %v1063_v7, %v1071_v8  ;;  %s1095_s30 = scalar_lea.vmem (%p1551_p6), %s1809_s3, %s1309_s12 }
  0x76   : > { %975 = vmatpush1.bf16.msra.mxu1 %v1394_v28 }
  0x77   : > { %1018 = vmatpush1.bf16.msra.mxu0 %v1395_v29  ;;  %976 = vmatprep.subr.bf16.mxu1 %v1396_v30 }
  0x78   : > { %1019 = vmatprep.subr.bf16.mxu0 %v1398_v31 }
  0x7a   : > { %977 = vmatpush1.bf16.msra.mxu1 %v1400_v32 }
  0x7b   : > { %1020 = vmatpush1.bf16.msra.mxu0 %v1401_v33  ;;  %978 = vmatprep.subr.bf16.mxu1 %v1402_v34 }
  0x7c   : > { %1021 = vmatprep.subr.bf16.mxu0 %v1404_v35 }
  0x7e   : > { %979 = vmatpush1.bf16.msra.mxu1 %v1406_v36 }
  0x7f   : > { %1022 = vmatpush1.bf16.msra.mxu0 %v1407_v37  ;;  %980 = vmatprep.subr.bf16.mxu1 %v1408_v38 }
  0x80   : > { %1023 = vmatprep.subr.bf16.mxu0 %v1410_v39 }
  0x82   : > { %981 = vmatpush1.bf16.msra.mxu1 %v1412_v40 }
  0x83   : > { %1024 = vmatpush1.bf16.msra.mxu0 %v1413_v41  ;;  %982 = vmatprep.subr.bf16.mxu1 %v1414_v42 }
  0x84   : > { %1025 = vmatprep.subr.bf16.mxu0 %v1416_v43 }
  0x86   : > { %983 = vmatpush1.bf16.msra.mxu1 %v1418_v44 }
  0x87   : > { %1026 = vmatpush1.bf16.msra.mxu0 %v1419_v45  ;;  %984 = vmatprep.subr.bf16.mxu1 %v1420_v46 }
  0x88   : > { %1027 = vmatprep.subr.bf16.mxu0 %v1422_v47 }
  0x8a   : > { %985 = vmatpush1.bf16.msra.mxu1 %v1424_v48 }
  0x8b   : > { %1028 = vmatpush1.bf16.msra.mxu0 %v1425_v49  ;;  %986 = vmatprep.subr.bf16.mxu1 %v1426_v50 }
  0x8c   : > { %1029 = vmatprep.subr.bf16.mxu0 %v1428_v51 }
  0x8e   : > { %987 = vmatpush1.bf16.msra.mxu1 %v1430_v52 }
  0x8f   : > { %1030 = vmatpush1.bf16.msra.mxu0 %v1431_v53  ;;  %988 = vmatprep.subr.bf16.mxu1 %v1432_v54 }
  0x90   : > { %1031 = vmatprep.subr.bf16.mxu0 %v1434_v55 }
  0x92   : > { %989 = vmatpush1.bf16.msra.mxu1 %v1436_v56 }
  0x93   : > { %1032 = vmatpush1.bf16.msra.mxu0 %v1437_v57  ;;  %990 = vmatprep.subr.bf16.mxu1 %v1438_v58 }
  0x94   : > { %1033 = vmatprep.subr.bf16.mxu0 %v1440_v59 }
  0x96   : > { %991 = vmatpush1.bf16.msra.mxu1 %v1442_v60 }
  0x97   : > { %1034 = vmatpush1.bf16.msra.mxu0 %v1443_v61  ;;  %992 = vmatprep.subr.bf16.mxu1 %v1444_v62 }
  0x98   : > { %1035 = vmatprep.subr.bf16.mxu0 %v1446_v63 }
  0x9a   : > { %993 = vmatpush1.bf16.msra.mxu1 %v1448_v0 }
  0x9b   : > { %1036 = vmatpush1.bf16.msra.mxu0 %v1449_v1 }
  0x9d   : > { %995 = vmatmul.mubr.bf16.vlgmr.msra.gmra.mrb[0].mxu1 %v1450_v2 }
  0x9e   : > { %1038 = vmatmul.mubr.bf16.vlgmr.msra.gmra.mrb[0].mxu0 %v1453_v3 }
 0x170   : > { %v996_v10 = vpop.f32.mrb[0].mxu1 }
 0x171   : > { %v1039_v11 = vpop.f32.mrb[0].mxu0  ;;  %v998_v14 = vpop.f32.mrb[1].mxu1 }
 0x172   : > { %v1040_v13 = vadd.f32 %v1039_v11, %v996_v10  ;;  %v1041_v15 = vpop.f32.mrb[1].mxu0  ;;  %v1000_v17 = vpop.f32.mrb[2].mxu1 }
 0x173   : > { %v1042_v16 = vadd.f32 %v1041_v15, %v998_v14  ;;  %v1043_v18 = vpop.f32.mrb[2].mxu0  ;;  %v1002_v21 = vpop.f32.mrb[3].mxu1  ;;  %1089 = sbr.rel (!%p1551_p6) target bundleno = 386 (0x182), region = 82 }
 0x174   : > { %v1075_v19 = vadd.f32 %v1068_v9, %v1040_v13  ;;  %v1044_v20 = vadd.f32 %v1043_v18, %v1000_v17  ;;  %v1045_v22 = vpop.f32.mrb[3].mxu0 }
 0x175   : > { %v1076_v23 = vadd.f32 %v1072_v12, %v1042_v16  ;;  %v1046_v24 = vadd.f32 %v1045_v22, %v1002_v21 }
 0x176   : > { %1079 = vst [vmem:[%s520_s27] sm:$0xff] %v1075_v19  ;;  %v1077_v25 = vadd.f32 %v1068_v9, %v1044_v20 }
 0x177   : > { %1080 = vst [vmem:[%s520_s27 + $0x8] sm:$0xff] %v1076_v23  ;;  %v1078_v26 = vadd.f32 %v1072_v12, %v1046_v24 }
 0x178   : > { %1081 = vst [vmem:[%s520_s27 + $0x10] sm:$0xff] %v1077_v25 }
 0x179   : > { %1082 = vst [vmem:[%s520_s27 + $0x18] sm:$0xff] %v1078_v26 }
 0x17d   : > { %v1108_v27 = vld [vmem:[%s520_s27] sm:$0xff] }
 0x17e   : > { %v1110_v28 = vld [vmem:[%s520_s27 + $0x8] sm:$0xff]  ;;  %1109 = vst [vmem:[%s1095_s30] sm:$0xff] %v1108_v27 }
 0x17f   : > { %v1112_v29 = vld [vmem:[%s520_s27 + $0x10] sm:$0xff]  ;;  %1111 = vst [vmem:[%s1095_s30 + $0x8] sm:$0xff] %v1110_v28 }
 0x180   : > { %v1114_v30 = vld [vmem:[%s520_s27 + $0x18] sm:$0xff]  ;;  %1113 = vst [vmem:[%s1095_s30 + $0x40] sm:$0xff] %v1112_v29 }
 0x181   : > { %1115 = vst [vmem:[%s1095_s30 + $0x48] sm:$0xff] %v1114_v30 }
 0x182 PF: > { %s13_s16 = sadd.s32 1, %s1494_s16   ;;  %s1811_s12 = smov %s1482_s13 }
 0x183   : > { %p10_p12 = scmp.ge.s32.totalorder %s13_s16, 6   ;;  %s1812_s13 = smov %s1556_s22 }
 0x184   : > { %s1813_s14 = smov %s1490_s15  ;;  %s1814_s15 = smov %s1816_s17 }
 0x185   :  { %12 = sbr.rel (!%p10_p12) target bundleno = 3 (0x3), region = 142 }

</bundles_post_ra>
